<compile_context>
chip_gen: v5e
topology: v5e:2x2
jax: 0.10.0
libtpu: 0.0.40
codegen_flags: <defaults>
</compile_context>

<pallas_src>
import functools

import jax
import jax.numpy as jnp
from jax.experimental import pallas as pl
from jax.experimental.pallas import tpu as pltpu

# ----------------------------- configuration -----------------------------
HIDDEN_DIMS = [8, 16]
INIT_SIZE = 16
CODE_DIM = 32
BATCH = 2
FINAL_SIZE = INIT_SIZE >> len(HIDDEN_DIMS)          # 4
FC_DIM = HIDDEN_DIMS[-1] * FINAL_SIZE ** 2          # 256
BN_EPS = 1e-5


# ----------------------------- fused Pallas kernel -----------------------------
def _vae_fused_kernel(
    x_ref, eps_ref,
    # encoder layer 1 / 2: dense conv weight, BN pool / broadcast mats, affine rows
    w1_ref, p1_ref, bc1_ref, aff1_ref,
    w2_ref, p2_ref, bc2_ref, aff2_ref,
    # latent FCs
    wm_ref, bm_ref, wv_ref, bv_ref, wfd_ref, bfd_ref,
    # decoder layer 1 (BN) and final layer (sigmoid)
    w3_ref, p3_ref, bc3_ref, aff3_ref,
    w4_ref, b4_ref,
    # outputs
    out_ref, mean_ref, logvar_ref,
):
    """Whole MyVAE forward.  Activations live in (N, C*H*W) lane-dense layout.

    Each conv / deconv is one dense matmul (weights pre-folded).  BatchNorm
    (training-mode batch statistics, biased variance) is done with two tiny
    matmuls: `pool` (F, C) averages each channel's H*W lane segment, `bcast`
    (C, F) broadcasts per-channel stats back to the lane layout — no reshapes
    or transposes anywhere inside the kernel.
    """

    def dense_bn_relu(h, w_ref, pool_ref, bcast_ref, aff_ref):
        bias_f = aff_ref[0:1, :]                      # conv bias, per-lane
        beta_f = aff_ref[1:2, :]                      # BN beta, per-lane
        gamma_f = aff_ref[2:3, :]                     # BN gamma, per-lane
        y = jnp.dot(h, w_ref[...], preferred_element_type=jnp.float32) + bias_f
        # per-channel batch mean (pool already divides by H*W; batch mean below)
        mean_c = jnp.dot(jnp.mean(y, axis=0, keepdims=True), pool_ref[...],
                         preferred_element_type=jnp.float32)        # (1, C)
        mean_f = jnp.dot(mean_c, bcast_ref[...],
                         preferred_element_type=jnp.float32)        # (1, F)
        d = y - mean_f
        var_c = jnp.dot(jnp.mean(d * d, axis=0, keepdims=True), pool_ref[...],
                        preferred_element_type=jnp.float32)         # biased var
        var_f = jnp.dot(var_c, bcast_ref[...],
                        preferred_element_type=jnp.float32)
        yn = d * (jax.lax.rsqrt(var_f + BN_EPS) * gamma_f) + beta_f
        return jnp.maximum(yn, 0.0)

    x = x_ref[...]                                                   # (N, 3*16*16)

    # ---- encoder ----
    h1 = dense_bn_relu(x, w1_ref, p1_ref, bc1_ref, aff1_ref)         # (N, 8*8*8)
    h2 = dense_bn_relu(h1, w2_ref, p2_ref, bc2_ref, aff2_ref)        # (N, 16*4*4)

    # ---- latent: fc_mean + fc_logvar + reparameterize + fc_decode ----
    mean = jnp.dot(h2, wm_ref[...], preferred_element_type=jnp.float32) + bm_ref[...]
    logvar = jnp.dot(h2, wv_ref[...], preferred_element_type=jnp.float32) + bv_ref[...]
    z = mean + eps_ref[...] * jnp.exp(0.5 * logvar)
    h3 = jnp.dot(z, wfd_ref[...], preferred_element_type=jnp.float32) + bfd_ref[...]

    # ---- decoder ----
    h4 = dense_bn_relu(h3, w3_ref, p3_ref, bc3_ref, aff3_ref)        # (N, 8*8*8)
    y = jnp.dot(h4, w4_ref[...], preferred_element_type=jnp.float32) + b4_ref[...]

    out_ref[...] = jax.nn.sigmoid(y)                                 # (N, 3*16*16)
    mean_ref[...] = mean
    logvar_ref[...] = logvar


# ----------------------------- pallas_call wrapper -----------------------------
def _zero_index_map(n, i):
    return (0,) * n


def _pcall(kernel, out_shapes, *arrays):
    """Single-step grid; every operand / result is one full-array VMEM block."""
    in_specs = [
        pl.BlockSpec(a.shape, functools.partial(_zero_index_map, a.ndim))
        for a in arrays
    ]
    out_specs = tuple(
        pl.BlockSpec(o.shape, functools.partial(_zero_index_map, len(o.shape)))
        for o in out_shapes
    )
    return pl.pallas_call(
        kernel,
        grid=(1,),
        in_specs=in_specs,
        out_specs=out_specs,
        out_shape=tuple(out_shapes),
        compiler_params=pltpu.CompilerParams(
            dimension_semantics=("arbitrary",),
            vmem_limit_bytes=32 * 1024 * 1024,
        ),
    )(*arrays)


# ----------------------------- parameter folding (one-time) -----------------------------
def _conv_dense(w_oihw, in_chw, stride, pad):
    """Dense (F_in, F_out) matrix of Conv2d(w, stride, pad) acting on the
    NCHW-flattened input as a right-multiplication on (N, F_in) rows."""
    cin, h, w = in_chw
    f_in = cin * h * w
    basis = jnp.eye(f_in, dtype=jnp.float32).reshape(f_in, cin, h, w)
    out = jax.lax.conv_general_dilated(
        basis, w_oihw.astype(jnp.float32),
        window_strides=(stride, stride),
        padding=[(pad, pad), (pad, pad)],
        dimension_numbers=("NCHW", "OIHW", "NCHW"))
    return out.reshape(f_in, -1)                       # cols in (cout, ho, wo) order


def _deconv_dense(w_iohw, out_chw, stride, pad):
    """Dense (F_in, F_out) matrix of ConvTranspose2d(w, stride, pad).

    ConvTranspose2d(A->B) with weight (A, B, k, k) is the adjoint of
    Conv2d(B->A) with the very same (OIHW) weight tensor, so its dense matrix
    is the transpose of that forward conv's dense matrix."""
    return _conv_dense(w_iohw, out_chw, stride, pad).T


def _bn_mats(c, hw):
    eye = jnp.eye(c, dtype=jnp.float32)
    pool = jnp.kron(eye, jnp.ones((hw, 1), jnp.float32)) / float(hw)   # (c*hw, c)
    bcast = jnp.kron(eye, jnp.ones((1, hw), jnp.float32))              # (c, c*hw)
    return pool, bcast


def _affine_rows(bias, beta, gamma, hw):
    rows = [jnp.repeat(v.astype(jnp.float32), hw)[None, :] for v in (bias, beta, gamma)]
    return jnp.concatenate(rows, axis=0)               # (3, C*hw)


def init_params(key):
    params = {"encode": [], "decode": []}
    channels = [3] + HIDDEN_DIMS
    keys = iter(jax.random.split(key, 64))

    for i in range(len(channels) - 1):
        cin, cout = channels[i], channels[i + 1]
        w = 0.05 * jax.random.normal(next(keys), (cout, cin, 3, 3), jnp.float32)
        b = 0.01 * jax.random.normal(next(keys), (cout,), jnp.float32)
        params["encode"].append((w, b, jnp.ones((cout,), jnp.float32),
                                 jnp.zeros((cout,), jnp.float32)))

    params["fc_mean_w"] = 0.05 * jax.random.normal(next(keys), (CODE_DIM, FC_DIM), jnp.float32)
    params["fc_mean_b"] = jnp.zeros((CODE_DIM,), jnp.float32)
    params["fc_logvar_w"] = 0.05 * jax.random.normal(next(keys), (CODE_DIM, FC_DIM), jnp.float32)
    params["fc_logvar_b"] = jnp.zeros((CODE_DIM,), jnp.float32)
    params["fc_decode_w"] = 0.05 * jax.random.normal(next(keys), (FC_DIM, CODE_DIM), jnp.float32)
    params["fc_decode_b"] = jnp.zeros((FC_DIM,), jnp.float32)

    rev = list(reversed([3] + HIDDEN_DIMS))             # [16, 8, 3]
    for i in range(len(rev) - 2):
        cin, cout = rev[i], rev[i + 1]
        w = 0.05 * jax.random.normal(next(keys), (cin, cout, 4, 4), jnp.float32)
        b = 0.01 * jax.random.normal(next(keys), (cout,), jnp.float32)
        params["decode"].append((w, b, jnp.ones((cout,), jnp.float32),
                                 jnp.zeros((cout,), jnp.float32)))
    cin, cout = rev[-2], rev[-1]
    w = 0.05 * jax.random.normal(next(keys), (cin, cout, 4, 4), jnp.float32)
    b = 0.01 * jax.random.normal(next(keys), (cout,), jnp.float32)
    params["decode"].append((w, b))
    return params


def prepare_params(params):
    """One-time repack: fold every conv / deconv into a dense matmul weight and
    build the constant BatchNorm pooling / broadcast matrices."""
    prep = {"encode": [], "decode": []}
    channels = [3] + HIDDEN_DIMS

    size = INIT_SIZE
    for i, (w, b, g, bt) in enumerate(params["encode"]):
        wd = _conv_dense(w, (channels[i], size, size), stride=2, pad=1)
        size //= 2
        hw = size * size
        pool, bcast = _bn_mats(channels[i + 1], hw)
        prep["encode"].append((wd, pool, bcast, _affine_rows(b, bt, g, hw)))

    prep["fc_mean_w"] = params["fc_mean_w"].T           # (FC_DIM, CODE_DIM)
    prep["fc_mean_b"] = params["fc_mean_b"].reshape(1, -1)
    prep["fc_logvar_w"] = params["fc_logvar_w"].T
    prep["fc_logvar_b"] = params["fc_logvar_b"].reshape(1, -1)
    prep["fc_decode_w"] = params["fc_decode_w"].T       # (CODE_DIM, FC_DIM)
    prep["fc_decode_b"] = params["fc_decode_b"].reshape(1, -1)

    rev = list(reversed(channels))                      # [16, 8, 3]
    size = FINAL_SIZE
    for i, layer in enumerate(params["decode"]):
        w, b = layer[0], layer[1]
        cout = rev[i + 1]
        size *= 2
        hw = size * size
        wd = _deconv_dense(w, (cout, size, size), stride=2, pad=1)
        if len(layer) == 4:
            g, bt = layer[2], layer[3]
            pool, bcast = _bn_mats(cout, hw)
            prep["decode"].append((wd, pool, bcast, _affine_rows(b, bt, g, hw)))
        else:
            prep["decode"].append((wd, jnp.repeat(b.astype(jnp.float32), hw)[None, :]))
    return prep


# ----------------------------- forward -----------------------------
@jax.jit
def vae_forward(prep, x_nchw, eps):
    n = x_nchw.shape[0]
    x_flat = x_nchw.reshape(n, -1).astype(jnp.float32)  # NCHW flatten (bitcast)

    # Operand order must match _vae_fused_kernel's signature (HIDDEN_DIMS=[8,16]).
    ops = [x_flat, eps.astype(jnp.float32)]
    for layer in prep["encode"]:
        ops.extend(layer)
    ops.extend([prep["fc_mean_w"], prep["fc_mean_b"],
                prep["fc_logvar_w"], prep["fc_logvar_b"],
                prep["fc_decode_w"], prep["fc_decode_b"]])
    for layer in prep["decode"]:
        ops.extend(layer)

    out_flat, mean, log_var = _pcall(
        _vae_fused_kernel,
        (jax.ShapeDtypeStruct((n, 3 * INIT_SIZE * INIT_SIZE), jnp.float32),
         jax.ShapeDtypeStruct((n, CODE_DIM), jnp.float32),
         jax.ShapeDtypeStruct((n, CODE_DIM), jnp.float32)),
        *ops)

    out = out_flat.reshape(n, 3, INIT_SIZE, INIT_SIZE)   # (c,h,w) flat order -> NCHW
    return out, mean, log_var


# ----------------------------- main -----------------------------
if __name__ == "__main__":
    key = jax.random.PRNGKey(0)
    k_param, k_x, k_eps = jax.random.split(key, 3)

    params = init_params(k_param)
    prep = prepare_params(params)

    x = jax.random.normal(k_x, (BATCH, 3, INIT_SIZE, INIT_SIZE), jnp.float32)
    # torch.randn_like(mean) has no in-kernel equivalent tied to torch RNG;
    # eps is sampled outside and fed into the fused kernel.
    eps = jax.random.normal(k_eps, (BATCH, CODE_DIM), jnp.float32)

    # NOTE: BatchNorm uses per-batch (training-mode) statistics with biased
    # variance, matching the PyTorch module's default train() behaviour.
    out, mean, log_var = vae_forward(prep, x, eps)
    jax.block_until_ready((out, mean, log_var))

    assert out.shape == (BATCH, 3, INIT_SIZE, INIT_SIZE)
    assert mean.shape == (BATCH, CODE_DIM)
    assert log_var.shape == (BATCH, CODE_DIM)
    assert bool(jnp.all(jnp.isfinite(out)))
    assert bool(jnp.all(jnp.isfinite(mean))) and bool(jnp.all(jnp.isfinite(log_var)))
    assert bool(jnp.all((out >= 0.0) & (out <= 1.0)))    # sigmoid output range
    print("KERNEL_OK")
</pallas_src>

<mosaic_0001>
module attributes {stable_mosaic.version = 11 : i64} {
  func.func @_vae_fused_kernel(%arg0: i32, %arg1: memref<2x768xf32, #tpu.memory_space<vmem>>, %arg2: memref<2x32xf32, #tpu.memory_space<vmem>>, %arg3: memref<768x512xf32, #tpu.memory_space<vmem>>, %arg4: memref<512x8xf32, #tpu.memory_space<vmem>>, %arg5: memref<8x512xf32, #tpu.memory_space<vmem>>, %arg6: memref<3x512xf32, #tpu.memory_space<vmem>>, %arg7: memref<512x256xf32, #tpu.memory_space<vmem>>, %arg8: memref<256x16xf32, #tpu.memory_space<vmem>>, %arg9: memref<16x256xf32, #tpu.memory_space<vmem>>, %arg10: memref<3x256xf32, #tpu.memory_space<vmem>>, %arg11: memref<256x32xf32, #tpu.memory_space<vmem>>, %arg12: memref<1x32xf32, #tpu.memory_space<vmem>>, %arg13: memref<256x32xf32, #tpu.memory_space<vmem>>, %arg14: memref<1x32xf32, #tpu.memory_space<vmem>>, %arg15: memref<32x256xf32, #tpu.memory_space<vmem>>, %arg16: memref<1x256xf32, #tpu.memory_space<vmem>>, %arg17: memref<256x512xf32, #tpu.memory_space<vmem>>, %arg18: memref<512x8xf32, #tpu.memory_space<vmem>>, %arg19: memref<8x512xf32, #tpu.memory_space<vmem>>, %arg20: memref<3x512xf32, #tpu.memory_space<vmem>>, %arg21: memref<512x768xf32, #tpu.memory_space<vmem>>, %arg22: memref<1x768xf32, #tpu.memory_space<vmem>>, %arg23: memref<2x768xf32, #tpu.memory_space<vmem>>, %arg24: memref<2x32xf32, #tpu.memory_space<vmem>>, %arg25: memref<2x32xf32, #tpu.memory_space<vmem>>) attributes {dimension_semantics = [#tpu.dimension_semantics<arbitrary>], iteration_bounds = array<i64: 1>, scalar_prefetch = 0 : i64, scratch_operands = 0 : i64, tpu.core_type = #tpu.core_type<tc>, window_params = [{pipeline_mode = #tpu.pipeline_mode<synchronous>, transform_indices = @transform_0, window_bounds = array<i64: 2, 768>}, {pipeline_mode = #tpu.pipeline_mode<synchronous>, transform_indices = @transform_1, window_bounds = array<i64: 2, 32>}, {pipeline_mode = #tpu.pipeline_mode<synchronous>, transform_indices = @transform_2, window_bounds = array<i64: 768, 512>}, {pipeline_mode = #tpu.pipeline_mode<synchronous>, transform_indices = @transform_3, window_bounds = array<i64: 512, 8>}, {pipeline_mode = #tpu.pipeline_mode<synchronous>, transform_indices = @transform_4, window_bounds = array<i64: 8, 512>}, {pipeline_mode = #tpu.pipeline_mode<synchronous>, transform_indices = @transform_5, window_bounds = array<i64: 3, 512>}, {pipeline_mode = #tpu.pipeline_mode<synchronous>, transform_indices = @transform_6, window_bounds = array<i64: 512, 256>}, {pipeline_mode = #tpu.pipeline_mode<synchronous>, transform_indices = @transform_7, window_bounds = array<i64: 256, 16>}, {pipeline_mode = #tpu.pipeline_mode<synchronous>, transform_indices = @transform_8, window_bounds = array<i64: 16, 256>}, {pipeline_mode = #tpu.pipeline_mode<synchronous>, transform_indices = @transform_9, window_bounds = array<i64: 3, 256>}, {pipeline_mode = #tpu.pipeline_mode<synchronous>, transform_indices = @transform_10, window_bounds = array<i64: 256, 32>}, {pipeline_mode = #tpu.pipeline_mode<synchronous>, transform_indices = @transform_11, window_bounds = array<i64: 1, 32>}, {pipeline_mode = #tpu.pipeline_mode<synchronous>, transform_indices = @transform_12, window_bounds = array<i64: 256, 32>}, {pipeline_mode = #tpu.pipeline_mode<synchronous>, transform_indices = @transform_13, window_bounds = array<i64: 1, 32>}, {pipeline_mode = #tpu.pipeline_mode<synchronous>, transform_indices = @transform_14, window_bounds = array<i64: 32, 256>}, {pipeline_mode = #tpu.pipeline_mode<synchronous>, transform_indices = @transform_15, window_bounds = array<i64: 1, 256>}, {pipeline_mode = #tpu.pipeline_mode<synchronous>, transform_indices = @transform_16, window_bounds = array<i64: 256, 512>}, {pipeline_mode = #tpu.pipeline_mode<synchronous>, transform_indices = @transform_17, window_bounds = array<i64: 512, 8>}, {pipeline_mode = #tpu.pipeline_mode<synchronous>, transform_indices = @transform_18, window_bounds = array<i64: 8, 512>}, {pipeline_mode = #tpu.pipeline_mode<synchronous>, transform_indices = @transform_19, window_bounds = array<i64: 3, 512>}, {pipeline_mode = #tpu.pipeline_mode<synchronous>, transform_indices = @transform_20, window_bounds = array<i64: 512, 768>}, {pipeline_mode = #tpu.pipeline_mode<synchronous>, transform_indices = @transform_21, window_bounds = array<i64: 1, 768>}, {pipeline_mode = #tpu.pipeline_mode<synchronous>, transform_indices = @transform_22, window_bounds = array<i64: 2, 768>}, {pipeline_mode = #tpu.pipeline_mode<synchronous>, transform_indices = @transform_23, window_bounds = array<i64: 2, 32>}, {pipeline_mode = #tpu.pipeline_mode<synchronous>, transform_indices = @transform_24, window_bounds = array<i64: 2, 32>}]} {
    %c0 = arith.constant 0 : index
    %c0_0 = arith.constant 0 : index
    %0 = vector.load %arg1[%c0, %c0_0] : memref<2x768xf32, #tpu.memory_space<vmem>>, vector<2x768xf32>
    %c0_1 = arith.constant 0 : index
    %c0_2 = arith.constant 0 : index
    %1 = vector.load %arg6[%c0_1, %c0_2] : memref<3x512xf32, #tpu.memory_space<vmem>>, vector<1x512xf32>
    %c1 = arith.constant 1 : index
    %c0_3 = arith.constant 0 : index
    %2 = vector.load %arg6[%c1, %c0_3] : memref<3x512xf32, #tpu.memory_space<vmem>>, vector<1x512xf32>
    %c2 = arith.constant 2 : index
    %c0_4 = arith.constant 0 : index
    %3 = vector.load %arg6[%c2, %c0_4] : memref<3x512xf32, #tpu.memory_space<vmem>>, vector<1x512xf32>
    %c0_5 = arith.constant 0 : index
    %c0_6 = arith.constant 0 : index
    %4 = vector.load %arg3[%c0_5, %c0_6] : memref<768x512xf32, #tpu.memory_space<vmem>>, vector<768x512xf32>
    %cst = arith.constant dense<0.000000e+00> : vector<2x512xf32>
    %5 = tpu.matmul %0, %4, %cst {dimension_numbers = #tpu.dot_dimension_numbers<[1], [0], [0], [1], [0, 0, 1, 1], [], []>} : vector<2x768xf32>, vector<768x512xf32>, vector<2x512xf32> -> vector<2x512xf32>
    %6 = vector.broadcast %1 : vector<1x512xf32> to vector<2x512xf32>
    %7 = arith.addf %5, %6 : vector<2x512xf32>
    %cst_7 = arith.constant dense<0.000000e+00> : vector<512xf32>
    %8 = vector.multi_reduction <add>, %7, %cst_7 [0] : vector<2x512xf32> to vector<512xf32>
    %9 = vector.shape_cast %8 : vector<512xf32> to vector<1x512xf32>
    %cst_8 = arith.constant 2.000000e+00 : f32
    %10 = vector.broadcast %cst_8 : f32 to vector<1x512xf32>
    %11 = arith.divf %9, %10 : vector<1x512xf32>
    %c0_9 = arith.constant 0 : index
    %c0_10 = arith.constant 0 : index
    %12 = vector.load %arg4[%c0_9, %c0_10] : memref<512x8xf32, #tpu.memory_space<vmem>>, vector<512x8xf32>
    %cst_11 = arith.constant dense<0.000000e+00> : vector<1x8xf32>
    %13 = tpu.matmul %11, %12, %cst_11 {dimension_numbers = #tpu.dot_dimension_numbers<[1], [0], [0], [1], [0, 0, 1, 1], [], []>} : vector<1x512xf32>, vector<512x8xf32>, vector<1x8xf32> -> vector<1x8xf32>
    %c0_12 = arith.constant 0 : index
    %c0_13 = arith.constant 0 : index
    %14 = vector.load %arg5[%c0_12, %c0_13] : memref<8x512xf32, #tpu.memory_space<vmem>>, vector<8x512xf32>
    %cst_14 = arith.constant dense<0.000000e+00> : vector<1x512xf32>
    %15 = tpu.matmul %13, %14, %cst_14 {dimension_numbers = #tpu.dot_dimension_numbers<[1], [0], [0], [1], [0, 0, 1, 1], [], []>} : vector<1x8xf32>, vector<8x512xf32>, vector<1x512xf32> -> vector<1x512xf32>
    %16 = vector.broadcast %15 : vector<1x512xf32> to vector<2x512xf32>
    %17 = arith.subf %7, %16 : vector<2x512xf32>
    %18 = arith.mulf %17, %17 : vector<2x512xf32>
    %cst_15 = arith.constant dense<0.000000e+00> : vector<512xf32>
    %19 = vector.multi_reduction <add>, %18, %cst_15 [0] : vector<2x512xf32> to vector<512xf32>
    %20 = vector.shape_cast %19 : vector<512xf32> to vector<1x512xf32>
    %cst_16 = arith.constant 2.000000e+00 : f32
    %21 = vector.broadcast %cst_16 : f32 to vector<1x512xf32>
    %22 = arith.divf %20, %21 : vector<1x512xf32>
    %c0_17 = arith.constant 0 : index
    %c0_18 = arith.constant 0 : index
    %23 = vector.load %arg4[%c0_17, %c0_18] : memref<512x8xf32, #tpu.memory_space<vmem>>, vector<512x8xf32>
    %cst_19 = arith.constant dense<0.000000e+00> : vector<1x8xf32>
    %24 = tpu.matmul %22, %23, %cst_19 {dimension_numbers = #tpu.dot_dimension_numbers<[1], [0], [0], [1], [0, 0, 1, 1], [], []>} : vector<1x512xf32>, vector<512x8xf32>, vector<1x8xf32> -> vector<1x8xf32>
    %c0_20 = arith.constant 0 : index
    %c0_21 = arith.constant 0 : index
    %25 = vector.load %arg5[%c0_20, %c0_21] : memref<8x512xf32, #tpu.memory_space<vmem>>, vector<8x512xf32>
    %cst_22 = arith.constant dense<0.000000e+00> : vector<1x512xf32>
    %26 = tpu.matmul %24, %25, %cst_22 {dimension_numbers = #tpu.dot_dimension_numbers<[1], [0], [0], [1], [0, 0, 1, 1], [], []>} : vector<1x8xf32>, vector<8x512xf32>, vector<1x512xf32> -> vector<1x512xf32>
    %cst_23 = arith.constant 9.99999974E-6 : f32
    %27 = vector.broadcast %cst_23 : f32 to vector<1x512xf32>
    %28 = arith.addf %26, %27 : vector<1x512xf32>
    %29 = math.rsqrt %28 : vector<1x512xf32>
    %30 = arith.mulf %29, %3 : vector<1x512xf32>
    %31 = vector.broadcast %30 : vector<1x512xf32> to vector<2x512xf32>
    %32 = arith.mulf %17, %31 : vector<2x512xf32>
    %33 = vector.broadcast %2 : vector<1x512xf32> to vector<2x512xf32>
    %34 = arith.addf %32, %33 : vector<2x512xf32>
    %cst_24 = arith.constant 0.000000e+00 : f32
    %35 = vector.broadcast %cst_24 : f32 to vector<2x512xf32>
    %36 = arith.maximumf %34, %35 : vector<2x512xf32>
    %c0_25 = arith.constant 0 : index
    %c0_26 = arith.constant 0 : index
    %37 = vector.load %arg10[%c0_25, %c0_26] : memref<3x256xf32, #tpu.memory_space<vmem>>, vector<1x256xf32>
    %c1_27 = arith.constant 1 : index
    %c0_28 = arith.constant 0 : index
    %38 = vector.load %arg10[%c1_27, %c0_28] : memref<3x256xf32, #tpu.memory_space<vmem>>, vector<1x256xf32>
    %c2_29 = arith.constant 2 : index
    %c0_30 = arith.constant 0 : index
    %39 = vector.load %arg10[%c2_29, %c0_30] : memref<3x256xf32, #tpu.memory_space<vmem>>, vector<1x256xf32>
    %c0_31 = arith.constant 0 : index
    %c0_32 = arith.constant 0 : index
    %40 = vector.load %arg7[%c0_31, %c0_32] : memref<512x256xf32, #tpu.memory_space<vmem>>, vector<512x256xf32>
    %cst_33 = arith.constant dense<0.000000e+00> : vector<2x256xf32>
    %41 = tpu.matmul %36, %40, %cst_33 {dimension_numbers = #tpu.dot_dimension_numbers<[1], [0], [0], [1], [0, 0, 1, 1], [], []>} : vector<2x512xf32>, vector<512x256xf32>, vector<2x256xf32> -> vector<2x256xf32>
    %42 = vector.broadcast %37 : vector<1x256xf32> to vector<2x256xf32>
    %43 = arith.addf %41, %42 : vector<2x256xf32>
    %cst_34 = arith.constant dense<0.000000e+00> : vector<256xf32>
    %44 = vector.multi_reduction <add>, %43, %cst_34 [0] : vector<2x256xf32> to vector<256xf32>
    %45 = vector.shape_cast %44 : vector<256xf32> to vector<1x256xf32>
    %cst_35 = arith.constant 2.000000e+00 : f32
    %46 = vector.broadcast %cst_35 : f32 to vector<1x256xf32>
    %47 = arith.divf %45, %46 : vector<1x256xf32>
    %c0_36 = arith.constant 0 : index
    %c0_37 = arith.constant 0 : index
    %48 = vector.load %arg8[%c0_36, %c0_37] : memref<256x16xf32, #tpu.memory_space<vmem>>, vector<256x16xf32>
    %cst_38 = arith.constant dense<0.000000e+00> : vector<1x16xf32>
    %49 = tpu.matmul %47, %48, %cst_38 {dimension_numbers = #tpu.dot_dimension_numbers<[1], [0], [0], [1], [0, 0, 1, 1], [], []>} : vector<1x256xf32>, vector<256x16xf32>, vector<1x16xf32> -> vector<1x16xf32>
    %c0_39 = arith.constant 0 : index
    %c0_40 = arith.constant 0 : index
    %50 = vector.load %arg9[%c0_39, %c0_40] : memref<16x256xf32, #tpu.memory_space<vmem>>, vector<16x256xf32>
    %cst_41 = arith.constant dense<0.000000e+00> : vector<1x256xf32>
    %51 = tpu.matmul %49, %50, %cst_41 {dimension_numbers = #tpu.dot_dimension_numbers<[1], [0], [0], [1], [0, 0, 1, 1], [], []>} : vector<1x16xf32>, vector<16x256xf32>, vector<1x256xf32> -> vector<1x256xf32>
    %52 = vector.broadcast %51 : vector<1x256xf32> to vector<2x256xf32>
    %53 = arith.subf %43, %52 : vector<2x256xf32>
    %54 = arith.mulf %53, %53 : vector<2x256xf32>
    %cst_42 = arith.constant dense<0.000000e+00> : vector<256xf32>
    %55 = vector.multi_reduction <add>, %54, %cst_42 [0] : vector<2x256xf32> to vector<256xf32>
    %56 = vector.shape_cast %55 : vector<256xf32> to vector<1x256xf32>
    %cst_43 = arith.constant 2.000000e+00 : f32
    %57 = vector.broadcast %cst_43 : f32 to vector<1x256xf32>
    %58 = arith.divf %56, %57 : vector<1x256xf32>
    %c0_44 = arith.constant 0 : index
    %c0_45 = arith.constant 0 : index
    %59 = vector.load %arg8[%c0_44, %c0_45] : memref<256x16xf32, #tpu.memory_space<vmem>>, vector<256x16xf32>
    %cst_46 = arith.constant dense<0.000000e+00> : vector<1x16xf32>
    %60 = tpu.matmul %58, %59, %cst_46 {dimension_numbers = #tpu.dot_dimension_numbers<[1], [0], [0], [1], [0, 0, 1, 1], [], []>} : vector<1x256xf32>, vector<256x16xf32>, vector<1x16xf32> -> vector<1x16xf32>
    %c0_47 = arith.constant 0 : index
    %c0_48 = arith.constant 0 : index
    %61 = vector.load %arg9[%c0_47, %c0_48] : memref<16x256xf32, #tpu.memory_space<vmem>>, vector<16x256xf32>
    %cst_49 = arith.constant dense<0.000000e+00> : vector<1x256xf32>
    %62 = tpu.matmul %60, %61, %cst_49 {dimension_numbers = #tpu.dot_dimension_numbers<[1], [0], [0], [1], [0, 0, 1, 1], [], []>} : vector<1x16xf32>, vector<16x256xf32>, vector<1x256xf32> -> vector<1x256xf32>
    %cst_50 = arith.constant 9.99999974E-6 : f32
    %63 = vector.broadcast %cst_50 : f32 to vector<1x256xf32>
    %64 = arith.addf %62, %63 : vector<1x256xf32>
    %65 = math.rsqrt %64 : vector<1x256xf32>
    %66 = arith.mulf %65, %39 : vector<1x256xf32>
    %67 = vector.broadcast %66 : vector<1x256xf32> to vector<2x256xf32>
    %68 = arith.mulf %53, %67 : vector<2x256xf32>
    %69 = vector.broadcast %38 : vector<1x256xf32> to vector<2x256xf32>
    %70 = arith.addf %68, %69 : vector<2x256xf32>
    %cst_51 = arith.constant 0.000000e+00 : f32
    %71 = vector.broadcast %cst_51 : f32 to vector<2x256xf32>
    %72 = arith.maximumf %70, %71 : vector<2x256xf32>
    %c0_52 = arith.constant 0 : index
    %c0_53 = arith.constant 0 : index
    %73 = vector.load %arg11[%c0_52, %c0_53] : memref<256x32xf32, #tpu.memory_space<vmem>>, vector<256x32xf32>
    %cst_54 = arith.constant dense<0.000000e+00> : vector<2x32xf32>
    %74 = tpu.matmul %72, %73, %cst_54 {dimension_numbers = #tpu.dot_dimension_numbers<[1], [0], [0], [1], [0, 0, 1, 1], [], []>} : vector<2x256xf32>, vector<256x32xf32>, vector<2x32xf32> -> vector<2x32xf32>
    %c0_55 = arith.constant 0 : index
    %c0_56 = arith.constant 0 : index
    %75 = vector.load %arg12[%c0_55, %c0_56] : memref<1x32xf32, #tpu.memory_space<vmem>>, vector<1x32xf32>
    %76 = vector.broadcast %75 : vector<1x32xf32> to vector<2x32xf32>
    %77 = arith.addf %74, %76 : vector<2x32xf32>
    %c0_57 = arith.constant 0 : index
    %c0_58 = arith.constant 0 : index
    %78 = vector.load %arg13[%c0_57, %c0_58] : memref<256x32xf32, #tpu.memory_space<vmem>>, vector<256x32xf32>
    %cst_59 = arith.constant dense<0.000000e+00> : vector<2x32xf32>
    %79 = tpu.matmul %72, %78, %cst_59 {dimension_numbers = #tpu.dot_dimension_numbers<[1], [0], [0], [1], [0, 0, 1, 1], [], []>} : vector<2x256xf32>, vector<256x32xf32>, vector<2x32xf32> -> vector<2x32xf32>
    %c0_60 = arith.constant 0 : index
    %c0_61 = arith.constant 0 : index
    %80 = vector.load %arg14[%c0_60, %c0_61] : memref<1x32xf32, #tpu.memory_space<vmem>>, vector<1x32xf32>
    %81 = vector.broadcast %80 : vector<1x32xf32> to vector<2x32xf32>
    %82 = arith.addf %79, %81 : vector<2x32xf32>
    %c0_62 = arith.constant 0 : index
    %c0_63 = arith.constant 0 : index
    %83 = vector.load %arg2[%c0_62, %c0_63] : memref<2x32xf32, #tpu.memory_space<vmem>>, vector<2x32xf32>
    %cst_64 = arith.constant 5.000000e-01 : f32
    %84 = vector.broadcast %cst_64 : f32 to vector<2x32xf32>
    %85 = arith.mulf %84, %82 : vector<2x32xf32>
    %86 = math.exp %85 : vector<2x32xf32>
    %87 = arith.mulf %83, %86 : vector<2x32xf32>
    %88 = arith.addf %77, %87 : vector<2x32xf32>
    %c0_65 = arith.constant 0 : index
    %c0_66 = arith.constant 0 : index
    %89 = vector.load %arg15[%c0_65, %c0_66] : memref<32x256xf32, #tpu.memory_space<vmem>>, vector<32x256xf32>
    %cst_67 = arith.constant dense<0.000000e+00> : vector<2x256xf32>
    %90 = tpu.matmul %88, %89, %cst_67 {dimension_numbers = #tpu.dot_dimension_numbers<[1], [0], [0], [1], [0, 0, 1, 1], [], []>} : vector<2x32xf32>, vector<32x256xf32>, vector<2x256xf32> -> vector<2x256xf32>
    %c0_68 = arith.constant 0 : index
    %c0_69 = arith.constant 0 : index
    %91 = vector.load %arg16[%c0_68, %c0_69] : memref<1x256xf32, #tpu.memory_space<vmem>>, vector<1x256xf32>
    %92 = vector.broadcast %91 : vector<1x256xf32> to vector<2x256xf32>
    %93 = arith.addf %90, %92 : vector<2x256xf32>
    %c0_70 = arith.constant 0 : index
    %c0_71 = arith.constant 0 : index
    %94 = vector.load %arg20[%c0_70, %c0_71] : memref<3x512xf32, #tpu.memory_space<vmem>>, vector<1x512xf32>
    %c1_72 = arith.constant 1 : index
    %c0_73 = arith.constant 0 : index
    %95 = vector.load %arg20[%c1_72, %c0_73] : memref<3x512xf32, #tpu.memory_space<vmem>>, vector<1x512xf32>
    %c2_74 = arith.constant 2 : index
    %c0_75 = arith.constant 0 : index
    %96 = vector.load %arg20[%c2_74, %c0_75] : memref<3x512xf32, #tpu.memory_space<vmem>>, vector<1x512xf32>
    %c0_76 = arith.constant 0 : index
    %c0_77 = arith.constant 0 : index
    %97 = vector.load %arg17[%c0_76, %c0_77] : memref<256x512xf32, #tpu.memory_space<vmem>>, vector<256x512xf32>
    %cst_78 = arith.constant dense<0.000000e+00> : vector<2x512xf32>
    %98 = tpu.matmul %93, %97, %cst_78 {dimension_numbers = #tpu.dot_dimension_numbers<[1], [0], [0], [1], [0, 0, 1, 1], [], []>} : vector<2x256xf32>, vector<256x512xf32>, vector<2x512xf32> -> vector<2x512xf32>
    %99 = vector.broadcast %94 : vector<1x512xf32> to vector<2x512xf32>
    %100 = arith.addf %98, %99 : vector<2x512xf32>
    %cst_79 = arith.constant dense<0.000000e+00> : vector<512xf32>
    %101 = vector.multi_reduction <add>, %100, %cst_79 [0] : vector<2x512xf32> to vector<512xf32>
    %102 = vector.shape_cast %101 : vector<512xf32> to vector<1x512xf32>
    %cst_80 = arith.constant 2.000000e+00 : f32
    %103 = vector.broadcast %cst_80 : f32 to vector<1x512xf32>
    %104 = arith.divf %102, %103 : vector<1x512xf32>
    %c0_81 = arith.constant 0 : index
    %c0_82 = arith.constant 0 : index
    %105 = vector.load %arg18[%c0_81, %c0_82] : memref<512x8xf32, #tpu.memory_space<vmem>>, vector<512x8xf32>
    %cst_83 = arith.constant dense<0.000000e+00> : vector<1x8xf32>
    %106 = tpu.matmul %104, %105, %cst_83 {dimension_numbers = #tpu.dot_dimension_numbers<[1], [0], [0], [1], [0, 0, 1, 1], [], []>} : vector<1x512xf32>, vector<512x8xf32>, vector<1x8xf32> -> vector<1x8xf32>
    %c0_84 = arith.constant 0 : index
    %c0_85 = arith.constant 0 : index
    %107 = vector.load %arg19[%c0_84, %c0_85] : memref<8x512xf32, #tpu.memory_space<vmem>>, vector<8x512xf32>
    %cst_86 = arith.constant dense<0.000000e+00> : vector<1x512xf32>
    %108 = tpu.matmul %106, %107, %cst_86 {dimension_numbers = #tpu.dot_dimension_numbers<[1], [0], [0], [1], [0, 0, 1, 1], [], []>} : vector<1x8xf32>, vector<8x512xf32>, vector<1x512xf32> -> vector<1x512xf32>
    %109 = vector.broadcast %108 : vector<1x512xf32> to vector<2x512xf32>
    %110 = arith.subf %100, %109 : vector<2x512xf32>
    %111 = arith.mulf %110, %110 : vector<2x512xf32>
    %cst_87 = arith.constant dense<0.000000e+00> : vector<512xf32>
    %112 = vector.multi_reduction <add>, %111, %cst_87 [0] : vector<2x512xf32> to vector<512xf32>
    %113 = vector.shape_cast %112 : vector<512xf32> to vector<1x512xf32>
    %cst_88 = arith.constant 2.000000e+00 : f32
    %114 = vector.broadcast %cst_88 : f32 to vector<1x512xf32>
    %115 = arith.divf %113, %114 : vector<1x512xf32>
    %c0_89 = arith.constant 0 : index
    %c0_90 = arith.constant 0 : index
    %116 = vector.load %arg18[%c0_89, %c0_90] : memref<512x8xf32, #tpu.memory_space<vmem>>, vector<512x8xf32>
    %cst_91 = arith.constant dense<0.000000e+00> : vector<1x8xf32>
    %117 = tpu.matmul %115, %116, %cst_91 {dimension_numbers = #tpu.dot_dimension_numbers<[1], [0], [0], [1], [0, 0, 1, 1], [], []>} : vector<1x512xf32>, vector<512x8xf32>, vector<1x8xf32> -> vector<1x8xf32>
    %c0_92 = arith.constant 0 : index
    %c0_93 = arith.constant 0 : index
    %118 = vector.load %arg19[%c0_92, %c0_93] : memref<8x512xf32, #tpu.memory_space<vmem>>, vector<8x512xf32>
    %cst_94 = arith.constant dense<0.000000e+00> : vector<1x512xf32>
    %119 = tpu.matmul %117, %118, %cst_94 {dimension_numbers = #tpu.dot_dimension_numbers<[1], [0], [0], [1], [0, 0, 1, 1], [], []>} : vector<1x8xf32>, vector<8x512xf32>, vector<1x512xf32> -> vector<1x512xf32>
    %cst_95 = arith.constant 9.99999974E-6 : f32
    %120 = vector.broadcast %cst_95 : f32 to vector<1x512xf32>
    %121 = arith.addf %119, %120 : vector<1x512xf32>
    %122 = math.rsqrt %121 : vector<1x512xf32>
    %123 = arith.mulf %122, %96 : vector<1x512xf32>
    %124 = vector.broadcast %123 : vector<1x512xf32> to vector<2x512xf32>
    %125 = arith.mulf %110, %124 : vector<2x512xf32>
    %126 = vector.broadcast %95 : vector<1x512xf32> to vector<2x512xf32>
    %127 = arith.addf %125, %126 : vector<2x512xf32>
    %cst_96 = arith.constant 0.000000e+00 : f32
    %128 = vector.broadcast %cst_96 : f32 to vector<2x512xf32>
    %129 = arith.maximumf %127, %128 : vector<2x512xf32>
    %c0_97 = arith.constant 0 : index
    %c0_98 = arith.constant 0 : index
    %130 = vector.load %arg21[%c0_97, %c0_98] : memref<512x768xf32, #tpu.memory_space<vmem>>, vector<512x768xf32>
    %cst_99 = arith.constant dense<0.000000e+00> : vector<2x768xf32>
    %131 = tpu.matmul %129, %130, %cst_99 {dimension_numbers = #tpu.dot_dimension_numbers<[1], [0], [0], [1], [0, 0, 1, 1], [], []>} : vector<2x512xf32>, vector<512x768xf32>, vector<2x768xf32> -> vector<2x768xf32>
    %c0_100 = arith.constant 0 : index
    %c0_101 = arith.constant 0 : index
    %132 = vector.load %arg22[%c0_100, %c0_101] : memref<1x768xf32, #tpu.memory_space<vmem>>, vector<1x768xf32>
    %133 = vector.broadcast %132 : vector<1x768xf32> to vector<2x768xf32>
    %134 = arith.addf %131, %133 : vector<2x768xf32>
    %135 = arith.negf %134 : vector<2x768xf32>
    %136 = math.exp %135 : vector<2x768xf32>
    %cst_102 = arith.constant 1.000000e+00 : f32
    %137 = vector.broadcast %cst_102 : f32 to vector<2x768xf32>
    %138 = arith.addf %137, %136 : vector<2x768xf32>
    %139 = arith.divf %137, %138 : vector<2x768xf32>
    %c0_103 = arith.constant 0 : index
    %c0_104 = arith.constant 0 : index
    %140 = vector.load %arg23[%c0_103, %c0_104] : memref<2x768xf32, #tpu.memory_space<vmem>>, vector<2x768xf32>
    tpu.vector_store %arg23[%c0_103, %c0_104], %139 {strides = array<i32>} : memref<2x768xf32, #tpu.memory_space<vmem>>, vector<2x768xf32>,
    %c0_105 = arith.constant 0 : index
    %c0_106 = arith.constant 0 : index
    %141 = vector.load %arg24[%c0_105, %c0_106] : memref<2x32xf32, #tpu.memory_space<vmem>>, vector<2x32xf32>
    tpu.vector_store %arg24[%c0_105, %c0_106], %77 {strides = array<i32>} : memref<2x32xf32, #tpu.memory_space<vmem>>, vector<2x32xf32>,
    %c0_107 = arith.constant 0 : index
    %c0_108 = arith.constant 0 : index
    %142 = vector.load %arg25[%c0_107, %c0_108] : memref<2x32xf32, #tpu.memory_space<vmem>>, vector<2x32xf32>
    tpu.vector_store %arg25[%c0_107, %c0_108], %82 {strides = array<i32>} : memref<2x32xf32, #tpu.memory_space<vmem>>, vector<2x32xf32>,
    return
  }
  func.func @transform_0(%arg0: i32) -> (i32, i32) {
    %c0_i32 = arith.constant 0 : i32
    %c0_i32_0 = arith.constant 0 : i32
    %c0_i32_1 = arith.constant 0 : i32
    return %c0_i32, %c0_i32_0 : i32, i32
  }
  func.func @transform_1(%arg0: i32) -> (i32, i32) {
    %c0_i32 = arith.constant 0 : i32
    %c0_i32_0 = arith.constant 0 : i32
    %c0_i32_1 = arith.constant 0 : i32
    return %c0_i32, %c0_i32_0 : i32, i32
  }
  func.func @transform_2(%arg0: i32) -> (i32, i32) {
    %c0_i32 = arith.constant 0 : i32
    %c0_i32_0 = arith.constant 0 : i32
    %c0_i32_1 = arith.constant 0 : i32
    return %c0_i32, %c0_i32_0 : i32, i32
  }
  func.func @transform_3(%arg0: i32) -> (i32, i32) {
    %c0_i32 = arith.constant 0 : i32
    %c0_i32_0 = arith.constant 0 : i32
    %c0_i32_1 = arith.constant 0 : i32
    return %c0_i32, %c0_i32_0 : i32, i32
  }
  func.func @transform_4(%arg0: i32) -> (i32, i32) {
    %c0_i32 = arith.constant 0 : i32
    %c0_i32_0 = arith.constant 0 : i32
    %c0_i32_1 = arith.constant 0 : i32
    return %c0_i32, %c0_i32_0 : i32, i32
  }
  func.func @transform_5(%arg0: i32) -> (i32, i32) {
    %c0_i32 = arith.constant 0 : i32
    %c0_i32_0 = arith.constant 0 : i32
    %c0_i32_1 = arith.constant 0 : i32
    return %c0_i32, %c0_i32_0 : i32, i32
  }
  func.func @transform_6(%arg0: i32) -> (i32, i32) {
    %c0_i32 = arith.constant 0 : i32
    %c0_i32_0 = arith.constant 0 : i32
    %c0_i32_1 = arith.constant 0 : i32
    return %c0_i32, %c0_i32_0 : i32, i32
  }
  func.func @transform_7(%arg0: i32) -> (i32, i32) {
    %c0_i32 = arith.constant 0 : i32
    %c0_i32_0 = arith.constant 0 : i32
    %c0_i32_1 = arith.constant 0 : i32
    return %c0_i32, %c0_i32_0 : i32, i32
  }
  func.func @transform_8(%arg0: i32) -> (i32, i32) {
    %c0_i32 = arith.constant 0 : i32
    %c0_i32_0 = arith.constant 0 : i32
    %c0_i32_1 = arith.constant 0 : i32
    return %c0_i32, %c0_i32_0 : i32, i32
  }
  func.func @transform_9(%arg0: i32) -> (i32, i32) {
    %c0_i32 = arith.constant 0 : i32
    %c0_i32_0 = arith.constant 0 : i32
    %c0_i32_1 = arith.constant 0 : i32
    return %c0_i32, %c0_i32_0 : i32, i32
  }
  func.func @transform_10(%arg0: i32) -> (i32, i32) {
    %c0_i32 = arith.constant 0 : i32
    %c0_i32_0 = arith.constant 0 : i32
    %c0_i32_1 = arith.constant 0 : i32
    return %c0_i32, %c0_i32_0 : i32, i32
  }
  func.func @transform_11(%arg0: i32) -> (i32, i32) {
    %c0_i32 = arith.constant 0 : i32
    %c0_i32_0 = arith.constant 0 : i32
    %c0_i32_1 = arith.constant 0 : i32
    return %c0_i32, %c0_i32_0 : i32, i32
  }
  func.func @transform_12(%arg0: i32) -> (i32, i32) {
    %c0_i32 = arith.constant 0 : i32
    %c0_i32_0 = arith.constant 0 : i32
    %c0_i32_1 = arith.constant 0 : i32
    return %c0_i32, %c0_i32_0 : i32, i32
  }
  func.func @transform_13(%arg0: i32) -> (i32, i32) {
    %c0_i32 = arith.constant 0 : i32
    %c0_i32_0 = arith.constant 0 : i32
    %c0_i32_1 = arith.constant 0 : i32
    return %c0_i32, %c0_i32_0 : i32, i32
  }
  func.func @transform_14(%arg0: i32) -> (i32, i32) {
    %c0_i32 = arith.constant 0 : i32
    %c0_i32_0 = arith.constant 0 : i32
    %c0_i32_1 = arith.constant 0 : i32
    return %c0_i32, %c0_i32_0 : i32, i32
  }
  func.func @transform_15(%arg0: i32) -> (i32, i32) {
    %c0_i32 = arith.constant 0 : i32
    %c0_i32_0 = arith.constant 0 : i32
    %c0_i32_1 = arith.constant 0 : i32
    return %c0_i32, %c0_i32_0 : i32, i32
  }
  func.func @transform_16(%arg0: i32) -> (i32, i32) {
    %c0_i32 = arith.constant 0 : i32
    %c0_i32_0 = arith.constant 0 : i32
    %c0_i32_1 = arith.constant 0 : i32
    return %c0_i32, %c0_i32_0 : i32, i32
  }
  func.func @transform_17(%arg0: i32) -> (i32, i32) {
    %c0_i32 = arith.constant 0 : i32
    %c0_i32_0 = arith.constant 0 : i32
    %c0_i32_1 = arith.constant 0 : i32
    return %c0_i32, %c0_i32_0 : i32, i32
  }
  func.func @transform_18(%arg0: i32) -> (i32, i32) {
    %c0_i32 = arith.constant 0 : i32
    %c0_i32_0 = arith.constant 0 : i32
    %c0_i32_1 = arith.constant 0 : i32
    return %c0_i32, %c0_i32_0 : i32, i32
  }
  func.func @transform_19(%arg0: i32) -> (i32, i32) {
    %c0_i32 = arith.constant 0 : i32
    %c0_i32_0 = arith.constant 0 : i32
    %c0_i32_1 = arith.constant 0 : i32
    return %c0_i32, %c0_i32_0 : i32, i32
  }
  func.func @transform_20(%arg0: i32) -> (i32, i32) {
    %c0_i32 = arith.constant 0 : i32
    %c0_i32_0 = arith.constant 0 : i32
    %c0_i32_1 = arith.constant 0 : i32
    return %c0_i32, %c0_i32_0 : i32, i32
  }
  func.func @transform_21(%arg0: i32) -> (i32, i32) {
    %c0_i32 = arith.constant 0 : i32
    %c0_i32_0 = arith.constant 0 : i32
    %c0_i32_1 = arith.constant 0 : i32
    return %c0_i32, %c0_i32_0 : i32, i32
  }
  func.func @transform_22(%arg0: i32) -> (i32, i32) {
    %c0_i32 = arith.constant 0 : i32
    %c0_i32_0 = arith.constant 0 : i32
    %c0_i32_1 = arith.constant 0 : i32
    return %c0_i32, %c0_i32_0 : i32, i32
  }
  func.func @transform_23(%arg0: i32) -> (i32, i32) {
    %c0_i32 = arith.constant 0 : i32
    %c0_i32_0 = arith.constant 0 : i32
    %c0_i32_1 = arith.constant 0 : i32
    return %c0_i32, %c0_i32_0 : i32, i32
  }
  func.func @transform_24(%arg0: i32) -> (i32, i32) {
    %c0_i32 = arith.constant 0 : i32
    %c0_i32_0 = arith.constant 0 : i32
    %c0_i32_1 = arith.constant 0 : i32
    return %c0_i32, %c0_i32_0 : i32, i32
  }
}

</mosaic_0001>

<bundles_post_ra>
// kernel: vae_forward.1
= control target key start
LH: loop header
LB: loop body
LE: loop exit
PB: predicated region body
PF: predicated region fallthrough
CT: control target
= control target key end

     0   :  { %s6884_s0 = inlined_call_operand.vmem [shape: f32[2,768], index: 0, kind: input, shape index: {}]   ;;  %s6885_s1 = inlined_call_operand.hbm [shape: f32[2,32], index: 1, kind: input, shape index: {}]   ;;  %s6886_s2 = inlined_call_operand.hbm [shape: f32[768,512], index: 2, kind: input, shape index: {}]   ;;  %s6887_s3 = inlined_call_operand.vmem [shape: f32[512,8], index: 3, kind: input, shape index: {}]   ;;  %s6888_s4 = inlined_call_operand.hbm [shape: f32[8,512], index: 4, kind: input, shape index: {}]   ;;  %s6889_s5 = inlined_call_operand.hbm [shape: f32[3,512], index: 5, kind: input, shape index: {}]   ;;  %s6890_s6 = inlined_call_operand.hbm [shape: f32[512,256], index: 6, kind: input, shape index: {}]   ;;  %s6891_s7 = inlined_call_operand.vmem [shape: f32[256,16], index: 7, kind: input, shape index: {}]   ;;  %s6892_s8 = inlined_call_operand.hbm [shape: f32[16,256], index: 8, kind: input, shape index: {}]   ;;  %s6893_s9 = inlined_call_operand.hbm [shape: f32[3,256], index: 9, kind: input, shape index: {}]   ;;  %s6894_s10 = inlined_call_operand.vmem [shape: f32[256,32], index: 10, kind: input, shape index: {}]   ;;  %s6895_s11 = inlined_call_operand.hbm [shape: f32[1,32], index: 11, kind: input, shape index: {}]   ;;  %s6896_s12 = inlined_call_operand.vmem [shape: f32[256,32], index: 12, kind: input, shape index: {}]   ;;  %s6897_s13 = inlined_call_operand.hbm [shape: f32[1,32], index: 13, kind: input, shape index: {}]   ;;  %s6898_s14 = inlined_call_operand.hbm [shape: f32[32,256], index: 14, kind: input, shape index: {}]   ;;  %s6899_s15 = inlined_call_operand.hbm [shape: f32[1,256], index: 15, kind: input, shape index: {}]   ;;  %s6900_s16 = inlined_call_operand.hbm [shape: f32[256,512], index: 16, kind: input, shape index: {}]   ;;  %s6901_s17 = inlined_call_operand.vmem [shape: f32[512,8], index: 17, kind: input, shape index: {}]   ;;  %s6902_s18 = inlined_call_operand.hbm [shape: f32[8,512], index: 18, kind: input, shape index: {}]   ;;  %s6903_s19 = inlined_call_operand.hbm [shape: f32[3,512], index: 19, kind: input, shape index: {}]   ;;  %s6904_s20 = inlined_call_operand.hbm [shape: f32[512,768], index: 20, kind: input, shape index: {}]   ;;  %s6905_s21 = inlined_call_operand.hbm [shape: f32[1,768], index: 21, kind: input, shape index: {}]   ;;  %s6906_s22 = inlined_call_operand.vmem [shape: f32[2,768], index: 22, kind: output, shape index: {0}]   ;;  %s6907_s23 = inlined_call_operand.hbm [shape: f32[2,32], index: 23, kind: output, shape index: {1}]   ;;  %s6908_s24 = inlined_call_operand.hbm [shape: f32[2,32], index: 24, kind: output, shape index: {2}]  }
   0x1   :  { %6962 = sst [smem:[#allocation68_spill]] %s6884_s0 }
   0x2   :  { %6963 = sst [smem:[#allocation69_spill]] %s6885_s1 }
   0x3   :  { %6964 = sst [smem:[#allocation70_spill]] %s6886_s2 }
   0x4   :  { %6965 = sst [smem:[#allocation71_spill]] %s6887_s3 }
   0x5   :  { %6966 = sst [smem:[#allocation72_spill]] %s6888_s4 }
   0x6   :  { %6967 = sst [smem:[#allocation73_spill]] %s6889_s5 }
   0x7   :  { %6968 = sst [smem:[#allocation74_spill]] %s6890_s6 }
   0x8   :  { %6969 = sst [smem:[#allocation75_spill]] %s6891_s7 }
   0x9   :  { %6970 = sst [smem:[#allocation76_spill]] %s6892_s8 }
   0xa   :  { %6971 = sst [smem:[#allocation77_spill]] %s6906_s22 }
   0xb   :  { %6972 = sst [smem:[#allocation78_spill]] %s6907_s23 }
   0xc   :  { %6973 = sst [smem:[#allocation79_spill]] %s6908_s24 }
   0xd   :  { %30 = vsyncpa [#allocation3], 0 }
   0xe   :  { %31 = vsyncpa [#allocation6], 0 }
   0xf   :  { %32 = vsyncpa [#allocation9], 0 }
  0x10   :  { %33 = vsyncpa [#allocation12], 0 }
  0x11   :  { %34 = vsyncpa [#allocation15], 0 }
  0x12   :  { %35 = vsyncpa [#allocation18], 0 }
  0x13   :  { %36 = vsyncpa [#allocation21], 0 }
  0x14   :  { %37 = vsyncpa [#allocation24], 0 }
  0x15   :  { %38 = vsyncpa [#allocation27], 0 }
  0x16   :  { %39 = vsyncpa [#allocation4], 0  ;;  %s6974_s27 = sld [smem:[#allocation70_spill]] }
  0x1c   :  { %s58_s28 = sshll.u32 %s6974_s27, 4  ;;  %s59_s28 = int_to_ptr.hbm [resolvable:$true] %s58_s28 }
  0x1d   :  { %40 = vsyncpa [#allocation30], 0  ;;  %s5027_s6 = smov [#allocation5]   ;;  %s6975_s7 = sld [smem:[#allocation73_spill]] }
  0x1e   :  { %s60_s2 = sshll.u32 %s5027_s6, 4  ;;  %s5028_s3 = smov 512   ;;  %s61_s2 = int_to_ptr.vmem [resolvable:$true] %s60_s2 }
  0x1f   :  { %s5029_s25 = smov 32   ;;  %s5030_s8 = smov [#allocation8]  }
  0x20   :  { %66 = dma.hbm_to_vmem [thread:$0]  %s59_s28, 49152, %s61_s2, [#allocation6], %s5028_s3, %s5028_s3, %s5029_s25  }
  0x21   :  { %s87_s4 = sshll.u32 %s5030_s8, 4  ;;  %s6976_s26 = sld [smem:[#allocation76_spill]]  ;;  %s88_s4 = int_to_ptr.vmem [resolvable:$true] %s87_s4 }
  0x22   :  { %s5031_s6 = smov [#allocation11]   ;;  %s5032_s24 = smov 256  }
  0x23   :  { %s85_s30 = sshll.u32 %s6975_s7, 4  ;;  %s112_s22 = sshll.u32 %s5031_s6, 4  ;;  %s86_s30 = int_to_ptr.hbm [resolvable:$true] %s85_s30  ;;  %s113_s22 = int_to_ptr.vmem [resolvable:$true] %s112_s22 }
  0x24   :  { %90 = dma.hbm_to_vmem [thread:$0]  %s86_s30, 256, %s88_s4, [#allocation9]  }
  0x25   :  { %s137_s7 = sshll.u32 %s6895_s11, 4  ;;  %s5033_s23 = smov 16   ;;  %s138_s7 = int_to_ptr.hbm [resolvable:$true] %s137_s7 }
  0x26   :  { %s5034_s28 = smov [#allocation14]   ;;  %s160_s4 = sshll.u32 %s6898_s14, 4  ;;  %s161_s4 = int_to_ptr.hbm [resolvable:$true] %s160_s4 }
  0x27   :  { %s110_s27 = sshll.u32 %s6976_s26, 4  ;;  %s139_s2 = sshll.u32 %s5034_s28, 4  ;;  %s111_s27 = int_to_ptr.hbm [resolvable:$true] %s110_s27  ;;  %s140_s2 = int_to_ptr.vmem [resolvable:$true] %s139_s2 }
  0x28   :  { %118 = dma.hbm_to_vmem [thread:$0]  %s111_s27, 512, %s113_s22, [#allocation12], %s5032_s24, %s5032_s24, %s5033_s23  }
  0x29   :  { %142 = dma.hbm_to_vmem [thread:$0]  %s138_s7, 16, %s140_s2, [#allocation15]  }
  0x2a   :  { %s184_s11 = sshll.u32 %s6900_s16, 4  ;;  %s5035_s26 = smov [#allocation17]   ;;  %s185_s11 = int_to_ptr.hbm [resolvable:$true] %s184_s11 }
  0x2b   :  { %s162_s6 = sshll.u32 %s5035_s26, 4  ;;  %s5036_s22 = smov [#allocation20]   ;;  %s163_s6 = int_to_ptr.vmem [resolvable:$true] %s162_s6 }
  0x2c   :  { %168 = dma.hbm_to_vmem [thread:$0]  %s161_s4, 1024, %s163_s6, [#allocation18], %s5032_s24, %s5032_s24, %s5033_s23  }
  0x2d   :  { %s186_s27 = sshll.u32 %s5036_s22, 4  ;;  %s211_s14 = sshll.u32 %s6903_s19, 4  ;;  %s187_s27 = int_to_ptr.vmem [resolvable:$true] %s186_s27  ;;  %s212_s14 = int_to_ptr.hbm [resolvable:$true] %s211_s14 }
  0x2e   :  { %192 = dma.hbm_to_vmem [thread:$0]  %s185_s11, 16384, %s187_s27, [#allocation21], %s5028_s3, %s5028_s3, %s5029_s25  }
  0x2f   :  { %s6977_s28 = sld [smem:[#allocation69_spill]]  ;;  %s5037_s30 = smov [#allocation23]  }
  0x30   :  { %s213_s8 = sshll.u32 %s5037_s30, 4  ;;  %s5038_s4 = smov [#allocation2]   ;;  %s214_s8 = int_to_ptr.vmem [resolvable:$true] %s213_s8 }
  0x31   :  { %216 = dma.hbm_to_vmem [thread:$0]  %s212_s14, 256, %s214_s8, [#allocation24]  }
  0x32   :  { %s50_s1 = sshll.u32 %s5038_s4, 4  ;;  %s6978_s19 = sld [smem:[#allocation72_spill]]  ;;  %s51_s1 = int_to_ptr.vmem [resolvable:$true] %s50_s1 }
  0x33   :  { %s6979_s25 = sld [smem:[#allocation74_spill]]  ;;  %s5039_s27 = smov [#allocation7]  }
  0x34   :  { %s76_s29 = sshll.u32 %s5039_s27, 4  ;;  %s5040_s0 = smov [#allocation10]   ;;  %s77_s29 = int_to_ptr.vmem [resolvable:$true] %s76_s29 }
  0x35   :  { %s48_s2 = sshll.u32 %s6977_s28, 4  ;;  %s97_s14 = sshll.u32 %s5040_s0, 4  ;;  %s49_s2 = int_to_ptr.hbm [resolvable:$true] %s48_s2  ;;  %s98_s14 = int_to_ptr.vmem [resolvable:$true] %s97_s14 }
  0x36   :  { %53 = dma.hbm_to_vmem [thread:$0]  %s49_s2, 32, %s51_s1, [#allocation3]  }
  0x37   :  { %s124_s28 = sshll.u32 %s6893_s9, 4  ;;  %s150_s8 = sshll.u32 %s6897_s13, 4  ;;  %s125_s28 = int_to_ptr.hbm [resolvable:$true] %s124_s28  ;;  %s151_s8 = int_to_ptr.hbm [resolvable:$true] %s150_s8 }
  0x38   :  { %s74_s6 = sshll.u32 %s6978_s19, 4  ;;  %s5041_s4 = smov [#allocation13]   ;;  %s75_s6 = int_to_ptr.hbm [resolvable:$true] %s74_s6 }
  0x39   :  { %s95_s11 = sshll.u32 %s6979_s25, 4  ;;  %s126_s1 = sshll.u32 %s5041_s4, 4  ;;  %s96_s11 = int_to_ptr.hbm [resolvable:$true] %s95_s11  ;;  %s127_s1 = int_to_ptr.vmem [resolvable:$true] %s126_s1 }
  0x3a   :  { %79 = dma.hbm_to_vmem [thread:$0]  %s75_s6, 512, %s77_s29, [#allocation6]  }
  0x3b   :  { %103 = dma.hbm_to_vmem [thread:$0]  %s96_s11, 16384, %s98_s14, [#allocation9], %s5032_s24, %s5032_s24, %s5033_s23  }
  0x3c   :  { %129 = dma.hbm_to_vmem [thread:$0]  %s125_s28, 128, %s127_s1, [#allocation12]  }
  0x3d   :  { %s5042_s5 = smov [#allocation16]   ;;  %s174_s9 = sshll.u32 %s6899_s15, 4  ;;  %s175_s9 = int_to_ptr.hbm [resolvable:$true] %s174_s9 }
  0x3e   :  { %s152_s26 = sshll.u32 %s5042_s5, 4  ;;  %s200_s24 = sshll.u32 %s6902_s18, 4  ;;  %s153_s26 = int_to_ptr.vmem [resolvable:$true] %s152_s26  ;;  %s201_s24 = int_to_ptr.hbm [resolvable:$true] %s200_s24 }
  0x3f   :  { %155 = dma.hbm_to_vmem [thread:$0]  %s151_s8, 16, %s153_s26, [#allocation15]  }
  0x40   :  { %s5043_s3 = smov [#allocation19]   ;;  %s5044_s25 = smov [#allocation22]  }
  0x41   :  { %s176_s13 = sshll.u32 %s5043_s3, 4  ;;  %s202_s11 = sshll.u32 %s5044_s25, 4  ;;  %s177_s13 = int_to_ptr.vmem [resolvable:$true] %s176_s13  ;;  %s203_s11 = int_to_ptr.vmem [resolvable:$true] %s202_s11 }
  0x42   :  { %179 = dma.hbm_to_vmem [thread:$0]  %s175_s9, 32, %s177_s13, [#allocation18]  }
  0x43   :  { %s221_s0 = sshll.u32 %s6904_s20, 4  ;;  %s5045_s15 = smov [#allocation25]   ;;  %s222_s0 = int_to_ptr.hbm [resolvable:$true] %s221_s0 }
  0x44   :  { %205 = dma.hbm_to_vmem [thread:$0]  %s201_s24, 512, %s203_s11, [#allocation21]  }
  0x45   :  { %s223_s14 = sshll.u32 %s5045_s15, 4  ;;  %s235_s18 = sshll.u32 %s6905_s21, 4  ;;  %s224_s14 = int_to_ptr.vmem [resolvable:$true] %s223_s14  ;;  %s236_s18 = int_to_ptr.hbm [resolvable:$true] %s235_s18 }
  0x46   :  { %s5046_s28 = smov 768   ;;  %s5047_s2 = smov 48  }
  0x47   :  { %229 = dma.hbm_to_vmem [thread:$0]  %s222_s0, 49152, %s224_s14, [#allocation24], %s5046_s28, %s5046_s28, %s5047_s2  }
  0x48   :  { %s5048_s30 = smov [#allocation26]  }
  0x49   :  { %s237_s8 = sshll.u32 %s5048_s30, 4  ;;  %s238_s8 = int_to_ptr.vmem [resolvable:$true] %s237_s8 }
  0x4a   :  { %240 = dma.hbm_to_vmem [thread:$0]  %s236_s18, 96, %s238_s8, [#allocation27]  }
  0x4b   :  { %5005 = dma.done.wait [#allocation3], 32  }
  0x4c   :  { %5006 = vsyncadd [#allocation3], 4294967264 }
  0x4d   :  { %5007 = dma.done.wait [#allocation6], 49664  }
  0x4e   :  { %5008 = vsyncadd [#allocation6], 4294917632 }
  0x4f   :  { %5009 = dma.done.wait [#allocation9], 16640  }
  0x50   :  { %5010 = vsyncadd [#allocation9], 4294950656 }
  0x51   :  { %5011 = dma.done.wait [#allocation12], 640  }
  0x52   :  { %5012 = vsyncadd [#allocation12], 4294966656 }
  0x53   :  { %5013 = dma.done.wait [#allocation15], 32  }
  0x54   :  { %5014 = vsyncadd [#allocation15], 4294967264 }
  0x55   :  { %5015 = dma.done.wait [#allocation18], 1056  }
  0x56   :  { %5016 = vsyncadd [#allocation18], 4294966240 }
  0x57   :  { %5017 = dma.done.wait [#allocation21], 16896  }
  0x58   :  { %5018 = vsyncadd [#allocation21], 4294950400 }
  0x59   :  { %5019 = dma.done.wait [#allocation24], 49408  }
  0x5a   :  { %5020 = vsyncadd [#allocation24], 4294917888 }
  0x5b   :  { %5021 = dma.done.wait [#allocation27], 96  }
  0x5c   :  { %5022 = vsyncadd [#allocation27], 4294967200  ;;  %v372_v0 = vld [vmem:[#allocation5 + $0x1e0] sm:$0xff]  ;;  %v373_v63 = vld [vmem:[#allocation5 + $0x1e8] sm:$0xff]  ;;  %s6980_s4 = sld [smem:[#allocation68_spill]]  ;;  %vm1202_vm0 = vcmask 1041408  }
  0x5d   :  { %v500_v1 = vld [vmem:[#allocation5 + $0x5e0] sm:$0xff]  ;;  %722 = vmatpush.msra.mxu0 %v372_v0  ;;  %s6981_s6 = sld [smem:[#allocation71_spill]]  ;;  %vm1390_vm2 = vcmask 64512   ;;  %vm2149_vm15 = vcmask 130048   ;;  %s5051_s9 = smov [#allocation29]  }
  0x5e   :  { %v368_v2 = vld [vmem:[#allocation5 + $0x1c0] sm:$0xff]  ;;  %762 = vmatpush.msra.mxu2 %v500_v1  ;;  %s7028_s8 = sld [smem:[#allocation75_spill]] }
  0x5f   :  { %v436_v3 = vld [vmem:[#allocation5 + $0x3e0] sm:$0xff]  ;;  %723 = vmatpush.msra.mxu0 %v368_v2  ;;  %s7081_s26 = sld [smem:[#allocation78_spill]] }
  0x60   :  { %v496_v4 = vld [vmem:[#allocation5 + $0x5c0] sm:$0xff]  ;;  %742 = vmatpush.msra.mxu1 %v436_v3  ;;  %s7082_s24 = sld [smem:[#allocation79_spill]] }
  0x61   :  { %v564_v5 = vld [vmem:[#allocation5 + $0x7e0] sm:$0xff]  ;;  %763 = vmatpush.msra.mxu2 %v496_v4  ;;  %v369_v4 = vld [vmem:[#allocation5 + $0x1c8] sm:$0xff]  ;;  %s7089_s11 = sld [smem:[#allocation77_spill]] }
  0x62   :  { %782 = vmatpush.msra.mxu3 %v564_v5  ;;  %v364_v6 = vld [vmem:[#allocation5 + $0x1a0] sm:$0xff]  ;;  %v437_v5 = vld [vmem:[#allocation5 + $0x3e8] sm:$0xff] }
  0x63   :  { %v432_v7 = vld [vmem:[#allocation5 + $0x3c0] sm:$0xff]  ;;  %724 = vmatpush.msra.mxu0 %v364_v6 }
  0x64   :  { %v492_v8 = vld [vmem:[#allocation5 + $0x5a0] sm:$0xff]  ;;  %743 = vmatpush.msra.mxu1 %v432_v7 }
  0x65   :  { %v560_v9 = vld [vmem:[#allocation5 + $0x7c0] sm:$0xff]  ;;  %764 = vmatpush.msra.mxu2 %v492_v8  ;;  %v365_v8 = vld [vmem:[#allocation5 + $0x1a8] sm:$0xff]  ;;  %s4428_s19 = sshll.u32 %s7081_s26, 4  ;;  %s4429_s19 = int_to_ptr.hbm [resolvable:$true] %s4428_s19 }
  0x66   :  { %v428_v10 = vld [vmem:[#allocation5 + $0x3a0] sm:$0xff]  ;;  %783 = vmatpush.msra.mxu3 %v560_v9  ;;  %v433_v9 = vld [vmem:[#allocation5 + $0x3c8] sm:$0xff]  ;;  %s4439_s3 = sshll.u32 %s7082_s24, 4  ;;  %s4440_s3 = int_to_ptr.hbm [resolvable:$true] %s4439_s3 }
  0x67   :  { %v360_v11 = vld [vmem:[#allocation5 + $0x180] sm:$0xff]  ;;  %744 = vmatpush.msra.mxu1 %v428_v10 }
  0x68   :  { %v488_v12 = vld [vmem:[#allocation5 + $0x580] sm:$0xff]  ;;  %725 = vmatpush.msra.mxu0 %v360_v11 }
  0x69   :  { %v556_v13 = vld [vmem:[#allocation5 + $0x7a0] sm:$0xff]  ;;  %765 = vmatpush.msra.mxu2 %v488_v12  ;;  %v361_v12 = vld [vmem:[#allocation5 + $0x188] sm:$0xff] }
  0x6a   :  { %v424_v14 = vld [vmem:[#allocation5 + $0x380] sm:$0xff]  ;;  %784 = vmatpush.msra.mxu3 %v556_v13  ;;  %v429_v13 = vld [vmem:[#allocation5 + $0x3a8] sm:$0xff] }
  0x6b   :  { %v552_v15 = vld [vmem:[#allocation5 + $0x780] sm:$0xff]  ;;  %745 = vmatpush.msra.mxu1 %v424_v14 }
  0x6c   :  { %v356_v16 = vld [vmem:[#allocation5 + $0x160] sm:$0xff]  ;;  %785 = vmatpush.msra.mxu3 %v552_v15 }
  0x6d   :  { %v484_v17 = vld [vmem:[#allocation5 + $0x560] sm:$0xff]  ;;  %726 = vmatpush.msra.mxu0 %v356_v16  ;;  %v357_v16 = vld [vmem:[#allocation5 + $0x168] sm:$0xff] }
  0x6e   :  { %v420_v18 = vld [vmem:[#allocation5 + $0x360] sm:$0xff]  ;;  %766 = vmatpush.msra.mxu2 %v484_v17  ;;  %v425_v17 = vld [vmem:[#allocation5 + $0x388] sm:$0xff] }
  0x6f   :  { %v548_v19 = vld [vmem:[#allocation5 + $0x760] sm:$0xff]  ;;  %746 = vmatpush.msra.mxu1 %v420_v18  ;;  %v305_v18 = vld [vmem:[%s6980_s4] sm:$0xff] }
  0x70   :  { %v352_v20 = vld [vmem:[#allocation5 + $0x140] sm:$0xff]  ;;  %786 = vmatpush.msra.mxu3 %v548_v19  ;;  %707 = vst [vmem:[#allocation1] ss:$4 sm:$0xff] %v305_v18  ;;  %v489_v18 = vld [vmem:[#allocation5 + $0x588] sm:$0xff] }
  0x71   :  { %v480_v21 = vld [vmem:[#allocation5 + $0x540] sm:$0xff]  ;;  %727 = vmatpush.msra.mxu0 %v352_v20 }
  0x72   :  { %v416_v22 = vld [vmem:[#allocation5 + $0x340] sm:$0xff]  ;;  %767 = vmatpush.msra.mxu2 %v480_v21  ;;  %v353_v21 = vld [vmem:[#allocation5 + $0x148] sm:$0xff] }
  0x73   :  { %v544_v23 = vld [vmem:[#allocation5 + $0x740] sm:$0xff]  ;;  %747 = vmatpush.msra.mxu1 %v416_v22  ;;  %v421_v22 = vld [vmem:[#allocation5 + $0x368] sm:$0xff] }
  0x74   :  { %v348_v24 = vld [vmem:[#allocation5 + $0x120] sm:$0xff]  ;;  %787 = vmatpush.msra.mxu3 %v544_v23 }
  0x75   :  { %v476_v25 = vld [vmem:[#allocation5 + $0x520] sm:$0xff]  ;;  %728 = vmatpush.msra.mxu0 %v348_v24 }
  0x76   :  { %v412_v26 = vld [vmem:[#allocation5 + $0x320] sm:$0xff]  ;;  %768 = vmatpush.msra.mxu2 %v476_v25  ;;  %v349_v25 = vld [vmem:[#allocation5 + $0x128] sm:$0xff] }
  0x77   :  { %v540_v27 = vld [vmem:[#allocation5 + $0x720] sm:$0xff]  ;;  %748 = vmatpush.msra.mxu1 %v412_v26  ;;  %v417_v26 = vld [vmem:[#allocation5 + $0x348] sm:$0xff] }
  0x78   :  { %v344_v28 = vld [vmem:[#allocation5 + $0x100] sm:$0xff]  ;;  %788 = vmatpush.msra.mxu3 %v540_v27 }
  0x79   :  { %v472_v29 = vld [vmem:[#allocation5 + $0x500] sm:$0xff]  ;;  %729 = vmatpush.msra.mxu0 %v344_v28 }
  0x7a   :  { %v408_v30 = vld [vmem:[#allocation5 + $0x300] sm:$0xff]  ;;  %769 = vmatpush.msra.mxu2 %v472_v29  ;;  %v345_v29 = vld [vmem:[#allocation5 + $0x108] sm:$0xff] }
  0x7b   :  { %v536_v31 = vld [vmem:[#allocation5 + $0x700] sm:$0xff]  ;;  %749 = vmatpush.msra.mxu1 %v408_v30  ;;  %v413_v30 = vld [vmem:[#allocation5 + $0x328] sm:$0xff] }
  0x7c   :  { %v340_v32 = vld [vmem:[#allocation5 + $0xe0] sm:$0xff]  ;;  %789 = vmatpush.msra.mxu3 %v536_v31 }
  0x7d   :  { %v468_v33 = vld [vmem:[#allocation5 + $0x4e0] sm:$0xff]  ;;  %730 = vmatpush.msra.mxu0 %v340_v32 }
  0x7e   :  { %v404_v34 = vld [vmem:[#allocation5 + $0x2e0] sm:$0xff]  ;;  %770 = vmatpush.msra.mxu2 %v468_v33 }
  0x7f   :  { %v532_v35 = vld [vmem:[#allocation5 + $0x6e0] sm:$0xff]  ;;  %750 = vmatpush.msra.mxu1 %v404_v34  ;;  %v341_v34 = vld [vmem:[#allocation5 + $0xe8] sm:$0xff] }
  0x80   :  { %v336_v36 = vld [vmem:[#allocation5 + $0xc0] sm:$0xff]  ;;  %790 = vmatpush.msra.mxu3 %v532_v35  ;;  %v409_v35 = vld [vmem:[#allocation5 + $0x308] sm:$0xff] }
  0x81   :  { %v464_v37 = vld [vmem:[#allocation5 + $0x4c0] sm:$0xff]  ;;  %731 = vmatpush.msra.mxu0 %v336_v36 }
  0x82   :  { %v400_v38 = vld [vmem:[#allocation5 + $0x2c0] sm:$0xff]  ;;  %771 = vmatpush.msra.mxu2 %v464_v37 }
  0x83   :  { %v528_v39 = vld [vmem:[#allocation5 + $0x6c0] sm:$0xff]  ;;  %751 = vmatpush.msra.mxu1 %v400_v38  ;;  %v337_v38 = vld [vmem:[#allocation5 + $0xc8] sm:$0xff] }
  0x84   :  { %v332_v40 = vld [vmem:[#allocation5 + $0xa0] sm:$0xff]  ;;  %791 = vmatpush.msra.mxu3 %v528_v39  ;;  %v405_v39 = vld [vmem:[#allocation5 + $0x2e8] sm:$0xff] }
  0x85   :  { %v460_v41 = vld [vmem:[#allocation5 + $0x4a0] sm:$0xff]  ;;  %732 = vmatpush.msra.mxu0 %v332_v40 }
  0x86   :  { %v396_v42 = vld [vmem:[#allocation5 + $0x2a0] sm:$0xff]  ;;  %772 = vmatpush.msra.mxu2 %v460_v41 }
  0x87   :  { %v524_v43 = vld [vmem:[#allocation5 + $0x6a0] sm:$0xff]  ;;  %752 = vmatpush.msra.mxu1 %v396_v42  ;;  %v333_v42 = vld [vmem:[#allocation5 + $0xa8] sm:$0xff] }
  0x88   :  { %v328_v44 = vld [vmem:[#allocation5 + $0x80] sm:$0xff]  ;;  %792 = vmatpush.msra.mxu3 %v524_v43  ;;  %v401_v43 = vld [vmem:[#allocation5 + $0x2c8] sm:$0xff] }
  0x89   :  { %v456_v45 = vld [vmem:[#allocation5 + $0x480] sm:$0xff]  ;;  %733 = vmatpush.msra.mxu0 %v328_v44 }
  0x8a   :  { %v392_v46 = vld [vmem:[#allocation5 + $0x280] sm:$0xff]  ;;  %773 = vmatpush.msra.mxu2 %v456_v45 }
  0x8b   :  { %v520_v47 = vld [vmem:[#allocation5 + $0x680] sm:$0xff]  ;;  %753 = vmatpush.msra.mxu1 %v392_v46  ;;  %v329_v46 = vld [vmem:[#allocation5 + $0x88] sm:$0xff] }
  0x8c   :  { %v324_v48 = vld [vmem:[#allocation5 + $0x60] sm:$0xff]  ;;  %793 = vmatpush.msra.mxu3 %v520_v47  ;;  %v397_v47 = vld [vmem:[#allocation5 + $0x2a8] sm:$0xff] }
  0x8d   :  { %v452_v49 = vld [vmem:[#allocation5 + $0x460] sm:$0xff]  ;;  %734 = vmatpush.msra.mxu0 %v324_v48 }
  0x8e   :  { %v388_v50 = vld [vmem:[#allocation5 + $0x260] sm:$0xff]  ;;  %774 = vmatpush.msra.mxu2 %v452_v49 }
  0x8f   :  { %v516_v51 = vld [vmem:[#allocation5 + $0x660] sm:$0xff]  ;;  %754 = vmatpush.msra.mxu1 %v388_v50  ;;  %v325_v50 = vld [vmem:[#allocation5 + $0x68] sm:$0xff] }
  0x90   :  { %v320_v52 = vld [vmem:[#allocation5 + $0x40] sm:$0xff]  ;;  %794 = vmatpush.msra.mxu3 %v516_v51  ;;  %v393_v51 = vld [vmem:[#allocation5 + $0x288] sm:$0xff] }
  0x91   :  { %v448_v53 = vld [vmem:[#allocation5 + $0x440] sm:$0xff]  ;;  %735 = vmatpush.msra.mxu0 %v320_v52 }
  0x92   :  { %v384_v54 = vld [vmem:[#allocation5 + $0x240] sm:$0xff]  ;;  %775 = vmatpush.msra.mxu2 %v448_v53 }
  0x93   :  { %v512_v55 = vld [vmem:[#allocation5 + $0x640] sm:$0xff]  ;;  %755 = vmatpush.msra.mxu1 %v384_v54 }
  0x94   :  { %v316_v56 = vld [vmem:[#allocation5 + $0x20] sm:$0xff]  ;;  %795 = vmatpush.msra.mxu3 %v512_v55  ;;  %v321_v55 = vld [vmem:[#allocation5 + $0x48] sm:$0xff] }
  0x95   :  { %v444_v57 = vld [vmem:[#allocation5 + $0x420] sm:$0xff]  ;;  %736 = vmatpush.msra.mxu0 %v316_v56  ;;  %v389_v56 = vld [vmem:[#allocation5 + $0x268] sm:$0xff] }
  0x96   :  { %v380_v58 = vld [vmem:[#allocation5 + $0x220] sm:$0xff]  ;;  %776 = vmatpush.msra.mxu2 %v444_v57  ;;  %v5248_v57 = vld.sshfl [vmem:[#allocation1] sm:$0xff pattern:$0x73625140] }
  0x97   :  { %v508_v59 = vld [vmem:[#allocation5 + $0x620] sm:$0xff]  ;;  %756 = vmatpush.msra.mxu1 %v380_v58  ;;  %v5251_v58 = vld.sshfl [vmem:[#allocation1 + $0x18] sm:$0xff pattern:$0x73625140] }
  0x98   :  { %v312_v60 = vld [vmem:[#allocation5] sm:$0xff]  ;;  %796 = vmatpush.msra.mxu3 %v508_v59 }
  0x99   :  { %v440_v61 = vld [vmem:[#allocation5 + $0x400] sm:$0xff]  ;;  %737 = vmatpush.msra.mxu0 %v312_v60 }
  0x9a   :  { %v628_v62 = vld [vmem:[#allocation5 + $0x9e0] sm:$0xff]  ;;  %777 = vmatpush.msra.mxu2 %v440_v61  ;;  %v317_v61 = vld [vmem:[#allocation5 + $0x28] sm:$0xff]  ;;  %738 = vmatmul.f32.vlgmr.msra.gmra.mxu0 %v5248_v57 }
  0x9b   :  { %v376_v0 = vld [vmem:[#allocation5 + $0x200] sm:$0xff]  ;;  %802 = vmatpush.msrb.mxu0 %v628_v62  ;;  %v385_v62 = vld [vmem:[#allocation5 + $0x248] sm:$0xff] }
  0x9c   :  { %v504_v1 = vld [vmem:[#allocation5 + $0x600] sm:$0xff]  ;;  %842 = vmatpush.msrb.mxu2 %v373_v63  ;;  %757 = vmatpush.msra.mxu1 %v376_v0 }
  0x9d   :  { %v624_v2 = vld [vmem:[#allocation5 + $0x9c0] sm:$0xff]  ;;  %797 = vmatpush.msra.mxu3 %v504_v1 }
  0x9e   :  { %v692_v3 = vld [vmem:[#allocation5 + $0xbe0] sm:$0xff]  ;;  %803 = vmatpush.msrb.mxu0 %v624_v2  ;;  %843 = vmatpush.msrb.mxu2 %v369_v4  ;;  %v313_v2 = vld [vmem:[#allocation5 + $0x8] sm:$0xff] }
  0x9f   :  { %v620_v6 = vld [vmem:[#allocation5 + $0x9a0] sm:$0xff]  ;;  %822 = vmatpush.msrb.mxu1 %v692_v3  ;;  %862 = vmatpush.msrb.mxu3 %v437_v5  ;;  %v381_v3 = vld [vmem:[#allocation5 + $0x228] sm:$0xff] }
  0xa0   :  { %v688_v7 = vld [vmem:[#allocation5 + $0xbc0] sm:$0xff]  ;;  %804 = vmatpush.msrb.mxu0 %v620_v6  ;;  %844 = vmatpush.msrb.mxu2 %v365_v8  ;;  %v501_v4 = vld [vmem:[#allocation5 + $0x5e8] sm:$0xff] }
  0xa1   :  { %v616_v10 = vld [vmem:[#allocation5 + $0x980] sm:$0xff]  ;;  %823 = vmatpush.msrb.mxu1 %v688_v7  ;;  %863 = vmatpush.msrb.mxu3 %v433_v9  ;;  %v629_v5 = vld [vmem:[#allocation5 + $0x9e8] sm:$0xff] }
  0xa2   :  { %v684_v11 = vld [vmem:[#allocation5 + $0xba0] sm:$0xff]  ;;  %805 = vmatpush.msrb.mxu0 %v616_v10  ;;  %845 = vmatpush.msrb.mxu2 %v361_v12  ;;  %v377_v7 = vld [vmem:[#allocation5 + $0x208] sm:$0xff] }
  0xa3   :  { %v612_v14 = vld [vmem:[#allocation5 + $0x960] sm:$0xff]  ;;  %824 = vmatpush.msrb.mxu1 %v684_v11  ;;  %864 = vmatpush.msrb.mxu3 %v429_v13  ;;  %v497_v8 = vld [vmem:[#allocation5 + $0x5c8] sm:$0xff] }
  0xa4   :  { %v680_v15 = vld [vmem:[#allocation5 + $0xb80] sm:$0xff]  ;;  %806 = vmatpush.msrb.mxu0 %v612_v14  ;;  %846 = vmatpush.msrb.mxu2 %v357_v16  ;;  %v565_v9 = vld [vmem:[#allocation5 + $0x7e8] sm:$0xff] }
  0xa5   :  { %v608_v19 = vld [vmem:[#allocation5 + $0x940] sm:$0xff]  ;;  %825 = vmatpush.msrb.mxu1 %v680_v15  ;;  %865 = vmatpush.msrb.mxu3 %v425_v17  ;;  %v625_v10 = vld [vmem:[#allocation5 + $0x9c8] sm:$0xff] }
  0xa6   :  { %v676_v20 = vld [vmem:[#allocation5 + $0xb60] sm:$0xff]  ;;  %807 = vmatpush.msrb.mxu0 %v608_v19  ;;  %847 = vmatpush.msrb.mxu2 %v353_v21  ;;  %v693_v11 = vld [vmem:[#allocation5 + $0xbe8] sm:$0xff] }
  0xa7   :  { %v604_v23 = vld [vmem:[#allocation5 + $0x920] sm:$0xff]  ;;  %826 = vmatpush.msrb.mxu1 %v676_v20  ;;  %866 = vmatpush.msrb.mxu3 %v421_v22  ;;  %v561_v13 = vld [vmem:[#allocation5 + $0x7c8] sm:$0xff] }
  0xa8   :  { %v672_v24 = vld [vmem:[#allocation5 + $0xb40] sm:$0xff]  ;;  %808 = vmatpush.msrb.mxu0 %v604_v23  ;;  %848 = vmatpush.msrb.mxu2 %v349_v25  ;;  %v493_v14 = vld [vmem:[#allocation5 + $0x5a8] sm:$0xff] }
  0xa9   :  { %v600_v27 = vld [vmem:[#allocation5 + $0x900] sm:$0xff]  ;;  %827 = vmatpush.msrb.mxu1 %v672_v24  ;;  %867 = vmatpush.msrb.mxu3 %v417_v26  ;;  %v621_v15 = vld [vmem:[#allocation5 + $0x9a8] sm:$0xff] }
  0xaa   :  { %v668_v28 = vld [vmem:[#allocation5 + $0xb20] sm:$0xff]  ;;  %809 = vmatpush.msrb.mxu0 %v600_v27  ;;  %849 = vmatpush.msrb.mxu2 %v345_v29  ;;  %v689_v16 = vld [vmem:[#allocation5 + $0xbc8] sm:$0xff] }
  0xab   :  { %v596_v31 = vld [vmem:[#allocation5 + $0x8e0] sm:$0xff]  ;;  %828 = vmatpush.msrb.mxu1 %v668_v28  ;;  %868 = vmatpush.msrb.mxu3 %v413_v30  ;;  %v557_v19 = vld [vmem:[#allocation5 + $0x7a8] sm:$0xff] }
  0xac   :  { %v664_v32 = vld [vmem:[#allocation5 + $0xb00] sm:$0xff]  ;;  %810 = vmatpush.msrb.mxu0 %v596_v31  ;;  %850 = vmatpush.msrb.mxu2 %v341_v34  ;;  %v617_v20 = vld [vmem:[#allocation5 + $0x988] sm:$0xff] }
  0xad   :  { %v306_v33 = vld [vmem:[%s6980_s4 + $0x8] sm:$0xf]  ;;  %829 = vmatpush.msrb.mxu1 %v664_v32  ;;  %869 = vmatpush.msrb.mxu3 %v409_v35  ;;  %v5246_v52 = vld.sshfl [vmem:[#allocation1 + $0x10] sm:$0xff pattern:$0x73625140] }
  0xae   :  { %v592_v36 = vld [vmem:[#allocation5 + $0x8c0] sm:$0xff]  ;;  %709 = vst [vmem:[#allocation1 + $0x20] ss:$4 sm:$0xff] %v306_v33  ;;  %851 = vmatpush.msrb.mxu2 %v337_v38  ;;  %798 = vmatmul.f32.vlgmr.msra.gmra.mxu3 %v5251_v58  ;;  %v685_v21 = vld [vmem:[#allocation5 + $0xba8] sm:$0xff] }
  0xaf   :  { %v660_v37 = vld [vmem:[#allocation5 + $0xae0] sm:$0xff]  ;;  %811 = vmatpush.msrb.mxu0 %v592_v36  ;;  %870 = vmatpush.msrb.mxu3 %v405_v39  ;;  %v485_v22 = vld [vmem:[#allocation5 + $0x568] sm:$0xff] }
  0xb0   :  { %v588_v40 = vld [vmem:[#allocation5 + $0x8a0] sm:$0xff]  ;;  %830 = vmatpush.msrb.mxu1 %v660_v37  ;;  %852 = vmatpush.msrb.mxu2 %v333_v42  ;;  %v553_v23 = vld [vmem:[#allocation5 + $0x788] sm:$0xff] }
  0xb1   :  { %v656_v41 = vld [vmem:[#allocation5 + $0xac0] sm:$0xff]  ;;  %812 = vmatpush.msrb.mxu0 %v588_v40  ;;  %871 = vmatpush.msrb.mxu3 %v401_v43  ;;  %v613_v24 = vld [vmem:[#allocation5 + $0x968] sm:$0xff] }
  0xb2   :  { %v584_v44 = vld [vmem:[#allocation5 + $0x880] sm:$0xff]  ;;  %831 = vmatpush.msrb.mxu1 %v656_v41  ;;  %853 = vmatpush.msrb.mxu2 %v329_v46  ;;  %v681_v25 = vld [vmem:[#allocation5 + $0xb88] sm:$0xff] }
  0xb3   :  { %v652_v45 = vld [vmem:[#allocation5 + $0xaa0] sm:$0xff]  ;;  %813 = vmatpush.msrb.mxu0 %v584_v44  ;;  %872 = vmatpush.msrb.mxu3 %v397_v47  ;;  %v481_v26 = vld [vmem:[#allocation5 + $0x548] sm:$0xff] }
  0xb4   :  { %v580_v48 = vld [vmem:[#allocation5 + $0x860] sm:$0xff]  ;;  %832 = vmatpush.msrb.mxu1 %v652_v45  ;;  %854 = vmatpush.msrb.mxu2 %v325_v50  ;;  %v549_v27 = vld [vmem:[#allocation5 + $0x768] sm:$0xff] }
  0xb5   :  { %v648_v49 = vld [vmem:[#allocation5 + $0xa80] sm:$0xff]  ;;  %814 = vmatpush.msrb.mxu0 %v580_v48  ;;  %873 = vmatpush.msrb.mxu3 %v393_v51  ;;  %v5258_v12 = vld.sshfl [vmem:[#allocation1 + $0x20] sm:$0xff pattern:$0x73625140]  ;;  %v609_v28 = vld [vmem:[#allocation5 + $0x948] sm:$0xff] }
  0xb6   :  { %v576_v53 = vld [vmem:[#allocation5 + $0x840] sm:$0xff]  ;;  %833 = vmatpush.msrb.mxu1 %v648_v49  ;;  %778 = vmatmul.f32.vlgmr.msra.gmra.mxu2 %v5246_v52  ;;  %v677_v29 = vld [vmem:[#allocation5 + $0xb68] sm:$0xff] }
  0xb7   :  { %v644_v54 = vld [vmem:[#allocation5 + $0xa60] sm:$0xff]  ;;  %815 = vmatpush.msrb.mxu0 %v576_v53  ;;  %855 = vmatpush.msrb.mxu2 %v321_v55  ;;  %v477_v30 = vld [vmem:[#allocation5 + $0x528] sm:$0xff] }
  0xb8   :  { %v572_v59 = vld [vmem:[#allocation5 + $0x820] sm:$0xff]  ;;  %834 = vmatpush.msrb.mxu1 %v644_v54  ;;  %874 = vmatpush.msrb.mxu3 %v389_v56  ;;  %v545_v31 = vld [vmem:[#allocation5 + $0x748] sm:$0xff] }
  0xb9   :  { %v640_v60 = vld [vmem:[#allocation5 + $0xa40] sm:$0xff]  ;;  %816 = vmatpush.msrb.mxu0 %v572_v59  ;;  %856 = vmatpush.msrb.mxu2 %v317_v61  ;;  %v605_v32 = vld [vmem:[#allocation5 + $0x928] sm:$0xff] }
  0xba   :  { %v5254_v63 = vld.sshfl [vmem:[#allocation1 + $0x8] sm:$0xff pattern:$0x73625140]  ;;  %835 = vmatpush.msrb.mxu1 %v640_v60  ;;  %875 = vmatpush.msrb.mxu3 %v385_v62  ;;  %v673_v33 = vld [vmem:[#allocation5 + $0xb48] sm:$0xff] }
  0xbb   :  { %v568_v0 = vld [vmem:[#allocation5 + $0x800] sm:$0xff]  ;;  %758 = vmatmul.f32.vlgmr.msra.gmra.mxu1 %v5254_v63  ;;  %857 = vmatpush.msrb.mxu2 %v313_v2  ;;  %v473_v34 = vld [vmem:[#allocation5 + $0x508] sm:$0xff] }
  0xbc   :  { %v636_v1 = vld [vmem:[#allocation5 + $0xa20] sm:$0xff]  ;;  %817 = vmatpush.msrb.mxu0 %v568_v0  ;;  %876 = vmatpush.msrb.mxu3 %v381_v3  ;;  %v541_v35 = vld [vmem:[#allocation5 + $0x728] sm:$0xff] }
  0xbd   :  { %836 = vmatpush.msrb.mxu1 %v636_v1  ;;  %v632_v6 = vld [vmem:[#allocation5 + $0xa00] sm:$0xff]  ;;  %922 = vmatpush.msra.mxu2 %v629_v5  ;;  %v601_v36 = vld [vmem:[#allocation5 + $0x908] sm:$0xff] }
  0xbe   :  { %882 = vmatpush.msra.mxu0 %v501_v4  ;;  %877 = vmatpush.msrb.mxu3 %v377_v7  ;;  %v5260_v17 = vld.sshfl [vmem:[#allocation1 + $0x28] sm:$0xff pattern:$0x73625140]  ;;  %v669_v37 = vld [vmem:[#allocation5 + $0xb28] sm:$0xff] }
  0xbf   :  { %837 = vmatpush.msrb.mxu1 %v632_v6  ;;  %923 = vmatpush.msra.mxu2 %v625_v10  ;;  %v469_v38 = vld [vmem:[#allocation5 + $0x4e8] sm:$0xff]  ;;  %v374_v10 = vld [vmem:[#allocation5 + $0x1f0] sm:$0xff] }
  0xc0   :  { %883 = vmatpush.msra.mxu0 %v497_v8  ;;  %942 = vmatpush.msra.mxu3 %v693_v11  ;;  %v537_v39 = vld [vmem:[#allocation5 + $0x708] sm:$0xff]  ;;  %v502_v11 = vld [vmem:[#allocation5 + $0x5f0] sm:$0xff] }
  0xc1   :  { %902 = vmatpush.msra.mxu1 %v565_v9  ;;  %818 = vmatmul.f32.vlgmr.msrb.gmra.mxu0 %v5258_v12  ;;  %v597_v40 = vld [vmem:[#allocation5 + $0x8e8] sm:$0xff] }
  0xc2   :  { %884 = vmatpush.msra.mxu0 %v493_v14  ;;  %924 = vmatpush.msra.mxu2 %v621_v15  ;;  %v665_v41 = vld [vmem:[#allocation5 + $0xb08] sm:$0xff]  ;;  %v370_v15 = vld [vmem:[#allocation5 + $0x1d0] sm:$0xff] }
  0xc3   :  { %903 = vmatpush.msra.mxu1 %v561_v13  ;;  %943 = vmatpush.msra.mxu3 %v689_v16  ;;  %v465_v42 = vld [vmem:[#allocation5 + $0x4c8] sm:$0xff]  ;;  %v438_v16 = vld [vmem:[#allocation5 + $0x3f0] sm:$0xff] }
  0xc4   :  { %838 = vmatmul.f32.vlgmr.msrb.gmra.mxu1 %v5260_v17  ;;  %885 = vmatpush.msra.mxu0 %v489_v18  ;;  %v533_v43 = vld [vmem:[#allocation5 + $0x6e8] sm:$0xff]  ;;  %v498_v18 = vld [vmem:[#allocation5 + $0x5d0] sm:$0xff] }
  0xc5   :  { %904 = vmatpush.msra.mxu1 %v557_v19  ;;  %925 = vmatpush.msra.mxu2 %v617_v20  ;;  %v593_v44 = vld [vmem:[#allocation5 + $0x8c8] sm:$0xff]  ;;  %v566_v19 = vld [vmem:[#allocation5 + $0x7f0] sm:$0xff] }
  0xc6   :  { %944 = vmatpush.msra.mxu3 %v685_v21  ;;  %886 = vmatpush.msra.mxu0 %v485_v22  ;;  %v661_v45 = vld [vmem:[#allocation5 + $0xae8] sm:$0xff]  ;;  %v366_v20 = vld [vmem:[#allocation5 + $0x1b0] sm:$0xff] }
  0xc7   :  { %905 = vmatpush.msra.mxu1 %v553_v23  ;;  %926 = vmatpush.msra.mxu2 %v613_v24  ;;  %v461_v46 = vld [vmem:[#allocation5 + $0x4a8] sm:$0xff]  ;;  %v434_v21 = vld [vmem:[#allocation5 + $0x3d0] sm:$0xff] }
  0xc8   :  { %945 = vmatpush.msra.mxu3 %v681_v25  ;;  %887 = vmatpush.msra.mxu0 %v481_v26  ;;  %v529_v47 = vld [vmem:[#allocation5 + $0x6c8] sm:$0xff]  ;;  %v494_v22 = vld [vmem:[#allocation5 + $0x5b0] sm:$0xff] }
  0xc9   :  { %906 = vmatpush.msra.mxu1 %v549_v27  ;;  %927 = vmatpush.msra.mxu2 %v609_v28  ;;  %v589_v48 = vld [vmem:[#allocation5 + $0x8a8] sm:$0xff]  ;;  %v562_v23 = vld [vmem:[#allocation5 + $0x7d0] sm:$0xff] }
  0xca   :  { %946 = vmatpush.msra.mxu3 %v677_v29  ;;  %888 = vmatpush.msra.mxu0 %v477_v30  ;;  %v657_v49 = vld [vmem:[#allocation5 + $0xac8] sm:$0xff]  ;;  %v362_v24 = vld [vmem:[#allocation5 + $0x190] sm:$0xff] }
  0xcb   :  { %907 = vmatpush.msra.mxu1 %v545_v31  ;;  %928 = vmatpush.msra.mxu2 %v605_v32  ;;  %v457_v50 = vld [vmem:[#allocation5 + $0x488] sm:$0xff]  ;;  %v430_v25 = vld [vmem:[#allocation5 + $0x3b0] sm:$0xff] }
  0xcc   :  { %947 = vmatpush.msra.mxu3 %v673_v33  ;;  %889 = vmatpush.msra.mxu0 %v473_v34  ;;  %v525_v51 = vld [vmem:[#allocation5 + $0x6a8] sm:$0xff]  ;;  %v490_v26 = vld [vmem:[#allocation5 + $0x590] sm:$0xff] }
  0xcd   :  { %908 = vmatpush.msra.mxu1 %v541_v35  ;;  %929 = vmatpush.msra.mxu2 %v601_v36  ;;  %v585_v53 = vld [vmem:[#allocation5 + $0x888] sm:$0xff]  ;;  %v558_v27 = vld [vmem:[#allocation5 + $0x7b0] sm:$0xff] }
  0xce   :  { %948 = vmatpush.msra.mxu3 %v669_v37  ;;  %890 = vmatpush.msra.mxu0 %v469_v38  ;;  %v653_v54 = vld [vmem:[#allocation5 + $0xaa8] sm:$0xff]  ;;  %v358_v28 = vld [vmem:[#allocation5 + $0x170] sm:$0xff] }
  0xcf   :  { %909 = vmatpush.msra.mxu1 %v537_v39  ;;  %930 = vmatpush.msra.mxu2 %v597_v40  ;;  %v453_v55 = vld [vmem:[#allocation5 + $0x468] sm:$0xff]  ;;  %v426_v29 = vld [vmem:[#allocation5 + $0x390] sm:$0xff] }
  0xd0   :  { %949 = vmatpush.msra.mxu3 %v665_v41  ;;  %891 = vmatpush.msra.mxu0 %v465_v42  ;;  %v521_v56 = vld [vmem:[#allocation5 + $0x688] sm:$0xff]  ;;  %v486_v30 = vld [vmem:[#allocation5 + $0x570] sm:$0xff] }
  0xd1   :  { %910 = vmatpush.msra.mxu1 %v533_v43  ;;  %931 = vmatpush.msra.mxu2 %v593_v44  ;;  %v581_v59 = vld [vmem:[#allocation5 + $0x868] sm:$0xff]  ;;  %v554_v31 = vld [vmem:[#allocation5 + $0x790] sm:$0xff] }
  0xd2   :  { %950 = vmatpush.msra.mxu3 %v661_v45  ;;  %892 = vmatpush.msra.mxu0 %v461_v46  ;;  %v649_v60 = vld [vmem:[#allocation5 + $0xa88] sm:$0xff]  ;;  %v354_v32 = vld [vmem:[#allocation5 + $0x150] sm:$0xff] }
  0xd3   :  { %911 = vmatpush.msra.mxu1 %v529_v47  ;;  %932 = vmatpush.msra.mxu2 %v589_v48  ;;  %v449_v61 = vld [vmem:[#allocation5 + $0x448] sm:$0xff]  ;;  %v422_v33 = vld [vmem:[#allocation5 + $0x370] sm:$0xff] }
  0xd4   :  { %951 = vmatpush.msra.mxu3 %v657_v49  ;;  %893 = vmatpush.msra.mxu0 %v457_v50  ;;  %v517_v62 = vld [vmem:[#allocation5 + $0x668] sm:$0xff]  ;;  %v482_v34 = vld [vmem:[#allocation5 + $0x550] sm:$0xff] }
  0xd5   :  { %912 = vmatpush.msra.mxu1 %v525_v51  ;;  %933 = vmatpush.msra.mxu2 %v585_v53  ;;  %v577_v0 = vld [vmem:[#allocation5 + $0x848] sm:$0xff]  ;;  %v550_v35 = vld [vmem:[#allocation5 + $0x770] sm:$0xff] }
  0xd6   :  { %952 = vmatpush.msra.mxu3 %v653_v54  ;;  %858 = vmatmul.f32.vlgmr.msrb.gmra.mxu2 %v5248_v57  ;;  %v645_v1 = vld [vmem:[#allocation5 + $0xa68] sm:$0xff]  ;;  %v350_v36 = vld [vmem:[#allocation5 + $0x130] sm:$0xff] }
  0xd7   :  { %894 = vmatpush.msra.mxu0 %v453_v55  ;;  %913 = vmatpush.msra.mxu1 %v521_v56  ;;  %v445_v2 = vld [vmem:[#allocation5 + $0x428] sm:$0xff]  ;;  %v418_v37 = vld [vmem:[#allocation5 + $0x350] sm:$0xff] }
  0xd8   :  { %934 = vmatpush.msra.mxu2 %v581_v59  ;;  %953 = vmatpush.msra.mxu3 %v649_v60  ;;  %v513_v3 = vld [vmem:[#allocation5 + $0x648] sm:$0xff]  ;;  %v478_v38 = vld [vmem:[#allocation5 + $0x530] sm:$0xff] }
  0xd9   :  { %895 = vmatpush.msra.mxu0 %v449_v61  ;;  %878 = vmatmul.f32.vlgmr.msrb.gmra.mxu3 %v5254_v63  ;;  %v573_v4 = vld [vmem:[#allocation5 + $0x828] sm:$0xff]  ;;  %v546_v39 = vld [vmem:[#allocation5 + $0x750] sm:$0xff] }
  0xda   :  { %914 = vmatpush.msra.mxu1 %v517_v62  ;;  %v641_v5 = vld [vmem:[#allocation5 + $0xa48] sm:$0xff]  ;;  %935 = vmatpush.msra.mxu2 %v577_v0  ;;  %v346_v40 = vld [vmem:[#allocation5 + $0x110] sm:$0xff] }
  0xdb   :  { %954 = vmatpush.msra.mxu3 %v645_v1  ;;  %v441_v6 = vld [vmem:[#allocation5 + $0x408] sm:$0xff]  ;;  %896 = vmatpush.msra.mxu0 %v445_v2  ;;  %v414_v41 = vld [vmem:[#allocation5 + $0x330] sm:$0xff] }
  0xdc   :  { %v509_v7 = vld [vmem:[#allocation5 + $0x628] sm:$0xff]  ;;  %915 = vmatpush.msra.mxu1 %v513_v3  ;;  %936 = vmatpush.msra.mxu2 %v573_v4  ;;  %v474_v42 = vld [vmem:[#allocation5 + $0x510] sm:$0xff] }
  0xdd   :  { %v569_v8 = vld [vmem:[#allocation5 + $0x808] sm:$0xff]  ;;  %955 = vmatpush.msra.mxu3 %v641_v5  ;;  %897 = vmatpush.msra.mxu0 %v441_v6  ;;  %v542_v43 = vld [vmem:[#allocation5 + $0x730] sm:$0xff] }
  0xde   :  { %v637_v9 = vld [vmem:[#allocation5 + $0xa28] sm:$0xff]  ;;  %916 = vmatpush.msra.mxu1 %v509_v7  ;;  %937 = vmatpush.msra.mxu2 %v569_v8  ;;  %v342_v44 = vld [vmem:[#allocation5 + $0xf0] sm:$0xff] }
  0xdf   :  { %v505_v13 = vld [vmem:[#allocation5 + $0x608] sm:$0xff]  ;;  %956 = vmatpush.msra.mxu3 %v637_v9  ;;  %938 = vmatmul.f32.vlgmr.msra.gmra.mxu2 %v5258_v12  ;;  %v410_v45 = vld [vmem:[#allocation5 + $0x310] sm:$0xff] }
  0xe0   :  { %v633_v14 = vld [vmem:[#allocation5 + $0xa08] sm:$0xff]  ;;  %962 = vmatpush.msrb.mxu0 %v374_v10  ;;  %1002 = vmatpush.msrb.mxu2 %v502_v11  ;;  %v470_v46 = vld [vmem:[#allocation5 + $0x4f0] sm:$0xff] }
  0xe1   :  { %917 = vmatpush.msra.mxu1 %v505_v13  ;;  %957 = vmatpush.msra.mxu3 %v633_v14  ;;  %v538_v47 = vld [vmem:[#allocation5 + $0x710] sm:$0xff] }
  0xe2   :  { %898 = vmatmul.f32.vlgmr.msra.gmra.mxu0 %v5246_v52  ;;  %958 = vmatmul.f32.vlgmr.msra.gmra.mxu3 %v5260_v17  ;;  %v338_v48 = vld [vmem:[#allocation5 + $0xd0] sm:$0xff] }
  0xe3   :  { %963 = vmatpush.msrb.mxu0 %v370_v15  ;;  %982 = vmatpush.msrb.mxu1 %v438_v16  ;;  %v406_v49 = vld [vmem:[#allocation5 + $0x2f0] sm:$0xff] }
  0xe4   :  { %1003 = vmatpush.msrb.mxu2 %v498_v18  ;;  %1022 = vmatpush.msrb.mxu3 %v566_v19  ;;  %v466_v50 = vld [vmem:[#allocation5 + $0x4d0] sm:$0xff]  ;;  %v375_v19 = vld [vmem:[#allocation5 + $0x1f8] sm:$0xff] }
  0xe5   :  { %918 = vmatmul.f32.vlgmr.msra.gmra.mxu1 %v5251_v58  ;;  %964 = vmatpush.msrb.mxu0 %v366_v20  ;;  %v534_v51 = vld [vmem:[#allocation5 + $0x6f0] sm:$0xff] }
  0xe6   :  { %983 = vmatpush.msrb.mxu1 %v434_v21  ;;  %1004 = vmatpush.msrb.mxu2 %v494_v22  ;;  %v334_v53 = vld [vmem:[#allocation5 + $0xb0] sm:$0xff] }
  0xe7   :  { %1023 = vmatpush.msrb.mxu3 %v562_v23  ;;  %965 = vmatpush.msrb.mxu0 %v362_v24  ;;  %v402_v54 = vld [vmem:[#allocation5 + $0x2d0] sm:$0xff]  ;;  %v371_v24 = vld [vmem:[#allocation5 + $0x1d8] sm:$0xff] }
  0xe8   :  { %984 = vmatpush.msrb.mxu1 %v430_v25  ;;  %1005 = vmatpush.msrb.mxu2 %v490_v26  ;;  %v462_v55 = vld [vmem:[#allocation5 + $0x4b0] sm:$0xff]  ;;  %v439_v25 = vld [vmem:[#allocation5 + $0x3f8] sm:$0xff] }
  0xe9   :  { %1024 = vmatpush.msrb.mxu3 %v558_v27  ;;  %966 = vmatpush.msrb.mxu0 %v358_v28  ;;  %v530_v56 = vld [vmem:[#allocation5 + $0x6d0] sm:$0xff]  ;;  %v367_v28 = vld [vmem:[#allocation5 + $0x1b8] sm:$0xff] }
  0xea   :  { %985 = vmatpush.msrb.mxu1 %v426_v29  ;;  %1006 = vmatpush.msrb.mxu2 %v486_v30  ;;  %v330_v59 = vld [vmem:[#allocation5 + $0x90] sm:$0xff]  ;;  %v435_v29 = vld [vmem:[#allocation5 + $0x3d8] sm:$0xff] }
  0xeb   :  { %1025 = vmatpush.msrb.mxu3 %v554_v31  ;;  %967 = vmatpush.msrb.mxu0 %v354_v32  ;;  %v398_v60 = vld [vmem:[#allocation5 + $0x2b0] sm:$0xff]  ;;  %v363_v32 = vld [vmem:[#allocation5 + $0x198] sm:$0xff] }
  0xec   :  { %986 = vmatpush.msrb.mxu1 %v422_v33  ;;  %1007 = vmatpush.msrb.mxu2 %v482_v34  ;;  %v458_v61 = vld [vmem:[#allocation5 + $0x490] sm:$0xff]  ;;  %v431_v33 = vld [vmem:[#allocation5 + $0x3b8] sm:$0xff] }
  0xed   :  { %1026 = vmatpush.msrb.mxu3 %v550_v35  ;;  %968 = vmatpush.msrb.mxu0 %v350_v36  ;;  %v526_v62 = vld [vmem:[#allocation5 + $0x6b0] sm:$0xff]  ;;  %v359_v36 = vld [vmem:[#allocation5 + $0x178] sm:$0xff] }
  0xee   :  { %987 = vmatpush.msrb.mxu1 %v418_v37  ;;  %1008 = vmatpush.msrb.mxu2 %v478_v38  ;;  %v326_v0 = vld [vmem:[#allocation5 + $0x70] sm:$0xff]  ;;  %v427_v37 = vld [vmem:[#allocation5 + $0x398] sm:$0xff] }
  0xef   :  { %1027 = vmatpush.msrb.mxu3 %v546_v39  ;;  %969 = vmatpush.msrb.mxu0 %v346_v40  ;;  %v394_v1 = vld [vmem:[#allocation5 + $0x290] sm:$0xff]  ;;  %v355_v40 = vld [vmem:[#allocation5 + $0x158] sm:$0xff] }
  0xf0   :  { %988 = vmatpush.msrb.mxu1 %v414_v41  ;;  %1009 = vmatpush.msrb.mxu2 %v474_v42  ;;  %v454_v2 = vld [vmem:[#allocation5 + $0x470] sm:$0xff]  ;;  %v423_v41 = vld [vmem:[#allocation5 + $0x378] sm:$0xff] }
  0xf1   :  { %1028 = vmatpush.msrb.mxu3 %v542_v43  ;;  %970 = vmatpush.msrb.mxu0 %v342_v44  ;;  %v522_v3 = vld [vmem:[#allocation5 + $0x690] sm:$0xff]  ;;  %v351_v44 = vld [vmem:[#allocation5 + $0x138] sm:$0xff] }
  0xf2   :  { %989 = vmatpush.msrb.mxu1 %v410_v45  ;;  %1010 = vmatpush.msrb.mxu2 %v470_v46  ;;  %v322_v4 = vld [vmem:[#allocation5 + $0x50] sm:$0xff]  ;;  %v419_v45 = vld [vmem:[#allocation5 + $0x358] sm:$0xff] }
  0xf3   :  { %1029 = vmatpush.msrb.mxu3 %v538_v47  ;;  %971 = vmatpush.msrb.mxu0 %v338_v48  ;;  %v390_v5 = vld [vmem:[#allocation5 + $0x270] sm:$0xff]  ;;  %v347_v48 = vld [vmem:[#allocation5 + $0x118] sm:$0xff] }
  0xf4   :  { %990 = vmatpush.msrb.mxu1 %v406_v49  ;;  %1011 = vmatpush.msrb.mxu2 %v466_v50  ;;  %v450_v6 = vld [vmem:[#allocation5 + $0x450] sm:$0xff]  ;;  %v415_v49 = vld [vmem:[#allocation5 + $0x338] sm:$0xff] }
  0xf5   :  { %1030 = vmatpush.msrb.mxu3 %v534_v51  ;;  %972 = vmatpush.msrb.mxu0 %v334_v53  ;;  %v518_v7 = vld [vmem:[#allocation5 + $0x670] sm:$0xff]  ;;  %v343_v53 = vld [vmem:[#allocation5 + $0xf8] sm:$0xff] }
  0xf6   :  { %991 = vmatpush.msrb.mxu1 %v402_v54  ;;  %1012 = vmatpush.msrb.mxu2 %v462_v55  ;;  %v318_v8 = vld [vmem:[#allocation5 + $0x30] sm:$0xff]  ;;  %v411_v54 = vld [vmem:[#allocation5 + $0x318] sm:$0xff] }
  0xf7   :  { %1031 = vmatpush.msrb.mxu3 %v530_v56  ;;  %973 = vmatpush.msrb.mxu0 %v330_v59  ;;  %v386_v9 = vld [vmem:[#allocation5 + $0x250] sm:$0xff]  ;;  %v339_v59 = vld [vmem:[#allocation5 + $0xd8] sm:$0xff] }
  0xf8   :  { %992 = vmatpush.msrb.mxu1 %v398_v60  ;;  %1013 = vmatpush.msrb.mxu2 %v458_v61  ;;  %v446_v10 = vld [vmem:[#allocation5 + $0x430] sm:$0xff]  ;;  %v407_v60 = vld [vmem:[#allocation5 + $0x2f8] sm:$0xff] }
  0xf9   :  { %1032 = vmatpush.msrb.mxu3 %v526_v62  ;;  %974 = vmatpush.msrb.mxu0 %v326_v0  ;;  %v514_v11 = vld [vmem:[#allocation5 + $0x650] sm:$0xff]  ;;  %v335_v0 = vld [vmem:[#allocation5 + $0xb8] sm:$0xff] }
  0xfa   :  { %993 = vmatpush.msrb.mxu1 %v394_v1  ;;  %1014 = vmatpush.msrb.mxu2 %v454_v2  ;;  %v314_v13 = vld [vmem:[#allocation5 + $0x10] sm:$0xff]  ;;  %v403_v1 = vld [vmem:[#allocation5 + $0x2d8] sm:$0xff] }
  0xfb   :  { %1033 = vmatpush.msrb.mxu3 %v522_v3  ;;  %975 = vmatpush.msrb.mxu0 %v322_v4  ;;  %v382_v14 = vld [vmem:[#allocation5 + $0x230] sm:$0xff]  ;;  %v331_v4 = vld [vmem:[#allocation5 + $0x98] sm:$0xff] }
  0xfc   :  { %994 = vmatpush.msrb.mxu1 %v390_v5  ;;  %1015 = vmatpush.msrb.mxu2 %v450_v6  ;;  %v442_v15 = vld [vmem:[#allocation5 + $0x410] sm:$0xff]  ;;  %v399_v5 = vld [vmem:[#allocation5 + $0x2b8] sm:$0xff] }
  0xfd   :  { %1034 = vmatpush.msrb.mxu3 %v518_v7  ;;  %976 = vmatpush.msrb.mxu0 %v318_v8  ;;  %v510_v16 = vld [vmem:[#allocation5 + $0x630] sm:$0xff]  ;;  %v327_v8 = vld [vmem:[#allocation5 + $0x78] sm:$0xff] }
  0xfe   :  { %995 = vmatpush.msrb.mxu1 %v386_v9  ;;  %1016 = vmatpush.msrb.mxu2 %v446_v10  ;;  %v630_v18 = vld [vmem:[#allocation5 + $0x9f0] sm:$0xff]  ;;  %v395_v9 = vld [vmem:[#allocation5 + $0x298] sm:$0xff] }
  0xff   :  { %1035 = vmatpush.msrb.mxu3 %v514_v11  ;;  %977 = vmatpush.msrb.mxu0 %v314_v13  ;;  %v378_v20 = vld [vmem:[#allocation5 + $0x210] sm:$0xff]  ;;  %v323_v13 = vld [vmem:[#allocation5 + $0x58] sm:$0xff] }
 0x100   :  { %996 = vmatpush.msrb.mxu1 %v382_v14  ;;  %v506_v21 = vld [vmem:[#allocation5 + $0x610] sm:$0xff]  ;;  %1017 = vmatpush.msrb.mxu2 %v442_v15  ;;  %v391_v14 = vld [vmem:[#allocation5 + $0x278] sm:$0xff] }
 0x101   :  { %1036 = vmatpush.msrb.mxu3 %v510_v16  ;;  %v626_v22 = vld [vmem:[#allocation5 + $0x9d0] sm:$0xff]  ;;  %1042 = vmatpush.msra.mxu0 %v630_v18  ;;  %v319_v16 = vld [vmem:[#allocation5 + $0x38] sm:$0xff] }
 0x102   :  { %v694_v23 = vld [vmem:[#allocation5 + $0xbf0] sm:$0xff]  ;;  %1082 = vmatpush.msra.mxu2 %v375_v19  ;;  %997 = vmatpush.msrb.mxu1 %v378_v20  ;;  %v387_v18 = vld [vmem:[#allocation5 + $0x258] sm:$0xff] }
 0x103   :  { %1037 = vmatpush.msrb.mxu3 %v506_v21  ;;  %v622_v26 = vld [vmem:[#allocation5 + $0x9b0] sm:$0xff]  ;;  %1043 = vmatpush.msra.mxu0 %v626_v22  ;;  %v315_v19 = vld [vmem:[#allocation5 + $0x18] sm:$0xff] }
 0x104   :  { %v690_v27 = vld [vmem:[#allocation5 + $0xbd0] sm:$0xff]  ;;  %1062 = vmatpush.msra.mxu1 %v694_v23  ;;  %1083 = vmatpush.msra.mxu2 %v371_v24  ;;  %v383_v20 = vld [vmem:[#allocation5 + $0x238] sm:$0xff] }
 0x105   :  { %1102 = vmatpush.msra.mxu3 %v439_v25  ;;  %v618_v30 = vld [vmem:[#allocation5 + $0x990] sm:$0xff]  ;;  %1044 = vmatpush.msra.mxu0 %v622_v26  ;;  %v631_v21 = vld [vmem:[#allocation5 + $0x9f8] sm:$0xff] }
 0x106   :  { %v686_v31 = vld [vmem:[#allocation5 + $0xbb0] sm:$0xff]  ;;  %1063 = vmatpush.msra.mxu1 %v690_v27  ;;  %1084 = vmatpush.msra.mxu2 %v367_v28  ;;  %v379_v23 = vld [vmem:[#allocation5 + $0x218] sm:$0xff] }
 0x107   :  { %1103 = vmatpush.msra.mxu3 %v435_v29  ;;  %v614_v34 = vld [vmem:[#allocation5 + $0x970] sm:$0xff]  ;;  %1045 = vmatpush.msra.mxu0 %v618_v30  ;;  %v499_v24 = vld [vmem:[#allocation5 + $0x5d8] sm:$0xff] }
 0x108   :  { %v682_v35 = vld [vmem:[#allocation5 + $0xb90] sm:$0xff]  ;;  %1064 = vmatpush.msra.mxu1 %v686_v31  ;;  %1085 = vmatpush.msra.mxu2 %v363_v32  ;;  %v627_v25 = vld [vmem:[#allocation5 + $0x9d8] sm:$0xff] }
 0x109   :  { %1104 = vmatpush.msra.mxu3 %v431_v33  ;;  %v610_v38 = vld [vmem:[#allocation5 + $0x950] sm:$0xff]  ;;  %1046 = vmatpush.msra.mxu0 %v614_v34  ;;  %v695_v26 = vld [vmem:[#allocation5 + $0xbf8] sm:$0xff] }
 0x10a   :  { %v678_v39 = vld [vmem:[#allocation5 + $0xb70] sm:$0xff]  ;;  %1065 = vmatpush.msra.mxu1 %v682_v35  ;;  %1086 = vmatpush.msra.mxu2 %v359_v36  ;;  %v567_v27 = vld [vmem:[#allocation5 + $0x7f8] sm:$0xff] }
 0x10b   :  { %1105 = vmatpush.msra.mxu3 %v427_v37  ;;  %v606_v42 = vld [vmem:[#allocation5 + $0x930] sm:$0xff]  ;;  %1047 = vmatpush.msra.mxu0 %v610_v38  ;;  %v495_v28 = vld [vmem:[#allocation5 + $0x5b8] sm:$0xff] }
 0x10c   :  { %v674_v43 = vld [vmem:[#allocation5 + $0xb50] sm:$0xff]  ;;  %1066 = vmatpush.msra.mxu1 %v678_v39  ;;  %1087 = vmatpush.msra.mxu2 %v355_v40  ;;  %v623_v29 = vld [vmem:[#allocation5 + $0x9b8] sm:$0xff] }
 0x10d   :  { %1106 = vmatpush.msra.mxu3 %v423_v41  ;;  %v602_v46 = vld [vmem:[#allocation5 + $0x910] sm:$0xff]  ;;  %1048 = vmatpush.msra.mxu0 %v606_v42  ;;  %v691_v30 = vld [vmem:[#allocation5 + $0xbd8] sm:$0xff] }
 0x10e   :  { %v670_v47 = vld [vmem:[#allocation5 + $0xb30] sm:$0xff]  ;;  %1067 = vmatpush.msra.mxu1 %v674_v43  ;;  %1088 = vmatpush.msra.mxu2 %v351_v44  ;;  %v563_v31 = vld [vmem:[#allocation5 + $0x7d8] sm:$0xff] }
 0x10f   :  { %1107 = vmatpush.msra.mxu3 %v419_v45  ;;  %v598_v50 = vld [vmem:[#allocation5 + $0x8f0] sm:$0xff]  ;;  %1049 = vmatpush.msra.mxu0 %v602_v46  ;;  %v491_v32 = vld [vmem:[#allocation5 + $0x598] sm:$0xff]  ;;  %v5276_v46 = vld [vmem:[#allocation8] ss:$4 sm:$0xf] }
 0x110   :  { %v666_v51 = vld [vmem:[#allocation5 + $0xb10] sm:$0xff]  ;;  %1068 = vmatpush.msra.mxu1 %v670_v47  ;;  %1089 = vmatpush.msra.mxu2 %v347_v48  ;;  %v687_v33 = vld [vmem:[#allocation5 + $0xbb8] sm:$0xff] }
 0x111   :  { %1108 = vmatpush.msra.mxu3 %v415_v49  ;;  %v594_v55 = vld [vmem:[#allocation5 + $0x8d0] sm:$0xff]  ;;  %1050 = vmatpush.msra.mxu0 %v598_v50  ;;  %v559_v34 = vld [vmem:[#allocation5 + $0x7b8] sm:$0xff] }
 0x112   :  { %v662_v56 = vld [vmem:[#allocation5 + $0xaf0] sm:$0xff]  ;;  %1069 = vmatpush.msra.mxu1 %v666_v51  ;;  %1090 = vmatpush.msra.mxu2 %v343_v53  ;;  %v487_v35 = vld [vmem:[#allocation5 + $0x578] sm:$0xff] }
 0x113   :  { %1109 = vmatpush.msra.mxu3 %v411_v54  ;;  %v590_v61 = vld [vmem:[#allocation5 + $0x8b0] sm:$0xff]  ;;  %1051 = vmatpush.msra.mxu0 %v594_v55  ;;  %v615_v36 = vld [vmem:[#allocation5 + $0x978] sm:$0xff]  ;;  %v697_v54 = vperm.slane %v5276_v46, 0 }
 0x114   :  { %v658_v62 = vld [vmem:[#allocation5 + $0xad0] sm:$0xff]  ;;  %1070 = vmatpush.msra.mxu1 %v662_v56  ;;  %1091 = vmatpush.msra.mxu2 %v339_v59  ;;  %v555_v37 = vld [vmem:[#allocation5 + $0x798] sm:$0xff] }
 0x115   :  { %1110 = vmatpush.msra.mxu3 %v407_v60  ;;  %v586_v2 = vld [vmem:[#allocation5 + $0x890] sm:$0xff]  ;;  %1052 = vmatpush.msra.mxu0 %v590_v61  ;;  %v483_v38 = vld [vmem:[#allocation5 + $0x558] sm:$0xff] }
 0x116   :  { %1071 = vmatpush.msra.mxu1 %v658_v62  ;;  %v654_v3 = vld [vmem:[#allocation5 + $0xab0] sm:$0xff]  ;;  %1092 = vmatpush.msra.mxu2 %v335_v0  ;;  %v611_v39 = vld [vmem:[#allocation5 + $0x958] sm:$0xff] }
 0x117   :  { %1111 = vmatpush.msra.mxu3 %v403_v1  ;;  %1018 = vmatmul.f32.vlgmr.msrb.gmra.mxu2 %v5246_v52  ;;  %v582_v6 = vld [vmem:[#allocation5 + $0x870] sm:$0xff]  ;;  %v679_v40 = vld [vmem:[#allocation5 + $0xb78] sm:$0xff]  ;;  %v739_v0 = vpop.f32.mrf.mxu0 }
 0x118   :  { %1053 = vmatpush.msra.mxu0 %v586_v2  ;;  %1072 = vmatpush.msra.mxu1 %v654_v3  ;;  %v650_v7 = vld [vmem:[#allocation5 + $0xa90] sm:$0xff]  ;;  %v551_v41 = vld [vmem:[#allocation5 + $0x778] sm:$0xff]  ;;  %v740_v3 = vadd.f32 %v739_v0, %v697_v54  ;;  %v5331_v54 = vld [vmem:[%s6981_s6 + $0x50] sm:$0xff] }
 0x119   :  { %1093 = vmatpush.msra.mxu2 %v331_v4  ;;  %1112 = vmatpush.msra.mxu3 %v399_v5  ;;  %v578_v10 = vld [vmem:[#allocation5 + $0x850] sm:$0xff]  ;;  %v479_v42 = vld [vmem:[#allocation5 + $0x538] sm:$0xff]  ;;  %v5362_v0 = vld [vmem:[%s6981_s6 + $0xd0] sm:$0xff] }
 0x11a   :  { %978 = vmatmul.f32.vlgmr.msrb.gmra.mxu0 %v5248_v57  ;;  %1038 = vmatmul.f32.vlgmr.msrb.gmra.mxu3 %v5251_v58  ;;  %v646_v11 = vld [vmem:[#allocation5 + $0xa70] sm:$0xff]  ;;  %v607_v43 = vld [vmem:[#allocation5 + $0x938] sm:$0xff] }
 0x11b   :  { %1054 = vmatpush.msra.mxu0 %v582_v6  ;;  %1073 = vmatpush.msra.mxu1 %v650_v7  ;;  %v574_v52 = vld [vmem:[#allocation5 + $0x830] sm:$0xff]  ;;  %v675_v44 = vld [vmem:[#allocation5 + $0xb58] sm:$0xff] }
 0x11c   :  { %1094 = vmatpush.msra.mxu2 %v327_v8  ;;  %1113 = vmatpush.msra.mxu3 %v395_v9  ;;  %v642_v15 = vld [vmem:[#allocation5 + $0xa50] sm:$0xff]  ;;  %v547_v45 = vld [vmem:[#allocation5 + $0x758] sm:$0xff] }
 0x11d   :  { %998 = vmatmul.f32.vlgmr.msrb.gmra.mxu1 %v5254_v63  ;;  %1055 = vmatpush.msra.mxu0 %v578_v10  ;;  %v570_v57 = vld [vmem:[#allocation5 + $0x810] sm:$0xff]  ;;  %v503_v63 = vld [vmem:[#allocation5 + $0x5f8] sm:$0xff] }
 0x11e   :  { %1074 = vmatpush.msra.mxu1 %v646_v11  ;;  %1095 = vmatpush.msra.mxu2 %v323_v13  ;;  %v638_v58 = vld [vmem:[#allocation5 + $0xa30] sm:$0xff]  ;;  %v475_v47 = vld [vmem:[#allocation5 + $0x518] sm:$0xff] }
 0x11f   :  { %1114 = vmatpush.msra.mxu3 %v391_v14  ;;  %1056 = vmatpush.msra.mxu0 %v574_v52  ;;  %v634_v22 = vld [vmem:[#allocation5 + $0xa10] sm:$0xff]  ;;  %v603_v48 = vld [vmem:[#allocation5 + $0x918] sm:$0xff] }
 0x120   :  { %1075 = vmatpush.msra.mxu1 %v642_v15  ;;  %1096 = vmatpush.msra.mxu2 %v319_v16  ;;  %v671_v49 = vld [vmem:[#allocation5 + $0xb38] sm:$0xff] }
 0x121   :  { %1115 = vmatpush.msra.mxu3 %v387_v18  ;;  %1057 = vmatpush.msra.mxu0 %v570_v57  ;;  %v543_v50 = vld [vmem:[#allocation5 + $0x738] sm:$0xff] }
 0x122   :  { %1076 = vmatpush.msra.mxu1 %v638_v58  ;;  %1097 = vmatpush.msra.mxu2 %v315_v19  ;;  %v471_v51 = vld [vmem:[#allocation5 + $0x4f8] sm:$0xff] }
 0x123   :  { %1116 = vmatpush.msra.mxu3 %v383_v20  ;;  %1058 = vmatmul.f32.vlgmr.msra.gmra.mxu0 %v5258_v12  ;;  %v619_v12 = vld [vmem:[#allocation5 + $0x998] sm:$0xff] }
 0x124   :  { %1162 = vmatpush.msrb.mxu2 %v631_v21  ;;  %1122 = vmatpush.msrb.mxu0 %v503_v63  ;;  %v599_v53 = vld [vmem:[#allocation5 + $0x8f8] sm:$0xff] }
 0x125   :  { %1077 = vmatpush.msra.mxu1 %v634_v22  ;;  %1117 = vmatpush.msra.mxu3 %v379_v23  ;;  %v667_v55 = vld [vmem:[#allocation5 + $0xb18] sm:$0xff] }
 0x126   :  { %1078 = vmatmul.f32.vlgmr.msra.gmra.mxu1 %v5260_v17  ;;  %1123 = vmatpush.msrb.mxu0 %v499_v24  ;;  %v683_v17 = vld [vmem:[#allocation5 + $0xb98] sm:$0xff] }
 0x127   :  { %1163 = vmatpush.msrb.mxu2 %v627_v25  ;;  %1182 = vmatpush.msrb.mxu3 %v695_v26  ;;  %v539_v56 = vld [vmem:[#allocation5 + $0x718] sm:$0xff] }
 0x128   :  { %1142 = vmatpush.msrb.mxu1 %v567_v27  ;;  %1124 = vmatpush.msrb.mxu0 %v495_v28  ;;  %v467_v59 = vld [vmem:[#allocation5 + $0x4d8] sm:$0xff] }
 0x129   :  { %1164 = vmatpush.msrb.mxu2 %v623_v29  ;;  %1183 = vmatpush.msrb.mxu3 %v691_v30  ;;  %v595_v60 = vld [vmem:[#allocation5 + $0x8d8] sm:$0xff] }
 0x12a   :  { %1143 = vmatpush.msrb.mxu1 %v563_v31  ;;  %1125 = vmatpush.msrb.mxu0 %v491_v32  ;;  %v663_v61 = vld [vmem:[#allocation5 + $0xaf8] sm:$0xff] }
 0x12b   :  { %1165 = vmatpush.msrb.mxu2 %v619_v12  ;;  %1184 = vmatpush.msrb.mxu3 %v687_v33  ;;  %v535_v62 = vld [vmem:[#allocation5 + $0x6f8] sm:$0xff]  ;;  %v5282_v33 = vld [vmem:[%s6981_s6 + $0x78] sm:$0xff] }
 0x12c   :  { %1144 = vmatpush.msrb.mxu1 %v559_v34  ;;  %1126 = vmatpush.msrb.mxu0 %v487_v35  ;;  %v463_v1 = vld [vmem:[#allocation5 + $0x4b8] sm:$0xff] }
 0x12d   :  { %1166 = vmatpush.msrb.mxu2 %v615_v36  ;;  %1185 = vmatpush.msrb.mxu3 %v683_v17  ;;  %v591_v2 = vld [vmem:[#allocation5 + $0x8b8] sm:$0xff] }
 0x12e   :  { %1145 = vmatpush.msrb.mxu1 %v555_v37  ;;  %1127 = vmatpush.msrb.mxu0 %v483_v38  ;;  %v659_v4 = vld [vmem:[#allocation5 + $0xad8] sm:$0xff]  ;;  %v5289_v37 = vld [vmem:[%s6981_s6 + $0x70] sm:$0xff] }
 0x12f   :  { %1167 = vmatpush.msrb.mxu2 %v611_v39  ;;  %1186 = vmatpush.msrb.mxu3 %v679_v40  ;;  %v531_v5 = vld [vmem:[#allocation5 + $0x6d8] sm:$0xff]  ;;  %v4570_v39 = vld.sshfl [vmem:[#allocation1 + $0x10] sm:$0xff pattern:$0x73625140] }
 0x130   :  { %1146 = vmatpush.msrb.mxu1 %v551_v41  ;;  %1128 = vmatpush.msrb.mxu0 %v479_v42  ;;  %v459_v6 = vld [vmem:[#allocation5 + $0x498] sm:$0xff]  ;;  %v5049_v41 = vmov 2.0  }
 0x131   :  { %1168 = vmatpush.msrb.mxu2 %v607_v43  ;;  %1187 = vmatpush.msrb.mxu3 %v675_v44  ;;  %v587_v7 = vld [vmem:[#allocation5 + $0x898] sm:$0xff]  ;;  %v799_v58 = vpop.f32.mrf.mxu3  ;;  %4519 = vrcp.f32 %v5049_v41  ;;  %v5303_v44 = vld [vmem:[%s6981_s6 + $0xf8] sm:$0xff] }
 0x132   :  { %1147 = vmatpush.msrb.mxu1 %v547_v45  ;;  %1129 = vmatpush.msrb.mxu0 %v475_v47  ;;  %v655_v9 = vld [vmem:[#allocation5 + $0xab8] sm:$0xff]  ;;  %v4572_v47 = vld.sshfl [vmem:[#allocation1 + $0x18] sm:$0xff pattern:$0x73625140] }
 0x133   :  { %1169 = vmatpush.msrb.mxu2 %v603_v48  ;;  %1188 = vmatpush.msrb.mxu3 %v671_v49  ;;  %v455_v13 = vld [vmem:[#allocation5 + $0x478] sm:$0xff]  ;;  %v5314_v48 = vld [vmem:[%s6981_s6 + $0xf0] sm:$0xff] }
 0x134   :  { %1148 = vmatpush.msrb.mxu1 %v543_v50  ;;  %1130 = vmatpush.msrb.mxu0 %v471_v51  ;;  %v527_v14 = vld [vmem:[#allocation5 + $0x6b8] sm:$0xff]  ;;  %v5319_v50 = vld [vmem:[%s6981_s6 + $0x58] sm:$0xff] }
 0x135   :  { %1170 = vmatpush.msrb.mxu2 %v599_v53  ;;  %1189 = vmatpush.msrb.mxu3 %v667_v55  ;;  %v583_v52 = vld [vmem:[#allocation5 + $0x878] sm:$0xff] }
 0x136   :  { %1149 = vmatpush.msrb.mxu1 %v539_v56  ;;  %1131 = vmatpush.msrb.mxu0 %v467_v59  ;;  %v651_v15 = vld [vmem:[#allocation5 + $0xa98] sm:$0xff] }
 0x137   :  { %1171 = vmatpush.msrb.mxu2 %v595_v60  ;;  %1190 = vmatpush.msrb.mxu3 %v663_v61  ;;  %v4567_v18 = vld.sshfl [vmem:[#allocation1] sm:$0xff pattern:$0x73625140]  ;;  %v4568_v23 = vld.sshfl [vmem:[#allocation1 + $0x8] sm:$0xff pattern:$0x73625140]  ;;  %v4520_v53 = vpop.eup %4519 }
 0x138   :  { %1150 = vmatpush.msrb.mxu1 %v535_v62  ;;  %v759_v8 = vpop.f32.mrf.mxu1  ;;  %1132 = vmatpush.msrb.mxu0 %v463_v1  ;;  %v451_v57 = vld [vmem:[#allocation5 + $0x458] sm:$0xff]  ;;  %v1232_v60 = vmul.f32 2.0, %v4520_v53  ;;  %v5350_v61 = vld [vmem:[%s6981_s6 + $0xd8] sm:$0xff]  ;;  %vm1236_vm1 = vweird.f32 %v4520_v53 }
 0x139   :  { %1172 = vmatpush.msrb.mxu2 %v591_v2  ;;  %v760_v10 = vadd.f32 %v759_v8, %v740_v3  ;;  %v779_v11 = vpop.f32.mrf.mxu2  ;;  %1191 = vmatpush.msrb.mxu3 %v659_v4  ;;  %v523_v19 = vld [vmem:[#allocation5 + $0x698] sm:$0xff]  ;;  %v5367_v2 = vld [vmem:[%s6981_s6 + $0x38] sm:$0xff] }
 0x13a   :  { %1151 = vmatpush.msrb.mxu1 %v531_v5  ;;  %1133 = vmatpush.msrb.mxu0 %v459_v6  ;;  %v579_v20 = vld [vmem:[#allocation5 + $0x858] sm:$0xff]  ;;  %v1233_v3 = vsub.f32 1.0, %v1232_v60  ;;  %v5379_v5 = vld [vmem:[%s6981_s6 + $0x30] sm:$0xff] }
 0x13b   :  { %1173 = vmatpush.msrb.mxu2 %v587_v7  ;;  %v780_v16 = vadd.f32 %v779_v11, %v760_v10  ;;  %1192 = vmatpush.msrb.mxu3 %v655_v9  ;;  %v647_v63 = vld [vmem:[#allocation5 + $0xa78] sm:$0xff]  ;;  %v698_v9 = vperm.slane %v5276_v46, 1  ;;  %v5399_v11 = vld [vmem:[%s6981_s6 + $0xb8] sm:$0xff] }
 0x13c   :  { %1098 = vmatmul.f32.vlgmr.msra.gmra.mxu2 %v4567_v18  ;;  %1134 = vmatpush.msrb.mxu0 %v455_v13  ;;  %v447_v22 = vld [vmem:[#allocation5 + $0x438] sm:$0xff]  ;;  %v1234_v10 = vmul.f32 %v4520_v53, %v1233_v3  ;;  %v5404_v13 = vld [vmem:[%s6981_s6 + $0x178] sm:$0xff] }
 0x13d   :  { %1152 = vmatpush.msrb.mxu1 %v527_v14  ;;  %v800_v21 = vadd.f32 %v799_v58, %v780_v16  ;;  %1174 = vmatpush.msrb.mxu2 %v583_v52  ;;  %v519_v24 = vld [vmem:[#allocation5 + $0x678] sm:$0xff]  ;;  %v5409_v14 = vld [vmem:[%s6981_s6 + $0x170] sm:$0xff] }
 0x13e   :  { %1193 = vmatpush.msrb.mxu3 %v651_v15  ;;  %1135 = vmatpush.msrb.mxu0 %v451_v57  ;;  %v575_v25 = vld [vmem:[#allocation5 + $0x838] sm:$0xff]  ;;  %v819_v26 = vpop.f32.mrf.mxu0  ;;  %v5422_v16 = vld [vmem:[%s6981_s6 + $0xb0] sm:$0xff]  ;;  %v5427_v57 = vld [vmem:[%s6981_s6 + $0x18] sm:$0xff] }
 0x13f   :  { %1118 = vmatmul.f32.vlgmr.msra.gmra.mxu3 %v4568_v23  ;;  %1153 = vmatpush.msrb.mxu1 %v523_v19  ;;  %v643_v27 = vld [vmem:[#allocation5 + $0xa58] sm:$0xff]  ;;  %v820_v29 = vadd.f32 %v819_v26, %v800_v21  ;;  %6984 = vst [vmem:[#allocation44_spill] sm:$0xff] %v5427_v57  ;;  %v1235_v19 = vadd.f32 %v4520_v53, %v1234_v10  ;;  %v5440_v21 = vld [vmem:[%s6981_s6 + $0x10] sm:$0xff]  ;;  %v5511_v10 = vld [vmem:[%s6981_s6 + $0x158] sm:$0xff] }
 0x140   :  { %1175 = vmatpush.msrb.mxu2 %v579_v20  ;;  %v443_v28 = vld [vmem:[#allocation5 + $0x418] sm:$0xff]  ;;  %1194 = vmatpush.msrb.mxu3 %v647_v63  ;;  %6985 = vst [vmem:[#allocation45_spill] sm:$0xff] %v5440_v21 }
 0x141   :  { %1136 = vmatpush.msrb.mxu0 %v447_v22  ;;  %v515_v30 = vld [vmem:[#allocation5 + $0x658] sm:$0xff]  ;;  %v839_v32 = vpop.f32.mrf.mxu1  ;;  %1154 = vmatpush.msrb.mxu1 %v519_v24 }
 0x142   :  { %v571_v31 = vld [vmem:[#allocation5 + $0x818] sm:$0xff]  ;;  %1176 = vmatpush.msrb.mxu2 %v575_v25  ;;  %1195 = vmatpush.msrb.mxu3 %v643_v27  ;;  %v5284_v36 = vadd.f32 %v839_v32, %v820_v29  ;;  %v5456_v27 = vsel %vm1236_vm1, %v4520_v53, %v1235_v19  ;;  %v5461_v29 = vld [vmem:[%s6981_s6 + $0x98] sm:$0xff]  ;;  %v5473_v32 = vld [vmem:[%s6981_s6 + $0x90] sm:$0xff] }
 0x143   :  { %v639_v12 = vld [vmem:[#allocation5 + $0xa38] sm:$0xff]  ;;  %1137 = vmatpush.msrb.mxu0 %v443_v28  ;;  %1155 = vmatpush.msrb.mxu1 %v515_v30  ;;  %6988 = vst [vmem:[#allocation48_spill] sm:$0xff] %v5461_v29  ;;  %v5535_v19 = vld [vmem:[%s6981_s6 + $0x138] sm:$0xff] }
 0x144   :  { %v511_v34 = vld [vmem:[#allocation5 + $0x638] sm:$0xff]  ;;  %1177 = vmatpush.msrb.mxu2 %v571_v31  ;;  %6982 = vst [vmem:[#allocation42_spill] sm:$0xff] %v5284_v36  ;;  %1196 = vmatpush.msrb.mxu3 %v639_v12  ;;  %v1203_v43 = vsel %vm1202_vm0, %v5284_v36, 0.0 }
 0x145   :  { %v635_v35 = vld [vmem:[#allocation5 + $0xa18] sm:$0xff]  ;;  %1306 = vmatpush.msra.mxu0 %v5282_v33  ;;  %1156 = vmatpush.msrb.mxu1 %v511_v34  ;;  %v1204_v49 = vrot.slane %v1203_v43, 4  ;;  %6990 = vst [vmem:[#allocation50_spill] sm:$0xff] %v5473_v32 }
 0x146   :  { %v4569_v17 = vld.sshfl [vmem:[#allocation1 + $0x20] sm:$0xff pattern:$0x73625140]  ;;  %1197 = vmatpush.msrb.mxu3 %v635_v35  ;;  %1138 = vmatmul.f32.vlgmr.msrb.gmra.mxu0 %v4570_v39  ;;  %v5295_v40 = vld [vmem:[%s6981_s6 + $0x68] sm:$0xff] }
 0x147   :  { %1178 = vmatmul.f32.vlgmr.msrb.gmra.mxu2 %v4569_v17  ;;  %v507_v38 = vld [vmem:[#allocation5 + $0x618] sm:$0xff]  ;;  %1307 = vmatpush.msra.mxu0 %v5289_v37  ;;  %v1205_v56 = vadd.f32 %v1204_v49, %v1203_v43 }
 0x148   :  { %v4571_v42 = vld.sshfl [vmem:[#allocation1 + $0x28] sm:$0xff pattern:$0x73625140]  ;;  %1157 = vmatpush.msrb.mxu1 %v507_v38  ;;  %v5308_v45 = vld [vmem:[%s6981_s6 + $0x60] sm:$0xff]  ;;  %1346 = vmatpush.msra.mxu2 %v5404_v13 }
 0x149   :  { %1198 = vmatmul.f32.vlgmr.msrb.gmra.mxu3 %v4571_v42  ;;  %1158 = vmatmul.f32.vlgmr.msrb.gmra.mxu1 %v4572_v47  ;;  %v5326_v51 = vld [vmem:[%s6981_s6 + $0xe8] sm:$0xff]  ;;  %v5338_v55 = vld [vmem:[%s6981_s6 + $0xe0] sm:$0xff]  ;;  %v1206_v1 = vrot.slane %v1205_v56, 2 }
 0x14a   :  { %1308 = vmatpush.msra.mxu0 %v5295_v40  ;;  %1326 = vmatpush.msra.mxu1 %v5303_v44  ;;  %v5343_v59 = vld [vmem:[%s6981_s6 + $0x48] sm:$0xff]  ;;  %v5355_v62 = vld [vmem:[%s6981_s6 + $0x40] sm:$0xff] }
 0x14b   :  { %v5374_v4 = vld [vmem:[%s6981_s6 + $0xc8] sm:$0xff]  ;;  %v5386_v6 = vld [vmem:[%s6981_s6 + $0xc0] sm:$0xff]  ;;  %v1207_v7 = vadd.f32 %v1206_v1, %v1205_v56  ;;  %1347 = vmatpush.msra.mxu2 %v5409_v14 }
 0x14c   :  { %1309 = vmatpush.msra.mxu0 %v5308_v45  ;;  %1327 = vmatpush.msra.mxu1 %v5314_v48  ;;  %v5391_v8 = vld [vmem:[%s6981_s6 + $0x28] sm:$0xff]  ;;  %v5414_v52 = vld [vmem:[%s6981_s6 + $0x20] sm:$0xff] }
 0x14d   :  { %6983 = vst [vmem:[#allocation43_spill] sm:$0xff] %v5414_v52  ;;  %v1208_v18 = vrot.slane %v1207_v7, 1  ;;  %v5435_v20 = vld [vmem:[%s6981_s6 + $0xa8] sm:$0xff]  ;;  %v5447_v23 = vld [vmem:[%s6981_s6 + $0xa0] sm:$0xff] }
 0x14e   :  { %1310 = vmatpush.msra.mxu0 %v5319_v50  ;;  %1328 = vmatpush.msra.mxu1 %v5326_v51  ;;  %6986 = vst [vmem:[#allocation46_spill] sm:$0xff] %v5447_v23  ;;  %v5452_v25 = vld [vmem:[%s6981_s6 + $0x8] sm:$0xff]  ;;  %v5466_v30 = vld [vmem:[%s6981_s6] sm:$0xff] }
 0x14f   :  { %v1209_v24 = vadd.f32 %v1208_v18, %v1207_v7  ;;  %6987 = vst [vmem:[#allocation47_spill] sm:$0xff] %v5452_v25  ;;  %v5481_v17 = vld [vmem:[%s6981_s6 + $0x88] sm:$0xff]  ;;  %v5487_v41 = vld [vmem:[%s6981_s6 + $0x80] sm:$0xff] }
 0x150   :  { %1311 = vmatpush.msra.mxu0 %v5331_v54  ;;  %1329 = vmatpush.msra.mxu1 %v5338_v55  ;;  %6989 = vst [vmem:[#allocation49_spill] sm:$0xff] %v5466_v30  ;;  %v5499_v7 = vld [vmem:[%s6981_s6 + $0x168] sm:$0xff] }
 0x151   :  { %v1238_v12 = vmul.f32 %v5456_v27, %v1209_v24  ;;  %6991 = vst [vmem:[#allocation51_spill] sm:$0xff] %v5481_v17  ;;  %1348 = vmatpush.msra.mxu2 %v5499_v7  ;;  %v5523_v18 = vld [vmem:[%s6981_s6 + $0x148] sm:$0xff]  ;;  %v5553_v24 = vld [vmem:[%s6981_s6 + $0x120] sm:$0xff] }
 0x152   :  { %1312 = vmatpush.msra.mxu0 %v5343_v59  ;;  %1330 = vmatpush.msra.mxu1 %v5350_v61  ;;  %6992 = vst [vmem:[#allocation52_spill] sm:$0xff] %v5487_v41 }
 0x153   :  { %6994 = vst [vmem:[#allocation54_spill] sm:$0xff] %v5553_v24 }
 0x154   :  { %1313 = vmatpush.msra.mxu0 %v5355_v62  ;;  %1331 = vmatpush.msra.mxu1 %v5362_v0 }
 0x156   :  { %1314 = vmatpush.msra.mxu0 %v5367_v2  ;;  %1332 = vmatpush.msra.mxu1 %v5374_v4 }
 0x158   :  { %1315 = vmatpush.msra.mxu0 %v5379_v5  ;;  %1333 = vmatpush.msra.mxu1 %v5386_v6 }
 0x159   :  { %v859_v15 = vpop.f32.mrf.mxu2 }
 0x15a   :  { %1316 = vmatpush.msra.mxu0 %v5391_v8  ;;  %v860_v58 = vadd.f32 %v859_v15, %v698_v9  ;;  %1334 = vmatpush.msra.mxu1 %v5399_v11  ;;  %v5505_v9 = vld [vmem:[%s6981_s6 + $0x160] sm:$0xff]  ;;  %v5517_v15 = vld [vmem:[%s6981_s6 + $0x150] sm:$0xff] }
 0x15b   :  { %1349 = vmatpush.msra.mxu2 %v5505_v9 }
 0x15c   :  { %1317 = vmatpush.msra.mxu0 %v5414_v52  ;;  %v879_v63 = vpop.f32.mrf.mxu3  ;;  %1335 = vmatpush.msra.mxu1 %v5422_v16 }
 0x15d   :  { %v880_v22 = vadd.f32 %v879_v63, %v860_v58  ;;  %1350 = vmatpush.msra.mxu2 %v5511_v10  ;;  %v5529_v58 = vld [vmem:[%s6981_s6 + $0x140] sm:$0xff]  ;;  %v5541_v63 = vld [vmem:[%s6981_s6 + $0x130] sm:$0xff] }
 0x15e   :  { %1318 = vmatpush.msra.mxu0 %v5427_v57  ;;  %1336 = vmatpush.msra.mxu1 %v5435_v20 }
 0x15f   :  { %v899_v26 = vpop.f32.mrf.mxu0  ;;  %1351 = vmatpush.msra.mxu2 %v5517_v15 }
 0x160   :  { %1319 = vmatpush.msra.mxu0 %v5440_v21  ;;  %v900_v28 = vadd.f32 %v899_v26, %v880_v22  ;;  %1337 = vmatpush.msra.mxu1 %v5447_v23  ;;  %v5547_v22 = vld [vmem:[%s6981_s6 + $0x128] sm:$0xff]  ;;  %v5559_v26 = vld [vmem:[%s6981_s6 + $0x118] sm:$0xff] }
 0x161   :  { %1352 = vmatpush.msra.mxu2 %v5523_v18  ;;  %6995 = vst [vmem:[#allocation55_spill] sm:$0xff] %v5559_v26 }
 0x162   :  { %1320 = vmatpush.msra.mxu0 %v5452_v25  ;;  %v919_v31 = vpop.f32.mrf.mxu1  ;;  %v939_v35 = vpop.f32.mrf.mxu2  ;;  %1338 = vmatpush.msra.mxu1 %v5461_v29 }
 0x163   :  { %v920_v34 = vadd.f32 %v919_v31, %v900_v28  ;;  %1353 = vmatpush.msra.mxu2 %v5529_v58  ;;  %v5565_v28 = vld [vmem:[%s6981_s6 + $0x110] sm:$0xff]  ;;  %v5570_v31 = vld [vmem:[%s6981_s6 + $0x108] sm:$0xff] }
 0x164   :  { %1321 = vmatpush.msra.mxu0 %v5466_v30  ;;  %1339 = vmatpush.msra.mxu1 %v5473_v32  ;;  %6996 = vst [vmem:[#allocation56_spill] sm:$0xff] %v5565_v28  ;;  %v700_v30 = vperm.slane %v5276_v46, 3 }
 0x165   :  { %1322 = vmatmul.f32.vlgmr.msra.gmra.mxu0 %v1238_v12  ;;  %v940_v38 = vadd.f32 %v939_v35, %v920_v34  ;;  %v959_v39 = vpop.f32.mrf.mxu3  ;;  %1354 = vmatpush.msra.mxu2 %v5535_v19  ;;  %6997 = vst [vmem:[#allocation57_spill] sm:$0xff] %v5570_v31  ;;  %v699_v12 = vperm.slane %v5276_v46, 2  ;;  %v5577_v34 = vld [vmem:[%s6981_s6 + $0x100] sm:$0xff]  ;;  %v5583_v35 = vld [vmem:[%s6981_s6 + $0x1f8] sm:$0xff] }
 0x166   :  { %1340 = vmatpush.msra.mxu1 %v5481_v17  ;;  %6998 = vst [vmem:[#allocation58_spill] sm:$0xff] %v5577_v34  ;;  %1366 = vmatpush.msra.mxu3 %v5583_v35 }
 0x167   :  { %v5489_v42 = vadd.f32 %v959_v39, %v940_v38  ;;  %1355 = vmatpush.msra.mxu2 %v5541_v63  ;;  %v5588_v38 = vld [vmem:[%s6981_s6 + $0x1f0] sm:$0xff] }
 0x168   :  { %1341 = vmatpush.msra.mxu1 %v5487_v41  ;;  %1367 = vmatpush.msra.mxu3 %v5588_v38 }
 0x169   :  { %6993 = vst [vmem:[#allocation53_spill] sm:$0xff] %v5489_v42  ;;  %v1210_v43 = vsel %vm1202_vm0, %v5489_v42, 0.0  ;;  %1356 = vmatpush.msra.mxu2 %v5547_v22 }
 0x16a   :  { %v1211_v47 = vrot.slane %v1210_v43, 4 }
 0x16b   :  { %1357 = vmatpush.msra.mxu2 %v5553_v24 }
 0x16c   :  { %v1212_v49 = vadd.f32 %v1211_v47, %v1210_v43 }
 0x16d   :  { %1358 = vmatpush.msra.mxu2 %v5559_v26 }
 0x16e   :  { %v1213_v53 = vrot.slane %v1212_v49, 2 }
 0x16f   :  { %1359 = vmatpush.msra.mxu2 %v5565_v28 }
 0x170   :  { %v1214_v56 = vadd.f32 %v1213_v53, %v1212_v49 }
 0x171   :  { %1360 = vmatpush.msra.mxu2 %v5570_v31 }
 0x172   :  { %v1215_v60 = vrot.slane %v1214_v56, 1 }
 0x173   :  { %1361 = vmatpush.msra.mxu2 %v5577_v34  ;;  %v5655_v34 = vld [vmem:[%s6981_s6 + $0x1a0] sm:$0xff] }
 0x174   :  { %v1216_v1 = vadd.f32 %v1215_v60, %v1214_v56  ;;  %7000 = vst [vmem:[#allocation60_spill] sm:$0xff] %v5655_v34 }
 0x176   :  { %v1239_v3 = vmul.f32 %v5456_v27, %v1216_v1 }
 0x178   :  { %1342 = vmatmul.f32.vlgmr.msra.gmra.mxu1 %v1239_v3  ;;  %v5596_v3 = vld [vmem:[%s6981_s6 + $0x1e8] sm:$0xff] }
 0x179   :  { %1368 = vmatpush.msra.mxu3 %v5596_v3 }
 0x197   :  { %v979_v39 = vpop.f32.mrf.mxu0 }
 0x198   :  { %v980_v43 = vadd.f32 %v979_v39, %v699_v12  ;;  %v5602_v12 = vld [vmem:[%s6981_s6 + $0x1e0] sm:$0xff] }
 0x199   :  { %1369 = vmatpush.msra.mxu3 %v5602_v12 }
 0x19a   :  { %v999_v47 = vpop.f32.mrf.mxu1  ;;  %v1019_v53 = vpop.f32.mrf.mxu2 }
 0x19b   :  { %v1000_v49 = vadd.f32 %v999_v47, %v980_v43  ;;  %v5610_v43 = vld [vmem:[%s6981_s6 + $0x1d8] sm:$0xff] }
 0x19c   :  { %1370 = vmatpush.msra.mxu3 %v5610_v43 }
 0x19d   :  { %v1020_v56 = vadd.f32 %v1019_v53, %v1000_v49  ;;  %v1039_v60 = vpop.f32.mrf.mxu3  ;;  %v5618_v49 = vld [vmem:[%s6981_s6 + $0x1d0] sm:$0xff] }
 0x19e   :  { %1371 = vmatpush.msra.mxu3 %v5618_v49 }
 0x19f   :  { %v1040_v1 = vadd.f32 %v1039_v60, %v1020_v56  ;;  %v5630_v56 = vld [vmem:[%s6981_s6 + $0x1c0] sm:$0xff] }
 0x1a0   :  { %v1059_v42 = vpop.f32.mrf.mxu0 }
 0x1a1   :  { %v1060_v36 = vadd.f32 %v1059_v42, %v1040_v1  ;;  %v5636_v1 = vld [vmem:[%s6981_s6 + $0x1b8] sm:$0xff] }
 0x1a3   :  { %v1079_v41 = vpop.f32.mrf.mxu1 }
 0x1a4   :  { %v5604_v39 = vadd.f32 %v1079_v41, %v1060_v36  ;;  %v5624_v41 = vld [vmem:[%s6981_s6 + $0x1c8] sm:$0xff] }
 0x1a5   :  { %1372 = vmatpush.msra.mxu3 %v5624_v41 }
 0x1a6   :  { %6999 = vst [vmem:[#allocation59_spill] sm:$0xff] %v5604_v39  ;;  %v1217_v47 = vsel %vm1202_vm0, %v5604_v39, 0.0 }
 0x1a7   :  { %v1218_v42 = vrot.slane %v1217_v47, 4  ;;  %1373 = vmatpush.msra.mxu3 %v5630_v56 }
 0x1a9   :  { %v1219_v36 = vadd.f32 %v1218_v42, %v1217_v47  ;;  %1374 = vmatpush.msra.mxu3 %v5636_v1  ;;  %v5642_v42 = vld [vmem:[%s6981_s6 + $0x1b0] sm:$0xff] }
 0x1ab   :  { %v1220_v53 = vrot.slane %v1219_v36, 2  ;;  %1375 = vmatpush.msra.mxu3 %v5642_v42 }
 0x1ad   :  { %v1221_v60 = vadd.f32 %v1220_v53, %v1219_v36  ;;  %v5648_v36 = vld [vmem:[%s6981_s6 + $0x1a8] sm:$0xff] }
 0x1ae   :  { %1376 = vmatpush.msra.mxu3 %v5648_v36 }
 0x1af   :  { %v1222_v47 = vrot.slane %v1221_v60, 1 }
 0x1b0   :  { %1377 = vmatpush.msra.mxu3 %v5655_v34 }
 0x1b1   :  { %v1223_v39 = vadd.f32 %v1222_v47, %v1221_v60  ;;  %v5661_v60 = vld [vmem:[%s6981_s6 + $0x198] sm:$0xff]  ;;  %v5667_v47 = vld [vmem:[%s6981_s6 + $0x190] sm:$0xff] }
 0x1b2   :  { %7001 = vst [vmem:[#allocation61_spill] sm:$0xff] %v5661_v60  ;;  %1378 = vmatpush.msra.mxu3 %v5661_v60 }
 0x1b3   :  { %v1240_v53 = vmul.f32 %v5456_v27, %v1223_v39  ;;  %7002 = vst [vmem:[#allocation62_spill] sm:$0xff] %v5667_v47  ;;  %v5673_v39 = vld [vmem:[%s6981_s6 + $0x188] sm:$0xff] }
 0x1b4   :  { %1379 = vmatpush.msra.mxu3 %v5667_v47  ;;  %7003 = vst [vmem:[#allocation63_spill] sm:$0xff] %v5673_v39 }
 0x1b5   :  { %1362 = vmatmul.f32.vlgmr.msra.gmra.mxu2 %v1240_v53  ;;  %v5678_v53 = vld [vmem:[%s6981_s6 + $0x180] sm:$0xff] }
 0x1b6   :  { %7004 = vst [vmem:[#allocation64_spill] sm:$0xff] %v5678_v53  ;;  %1380 = vmatpush.msra.mxu3 %v5673_v39 }
 0x1b8   :  { %1381 = vmatpush.msra.mxu3 %v5678_v53 }
 0x1bf   :  { %v1099_v31 = vpop.f32.mrf.mxu2 }
 0x1c0   :  { %v1100_v17 = vadd.f32 %v1099_v31, %v700_v30 }
 0x1c2   :  { %v1119_v25 = vpop.f32.mrf.mxu3 }
 0x1c3   :  { %v1120_v47 = vadd.f32 %v1119_v25, %v1100_v17  ;;  %v1139_v28 = vpop.f32.mrf.mxu0  ;;  %v5688_v17 = vld [vmem:[#allocation7] sm:$0xff] }
 0x1c4   :  { %1409 = vmatpush.msrb.mxu0 %v5688_v17 }
 0x1c5   :  { %v1140_v32 = vadd.f32 %v1139_v28, %v1120_v47 }
 0x1c6   :  { %v1159_v21 = vpop.f32.mrf.mxu1  ;;  %1518 = vmatpush.msra.mxu0 %v5282_v33 }
 0x1c7   :  { %v1160_v60 = vadd.f32 %v1159_v21, %v1140_v32  ;;  %v5690_v21 = vld [vmem:[#allocation7 + $0x8] sm:$0xff]  ;;  %v5692_v32 = vld [vmem:[#allocation7 + $0x10] sm:$0xff] }
 0x1c8   :  { %1429 = vmatpush.msrb.mxu1 %v5690_v21  ;;  %1449 = vmatpush.msrb.mxu2 %v5692_v32 }
 0x1c9   :  { %1519 = vmatpush.msra.mxu0 %v5289_v37  ;;  %v7005_v37 = vld [vmem:[#allocation43_spill] sm:$0xff] }
 0x1ca   :  { %v1179_v26 = vpop.f32.mrf.mxu2  ;;  %1538 = vmatpush.msra.mxu1 %v5303_v44  ;;  %1558 = vmatpush.msra.mxu2 %v5404_v13  ;;  %v7007_v44 = vld [vmem:[#allocation54_spill] sm:$0xff] }
 0x1cb   :  { %v1180_v29 = vadd.f32 %v1179_v26, %v1160_v60  ;;  %1520 = vmatpush.msra.mxu0 %v5295_v40  ;;  %v7006_v40 = vld [vmem:[#allocation46_spill] sm:$0xff] }
 0x1cc   :  { %v1199_v57 = vpop.f32.mrf.mxu3  ;;  %1539 = vmatpush.msra.mxu1 %v5314_v48  ;;  %1559 = vmatpush.msra.mxu2 %v5409_v14  ;;  %v7019_v14 = vld [vmem:[#allocation57_spill] sm:$0xff] }
 0x1cd   :  { %v5683_v34 = vadd.f32 %v1199_v57, %v1180_v29  ;;  %v5696_v57 = vld [vmem:[#allocation7 + $0x18] sm:$0xff]  ;;  %1521 = vmatpush.msra.mxu0 %v5308_v45  ;;  %v7008_v45 = vld [vmem:[#allocation60_spill] sm:$0xff] }
 0x1ce   :  { %1469 = vmatpush.msrb.mxu3 %v5696_v57  ;;  %1540 = vmatpush.msra.mxu1 %v5326_v51  ;;  %v7009_v51 = vld [vmem:[#allocation44_spill] sm:$0xff] }
 0x1cf   :  { %v1224_v39 = vsel %vm1202_vm0, %v5683_v34, 0.0  ;;  %1560 = vmatpush.msra.mxu2 %v5499_v7  ;;  %1522 = vmatpush.msra.mxu0 %v5319_v50  ;;  %v7024_v29 = vld [vmem:[#allocation64_spill] sm:$0xff] }
 0x1d0   :  { %v1225_v24 = vrot.slane %v1224_v39, 4  ;;  %1541 = vmatpush.msra.mxu1 %v5338_v55 }
 0x1d1   :  { %1561 = vmatpush.msra.mxu2 %v5505_v9  ;;  %1523 = vmatpush.msra.mxu0 %v5331_v54  ;;  %v7010_v54 = vld [vmem:[#allocation48_spill] sm:$0xff] }
 0x1d2   :  { %v1226_v46 = vadd.f32 %v1225_v24, %v1224_v39  ;;  %1542 = vmatpush.msra.mxu1 %v5350_v61  ;;  %v7012_v61 = vld [vmem:[#allocation61_spill] sm:$0xff] }
 0x1d3   :  { %1562 = vmatpush.msra.mxu2 %v5511_v10  ;;  %1524 = vmatpush.msra.mxu0 %v5343_v59  ;;  %v7011_v59 = vld [vmem:[#allocation55_spill] sm:$0xff] }
 0x1d4   :  { %v1227_v23 = vrot.slane %v1226_v46, 2  ;;  %1543 = vmatpush.msra.mxu1 %v5362_v0  ;;  %v7014_v0 = vld [vmem:[#allocation50_spill] sm:$0xff] }
 0x1d5   :  { %1563 = vmatpush.msra.mxu2 %v5517_v15  ;;  %1525 = vmatpush.msra.mxu0 %v5355_v62  ;;  %v7013_v62 = vld [vmem:[#allocation45_spill] sm:$0xff] }
 0x1d6   :  { %v1228_v53 = vadd.f32 %v1227_v23, %v1226_v46  ;;  %1544 = vmatpush.msra.mxu1 %v5374_v4  ;;  %v7015_v4 = vld [vmem:[#allocation56_spill] sm:$0xff]  ;;  %v7023_v23 = vld [vmem:[#allocation58_spill] sm:$0xff] }
 0x1d7   :  { %1564 = vmatpush.msra.mxu2 %v5523_v18  ;;  %1526 = vmatpush.msra.mxu0 %v5367_v2  ;;  %v7025_v18 = vld [vmem:[#allocation42_spill] sm:$0xff] }
 0x1d8   :  { %v1229_v52 = vrot.slane %v1228_v53, 1  ;;  %1545 = vmatpush.msra.mxu1 %v5386_v6 }
 0x1d9   :  { %1565 = vmatpush.msra.mxu2 %v5529_v58  ;;  %1527 = vmatpush.msra.mxu0 %v5379_v5  ;;  %v7016_v5 = vld [vmem:[#allocation62_spill] sm:$0xff] }
 0x1da   :  { %v1230_v30 = vadd.f32 %v1229_v52, %v1228_v53  ;;  %1546 = vmatpush.msra.mxu1 %v5399_v11  ;;  %v7018_v11 = vld [vmem:[#allocation51_spill] sm:$0xff] }
 0x1db   :  { %1566 = vmatpush.msra.mxu2 %v5535_v19  ;;  %1528 = vmatpush.msra.mxu0 %v5391_v8  ;;  %v7017_v8 = vld [vmem:[#allocation47_spill] sm:$0xff]  ;;  %v7026_v19 = vld [vmem:[#allocation53_spill] sm:$0xff] }
 0x1dc   :  { %v1241_v25 = vmul.f32 %v5456_v27, %v1230_v30  ;;  %1547 = vmatpush.msra.mxu1 %v5422_v16  ;;  %v7020_v52 = vld [vmem:[#allocation63_spill] sm:$0xff]  ;;  %v7021_v16 = vld [vmem:[#allocation49_spill] sm:$0xff] }
 0x1dd   :  { %1567 = vmatpush.msra.mxu2 %v5541_v63  ;;  %1529 = vmatpush.msra.mxu0 %v7005_v37 }
 0x1de   :  { %1382 = vmatmul.f32.vlgmr.msra.gmra.mxu3 %v1241_v25  ;;  %1548 = vmatpush.msra.mxu1 %v5435_v20  ;;  %v7022_v20 = vld [vmem:[#allocation52_spill] sm:$0xff] }
 0x1df   :  { %1578 = vmatpush.msra.mxu3 %v5583_v35  ;;  %1568 = vmatpush.msra.mxu2 %v5547_v22 }
 0x1e0   :  { %1549 = vmatpush.msra.mxu1 %v7006_v40  ;;  %1530 = vmatpush.msra.mxu0 %v7009_v51 }
 0x1e1   :  { %1579 = vmatpush.msra.mxu3 %v5588_v38  ;;  %1569 = vmatpush.msra.mxu2 %v7007_v44 }
 0x1e2   :  { %v1323_v48 = vpop.f32.mrf.mxu0  ;;  %1550 = vmatpush.msra.mxu1 %v7010_v54  ;;  %1531 = vmatpush.msra.mxu0 %v7013_v62 }
 0x1e3   :  { %1580 = vmatpush.msra.mxu3 %v5596_v3  ;;  %1570 = vmatpush.msra.mxu2 %v7011_v59 }
 0x1e4   :  { %1551 = vmatpush.msra.mxu1 %v7014_v0  ;;  %1532 = vmatpush.msra.mxu0 %v7017_v8  ;;  %v1824_v8 = vld [vmem:[#allocation10 + $0x1e0] sm:$0xff] }
 0x1e5   :  { %1581 = vmatpush.msra.mxu3 %v5602_v12  ;;  %1571 = vmatpush.msra.mxu2 %v7015_v4  ;;  %v1794_v4 = vld [vmem:[#allocation10 + $0xf0] sm:$0xff] }
 0x1e6   :  { %1552 = vmatpush.msra.mxu1 %v7018_v11  ;;  %1533 = vmatpush.msra.mxu0 %v7021_v16  ;;  %v1790_v11 = vld [vmem:[#allocation10 + $0xd0] sm:$0xff] }
 0x1e7   :  { %1582 = vmatpush.msra.mxu3 %v5610_v43  ;;  %1572 = vmatpush.msra.mxu2 %v7019_v14  ;;  %v1858_v14 = vld [vmem:[#allocation10 + $0x2f0] sm:$0xff] }
 0x1e8   :  { %1553 = vmatpush.msra.mxu1 %v7022_v20  ;;  %v1890_v16 = vld [vmem:[#allocation10 + $0x3f0] sm:$0xff]  ;;  %v1820_v20 = vld [vmem:[#allocation10 + $0x1c0] sm:$0xff] }
 0x1e9   :  { %1583 = vmatpush.msra.mxu3 %v5618_v49  ;;  %1573 = vmatpush.msra.mxu2 %v7023_v23  ;;  %v1856_v23 = vld [vmem:[#allocation10 + $0x2e0] sm:$0xff] }
 0x1eb   :  { %1584 = vmatpush.msra.mxu3 %v5624_v41 }
 0x1ed   :  { %1585 = vmatpush.msra.mxu3 %v5630_v56  ;;  %v7027_v56 = vld [vmem:[#allocation59_spill] sm:$0xff] }
 0x1ef   :  { %1586 = vmatpush.msra.mxu3 %v5636_v1 }
 0x1f1   :  { %1587 = vmatpush.msra.mxu3 %v5642_v42 }
 0x1f3   :  { %1588 = vmatpush.msra.mxu3 %v5648_v36 }
 0x1f5   :  { %v1343_v33 = vpop.f32.mrf.mxu1  ;;  %1589 = vmatpush.msra.mxu3 %v7008_v45 }
 0x1f6   :  { %v1344_v55 = vadd.f32 %v1343_v33, %v1323_v48 }
 0x1f7   :  { %1590 = vmatpush.msra.mxu3 %v7012_v61 }
 0x1f9   :  { %1591 = vmatpush.msra.mxu3 %v7016_v5  ;;  %v1826_v5 = vld [vmem:[#allocation10 + $0x1f0] sm:$0xff] }
 0x1fb   :  { %1592 = vmatpush.msra.mxu3 %v7020_v52  ;;  %v1788_v52 = vld [vmem:[#allocation10 + $0xc0] sm:$0xff] }
 0x1fd   :  { %1593 = vmatpush.msra.mxu3 %v7024_v29  ;;  %v1888_v29 = vld [vmem:[#allocation10 + $0x3e0] sm:$0xff] }
 0x238   :  { %v1363_v50 = vpop.f32.mrf.mxu2 }
 0x239   :  { %v1364_v2 = vadd.f32 %v1363_v50, %v1344_v55 }
 0x261   :  { %v1383_v6 = vpop.f32.mrf.mxu3 }
 0x262   :  { %v1384_v13 = vadd.f32 %v1383_v6, %v1364_v2  ;;  %v1792_v6 = vld [vmem:[#allocation10 + $0xe0] sm:$0xff] }
 0x264   :  { %4464 = vmatmul.msk.f32.vlgmr.msrb.gmra.mxu0 %vm1390_vm2, %v1384_v13  ;;  %4465 = vmatmul.msk.f32.vlgmr.msrb.gmra.mxu1 %vm1390_vm2, %v1384_v13 }
 0x265   :  { %4466 = vmatmul.msk.f32.vlgmr.msrb.gmra.mxu2 %vm1390_vm2, %v1384_v13  ;;  %4467 = vmatmul.msk.f32.vlgmr.msrb.gmra.mxu3 %vm1390_vm2, %v1384_v13  ;;  %v1822_v13 = vld [vmem:[#allocation10 + $0x1d0] sm:$0xff] }
 0x266   :  { %1616 = vmatpush.msrb.mxu0 %v5688_v17  ;;  %1636 = vmatpush.msrb.mxu1 %v5690_v21 }
 0x267   :  { %1656 = vmatpush.msrb.mxu2 %v5692_v32  ;;  %1676 = vmatpush.msrb.mxu3 %v5696_v57 }
 0x2e1   :  { %v1411_v7 = vpop.f32.mrf.mxu0  ;;  %v1431_v9 = vpop.f32.mrf.mxu1 }
 0x2e2   :  { %v1474_v10 = vperm.slane %v1411_v7, 0  ;;  %v1475_v15 = vperm.slane %v1431_v9, 0  ;;  %v1854_v7 = vld [vmem:[#allocation10 + $0x2d0] sm:$0xff] }
 0x2e3   :  { %v1886_v9 = vld [vmem:[#allocation10 + $0x3d0] sm:$0xff] }
 0x2e4   :  { %v5773_v58 = vsub.f32 %v7025_v18, %v1474_v10  ;;  %v5776_v63 = vsub.f32 %v7026_v19, %v1475_v15  ;;  %v1786_v10 = vld [vmem:[#allocation10 + $0xb0] sm:$0xff]  ;;  %v1852_v18 = vld [vmem:[#allocation10 + $0x2c0] sm:$0xff] }
 0x2e5   :  { %v1818_v15 = vld [vmem:[#allocation10 + $0x1b0] sm:$0xff]  ;;  %v1884_v19 = vld [vmem:[#allocation10 + $0x3c0] sm:$0xff] }
 0x2e6   :  { %v1482_v22 = vmul.f32 %v5773_v58, %v5773_v58  ;;  %v1483_v24 = vmul.f32 %v5776_v63, %v5776_v63 }
 0x2e8   :  { %v1486_v26 = vsel %vm1202_vm0, %v1482_v22, 0.0  ;;  %v1493_v28 = vsel %vm1202_vm0, %v1483_v24, 0.0  ;;  %v1451_v31 = vpop.f32.mrf.mxu2  ;;  %v1471_v35 = vpop.f32.mrf.mxu3  ;;  %v1784_v22 = vld [vmem:[#allocation10 + $0xa0] sm:$0xff] }
 0x2e9   :  { %v1487_v38 = vrot.slane %v1486_v26, 4  ;;  %v1494_v3 = vrot.slane %v1493_v28, 4  ;;  %v1476_v12 = vperm.slane %v1451_v31, 0  ;;  %v1477_v43 = vperm.slane %v1471_v35, 0  ;;  %v1816_v24 = vld [vmem:[#allocation10 + $0x1a0] sm:$0xff]  ;;  %v1782_v31 = vld [vmem:[#allocation10 + $0x90] sm:$0xff] }
 0x2ea   :  { %v1814_v35 = vld [vmem:[#allocation10 + $0x190] sm:$0xff] }
 0x2eb   :  { %v1488_v49 = vadd.f32 %v1487_v38, %v1486_v26  ;;  %v1495_v41 = vadd.f32 %v1494_v3, %v1493_v28  ;;  %v5785_v1 = vsub.f32 %v7027_v56, %v1476_v12  ;;  %v5788_v42 = vsub.f32 %v5683_v34, %v1477_v43  ;;  %v1850_v26 = vld [vmem:[#allocation10 + $0x2b0] sm:$0xff]  ;;  %v1848_v38 = vld [vmem:[#allocation10 + $0x2a0] sm:$0xff] }
 0x2ec   :  { %v1882_v28 = vld [vmem:[#allocation10 + $0x3b0] sm:$0xff]  ;;  %v1880_v3 = vld [vmem:[#allocation10 + $0x3a0] sm:$0xff] }
 0x2ed   :  { %v1489_v36 = vrot.slane %v1488_v49, 2  ;;  %v1496_v60 = vrot.slane %v1495_v41, 2  ;;  %v1484_v47 = vmul.f32 %v5785_v1, %v5785_v1  ;;  %v1485_v39 = vmul.f32 %v5788_v42, %v5788_v42  ;;  %v1780_v12 = vld [vmem:[#allocation10 + $0x80] sm:$0xff]  ;;  %v1778_v56 = vld [vmem:[#allocation10 + $0x70] sm:$0xff] }
 0x2ee   :  { %v1812_v43 = vld [vmem:[#allocation10 + $0x180] sm:$0xff] }
 0x2ef   :  { %v1490_v53 = vadd.f32 %v1489_v36, %v1488_v49  ;;  %v1497_v46 = vadd.f32 %v1496_v60, %v1495_v41  ;;  %v1500_v30 = vsel %vm1202_vm0, %v1484_v47, 0.0  ;;  %v1507_v25 = vsel %vm1202_vm0, %v1485_v39, 0.0  ;;  %v1846_v49 = vld [vmem:[#allocation10 + $0x290] sm:$0xff]  ;;  %v1844_v60 = vld [vmem:[#allocation10 + $0x280] sm:$0xff] }
 0x2f0   :  { %v1501_v17 = vrot.slane %v1500_v30, 4  ;;  %v1508_v21 = vrot.slane %v1507_v25, 4  ;;  %v1878_v41 = vld [vmem:[#allocation10 + $0x390] sm:$0xff]  ;;  %v1876_v47 = vld [vmem:[#allocation10 + $0x380] sm:$0xff] }
 0x2f1   :  { %v1491_v32 = vrot.slane %v1490_v53, 1  ;;  %v1498_v57 = vrot.slane %v1497_v46, 1  ;;  %v1810_v36 = vld [vmem:[#allocation10 + $0x170] sm:$0xff]  ;;  %v1776_v39 = vld [vmem:[#allocation10 + $0x60] sm:$0xff] }
 0x2f2   :  { %v1502_v34 = vadd.f32 %v1501_v17, %v1500_v30  ;;  %v1509_v33 = vadd.f32 %v1508_v21, %v1507_v25  ;;  %v1874_v30 = vld [vmem:[#allocation10 + $0x370] sm:$0xff]  ;;  %v1772_v21 = vld [vmem:[#allocation10 + $0x40] sm:$0xff] }
 0x2f3   :  { %v1492_v37 = vadd.f32 %v1491_v32, %v1490_v53  ;;  %v1499_v40 = vadd.f32 %v1498_v57, %v1497_v46  ;;  %v1808_v53 = vld [vmem:[#allocation10 + $0x160] sm:$0xff]  ;;  %v1842_v46 = vld [vmem:[#allocation10 + $0x270] sm:$0xff] }
 0x2f4   :  { %v1503_v44 = vrot.slane %v1502_v34, 2  ;;  %v1510_v45 = vrot.slane %v1509_v33, 2  ;;  %v1774_v25 = vld [vmem:[#allocation10 + $0x50] sm:$0xff]  ;;  %v1804_v32 = vld [vmem:[#allocation10 + $0x140] sm:$0xff] }
 0x2f5   :  { %v1514_v48 = vmul.f32 %v1492_v37, %v5456_v27  ;;  %v1515_v50 = vmul.f32 %v1499_v40, %v5456_v27  ;;  %v1806_v17 = vld [vmem:[#allocation10 + $0x150] sm:$0xff] }
 0x2f6   :  { %v1504_v51 = vadd.f32 %v1503_v44, %v1502_v34  ;;  %v1511_v54 = vadd.f32 %v1510_v45, %v1509_v33 }
 0x2f7   :  { %1534 = vmatmul.f32.vlgmr.msra.gmra.mxu0 %v1514_v48  ;;  %1554 = vmatmul.f32.vlgmr.msra.gmra.mxu1 %v1515_v50  ;;  %v1770_v48 = vld [vmem:[#allocation10 + $0x30] sm:$0xff] }
 0x2f8   :  { %v1505_v55 = vrot.slane %v1504_v51, 1  ;;  %v1512_v59 = vrot.slane %v1511_v54, 1  ;;  %1897 = vmatpush.msra.mxu0 %v1794_v4  ;;  %1917 = vmatpush.msra.mxu1 %v1826_v5  ;;  %v1802_v50 = vld [vmem:[#allocation10 + $0x130] sm:$0xff]  ;;  %v1836_v4 = vld [vmem:[#allocation10 + $0x240] sm:$0xff] }
 0x2f9   :  { %v1868_v5 = vld [vmem:[#allocation10 + $0x340] sm:$0xff] }
 0x2fa   :  { %v1506_v61 = vadd.f32 %v1505_v55, %v1504_v51  ;;  %v1513_v62 = vadd.f32 %v1512_v59, %v1511_v54  ;;  %1898 = vmatpush.msra.mxu0 %v1792_v6  ;;  %1918 = vmatpush.msra.mxu1 %v1824_v8  ;;  %v1840_v51 = vld [vmem:[#allocation10 + $0x260] sm:$0xff] }
 0x2fb   :  { %v1872_v54 = vld [vmem:[#allocation10 + $0x360] sm:$0xff] }
 0x2fc   :  { %v1516_v0 = vmul.f32 %v1506_v61, %v5456_v27  ;;  %v1517_v2 = vmul.f32 %v1513_v62, %v5456_v27  ;;  %1899 = vmatpush.msra.mxu0 %v1790_v11  ;;  %1919 = vmatpush.msra.mxu1 %v1822_v13  ;;  %v1768_v55 = vld [vmem:[#allocation10 + $0x20] sm:$0xff]  ;;  %v1838_v61 = vld [vmem:[#allocation10 + $0x250] sm:$0xff] }
 0x2fd   :  { %v1800_v59 = vld [vmem:[#allocation10 + $0x120] sm:$0xff]  ;;  %v1870_v62 = vld [vmem:[#allocation10 + $0x350] sm:$0xff] }
 0x2fe   :  { %1574 = vmatmul.f32.vlgmr.msra.gmra.mxu2 %v1516_v0  ;;  %1594 = vmatmul.f32.vlgmr.msra.gmra.mxu3 %v1517_v2  ;;  %v1766_v0 = vld [vmem:[#allocation10 + $0x10] sm:$0xff]  ;;  %v1764_v6 = vld [vmem:[#allocation10] sm:$0xff] }
 0x2ff   :  { %1937 = vmatpush.msra.mxu2 %v1858_v14  ;;  %1957 = vmatpush.msra.mxu3 %v1890_v16  ;;  %v1798_v2 = vld [vmem:[#allocation10 + $0x110] sm:$0xff]  ;;  %v1796_v8 = vld [vmem:[#allocation10 + $0x100] sm:$0xff]  ;;  %v1795_v14 = vld [vmem:[#allocation10 + $0xf8] sm:$0xff] }
 0x300   :  { %1900 = vmatpush.msra.mxu0 %v1788_v52  ;;  %1920 = vmatpush.msra.mxu1 %v1820_v20  ;;  %v1834_v11 = vld [vmem:[#allocation10 + $0x230] sm:$0xff]  ;;  %v1827_v52 = vld [vmem:[#allocation10 + $0x1f8] sm:$0xff]  ;;  %v1832_v16 = vld [vmem:[#allocation10 + $0x220] sm:$0xff] }
 0x301   :  { %1938 = vmatpush.msra.mxu2 %v1856_v23  ;;  %1958 = vmatpush.msra.mxu3 %v1888_v29  ;;  %v1866_v13 = vld [vmem:[#allocation10 + $0x330] sm:$0xff]  ;;  %v1864_v20 = vld [vmem:[#allocation10 + $0x320] sm:$0xff]  ;;  %v1793_v23 = vld [vmem:[#allocation10 + $0xe8] sm:$0xff] }
 0x302   :  { %1901 = vmatpush.msra.mxu0 %v1786_v10  ;;  %1921 = vmatpush.msra.mxu1 %v1818_v15  ;;  %v1825_v29 = vld [vmem:[#allocation10 + $0x1e8] sm:$0xff]  ;;  %v1791_v10 = vld [vmem:[#allocation10 + $0xd8] sm:$0xff] }
 0x303   :  { %1939 = vmatpush.msra.mxu2 %v1854_v7  ;;  %1959 = vmatpush.msra.mxu3 %v1886_v9  ;;  %v1830_v7 = vld [vmem:[#allocation10 + $0x210] sm:$0xff]  ;;  %v1823_v15 = vld [vmem:[#allocation10 + $0x1d8] sm:$0xff] }
 0x304   :  { %1902 = vmatpush.msra.mxu0 %v1784_v22  ;;  %1922 = vmatpush.msra.mxu1 %v1816_v24  ;;  %v1862_v9 = vld [vmem:[#allocation10 + $0x310] sm:$0xff]  ;;  %v1789_v22 = vld [vmem:[#allocation10 + $0xc8] sm:$0xff] }
 0x305   :  { %1940 = vmatpush.msra.mxu2 %v1852_v18  ;;  %1960 = vmatpush.msra.mxu3 %v1884_v19  ;;  %v1828_v18 = vld [vmem:[#allocation10 + $0x200] sm:$0xff]  ;;  %v1821_v24 = vld [vmem:[#allocation10 + $0x1c8] sm:$0xff] }
 0x306   :  { %1903 = vmatpush.msra.mxu0 %v1782_v31  ;;  %1923 = vmatpush.msra.mxu1 %v1814_v35  ;;  %v1860_v19 = vld [vmem:[#allocation10 + $0x300] sm:$0xff]  ;;  %v1787_v31 = vld [vmem:[#allocation10 + $0xb8] sm:$0xff] }
 0x307   :  { %1941 = vmatpush.msra.mxu2 %v1850_v26  ;;  %1961 = vmatpush.msra.mxu3 %v1882_v28  ;;  %v1859_v26 = vld [vmem:[#allocation10 + $0x2f8] sm:$0xff] }
 0x308   :  { %1904 = vmatpush.msra.mxu0 %v1780_v12  ;;  %1924 = vmatpush.msra.mxu1 %v1812_v43  ;;  %v1891_v28 = vld [vmem:[#allocation10 + $0x3f8] sm:$0xff]  ;;  %v1785_v12 = vld [vmem:[#allocation10 + $0xa8] sm:$0xff] }
 0x309   :  { %1942 = vmatpush.msra.mxu2 %v1848_v38  ;;  %1962 = vmatpush.msra.mxu3 %v1880_v3  ;;  %v1819_v35 = vld [vmem:[#allocation10 + $0x1b8] sm:$0xff]  ;;  %v1857_v38 = vld [vmem:[#allocation10 + $0x2e8] sm:$0xff] }
 0x30a   :  { %1905 = vmatpush.msra.mxu0 %v1778_v56  ;;  %1925 = vmatpush.msra.mxu1 %v1810_v36  ;;  %v1889_v3 = vld [vmem:[#allocation10 + $0x3e8] sm:$0xff]  ;;  %v1783_v56 = vld [vmem:[#allocation10 + $0x98] sm:$0xff] }
 0x30b   :  { %1943 = vmatpush.msra.mxu2 %v1846_v49  ;;  %1963 = vmatpush.msra.mxu3 %v1878_v41  ;;  %v1817_v43 = vld [vmem:[#allocation10 + $0x1a8] sm:$0xff]  ;;  %v1855_v49 = vld [vmem:[#allocation10 + $0x2d8] sm:$0xff] }
 0x30c   :  { %1906 = vmatpush.msra.mxu0 %v1776_v39  ;;  %1926 = vmatpush.msra.mxu1 %v1808_v53  ;;  %v1887_v41 = vld [vmem:[#allocation10 + $0x3d8] sm:$0xff]  ;;  %v1781_v39 = vld [vmem:[#allocation10 + $0x88] sm:$0xff] }
 0x30d   :  { %1944 = vmatpush.msra.mxu2 %v1844_v60  ;;  %1964 = vmatpush.msra.mxu3 %v1876_v47  ;;  %v1815_v36 = vld [vmem:[#allocation10 + $0x198] sm:$0xff]  ;;  %v1853_v60 = vld [vmem:[#allocation10 + $0x2c8] sm:$0xff] }
 0x30e   :  { %1907 = vmatpush.msra.mxu0 %v1774_v25  ;;  %1927 = vmatpush.msra.mxu1 %v1806_v17  ;;  %v1885_v47 = vld [vmem:[#allocation10 + $0x3c8] sm:$0xff]  ;;  %v1779_v25 = vld [vmem:[#allocation10 + $0x78] sm:$0xff] }
 0x30f   :  { %1945 = vmatpush.msra.mxu2 %v1842_v46  ;;  %1965 = vmatpush.msra.mxu3 %v1874_v30  ;;  %v1813_v53 = vld [vmem:[#allocation10 + $0x188] sm:$0xff]  ;;  %v1851_v46 = vld [vmem:[#allocation10 + $0x2b8] sm:$0xff] }
 0x310   :  { %1908 = vmatpush.msra.mxu0 %v1772_v21  ;;  %1928 = vmatpush.msra.mxu1 %v1804_v32  ;;  %v1883_v30 = vld [vmem:[#allocation10 + $0x3b8] sm:$0xff]  ;;  %v1849_v21 = vld [vmem:[#allocation10 + $0x2a8] sm:$0xff] }
 0x311   :  { %1946 = vmatpush.msra.mxu2 %v1840_v51  ;;  %1966 = vmatpush.msra.mxu3 %v1872_v54  ;;  %v1811_v17 = vld [vmem:[#allocation10 + $0x178] sm:$0xff]  ;;  %v1881_v32 = vld [vmem:[#allocation10 + $0x3a8] sm:$0xff] }
 0x312   :  { %1909 = vmatpush.msra.mxu0 %v1770_v48  ;;  %1929 = vmatpush.msra.mxu1 %v1802_v50  ;;  %v1877_v48 = vld [vmem:[#allocation10 + $0x388] sm:$0xff]  ;;  %v1843_v54 = vld [vmem:[#allocation10 + $0x278] sm:$0xff] }
 0x313   :  { %1947 = vmatpush.msra.mxu2 %v1838_v61  ;;  %1967 = vmatpush.msra.mxu3 %v1870_v62  ;;  %v1773_v50 = vld [vmem:[#allocation10 + $0x48] sm:$0xff]  ;;  %v1875_v61 = vld [vmem:[#allocation10 + $0x378] sm:$0xff] }
 0x314   :  { %1910 = vmatpush.msra.mxu0 %v1768_v55  ;;  %1930 = vmatpush.msra.mxu1 %v1800_v59  ;;  %v1805_v51 = vld [vmem:[#allocation10 + $0x148] sm:$0xff]  ;;  %v1771_v62 = vld [vmem:[#allocation10 + $0x38] sm:$0xff] }
 0x315   :  { %1948 = vmatpush.msra.mxu2 %v1836_v4  ;;  %1968 = vmatpush.msra.mxu3 %v1868_v5  ;;  %v1841_v5 = vld [vmem:[#allocation10 + $0x268] sm:$0xff] }
 0x316   :  { %1911 = vmatpush.msra.mxu0 %v1766_v0  ;;  %1931 = vmatpush.msra.mxu1 %v1798_v2  ;;  %v1803_v0 = vld [vmem:[#allocation10 + $0x138] sm:$0xff] }
 0x317   :  { %1949 = vmatpush.msra.mxu2 %v1834_v11  ;;  %1969 = vmatpush.msra.mxu3 %v1866_v13  ;;  %v1801_v11 = vld [vmem:[#allocation10 + $0x128] sm:$0xff]  ;;  %v1839_v13 = vld [vmem:[#allocation10 + $0x258] sm:$0xff] }
 0x318   :  { %1912 = vmatpush.msra.mxu0 %v1764_v6  ;;  %1932 = vmatpush.msra.mxu1 %v1796_v8  ;;  %v1873_v6 = vld [vmem:[#allocation10 + $0x368] sm:$0xff] }
 0x319   :  { %1950 = vmatpush.msra.mxu2 %v1832_v16  ;;  %1970 = vmatpush.msra.mxu3 %v1864_v20  ;;  %v1769_v8 = vld [vmem:[#allocation10 + $0x28] sm:$0xff]  ;;  %v1799_v16 = vld [vmem:[#allocation10 + $0x118] sm:$0xff] }
 0x31a   :  { %v1837_v20 = vld [vmem:[#allocation10 + $0x248] sm:$0xff] }
 0x31b   :  { %1951 = vmatpush.msra.mxu2 %v1830_v7  ;;  %1971 = vmatpush.msra.mxu3 %v1862_v9  ;;  %v1765_v9 = vld [vmem:[#allocation10 + $0x8] sm:$0xff] }
 0x31d   :  { %1952 = vmatpush.msra.mxu2 %v1828_v18  ;;  %1972 = vmatpush.msra.mxu3 %v1860_v19 }
 0x374   :  { %v1535_v57 = vpop.f32.mrf.mxu0  ;;  %v1555_v34 = vpop.f32.mrf.mxu1 }
 0x375   :  { %v1556_v33 = vadd.f32 %v1555_v34, %v1535_v57  ;;  %v1777_v57 = vld [vmem:[#allocation10 + $0x68] sm:$0xff] }
 0x376   :  { %v1809_v34 = vld [vmem:[#allocation10 + $0x168] sm:$0xff] }
 0x381   :  { %v1575_v37 = vpop.f32.mrf.mxu2  ;;  %v1595_v44 = vpop.f32.mrf.mxu3 }
 0x382   :  { %v1576_v40 = vadd.f32 %v1575_v37, %v1556_v33  ;;  %v1847_v33 = vld [vmem:[#allocation10 + $0x298] sm:$0xff] }
 0x383   :  { %v1879_v37 = vld [vmem:[#allocation10 + $0x398] sm:$0xff] }
 0x384   :  { %v1596_v45 = vadd.f32 %v1595_v44, %v1576_v40  ;;  %v1775_v40 = vld [vmem:[#allocation10 + $0x58] sm:$0xff] }
 0x385   :  { %v1807_v44 = vld [vmem:[#allocation10 + $0x158] sm:$0xff] }
 0x386   :  { %4468 = vmatmul.msk.f32.vlgmr.msrb.gmra.mxu0 %vm1390_vm2, %v1596_v45  ;;  %4469 = vmatmul.msk.f32.vlgmr.msrb.gmra.mxu1 %vm1390_vm2, %v1596_v45 }
 0x387   :  { %4470 = vmatmul.msk.f32.vlgmr.msrb.gmra.mxu2 %vm1390_vm2, %v1596_v45  ;;  %4471 = vmatmul.msk.f32.vlgmr.msrb.gmra.mxu3 %vm1390_vm2, %v1596_v45  ;;  %v1845_v45 = vld [vmem:[#allocation10 + $0x288] sm:$0xff] }
 0x388   :  { %1977 = vmatpush.msrb.mxu0 %v1795_v14  ;;  %1997 = vmatpush.msrb.mxu1 %v1827_v52  ;;  %v1871_v14 = vld [vmem:[#allocation10 + $0x358] sm:$0xff] }
 0x389   :  { %2017 = vmatpush.msrb.mxu2 %v1859_v26  ;;  %2037 = vmatpush.msrb.mxu3 %v1891_v28  ;;  %v1767_v52 = vld [vmem:[#allocation10 + $0x18] sm:$0xff]  ;;  %v1833_v26 = vld [vmem:[#allocation10 + $0x228] sm:$0xff] }
 0x38a   :  { %1978 = vmatpush.msrb.mxu0 %v1793_v23  ;;  %1998 = vmatpush.msrb.mxu1 %v1825_v29  ;;  %v1869_v23 = vld [vmem:[#allocation10 + $0x348] sm:$0xff] }
 0x38b   :  { %2018 = vmatpush.msrb.mxu2 %v1857_v38  ;;  %2038 = vmatpush.msrb.mxu3 %v1889_v3  ;;  %v1865_v28 = vld [vmem:[#allocation10 + $0x328] sm:$0xff]  ;;  %v1831_v3 = vld [vmem:[#allocation10 + $0x218] sm:$0xff] }
 0x38c   :  { %1979 = vmatpush.msrb.mxu0 %v1791_v10  ;;  %1999 = vmatpush.msrb.mxu1 %v1823_v15  ;;  %v1797_v10 = vld [vmem:[#allocation10 + $0x108] sm:$0xff]  ;;  %v1835_v15 = vld [vmem:[#allocation10 + $0x238] sm:$0xff] }
 0x38d   :  { %2019 = vmatpush.msrb.mxu2 %v1855_v49  ;;  %2039 = vmatpush.msrb.mxu3 %v1887_v41  ;;  %v1829_v41 = vld [vmem:[#allocation10 + $0x208] sm:$0xff] }
 0x38e   :  { %1980 = vmatpush.msrb.mxu0 %v1789_v22  ;;  %2000 = vmatpush.msrb.mxu1 %v1821_v24  ;;  %v1867_v22 = vld [vmem:[#allocation10 + $0x338] sm:$0xff] }
 0x38f   :  { %2020 = vmatpush.msrb.mxu2 %v1853_v60  ;;  %2040 = vmatpush.msrb.mxu3 %v1885_v47 }
 0x390   :  { %1981 = vmatpush.msrb.mxu0 %v1787_v31  ;;  %2001 = vmatpush.msrb.mxu1 %v1819_v35 }
 0x391   :  { %2021 = vmatpush.msrb.mxu2 %v1851_v46  ;;  %2041 = vmatpush.msrb.mxu3 %v1883_v30 }
 0x392   :  { %1982 = vmatpush.msrb.mxu0 %v1785_v12  ;;  %2002 = vmatpush.msrb.mxu1 %v1817_v43  ;;  %v1863_v12 = vld [vmem:[#allocation10 + $0x318] sm:$0xff] }
 0x393   :  { %2022 = vmatpush.msrb.mxu2 %v1849_v21  ;;  %2042 = vmatpush.msrb.mxu3 %v1881_v32 }
 0x394   :  { %1983 = vmatpush.msrb.mxu0 %v1783_v56  ;;  %2003 = vmatpush.msrb.mxu1 %v1815_v36  ;;  %v1861_v56 = vld [vmem:[#allocation10 + $0x308] sm:$0xff]  ;;  %v311_v36 = vld [vmem:[#allocation8 + $0x2] ss:$4 sm:$0xf] }
 0x395   :  { %2023 = vmatpush.msrb.mxu2 %v1847_v33  ;;  %2043 = vmatpush.msrb.mxu3 %v1879_v37  ;;  %v1722_v30 = vperm.slane %v311_v36, 0  ;;  %v1723_v32 = vperm.slane %v311_v36, 1 }
 0x396   :  { %1984 = vmatpush.msrb.mxu0 %v1781_v39  ;;  %2004 = vmatpush.msrb.mxu1 %v1813_v53 }
 0x397   :  { %2024 = vmatpush.msrb.mxu2 %v1845_v45  ;;  %2044 = vmatpush.msrb.mxu3 %v1877_v48 }
 0x398   :  { %1985 = vmatpush.msrb.mxu0 %v1779_v25  ;;  %2005 = vmatpush.msrb.mxu1 %v1811_v17 }
 0x399   :  { %2025 = vmatpush.msrb.mxu2 %v1843_v54  ;;  %2045 = vmatpush.msrb.mxu3 %v1875_v61  ;;  %v1724_v54 = vperm.slane %v311_v36, 2 }
 0x39a   :  { %1986 = vmatpush.msrb.mxu0 %v1777_v57  ;;  %2006 = vmatpush.msrb.mxu1 %v1809_v34 }
 0x39b   :  { %2026 = vmatpush.msrb.mxu2 %v1841_v5  ;;  %2046 = vmatpush.msrb.mxu3 %v1873_v6  ;;  %v1725_v6 = vperm.slane %v311_v36, 3  ;;  %v5896_v36 = vld [vmem:[%s7028_s8 + $0xe0] sm:$0xff] }
 0x39c   :  { %1987 = vmatpush.msrb.mxu0 %v1775_v40  ;;  %2007 = vmatpush.msrb.mxu1 %v1807_v44  ;;  %v309_v44 = vld [vmem:[#allocation8 + $0x1] ss:$4 sm:$0xf] }
 0x39d   :  { %2027 = vmatpush.msrb.mxu2 %v1839_v13  ;;  %2047 = vmatpush.msrb.mxu3 %v1871_v14  ;;  %v1744_v5 = vperm.slane %v309_v44, 1 }
 0x39e   :  { %1988 = vmatpush.msrb.mxu0 %v1773_v50  ;;  %2008 = vmatpush.msrb.mxu1 %v1805_v51 }
 0x39f   :  { %2028 = vmatpush.msrb.mxu2 %v1837_v20  ;;  %2048 = vmatpush.msrb.mxu3 %v1869_v23 }
 0x3a0   :  { %1989 = vmatpush.msrb.mxu0 %v1771_v62  ;;  %2009 = vmatpush.msrb.mxu1 %v1803_v0  ;;  %v1743_v62 = vperm.slane %v309_v44, 0 }
 0x3a1   :  { %2029 = vmatpush.msrb.mxu2 %v1835_v15  ;;  %2049 = vmatpush.msrb.mxu3 %v1867_v22  ;;  %v1745_v15 = vperm.slane %v309_v44, 2 }
 0x3a2   :  { %1990 = vmatpush.msrb.mxu0 %v1769_v8  ;;  %2010 = vmatpush.msrb.mxu1 %v1801_v11 }
 0x3a3   :  { %2030 = vmatpush.msrb.mxu2 %v1833_v26  ;;  %2050 = vmatpush.msrb.mxu3 %v1865_v28 }
 0x3a4   :  { %1991 = vmatpush.msrb.mxu0 %v1767_v52  ;;  %2011 = vmatpush.msrb.mxu1 %v1799_v16 }
 0x3a5   :  { %2031 = vmatpush.msrb.mxu2 %v1831_v3  ;;  %2051 = vmatpush.msrb.mxu3 %v1863_v12  ;;  %v5860_v3 = vld [vmem:[%s7028_s8 + $0xf8] sm:$0xff]  ;;  %v5867_v12 = vld [vmem:[%s7028_s8 + $0x50] sm:$0xff] }
 0x3a6   :  { %1992 = vmatpush.msrb.mxu0 %v1765_v9  ;;  %2012 = vmatpush.msrb.mxu1 %v1797_v10 }
 0x3a7   :  { %2032 = vmatpush.msrb.mxu2 %v1829_v41  ;;  %2052 = vmatpush.msrb.mxu3 %v1861_v56  ;;  %v5884_v41 = vld [vmem:[%s7028_s8 + $0xe8] sm:$0xff]  ;;  %v5891_v56 = vld [vmem:[%s7028_s8 + $0x40] sm:$0xff] }
 0x403   :  { %v1618_v55 = vpop.f32.mrf.mxu0  ;;  %v1638_v59 = vpop.f32.mrf.mxu1 }
 0x404   :  { %v5804_v2 = vadd.f32 1e-05, %v1618_v55  ;;  %v5806_v4 = vadd.f32 1e-05, %v1638_v59 }
 0x406   :  { %4521 = vrsqrt.f32 %v5804_v2  ;;  %vm1687_vm5 = vweird.f32 %v5804_v2  ;;  %vm1697_vm7 = vweird.f32 %v5806_v4 }
 0x407   :  { %4523 = vrsqrt.f32 %v5806_v4 }
 0x40a   :  { %v1658_v29 = vpop.f32.mrf.mxu2  ;;  %v1678_v7 = vpop.f32.mrf.mxu3 }
 0x40b   :  { %v5810_v18 = vadd.f32 1e-05, %v1658_v29  ;;  %v5812_v19 = vadd.f32 1e-05, %v1678_v7 }
 0x40c   :  { %v4522_v24 = vpop.eup %4521 }
 0x40d   :  { %v4524_v31 = vpop.eup %4523  ;;  %v1682_v35 = vmul.f32 %v4522_v24, %v5804_v2  ;;  %4525 = vrsqrt.f32 %v5810_v18  ;;  %vm1688_vm3 = vweird.f32 %v4522_v24  ;;  %vm1707_vm11 = vweird.f32 %v5810_v18 }
 0x40e   :  { %v1692_v38 = vmul.f32 %v4524_v31, %v5806_v4  ;;  %4527 = vrsqrt.f32 %v5812_v19  ;;  %vm1698_vm4 = vweird.f32 %v4524_v31  ;;  %vm1689_vm6 = vmor %vm1687_vm5, %vm1688_vm3  ;;  %vm1717_vm13 = vweird.f32 %v5812_v19 }
 0x40f   :  { %v1683_v43 = vmul.f32 %v4522_v24, %v1682_v35  ;;  %vm1699_vm8 = vmor %vm1697_vm7, %vm1698_vm4  ;;  %v5848_v35 = vld [vmem:[%s7028_s8 + $0x60] sm:$0xff] }
 0x410   :  { %v1693_v49 = vmul.f32 %v4524_v31, %v1692_v38  ;;  %v5855_v38 = vld [vmem:[%s7028_s8 + $0x58] sm:$0xff] }
 0x411   :  { %v1684_v60 = vmul.f32 0.5, %v1683_v43  ;;  %v5872_v43 = vld [vmem:[%s7028_s8 + $0xf0] sm:$0xff] }
 0x412   :  { %v1694_v47 = vmul.f32 0.5, %v1693_v49  ;;  %v5879_v49 = vld [vmem:[%s7028_s8 + $0x48] sm:$0xff] }
 0x413   :  { %v4526_v39 = vpop.eup %4525  ;;  %v1685_v53 = vsub.f32 1.5, %v1684_v60  ;;  %v5903_v60 = vld [vmem:[%s7028_s8 + $0x38] sm:$0xff] }
 0x414   :  { %v4528_v46 = vpop.eup %4527  ;;  %v1695_v25 = vsub.f32 1.5, %v1694_v47  ;;  %v1702_v17 = vmul.f32 %v4526_v39, %v5810_v18  ;;  %vm1708_vm9 = vweird.f32 %v4526_v39  ;;  %v5908_v47 = vld [vmem:[%s7028_s8 + $0xd8] sm:$0xff] }
 0x415   :  { %v1686_v21 = vmul.f32 %v4522_v24, %v1685_v53  ;;  %v1712_v57 = vmul.f32 %v4528_v46, %v5812_v19  ;;  %vm1718_vm10 = vweird.f32 %v4528_v46  ;;  %vm1709_vm12 = vmor %vm1707_vm11, %vm1708_vm9  ;;  %v5920_v53 = vld [vmem:[%s7028_s8 + $0xd0] sm:$0xff]  ;;  %vm2510_vm9 = vcmask 261120  }
 0x416   :  { %v1696_v34 = vmul.f32 %v4524_v31, %v1695_v25  ;;  %v1703_v33 = vmul.f32 %v4526_v39, %v1702_v17  ;;  %vm1719_vm14 = vmor %vm1717_vm13, %vm1718_vm10  ;;  %v5939_v25 = vld [vmem:[%s7028_s8 + $0x20] sm:$0xff] }
 0x417   :  { %v1690_v37 = vsel %vm1689_vm6, %v4522_v24, %v1686_v21  ;;  %v1713_v40 = vmul.f32 %v4528_v46, %v1712_v57  ;;  %v5944_v17 = vld [vmem:[%s7028_s8 + $0xc0] sm:$0xff]  ;;  %v5951_v21 = vld [vmem:[%s7028_s8 + $0x18] sm:$0xff]  ;;  %v5963_v57 = vld [vmem:[%s7028_s8 + $0x10] sm:$0xff] }
 0x418   :  { %v1730_v45 = vmul.f32 %v1722_v30, %v1690_v37  ;;  %v1700_v48 = vsel %vm1699_vm8, %v4524_v31, %v1696_v34  ;;  %v1704_v50 = vmul.f32 0.5, %v1703_v33  ;;  %v5831_v31 = vld [vmem:[%s7028_s8 + $0x78] sm:$0xff]  ;;  %v5932_v30 = vld [vmem:[%s7028_s8 + $0xc8] sm:$0xff]  ;;  %v5968_v34 = vld [vmem:[%s7028_s8 + $0xb0] sm:$0xff]  ;;  %vm4416_vm8 = vcmask 254976  }
 0x419   :  { %v1731_v51 = vmul.f32 %v1723_v32, %v1700_v48  ;;  %v1714_v55 = vmul.f32 0.5, %v1713_v40  ;;  %v5956_v32 = vld [vmem:[%s7028_s8 + $0xb8] sm:$0xff]  ;;  %v5975_v33 = vld [vmem:[%s7028_s8 + $0x8] sm:$0xff]  ;;  %v5987_v40 = vld [vmem:[%s7028_s8] sm:$0xff] }
 0x41a   :  { %v1734_v59 = vperm.slane %v1730_v45, 0  ;;  %v1705_v61 = vsub.f32 1.5, %v1704_v50  ;;  %v5980_v37 = vld [vmem:[%s7028_s8 + $0xa8] sm:$0xff]  ;;  %v1759_v45 = vld [vmem:[#allocation13] ss:$4 sm:$0x3] }
 0x41b   :  { %v1735_v0 = vperm.slane %v1731_v51, 0  ;;  %v1715_v2 = vsub.f32 1.5, %v1714_v55  ;;  %v5999_v48 = vld [vmem:[%s7028_s8 + $0x98] sm:$0xff]  ;;  %v1893_v51 = vperm.slane %v1759_v45, 0  ;;  %v6011_v55 = vld [vmem:[%s7028_s8 + $0x88] sm:$0xff] }
 0x41c   :  { %v1706_v4 = vmul.f32 %v4526_v39, %v1705_v61  ;;  %v1738_v8 = vmul.f32 %v1734_v59, %v5773_v58  ;;  %v1746_v58 = vperm.slane %v309_v44, 3  ;;  %v5992_v44 = vld [vmem:[%s7028_s8 + $0xa0] sm:$0xff] }
 0x41d   :  { %v1716_v11 = vmul.f32 %v4528_v46, %v1715_v2  ;;  %v1739_v13 = vmul.f32 %v1735_v0, %v5776_v63  ;;  %v6016_v59 = vld [vmem:[%s7028_s8 + $0x80] sm:$0xff]  ;;  %v1894_v2 = vperm.slane %v1759_v45, 1 }
 0x41e   :  { %v1710_v14 = vsel %vm1709_vm12, %v4526_v39, %v1706_v4  ;;  %v1751_v52 = vadd.f32 %v1743_v62, %v1738_v8  ;;  %v5915_v39 = vld [vmem:[%s7028_s8 + $0x30] sm:$0xff] }
 0x41f   :  { %v1732_v16 = vmul.f32 %v1724_v54, %v1710_v14  ;;  %v1720_v20 = vsel %vm1719_vm14, %v4528_v46, %v1716_v11  ;;  %v1752_v23 = vadd.f32 %v1744_v5, %v1739_v13  ;;  %v5927_v46 = vld [vmem:[%s7028_s8 + $0x28] sm:$0xff]  ;;  %v6005_v54 = vld [vmem:[%s7028_s8 + $0x90] sm:$0xff] }
 0x420   :  { %v1733_v29 = vmul.f32 %v1725_v6, %v1720_v20  ;;  %v1755_v7 = vmax.f32 %v1751_v52, 0.0 }
 0x421   :  { %v1736_v9 = vperm.slane %v1732_v16, 0  ;;  %v1756_v10 = vmax.f32 %v1752_v23, 0.0 }
 0x422   :  { %v1737_v18 = vperm.slane %v1733_v29, 0  ;;  %1913 = vmatmul.f32.vlgmr.msra.gmra.mxu0 %v1755_v7 }
 0x423   :  { %1933 = vmatmul.f32.vlgmr.msra.gmra.mxu1 %v1756_v10  ;;  %v1740_v22 = vmul.f32 %v1736_v9, %v5785_v1  ;;  %2105 = vmatpush.msra.mxu0 %v5831_v31  ;;  %v5837_v1 = vld [vmem:[%s7028_s8 + $0x70] sm:$0xff] }
 0x424   :  { %v1741_v19 = vmul.f32 %v1737_v18, %v5788_v42  ;;  %v5842_v42 = vld [vmem:[%s7028_s8 + $0x68] sm:$0xff]  ;;  %2125 = vmatpush.msra.mxu1 %v5860_v3  ;;  %s4437_s8 = sshll.u32 %s5051_s9, 4  ;;  %s4438_s8 = int_to_ptr.vmem [resolvable:$true] %s4437_s8 }
 0x425   :  { %v1753_v63 = vadd.f32 %v1745_v15, %v1740_v22  ;;  %2106 = vmatpush.msra.mxu0 %v5837_v1 }
 0x426   :  { %v1754_v24 = vadd.f32 %v1746_v58, %v1741_v19  ;;  %2126 = vmatpush.msra.mxu1 %v5872_v43 }
 0x427   :  { %v1757_v26 = vmax.f32 %v1753_v63, 0.0  ;;  %2107 = vmatpush.msra.mxu0 %v5842_v42 }
 0x428   :  { %v1758_v28 = vmax.f32 %v1754_v24, 0.0  ;;  %2127 = vmatpush.msra.mxu1 %v5884_v41 }
 0x429   :  { %1953 = vmatmul.f32.vlgmr.msra.gmra.mxu2 %v1757_v26  ;;  %2108 = vmatpush.msra.mxu0 %v5848_v35 }
 0x42a   :  { %1973 = vmatmul.f32.vlgmr.msra.gmra.mxu3 %v1758_v28  ;;  %1993 = vmatmul.f32.vlgmr.msrb.gmra.mxu0 %v1755_v7 }
 0x42b   :  { %2013 = vmatmul.f32.vlgmr.msrb.gmra.mxu1 %v1756_v10  ;;  %2109 = vmatpush.msra.mxu0 %v5855_v38 }
 0x42c   :  { %2128 = vmatpush.msra.mxu1 %v5896_v36 }
 0x42d   :  { %2110 = vmatpush.msra.mxu0 %v5867_v12 }
 0x42e   :  { %2129 = vmatpush.msra.mxu1 %v5908_v47 }
 0x42f   :  { %2111 = vmatpush.msra.mxu0 %v5879_v49 }
 0x430   :  { %2130 = vmatpush.msra.mxu1 %v5920_v53 }
 0x431   :  { %2033 = vmatmul.f32.vlgmr.msrb.gmra.mxu2 %v1757_v26  ;;  %2112 = vmatpush.msra.mxu0 %v5891_v56 }
 0x432   :  { %2053 = vmatmul.f32.vlgmr.msrb.gmra.mxu3 %v1758_v28  ;;  %2131 = vmatpush.msra.mxu1 %v5932_v30 }
 0x433   :  { %2113 = vmatpush.msra.mxu0 %v5903_v60 }
 0x434   :  { %2132 = vmatpush.msra.mxu1 %v5944_v17 }
 0x435   :  { %2114 = vmatpush.msra.mxu0 %v5915_v39 }
 0x436   :  { %2133 = vmatpush.msra.mxu1 %v5956_v32 }
 0x437   :  { %2115 = vmatpush.msra.mxu0 %v5927_v46 }
 0x438   :  { %2134 = vmatpush.msra.mxu1 %v5968_v34 }
 0x439   :  { %2116 = vmatpush.msra.mxu0 %v5939_v25 }
 0x43a   :  { %2135 = vmatpush.msra.mxu1 %v5980_v37 }
 0x43b   :  { %2117 = vmatpush.msra.mxu0 %v5951_v21 }
 0x43c   :  { %2136 = vmatpush.msra.mxu1 %v5992_v44 }
 0x43d   :  { %2118 = vmatpush.msra.mxu0 %v5963_v57 }
 0x43e   :  { %2137 = vmatpush.msra.mxu1 %v5999_v48 }
 0x43f   :  { %2119 = vmatpush.msra.mxu0 %v5975_v33 }
 0x440   :  { %2138 = vmatpush.msra.mxu1 %v6005_v54 }
 0x441   :  { %2120 = vmatpush.msra.mxu0 %v5987_v40 }
 0x442   :  { %2139 = vmatpush.msra.mxu1 %v6011_v55 }
 0x444   :  { %2140 = vmatpush.msra.mxu1 %v6016_v59 }
 0x49f   :  { %v1914_v50 = vpop.f32.mrf.mxu0 }
 0x4a0   :  { %v1915_v61 = vadd.f32 %v1914_v50, %v1893_v51  ;;  %v1934_v62 = vpop.f32.mrf.mxu1 }
 0x4a2   :  { %v1935_v0 = vadd.f32 %v1934_v62, %v1915_v61  ;;  %v2147_v62 = vld [vmem:[#allocation11 + $0x10] sm:$0xff] }
 0x4a3   :  { %2167 = vmatpush.msra.mxu2 %v2147_v62  ;;  %2272 = vmatpush.msrb.mxu0 %v2147_v62  ;;  %v2362_v62 = vld [vmem:[%s6894_s10 + $0xc0] sm:$0xff] }
 0x4a7   :  { %v1994_v5 = vpop.f32.mrf.mxu0 }
 0x4a8   :  { %v1995_v11 = vadd.f32 %v1994_v5, %v1894_v2  ;;  %v2014_v52 = vpop.f32.mrf.mxu1  ;;  %v2145_v2 = vld [vmem:[#allocation11] sm:$0xff]  ;;  %v2146_v5 = vld [vmem:[#allocation11 + $0x8] sm:$0xff] }
 0x4a9   :  { %2168 = vmatpush.msra.mxu2 %v2145_v2  ;;  %2273 = vmatpush.msrb.mxu0 %v2145_v2  ;;  %v2438_v2 = vld [vmem:[%s6896_s12 + $0xc0] sm:$0xff] }
 0x4aa   :  { %v2015_v20 = vadd.f32 %v2014_v52, %v1995_v11  ;;  %v2368_v11 = vld [vmem:[%s6894_s10 + $0xf0] sm:$0xff]  ;;  %v2351_v52 = vld [vmem:[%s6894_s10 + $0x68] sm:$0xff] }
 0x4ab   :  { %2215 = vmatpush.msrb.mxu2 %v5831_v31 }
 0x4ac   :  { %v1954_v4 = vpop.f32.mrf.mxu2 }
 0x4ad   :  { %v1955_v6 = vadd.f32 %v1954_v4, %v1935_v0  ;;  %v1974_v8 = vpop.f32.mrf.mxu3  ;;  %v2148_v0 = vld [vmem:[#allocation11 + $0x18] sm:$0xff]  ;;  %2216 = vmatpush.msrb.mxu2 %v5837_v1 }
 0x4ae   :  { %2187 = vmatpush.msra.mxu3 %v2148_v0  ;;  %2292 = vmatpush.msrb.mxu1 %v2148_v0  ;;  %v2429_v4 = vld [vmem:[%s6896_s12 + $0x78] sm:$0xff]  ;;  %v2422_v0 = vld [vmem:[%s6896_s12 + $0x40] sm:$0xff] }
 0x4af   :  { %v6020_v13 = vadd.f32 %v1974_v8, %v1955_v6  ;;  %2217 = vmatpush.msrb.mxu2 %v5842_v42  ;;  %v2445_v6 = vld [vmem:[%s6896_s12 + $0xf8] sm:$0xff]  ;;  %v2352_v8 = vld [vmem:[%s6894_s10 + $0x70] sm:$0xff] }
 0x4b0   :  { %2188 = vmatpush.msra.mxu3 %v2146_v5  ;;  %2293 = vmatpush.msrb.mxu1 %v2146_v5  ;;  %v2345_v5 = vld [vmem:[%s6894_s10 + $0x38] sm:$0xff] }
 0x4b1   :  { %v2057_v14 = vsel %vm1202_vm0, %v6020_v13, 0.0  ;;  %2218 = vmatpush.msrb.mxu2 %v5848_v35 }
 0x4b2   :  { %v2058_v16 = vrot.slane %v2057_v14, 4  ;;  %2235 = vmatpush.msrb.mxu3 %v5860_v3 }
 0x4b3   :  { %2219 = vmatpush.msrb.mxu2 %v5855_v38 }
 0x4b4   :  { %v2059_v23 = vadd.f32 %v2058_v16, %v2057_v14  ;;  %v2034_v29 = vpop.f32.mrf.mxu2  ;;  %2236 = vmatpush.msrb.mxu3 %v5872_v43  ;;  %v2444_v14 = vld [vmem:[%s6896_s12 + $0xf0] sm:$0xff]  ;;  %v2367_v16 = vld [vmem:[%s6894_s10 + $0xe8] sm:$0xff] }
 0x4b5   :  { %v2035_v7 = vadd.f32 %v2034_v29, %v2015_v20  ;;  %v2054_v10 = vpop.f32.mrf.mxu3  ;;  %2220 = vmatpush.msrb.mxu2 %v5867_v12  ;;  %v2427_v20 = vld [vmem:[%s6896_s12 + $0x68] sm:$0xff]  ;;  %v2350_v29 = vld [vmem:[%s6894_s10 + $0x60] sm:$0xff] }
 0x4b6   :  { %v2060_v9 = vrot.slane %v2059_v23, 2  ;;  %2237 = vmatpush.msrb.mxu3 %v5884_v41 }
 0x4b7   :  { %v6024_v15 = vadd.f32 %v2054_v10, %v2035_v7  ;;  %2221 = vmatpush.msrb.mxu2 %v5879_v49  ;;  %v2366_v7 = vld [vmem:[%s6894_s10 + $0xe0] sm:$0xff] }
 0x4b8   :  { %v2061_v18 = vadd.f32 %v2060_v9, %v2059_v23  ;;  %2238 = vmatpush.msrb.mxu3 %v5896_v36  ;;  %v2443_v23 = vld [vmem:[%s6896_s12 + $0xe8] sm:$0xff]  ;;  %v2426_v9 = vld [vmem:[%s6896_s12 + $0x60] sm:$0xff] }
 0x4b9   :  { %v2064_v58 = vsel %vm1202_vm0, %v6024_v15, 0.0  ;;  %2222 = vmatpush.msrb.mxu2 %v5891_v56  ;;  %v2442_v10 = vld [vmem:[%s6896_s12 + $0xe0] sm:$0xff] }
 0x4ba   :  { %v2062_v22 = vrot.slane %v2061_v18, 1  ;;  %v2065_v19 = vrot.slane %v2064_v58, 4  ;;  %2239 = vmatpush.msrb.mxu3 %v5908_v47 }
 0x4bb   :  { %2223 = vmatpush.msrb.mxu2 %v5903_v60 }
 0x4bc   :  { %v2063_v63 = vadd.f32 %v2062_v22, %v2061_v18  ;;  %v2066_v24 = vadd.f32 %v2065_v19, %v2064_v58  ;;  %2240 = vmatpush.msrb.mxu3 %v5920_v53  ;;  %v2365_v18 = vld [vmem:[%s6894_s10 + $0xd8] sm:$0xff]  ;;  %v2348_v19 = vld [vmem:[%s6894_s10 + $0x50] sm:$0xff] }
 0x4bd   :  { %2224 = vmatpush.msrb.mxu2 %v5915_v39  ;;  %v2425_v58 = vld [vmem:[%s6896_s12 + $0x58] sm:$0xff] }
 0x4be   :  { %v2067_v26 = vrot.slane %v2066_v24, 2  ;;  %v2071_v28 = vmul.f32 %v2063_v63, %v5456_v27  ;;  %2241 = vmatpush.msrb.mxu3 %v5932_v30  ;;  %v2441_v22 = vld [vmem:[%s6896_s12 + $0xd8] sm:$0xff]  ;;  %v2364_v63 = vld [vmem:[%s6894_s10 + $0xd0] sm:$0xff] }
 0x4bf   :  { %2225 = vmatpush.msrb.mxu2 %v5927_v46 }
 0x4c0   :  { %v2068_v45 = vadd.f32 %v2067_v26, %v2066_v24  ;;  %2121 = vmatmul.f32.vlgmr.msra.gmra.mxu0 %v2071_v28  ;;  %2242 = vmatpush.msrb.mxu3 %v5944_v17  ;;  %v2424_v24 = vld [vmem:[%s6896_s12 + $0x50] sm:$0xff]  ;;  %v2347_v28 = vld [vmem:[%s6894_s10 + $0x48] sm:$0xff] }
 0x4c1   :  { %2226 = vmatpush.msrb.mxu2 %v5939_v25  ;;  %v2440_v26 = vld [vmem:[%s6896_s12 + $0xd0] sm:$0xff] }
 0x4c2   :  { %v2069_v50 = vrot.slane %v2068_v45, 1  ;;  %2243 = vmatpush.msrb.mxu3 %v5956_v32 }
 0x4c3   :  { %2227 = vmatpush.msrb.mxu2 %v5951_v21 }
 0x4c4   :  { %v2070_v51 = vadd.f32 %v2069_v50, %v2068_v45  ;;  %2244 = vmatpush.msrb.mxu3 %v5968_v34  ;;  %v2363_v45 = vld [vmem:[%s6894_s10 + $0xc8] sm:$0xff] }
 0x4c5   :  { %2228 = vmatpush.msrb.mxu2 %v5963_v57  ;;  %v2423_v50 = vld [vmem:[%s6896_s12 + $0x48] sm:$0xff] }
 0x4c6   :  { %v2072_v61 = vmul.f32 %v2070_v51, %v5456_v27  ;;  %2245 = vmatpush.msrb.mxu3 %v5980_v37  ;;  %v2439_v51 = vld [vmem:[%s6896_s12 + $0xc8] sm:$0xff] }
 0x4c7   :  { %2229 = vmatpush.msrb.mxu2 %v5975_v33 }
 0x4c8   :  { %2141 = vmatmul.f32.vlgmr.msra.gmra.mxu1 %v2072_v61  ;;  %2246 = vmatpush.msrb.mxu3 %v5992_v44  ;;  %v2346_v61 = vld [vmem:[%s6894_s10 + $0x40] sm:$0xff] }
 0x4c9   :  { %2230 = vmatpush.msrb.mxu2 %v5987_v40 }
 0x4ca   :  { %2247 = vmatpush.msrb.mxu3 %v5999_v48 }
 0x4cc   :  { %2248 = vmatpush.msrb.mxu3 %v6005_v54 }
 0x4ce   :  { %2249 = vmatpush.msrb.mxu3 %v6011_v55  ;;  %v2353_v55 = vld [vmem:[%s6894_s10 + $0x78] sm:$0xff] }
 0x4cf   :  { %2374 = vmatpush.msra.mxu0 %v2353_v55  ;;  %v2354_v55 = vld [vmem:[%s6894_s10 + $0x80] sm:$0xff] }
 0x4d0   :  { %2250 = vmatpush.msrb.mxu3 %v6016_v59  ;;  %v2369_v59 = vld [vmem:[%s6894_s10 + $0xf8] sm:$0xff] }
 0x4d1   :  { %2394 = vmatpush.msra.mxu1 %v2369_v59  ;;  %2375 = vmatpush.msra.mxu0 %v2352_v8  ;;  %v2414_v59 = vld [vmem:[%s6896_s12] sm:$0xff] }
 0x4d3   :  { %2395 = vmatpush.msra.mxu1 %v2368_v11  ;;  %2376 = vmatpush.msra.mxu0 %v2351_v52 }
 0x4d5   :  { %2396 = vmatpush.msra.mxu1 %v2367_v16  ;;  %2377 = vmatpush.msra.mxu0 %v2350_v29 }
 0x4d7   :  { %2397 = vmatpush.msra.mxu1 %v2366_v7  ;;  %v1763_v7 = vld [vmem:[#allocation13 + $0x2] ss:$4 sm:$0x3] }
 0x4d9   :  { %2398 = vmatpush.msra.mxu1 %v2365_v18  ;;  %v2319_v18 = vperm.slane %v1763_v7, 0 }
 0x4db   :  { %2399 = vmatpush.msra.mxu1 %v2364_v63 }
 0x4dd   :  { %2400 = vmatpush.msra.mxu1 %v2363_v45 }
 0x4df   :  { %2401 = vmatpush.msra.mxu1 %v2362_v62 }
 0x53d   :  { %v2122_v31 = vpop.f32.mrf.mxu0 }
 0x545   :  { %v2142_v1 = vpop.f32.mrf.mxu1 }
 0x546   :  { %v2143_v42 = vadd.f32 %v2142_v1, %v2122_v31  ;;  %v2361_v31 = vld [vmem:[%s6894_s10 + $0xb8] sm:$0xff] }
 0x547   :  { %v2421_v1 = vld [vmem:[%s6896_s12 + $0x38] sm:$0xff]  ;;  %2402 = vmatpush.msra.mxu1 %v2361_v31 }
 0x548   :  { %4472 = vmatmul.msk.f32.vlgmr.msra.gmra.mxu2 %vm2149_vm15, %v2143_v42  ;;  %4473 = vmatmul.msk.f32.vlgmr.msra.gmra.mxu3 %vm2149_vm15, %v2143_v42  ;;  %v2437_v42 = vld [vmem:[%s6896_s12 + $0xb8] sm:$0xff] }
 0x549   :  { %2450 = vmatpush.msra.mxu2 %v2429_v4  ;;  %2470 = vmatpush.msra.mxu3 %v2445_v6  ;;  %v2430_v4 = vld [vmem:[%s6896_s12 + $0x80] sm:$0xff] }
 0x54b   :  { %2471 = vmatpush.msra.mxu3 %v2444_v14 }
 0x54d   :  { %2472 = vmatpush.msra.mxu3 %v2443_v23 }
 0x54f   :  { %2473 = vmatpush.msra.mxu3 %v2442_v10 }
 0x551   :  { %2474 = vmatpush.msra.mxu3 %v2441_v22 }
 0x553   :  { %2475 = vmatpush.msra.mxu3 %v2440_v26  ;;  %v1761_v26 = vld [vmem:[#allocation13 + $0x1] ss:$4 sm:$0x3] }
 0x555   :  { %2476 = vmatpush.msra.mxu3 %v2439_v51 }
 0x557   :  { %2477 = vmatpush.msra.mxu3 %v2438_v2 }
 0x559   :  { %2478 = vmatpush.msra.mxu3 %v2437_v42 }
 0x5cb   :  { %v2170_v35 = vpop.f32.mrf.mxu2  ;;  %v2190_v38 = vpop.f32.mrf.mxu3 }
 0x5cc   :  { %v2193_v3 = vperm.slane %v2170_v35, 0  ;;  %v2194_v12 = vperm.slane %v2190_v38, 0  ;;  %v2344_v35 = vld [vmem:[%s6894_s10 + $0x30] sm:$0xff] }
 0x5cd   :  { %v2360_v38 = vld [vmem:[%s6894_s10 + $0xb0] sm:$0xff] }
 0x5ce   :  { %v6065_v43 = vsub.f32 %v6020_v13, %v2193_v3  ;;  %v6068_v49 = vsub.f32 %v6024_v15, %v2194_v12  ;;  %v2428_v13 = vld [vmem:[%s6896_s12 + $0x70] sm:$0xff]  ;;  %v2349_v15 = vld [vmem:[%s6894_s10 + $0x58] sm:$0xff]  ;;  %2403 = vmatpush.msra.mxu1 %v2360_v38 }
 0x5cf   :  { %2451 = vmatpush.msra.mxu2 %v2428_v13  ;;  %2378 = vmatpush.msra.mxu0 %v2349_v15  ;;  %v2420_v3 = vld [vmem:[%s6896_s12 + $0x30] sm:$0xff] }
 0x5d0   :  { %v2197_v41 = vmul.f32 %v6065_v43, %v6065_v43  ;;  %v2198_v56 = vmul.f32 %v6068_v49, %v6068_v49  ;;  %v2436_v12 = vld [vmem:[%s6896_s12 + $0xb0] sm:$0xff] }
 0x5d1   :  { %2452 = vmatpush.msra.mxu2 %v2427_v20  ;;  %2379 = vmatpush.msra.mxu0 %v2348_v19  ;;  %v2320_v19 = vperm.slane %v1763_v7, 1  ;;  %v2502_v38 = vld [vmem:[#allocation17 + $0x30] sm:$0xff]  ;;  %v2659_v7 = vld [vmem:[#allocation20 + $0x320] sm:$0xff] }
 0x5d2   :  { %v2199_v36 = vsel %vm1202_vm0, %v2197_v41, 0.0  ;;  %v2206_v60 = vsel %vm1202_vm0, %v2198_v56, 0.0  ;;  %2479 = vmatpush.msra.mxu3 %v2436_v12  ;;  %v2343_v41 = vld [vmem:[%s6894_s10 + $0x28] sm:$0xff] }
 0x5d3   :  { %v2200_v47 = vrot.slane %v2199_v36, 4  ;;  %v2207_v39 = vrot.slane %v2206_v60, 4  ;;  %2453 = vmatpush.msra.mxu2 %v2426_v9  ;;  %2380 = vmatpush.msra.mxu0 %v2347_v28  ;;  %v2359_v56 = vld [vmem:[%s6894_s10 + $0xa8] sm:$0xff] }
 0x5d4   :  { %2404 = vmatpush.msra.mxu1 %v2359_v56  ;;  %v2500_v12 = vld [vmem:[#allocation17 + $0x20] sm:$0xff]  ;;  %v2498_v56 = vld [vmem:[#allocation17 + $0x10] sm:$0xff] }
 0x5d5   :  { %v2201_v53 = vadd.f32 %v2200_v47, %v2199_v36  ;;  %v2208_v46 = vadd.f32 %v2207_v39, %v2206_v60  ;;  %2454 = vmatpush.msra.mxu2 %v2425_v58  ;;  %2381 = vmatpush.msra.mxu0 %v2346_v61  ;;  %v2419_v36 = vld [vmem:[%s6896_s12 + $0x28] sm:$0xff]  ;;  %v2342_v47 = vld [vmem:[%s6894_s10 + $0x20] sm:$0xff]  ;;  %v2330_v61 = vperm.slane %v1761_v26, 0 }
 0x5d6   :  { %v2435_v60 = vld [vmem:[%s6896_s12 + $0xa8] sm:$0xff]  ;;  %v2358_v39 = vld [vmem:[%s6894_s10 + $0xa0] sm:$0xff] }
 0x5d7   :  { %v2202_v30 = vrot.slane %v2201_v53, 2  ;;  %v2209_v25 = vrot.slane %v2208_v46, 2  ;;  %2455 = vmatpush.msra.mxu2 %v2424_v24  ;;  %2382 = vmatpush.msra.mxu0 %v2345_v5 }
 0x5d8   :  { %2480 = vmatpush.msra.mxu3 %v2435_v60  ;;  %2405 = vmatpush.msra.mxu1 %v2358_v39  ;;  %v2619_v60 = vld [vmem:[#allocation20 + $0x1e0] sm:$0xff]  ;;  %v2620_v39 = vld [vmem:[#allocation20 + $0x1e8] sm:$0xff] }
 0x5d9   :  { %v2203_v17 = vadd.f32 %v2202_v30, %v2201_v53  ;;  %v2210_v21 = vadd.f32 %v2209_v25, %v2208_v46  ;;  %2456 = vmatpush.msra.mxu2 %v2423_v50  ;;  %2383 = vmatpush.msra.mxu0 %v2344_v35  ;;  %v2418_v53 = vld [vmem:[%s6896_s12 + $0x20] sm:$0xff]  ;;  %v2341_v30 = vld [vmem:[%s6894_s10 + $0x18] sm:$0xff] }
 0x5da   :  { %v2434_v46 = vld [vmem:[%s6896_s12 + $0xa0] sm:$0xff]  ;;  %v2357_v25 = vld [vmem:[%s6894_s10 + $0x98] sm:$0xff] }
 0x5db   :  { %v2204_v32 = vrot.slane %v2203_v17, 1  ;;  %v2211_v57 = vrot.slane %v2210_v21, 1  ;;  %2457 = vmatpush.msra.mxu2 %v2422_v0  ;;  %2384 = vmatpush.msra.mxu0 %v2343_v41  ;;  %v2331_v0 = vperm.slane %v1761_v26, 1  ;;  %v2501_v41 = vld [vmem:[#allocation17 + $0x28] sm:$0xff] }
 0x5dc   :  { %2481 = vmatpush.msra.mxu3 %v2434_v46  ;;  %2406 = vmatpush.msra.mxu1 %v2357_v25  ;;  %v2684_v46 = vld [vmem:[#allocation20 + $0x3e8] sm:$0xff]  ;;  %v2679_v25 = vld [vmem:[#allocation20 + $0x3c0] sm:$0xff] }
 0x5dd   :  { %v2205_v34 = vadd.f32 %v2204_v32, %v2203_v17  ;;  %v2212_v33 = vadd.f32 %v2211_v57, %v2210_v21  ;;  %2458 = vmatpush.msra.mxu2 %v2421_v1  ;;  %2385 = vmatpush.msra.mxu0 %v2342_v47  ;;  %v2417_v17 = vld [vmem:[%s6896_s12 + $0x18] sm:$0xff]  ;;  %v2340_v32 = vld [vmem:[%s6894_s10 + $0x10] sm:$0xff]  ;;  %v2683_v47 = vld [vmem:[#allocation20 + $0x3e0] sm:$0xff] }
 0x5de   :  { %v2433_v21 = vld [vmem:[%s6896_s12 + $0x98] sm:$0xff]  ;;  %v2356_v57 = vld [vmem:[%s6894_s10 + $0x90] sm:$0xff]  ;;  %v2587_v26 = vld [vmem:[#allocation20 + $0xe0] sm:$0xff] }
 0x5df   :  { %v2213_v37 = vmul.f32 %v2205_v34, %v5456_v27  ;;  %v2214_v40 = vmul.f32 %v2212_v33, %v5456_v27  ;;  %2459 = vmatpush.msra.mxu2 %v2420_v3  ;;  %2386 = vmatpush.msra.mxu0 %v2341_v30  ;;  %v2416_v34 = vld [vmem:[%s6896_s12 + $0x10] sm:$0xff]  ;;  %v2503_v3 = vld [vmem:[#allocation17 + $0x38] sm:$0xff]  ;;  %v2615_v30 = vld [vmem:[#allocation20 + $0x1c0] sm:$0xff] }
 0x5e0   :  { %2482 = vmatpush.msra.mxu3 %v2433_v21  ;;  %v2432_v33 = vld [vmem:[%s6896_s12 + $0x90] sm:$0xff]  ;;  %2407 = vmatpush.msra.mxu1 %v2356_v57  ;;  %v2675_v57 = vld [vmem:[#allocation20 + $0x3a0] sm:$0xff] }
 0x5e1   :  { %2231 = vmatmul.f32.vlgmr.msrb.gmra.mxu2 %v2213_v37  ;;  %2251 = vmatmul.f32.vlgmr.msrb.gmra.mxu3 %v2214_v40  ;;  %v2339_v37 = vld [vmem:[%s6894_s10 + $0x8] sm:$0xff]  ;;  %v2680_v21 = vld [vmem:[#allocation20 + $0x3c8] sm:$0xff] }
 0x5e2   :  { %2460 = vmatpush.msra.mxu2 %v2419_v36  ;;  %2387 = vmatpush.msra.mxu0 %v2340_v32  ;;  %v2355_v40 = vld [vmem:[%s6894_s10 + $0x88] sm:$0xff] }
 0x5e3   :  { %2483 = vmatpush.msra.mxu3 %v2432_v33  ;;  %2408 = vmatpush.msra.mxu1 %v2355_v40  ;;  %v2496_v36 = vld [vmem:[#allocation17] sm:$0xff]  ;;  %v2676_v33 = vld [vmem:[#allocation20 + $0x3a8] sm:$0xff] }
 0x5e4   :  { %2461 = vmatpush.msra.mxu2 %v2418_v53  ;;  %2388 = vmatpush.msra.mxu0 %v2339_v37  ;;  %v4517_v53 = vld [vmem:[#allocation14] ss:$0 sm:$0xff]  ;;  %v2611_v32 = vld [vmem:[#allocation20 + $0x1a0] sm:$0xff] }
 0x5e5   :  { %2409 = vmatpush.msra.mxu1 %v2354_v55  ;;  %v2607_v37 = vld [vmem:[#allocation20 + $0x180] sm:$0xff] }
 0x5e6   :  { %2462 = vmatpush.msra.mxu2 %v2417_v17  ;;  %v2616_v17 = vld [vmem:[#allocation20 + $0x1c8] sm:$0xff]  ;;  %v2671_v40 = vld [vmem:[#allocation20 + $0x380] sm:$0xff] }
 0x5e7   :  { %v2603_v55 = vld [vmem:[#allocation20 + $0x160] sm:$0xff] }
 0x5e8   :  { %2463 = vmatpush.msra.mxu2 %v2416_v34  ;;  %v2612_v34 = vld [vmem:[#allocation20 + $0x1a8] sm:$0xff] }
 0x664   :  { %v2232_v44 = vpop.f32.mrf.mxu2  ;;  %v2252_v48 = vpop.f32.mrf.mxu3 }
 0x665   :  { %v2253_v54 = vadd.f32 %v2252_v48, %v2232_v44  ;;  %v2415_v44 = vld [vmem:[%s6896_s12 + $0x8] sm:$0xff] }
 0x666   :  { %v2431_v48 = vld [vmem:[%s6896_s12 + $0x88] sm:$0xff]  ;;  %2464 = vmatpush.msra.mxu2 %v2415_v44  ;;  %v2608_v44 = vld [vmem:[#allocation20 + $0x188] sm:$0xff] }
 0x667   :  { %4474 = vmatmul.msk.f32.vlgmr.msrb.gmra.mxu0 %vm2149_vm15, %v2253_v54  ;;  %4475 = vmatmul.msk.f32.vlgmr.msrb.gmra.mxu1 %vm2149_vm15, %v2253_v54  ;;  %v2338_v54 = vld [vmem:[%s6894_s10] sm:$0xff] }
 0x668   :  { %2484 = vmatpush.msra.mxu3 %v2431_v48  ;;  %2389 = vmatpush.msra.mxu0 %v2338_v54  ;;  %v2672_v48 = vld [vmem:[#allocation20 + $0x388] sm:$0xff] }
 0x669   :  { %2465 = vmatpush.msra.mxu2 %v2414_v59  ;;  %2546 = vmatpush.msrb.mxu1 %v2503_v3  ;;  %v2667_v59 = vld [vmem:[#allocation20 + $0x360] sm:$0xff] }
 0x66a   :  { %2485 = vmatpush.msra.mxu3 %v2430_v4  ;;  %2526 = vmatpush.msrb.mxu0 %v2502_v38  ;;  %v2644_v38 = vld [vmem:[#allocation20 + $0x2a8] sm:$0xff]  ;;  %v2575_v3 = vld [vmem:[#allocation20 + $0x80] sm:$0xff] }
 0x66b   :  { %2547 = vmatpush.msrb.mxu1 %v2501_v41  ;;  %2696 = vmatpush.msrb.mxu2 %v2619_v60  ;;  %v2576_v41 = vld [vmem:[#allocation20 + $0x88] sm:$0xff] }
 0x66c   :  { %2527 = vmatpush.msrb.mxu0 %v2500_v12  ;;  %2716 = vmatpush.msrb.mxu3 %v2683_v47  ;;  %v2639_v12 = vld [vmem:[#allocation20 + $0x280] sm:$0xff]  ;;  %v2636_v60 = vld [vmem:[#allocation20 + $0x268] sm:$0xff] }
 0x66d   :  { %2697 = vmatpush.msrb.mxu2 %v2615_v30  ;;  %v2567_v47 = vld [vmem:[#allocation20 + $0x40] sm:$0xff]  ;;  %v2632_v30 = vld [vmem:[#allocation20 + $0x248] sm:$0xff] }
 0x66e   :  { %2528 = vmatpush.msrb.mxu0 %v2498_v56  ;;  %2717 = vmatpush.msrb.mxu3 %v2679_v25  ;;  %v2640_v56 = vld [vmem:[#allocation20 + $0x288] sm:$0xff]  ;;  %v2563_v25 = vld [vmem:[#allocation20 + $0x20] sm:$0xff] }
 0x66f   :  { %2698 = vmatpush.msrb.mxu2 %v2611_v32  ;;  %v2564_v32 = vld [vmem:[#allocation20 + $0x28] sm:$0xff] }
 0x670   :  { %2529 = vmatpush.msrb.mxu0 %v2496_v36  ;;  %2718 = vmatpush.msrb.mxu3 %v2675_v57  ;;  %v2635_v36 = vld [vmem:[#allocation20 + $0x260] sm:$0xff]  ;;  %v2628_v57 = vld [vmem:[#allocation20 + $0x228] sm:$0xff] }
 0x671   :  { %2699 = vmatpush.msrb.mxu2 %v2607_v37  ;;  %v2623_v37 = vld [vmem:[#allocation20 + $0x200] sm:$0xff] }
 0x672   :  { %2719 = vmatpush.msrb.mxu3 %v2671_v40 }
 0x673   :  { %2700 = vmatpush.msrb.mxu2 %v2603_v55  ;;  %v2685_v55 = vld [vmem:[#allocation20 + $0x3f0] sm:$0xff] }
 0x674   :  { %2720 = vmatpush.msrb.mxu3 %v2667_v59  ;;  %v2622_v59 = vld [vmem:[#allocation20 + $0x1f8] sm:$0xff] }
 0x6e4   :  { %v2275_v6 = vpop.f32.mrf.mxu0  ;;  %v2295_v8 = vpop.f32.mrf.mxu1 }
 0x6e5   :  { %v2276_v11 = vadd.f32 1e-05, %v2275_v6  ;;  %v2296_v13 = vadd.f32 1e-05, %v2295_v8  ;;  %v2604_v6 = vld [vmem:[#allocation20 + $0x168] sm:$0xff] }
 0x6e6   :  { %v2668_v8 = vld [vmem:[#allocation20 + $0x368] sm:$0xff] }
 0x6e7   :  { %4529 = vrsqrt.f32 %v2276_v11  ;;  %vm2304_vm4 = vweird.f32 %v2276_v11  ;;  %vm2314_vm6 = vweird.f32 %v2296_v13 }
 0x6e8   :  { %4531 = vrsqrt.f32 %v2296_v13 }
 0x6ed   :  { %v4530_v14 = vpop.eup %4529 }
 0x6ee   :  { %v4532_v52 = vpop.eup %4531  ;;  %v2299_v16 = vmul.f32 %v4530_v14, %v2276_v11  ;;  %vm2305_vm1 = vweird.f32 %v4530_v14 }
 0x6ef   :  { %v2309_v20 = vmul.f32 %v4532_v52, %v2296_v13  ;;  %vm2315_vm3 = vweird.f32 %v4532_v52  ;;  %vm2306_vm5 = vmor %vm2304_vm4, %vm2305_vm1  ;;  %v2599_v13 = vld [vmem:[#allocation20 + $0x140] sm:$0xff] }
 0x6f0   :  { %v2300_v23 = vmul.f32 %v4530_v14, %v2299_v16  ;;  %vm2316_vm7 = vmor %vm2314_vm6, %vm2315_vm3  ;;  %v4518_v16 = vld [vmem:[#allocation16] ss:$0 sm:$0xff]  ;;  %2701 = vmatpush.msrb.mxu2 %v2599_v13 }
 0x6f1   :  { %v2310_v29 = vmul.f32 %v4532_v52, %v2309_v20  ;;  %v2600_v20 = vld [vmem:[#allocation20 + $0x148] sm:$0xff]  ;;  %v2682_v13 = vld [vmem:[#allocation20 + $0x3d8] sm:$0xff] }
 0x6f2   :  { %v2301_v9 = vmul.f32 0.5, %v2300_v23  ;;  %v2664_v23 = vld [vmem:[#allocation20 + $0x348] sm:$0xff] }
 0x6f3   :  { %v2311_v10 = vmul.f32 0.5, %v2310_v29  ;;  %v2595_v29 = vld [vmem:[#allocation20 + $0x120] sm:$0xff] }
 0x6f4   :  { %v2302_v15 = vsub.f32 1.5, %v2301_v9  ;;  %v2596_v9 = vld [vmem:[#allocation20 + $0x128] sm:$0xff]  ;;  %2702 = vmatpush.msrb.mxu2 %v2595_v29  ;;  %v2673_v29 = vld [vmem:[#allocation20 + $0x390] sm:$0xff] }
 0x6f5   :  { %v2312_v58 = vsub.f32 1.5, %v2311_v10  ;;  %v2660_v10 = vld [vmem:[#allocation20 + $0x328] sm:$0xff] }
 0x6f6   :  { %v2303_v22 = vmul.f32 %v4530_v14, %v2302_v15 }
 0x6f7   :  { %v2313_v63 = vmul.f32 %v4532_v52, %v2312_v58  ;;  %v2655_v58 = vld [vmem:[#allocation20 + $0x300] sm:$0xff] }
 0x6f8   :  { %v2307_v24 = vsel %vm2306_vm5, %v4530_v14, %v2303_v22  ;;  %v2663_v14 = vld [vmem:[#allocation20 + $0x340] sm:$0xff] }
 0x6f9   :  { %v2323_v28 = vmul.f32 %v2319_v18, %v2307_v24  ;;  %v2317_v45 = vsel %vm2316_vm7, %v4532_v52, %v2313_v63  ;;  %2721 = vmatpush.msrb.mxu3 %v2663_v14  ;;  %v2591_v18 = vld [vmem:[#allocation20 + $0x100] sm:$0xff]  ;;  %v2656_v63 = vld [vmem:[#allocation20 + $0x308] sm:$0xff]  ;;  %v2613_v14 = vld [vmem:[#allocation20 + $0x1b0] sm:$0xff] }
 0x6fa   :  { %v2324_v50 = vmul.f32 %v2320_v19, %v2317_v45  ;;  %v2592_v19 = vld [vmem:[#allocation20 + $0x108] sm:$0xff]  ;;  %2703 = vmatpush.msrb.mxu2 %v2591_v18  ;;  %v2606_v18 = vld [vmem:[#allocation20 + $0x178] sm:$0xff] }
 0x6fb   :  { %v2325_v51 = vperm.slane %v2323_v28, 0  ;;  %2722 = vmatpush.msrb.mxu3 %v2659_v7  ;;  %v2651_v28 = vld [vmem:[#allocation20 + $0x2e0] sm:$0xff]  ;;  %v2610_v7 = vld [vmem:[#allocation20 + $0x198] sm:$0xff] }
 0x6fc   :  { %v2326_v62 = vperm.slane %v2324_v50, 0  ;;  %v2588_v50 = vld [vmem:[#allocation20 + $0xe8] sm:$0xff]  ;;  %2704 = vmatpush.msrb.mxu2 %v2587_v26  ;;  %v2597_v26 = vld [vmem:[#allocation20 + $0x130] sm:$0xff] }
 0x6fd   :  { %v2327_v2 = vmul.f32 %v2325_v51, %v6065_v43  ;;  %v2499_v43 = vld [vmem:[#allocation17 + $0x18] sm:$0xff]  ;;  %2723 = vmatpush.msrb.mxu3 %v2655_v58  ;;  %v2652_v51 = vld [vmem:[#allocation20 + $0x2e8] sm:$0xff] }
 0x6fe   :  { %v2328_v5 = vmul.f32 %v2326_v62, %v6068_v49  ;;  %v2497_v49 = vld [vmem:[#allocation17 + $0x8] sm:$0xff]  ;;  %2548 = vmatpush.msrb.mxu1 %v2499_v43  ;;  %v2670_v58 = vld [vmem:[#allocation20 + $0x378] sm:$0xff] }
 0x6ff   :  { %v2334_v31 = vadd.f32 %v2330_v61, %v2327_v2  ;;  %v2583_v61 = vld [vmem:[#allocation20 + $0xc0] sm:$0xff]  ;;  %2724 = vmatpush.msrb.mxu3 %v2651_v28  ;;  %v2584_v2 = vld [vmem:[#allocation20 + $0xc8] sm:$0xff]  ;;  %v2661_v28 = vld [vmem:[#allocation20 + $0x330] sm:$0xff] }
 0x700   :  { %v2335_v1 = vadd.f32 %v2331_v0, %v2328_v5  ;;  %2549 = vmatpush.msrb.mxu1 %v2497_v49  ;;  %v2647_v62 = vld [vmem:[#allocation20 + $0x2c0] sm:$0xff]  ;;  %v2648_v5 = vld [vmem:[#allocation20 + $0x2c8] sm:$0xff]  ;;  %2705 = vmatpush.msrb.mxu2 %v2583_v61  ;;  %v2657_v61 = vld [vmem:[#allocation20 + $0x310] sm:$0xff] }
 0x701   :  { %v2336_v42 = vmax.f32 %v2334_v31, 0.0  ;;  %v2579_v31 = vld [vmem:[#allocation20 + $0xa0] sm:$0xff]  ;;  %2725 = vmatpush.msrb.mxu3 %v2647_v62  ;;  %v2572_v49 = vld [vmem:[#allocation20 + $0x68] sm:$0xff]  ;;  %v2594_v62 = vld [vmem:[#allocation20 + $0x118] sm:$0xff] }
 0x702   :  { %v2337_v35 = vmax.f32 %v2335_v1, 0.0  ;;  %v2643_v1 = vld [vmem:[#allocation20 + $0x2a0] sm:$0xff]  ;;  %2706 = vmatpush.msrb.mxu2 %v2579_v31  ;;  %v2590_v31 = vld [vmem:[#allocation20 + $0xf8] sm:$0xff] }
 0x703   :  { %2390 = vmatmul.f32.vlgmr.msra.gmra.mxu0 %v2336_v42  ;;  %2466 = vmatmul.f32.vlgmr.msra.gmra.mxu2 %v2336_v42  ;;  %v2571_v43 = vld [vmem:[#allocation20 + $0x60] sm:$0xff] }
 0x704   :  { %2410 = vmatmul.f32.vlgmr.msra.gmra.mxu1 %v2337_v35  ;;  %2486 = vmatmul.f32.vlgmr.msra.gmra.mxu3 %v2337_v35  ;;  %v2580_v35 = vld [vmem:[#allocation20 + $0xa8] sm:$0xff] }
 0x705   :  { %2736 = vmatpush.msra.mxu0 %v2620_v39  ;;  %2756 = vmatpush.msra.mxu1 %v2684_v46  ;;  %v2631_v39 = vld [vmem:[#allocation20 + $0x240] sm:$0xff]  ;;  %v2568_v46 = vld [vmem:[#allocation20 + $0x48] sm:$0xff] }
 0x706   :  { %2726 = vmatpush.msrb.mxu3 %v2643_v1  ;;  %2707 = vmatpush.msrb.mxu2 %v2575_v3  ;;  %v2654_v1 = vld [vmem:[#allocation20 + $0x2f8] sm:$0xff] }
 0x707   :  { %2737 = vmatpush.msra.mxu0 %v2616_v17  ;;  %2757 = vmatpush.msra.mxu1 %v2680_v21  ;;  %v2627_v17 = vld [vmem:[#allocation20 + $0x220] sm:$0xff]  ;;  %v2650_v3 = vld [vmem:[#allocation20 + $0x2d8] sm:$0xff] }
 0x708   :  { %2727 = vmatpush.msrb.mxu3 %v2639_v12  ;;  %2708 = vmatpush.msrb.mxu2 %v2571_v43  ;;  %v2581_v12 = vld [vmem:[#allocation20 + $0xb0] sm:$0xff]  ;;  %v2646_v43 = vld [vmem:[#allocation20 + $0x2b8] sm:$0xff] }
 0x709   :  { %2738 = vmatpush.msra.mxu0 %v2612_v34  ;;  %2758 = vmatpush.msra.mxu1 %v2676_v33  ;;  %v2559_v33 = vld [vmem:[#allocation20] sm:$0xff] }
 0x70a   :  { %2728 = vmatpush.msrb.mxu3 %v2635_v36  ;;  %2709 = vmatpush.msrb.mxu2 %v2567_v47  ;;  %v2577_v36 = vld [vmem:[#allocation20 + $0x90] sm:$0xff]  ;;  %v2642_v47 = vld [vmem:[#allocation20 + $0x298] sm:$0xff] }
 0x70b   :  { %2739 = vmatpush.msra.mxu0 %v2608_v44  ;;  %2759 = vmatpush.msra.mxu1 %v2672_v48  ;;  %v2560_v44 = vld [vmem:[#allocation20 + $0x8] sm:$0xff] }
 0x70c   :  { %2729 = vmatpush.msrb.mxu3 %v2631_v39  ;;  %2710 = vmatpush.msrb.mxu2 %v2563_v25  ;;  %v2624_v48 = vld [vmem:[#allocation20 + $0x208] sm:$0xff]  ;;  %v2573_v39 = vld [vmem:[#allocation20 + $0x70] sm:$0xff] }
 0x70d   :  { %2740 = vmatpush.msra.mxu0 %v2604_v6  ;;  %2760 = vmatpush.msra.mxu1 %v2668_v8  ;;  %v2617_v6 = vld [vmem:[#allocation20 + $0x1d0] sm:$0xff] }
 0x70e   :  { %2730 = vmatpush.msrb.mxu3 %v2627_v17  ;;  %2711 = vmatpush.msrb.mxu2 %v2559_v33  ;;  %v2681_v8 = vld [vmem:[#allocation20 + $0x3d0] sm:$0xff]  ;;  %v2566_v33 = vld [vmem:[#allocation20 + $0x38] sm:$0xff] }
 0x70f   :  { %2741 = vmatpush.msra.mxu0 %v2600_v20  ;;  %2761 = vmatpush.msra.mxu1 %v2664_v23  ;;  %v2678_v20 = vld [vmem:[#allocation20 + $0x3b8] sm:$0xff]  ;;  %v2609_v23 = vld [vmem:[#allocation20 + $0x190] sm:$0xff] }
 0x710   :  { %2731 = vmatpush.msrb.mxu3 %v2623_v37  ;;  %v2569_v25 = vld [vmem:[#allocation20 + $0x50] sm:$0xff]  ;;  %v2630_v37 = vld [vmem:[#allocation20 + $0x238] sm:$0xff] }
 0x711   :  { %2742 = vmatpush.msra.mxu0 %v2596_v9  ;;  %2762 = vmatpush.msra.mxu1 %v2660_v10  ;;  %v2674_v9 = vld [vmem:[#allocation20 + $0x398] sm:$0xff]  ;;  %v2605_v10 = vld [vmem:[#allocation20 + $0x170] sm:$0xff] }
 0x712   :  { %2796 = vmatpush.msra.mxu3 %v2685_v55  ;;  %v2633_v17 = vld [vmem:[#allocation20 + $0x250] sm:$0xff]  ;;  %v2504_v55 = vld [vmem:[#allocation19] sm:$0x3] }
 0x713   :  { %2743 = vmatpush.msra.mxu0 %v2592_v19  ;;  %2763 = vmatpush.msra.mxu1 %v2656_v63  ;;  %v2665_v19 = vld [vmem:[#allocation20 + $0x350] sm:$0xff]  ;;  %v2602_v63 = vld [vmem:[#allocation20 + $0x158] sm:$0xff] }
 0x714   :  { %2797 = vmatpush.msra.mxu3 %v2681_v8 }
 0x715   :  { %2744 = vmatpush.msra.mxu0 %v2588_v50  ;;  %2764 = vmatpush.msra.mxu1 %v2652_v51  ;;  %v2662_v50 = vld [vmem:[#allocation20 + $0x338] sm:$0xff]  ;;  %v2593_v51 = vld [vmem:[#allocation20 + $0x110] sm:$0xff] }
 0x717   :  { %2745 = vmatpush.msra.mxu0 %v2584_v2  ;;  %2765 = vmatpush.msra.mxu1 %v2648_v5  ;;  %v2589_v2 = vld [vmem:[#allocation20 + $0xf0] sm:$0xff] }
 0x718   :  { %v2653_v5 = vld [vmem:[#allocation20 + $0x2f0] sm:$0xff] }
 0x719   :  { %2746 = vmatpush.msra.mxu0 %v2580_v35  ;;  %2766 = vmatpush.msra.mxu1 %v2644_v38  ;;  %v2649_v35 = vld [vmem:[#allocation20 + $0x2d0] sm:$0xff]  ;;  %v2586_v38 = vld [vmem:[#allocation20 + $0xd8] sm:$0xff] }
 0x71b   :  { %2747 = vmatpush.msra.mxu0 %v2576_v41  ;;  %2767 = vmatpush.msra.mxu1 %v2640_v56  ;;  %v2645_v41 = vld [vmem:[#allocation20 + $0x2b0] sm:$0xff]  ;;  %v2582_v56 = vld [vmem:[#allocation20 + $0xb8] sm:$0xff] }
 0x71d   :  { %2748 = vmatpush.msra.mxu0 %v2572_v49  ;;  %2768 = vmatpush.msra.mxu1 %v2636_v60  ;;  %v2641_v49 = vld [vmem:[#allocation20 + $0x290] sm:$0xff]  ;;  %v2578_v60 = vld [vmem:[#allocation20 + $0x98] sm:$0xff] }
 0x71f   :  { %2749 = vmatpush.msra.mxu0 %v2568_v46  ;;  %2769 = vmatpush.msra.mxu1 %v2632_v30  ;;  %v2574_v46 = vld [vmem:[#allocation20 + $0x78] sm:$0xff] }
 0x720   :  { %v2638_v30 = vld [vmem:[#allocation20 + $0x278] sm:$0xff] }
 0x721   :  { %2750 = vmatpush.msra.mxu0 %v2564_v32  ;;  %2770 = vmatpush.msra.mxu1 %v2628_v57  ;;  %v2634_v32 = vld [vmem:[#allocation20 + $0x258] sm:$0xff]  ;;  %v2565_v57 = vld [vmem:[#allocation20 + $0x30] sm:$0xff] }
 0x723   :  { %2751 = vmatpush.msra.mxu0 %v2560_v44  ;;  %2771 = vmatpush.msra.mxu1 %v2624_v48  ;;  %v2625_v44 = vld [vmem:[#allocation20 + $0x210] sm:$0xff]  ;;  %v2562_v48 = vld [vmem:[#allocation20 + $0x18] sm:$0xff] }
 0x780   :  { %v2391_v54 = vpop.f32.mrf.mxu0 }
 0x781   :  { %v2392_v4 = vadd.f32 %v4517_v53, %v2391_v54  ;;  %v2411_v11 = vpop.f32.mrf.mxu1  ;;  %v2490_v53 = vld [vmem:[#allocation2] sm:$0x3]  ;;  %v2621_v54 = vld [vmem:[#allocation20 + $0x1f0] sm:$0xff] }
 0x782   :  { %2776 = vmatpush.msra.mxu2 %v2621_v54  ;;  %v2626_v54 = vld [vmem:[#allocation20 + $0x218] sm:$0xff] }
 0x783   :  { %v6274_v52 = vadd.f32 %v2411_v11, %v2392_v4  ;;  %v2686_v4 = vld [vmem:[#allocation20 + $0x3f8] sm:$0xff] }
 0x784   :  { %v2618_v11 = vld [vmem:[#allocation20 + $0x1d8] sm:$0xff]  ;;  %2777 = vmatpush.msra.mxu2 %v2617_v6 }
 0x785   :  { %4417 = vst.msk [vmem:[#allocation28] sm:$0x3] %vm4416_vm8, %v6274_v52 }
 0x786   :  { %v2467_v15 = vpop.f32.mrf.mxu2  ;;  %2778 = vmatpush.msra.mxu2 %v2613_v14  ;;  %v6283_v14 = vld [vmem:[%s6901_s17 + $0xf8] sm:$0xff] }
 0x787   :  { %v2468_v22 = vadd.f32 %v4518_v16, %v2467_v15  ;;  %v2487_v24 = vpop.f32.mrf.mxu3  ;;  %v2614_v16 = vld [vmem:[#allocation20 + $0x1b8] sm:$0xff]  ;;  %v2669_v15 = vld [vmem:[#allocation20 + $0x370] sm:$0xff] }
 0x788   :  { %2779 = vmatpush.msra.mxu2 %v2609_v23  ;;  %v6303_v23 = vld [vmem:[%s6901_s17 + $0x70] sm:$0xff] }
 0x789   :  { %v2488_v45 = vadd.f32 %v2487_v24, %v2468_v22  ;;  %v2601_v22 = vld [vmem:[#allocation20 + $0x150] sm:$0xff]  ;;  %v2666_v24 = vld [vmem:[#allocation20 + $0x358] sm:$0xff] }
 0x78a   :  { %2780 = vmatpush.msra.mxu2 %v2605_v10  ;;  %v6331_v10 = vld [vmem:[%s6901_s17 + $0xe0] sm:$0xff] }
 0x78b   :  { %v2491_v0 = vmul.f32 0.5, %v2488_v45  ;;  %4418 = vst.msk [vmem:[#allocation29] sm:$0x3] %vm4416_vm8, %v2488_v45  ;;  %v2598_v45 = vld [vmem:[#allocation20 + $0x138] sm:$0xff] }
 0x78c   :  { %2781 = vmatpush.msra.mxu2 %v2601_v22  ;;  %v6354_v22 = vld [vmem:[%s6901_s17 + $0xc8] sm:$0xff]  ;;  %4442 = dma.vmem_to_hbm [thread:$0]  %s4438_s8, 32, %s4440_s3, [#allocation30]  }
 0x78d   :  { %v2492_v42 = vmul.f32 1.442695, %v2491_v0  ;;  %v2658_v0 = vld [vmem:[#allocation20 + $0x318] sm:$0xff] }
 0x78e   :  { %2782 = vmatpush.msra.mxu2 %v2597_v26  ;;  %v6377_v26 = vld [vmem:[%s6901_s17 + $0x178] sm:$0xff] }
 0x78f   :  { %4533 = vpow2.f32 %v2492_v42  ;;  %v2585_v42 = vld [vmem:[#allocation20 + $0xd0] sm:$0xff] }
 0x790   :  { %2783 = vmatpush.msra.mxu2 %v2593_v51  ;;  %v6401_v51 = vld [vmem:[%s6901_s17 + $0x170] sm:$0xff] }
 0x792   :  { %2784 = vmatpush.msra.mxu2 %v2589_v2  ;;  %v6425_v2 = vld [vmem:[%s6901_s17 + $0x168] sm:$0xff] }
 0x794   :  { %2785 = vmatpush.msra.mxu2 %v2585_v42  ;;  %v6449_v42 = vld [vmem:[%s6901_s17 + $0x160] sm:$0xff] }
 0x795   :  { %v4534_v21 = vpop.eup %4533 }
 0x796   :  { %v2494_v34 = vmul.f32 %v4534_v21, %v2490_v53  ;;  %2786 = vmatpush.msra.mxu2 %v2581_v12  ;;  %v2637_v53 = vld [vmem:[#allocation20 + $0x270] sm:$0xff]  ;;  %v2570_v21 = vld [vmem:[#allocation20 + $0x58] sm:$0xff] }
 0x797   :  { %v6473_v12 = vld [vmem:[%s6901_s17 + $0x158] sm:$0xff] }
 0x798   :  { %v2495_v40 = vadd.f32 %v2494_v34, %v6274_v52  ;;  %v2677_v52 = vld [vmem:[#allocation20 + $0x3b0] sm:$0xff]  ;;  %2787 = vmatpush.msra.mxu2 %v2577_v36  ;;  %v6497_v36 = vld [vmem:[%s6901_s17 + $0x150] sm:$0xff] }
 0x799   :  { %2798 = vmatpush.msra.mxu3 %v2677_v52  ;;  %v2629_v34 = vld [vmem:[#allocation20 + $0x230] sm:$0xff] }
 0x79a   :  { %4476 = vmatmul.msk.f32.vlgmr.msrb.gmra.mxu0 %vm2510_vm9, %v2495_v40  ;;  %4477 = vmatmul.msk.f32.vlgmr.msrb.gmra.mxu1 %vm2510_vm9, %v2495_v40  ;;  %v2561_v40 = vld [vmem:[#allocation20 + $0x10] sm:$0xff] }
 0x79b   :  { %2816 = vmatpush.msrb.mxu0 %v2622_v59  ;;  %2836 = vmatpush.msrb.mxu1 %v2686_v4  ;;  %v2506_v59 = vperm.slane %v2504_v55, 0  ;;  %v2507_v4 = vperm.slane %v2504_v55, 1  ;;  %v6288_v52 = vld [vmem:[%s6901_s17 + $0x78] sm:$0xff]  ;;  %v6619_v55 = vld [vmem:[%s6901_s17] sm:$0xff] }
 0x79c   :  { %2799 = vmatpush.msra.mxu3 %v2673_v29  ;;  %2788 = vmatpush.msra.mxu2 %v2573_v39  ;;  %v6310_v29 = vld [vmem:[%s6901_s17 + $0x1f0] sm:$0xff]  ;;  %v6521_v39 = vld [vmem:[%s6901_s17 + $0x148] sm:$0xff]  ;;  %7044 = vst [vmem:[#allocation63_spill] sm:$0xff] %v6619_v55 }
 0x79d   :  { %2817 = vmatpush.msrb.mxu0 %v2618_v11  ;;  %2837 = vmatpush.msrb.mxu1 %v2682_v13 }
 0x79e   :  { %2800 = vmatpush.msra.mxu3 %v2669_v15  ;;  %2789 = vmatpush.msra.mxu2 %v2569_v25  ;;  %v6336_v15 = vld [vmem:[%s6901_s17 + $0xd8] sm:$0xff]  ;;  %v6545_v25 = vld [vmem:[%s6901_s17 + $0x140] sm:$0xff] }
 0x79f   :  { %2818 = vmatpush.msrb.mxu0 %v2614_v16  ;;  %2838 = vmatpush.msrb.mxu1 %v2678_v20  ;;  %v6293_v16 = vld [vmem:[%s6901_s17 + $0x1f8] sm:$0xff]  ;;  %v6298_v20 = vld [vmem:[%s6901_s17 + $0xf0] sm:$0xff] }
 0x7a0   :  { %2801 = vmatpush.msra.mxu3 %v2665_v19  ;;  %2790 = vmatpush.msra.mxu2 %v2565_v57  ;;  %v6359_v19 = vld [vmem:[%s6901_s17 + $0x1e8] sm:$0xff]  ;;  %v6569_v57 = vld [vmem:[%s6901_s17 + $0x138] sm:$0xff] }
 0x7a1   :  { %2819 = vmatpush.msrb.mxu0 %v2610_v7  ;;  %2839 = vmatpush.msrb.mxu1 %v2674_v9  ;;  %v6315_v7 = vld [vmem:[%s6901_s17 + $0xe8] sm:$0xff] }
 0x7a2   :  { %2802 = vmatpush.msra.mxu3 %v2661_v28  ;;  %2791 = vmatpush.msra.mxu2 %v2561_v40  ;;  %v6321_v9 = vld [vmem:[%s6901_s17 + $0x68] sm:$0xff]  ;;  %v6384_v28 = vld [vmem:[%s6901_s17 + $0x1e0] sm:$0xff]  ;;  %v6593_v40 = vld [vmem:[%s6901_s17 + $0x198] sm:$0xff] }
 0x7a3   :  { %2820 = vmatpush.msrb.mxu0 %v2606_v18  ;;  %2840 = vmatpush.msrb.mxu1 %v2670_v58  ;;  %v6342_v18 = vld [vmem:[%s6901_s17 + $0xd0] sm:$0xff]  ;;  %v6349_v58 = vld [vmem:[%s6901_s17 + $0x60] sm:$0xff]  ;;  %7041 = vst [vmem:[#allocation47_spill] sm:$0xff] %v6593_v40 }
 0x7a4   :  { %2803 = vmatpush.msra.mxu3 %v2657_v61  ;;  %v6408_v61 = vld [vmem:[%s6901_s17 + $0x1d8] sm:$0xff] }
 0x7a5   :  { %2821 = vmatpush.msrb.mxu0 %v2602_v63  ;;  %2841 = vmatpush.msrb.mxu1 %v2666_v24  ;;  %v6367_v63 = vld [vmem:[%s6901_s17 + $0x58] sm:$0xff]  ;;  %v6372_v24 = vld [vmem:[%s6901_s17 + $0xc0] sm:$0xff] }
 0x7a6   :  { %2804 = vmatpush.msra.mxu3 %v2653_v5  ;;  %v6432_v5 = vld [vmem:[%s6901_s17 + $0x1d0] sm:$0xff] }
 0x7a7   :  { %2822 = vmatpush.msrb.mxu0 %v2598_v45  ;;  %2842 = vmatpush.msrb.mxu1 %v2662_v50  ;;  %v6391_v45 = vld [vmem:[%s6901_s17 + $0x50] sm:$0xff]  ;;  %v6396_v50 = vld [vmem:[%s6901_s17 + $0xb8] sm:$0xff] }
 0x7a8   :  { %2805 = vmatpush.msra.mxu3 %v2649_v35  ;;  %v6456_v35 = vld [vmem:[%s6901_s17 + $0x1c8] sm:$0xff] }
 0x7a9   :  { %2823 = vmatpush.msrb.mxu0 %v2594_v62  ;;  %2843 = vmatpush.msrb.mxu1 %v2658_v0  ;;  %v6415_v62 = vld [vmem:[%s6901_s17 + $0x48] sm:$0xff]  ;;  %v6420_v0 = vld [vmem:[%s6901_s17 + $0xb0] sm:$0xff] }
 0x7aa   :  { %2806 = vmatpush.msra.mxu3 %v2645_v41  ;;  %v6480_v41 = vld [vmem:[%s6901_s17 + $0x1c0] sm:$0xff] }
 0x7ab   :  { %2824 = vmatpush.msrb.mxu0 %v2590_v31  ;;  %2844 = vmatpush.msrb.mxu1 %v2654_v1  ;;  %v6439_v31 = vld [vmem:[%s6901_s17 + $0x40] sm:$0xff]  ;;  %v6444_v1 = vld [vmem:[%s6901_s17 + $0xa8] sm:$0xff] }
 0x7ac   :  { %2807 = vmatpush.msra.mxu3 %v2641_v49  ;;  %7029 = vst [vmem:[#allocation43_spill] sm:$0xff] %v6444_v1  ;;  %v6504_v49 = vld [vmem:[%s6901_s17 + $0x1b8] sm:$0xff] }
 0x7ad   :  { %2825 = vmatpush.msrb.mxu0 %v2586_v38  ;;  %2845 = vmatpush.msrb.mxu1 %v2650_v3  ;;  %v6463_v38 = vld [vmem:[%s6901_s17 + $0x38] sm:$0xff]  ;;  %v6468_v3 = vld [vmem:[%s6901_s17 + $0xa0] sm:$0xff] }
 0x7ae   :  { %2808 = vmatpush.msra.mxu3 %v2637_v53  ;;  %7030 = vst [vmem:[#allocation46_spill] sm:$0xff] %v6468_v3  ;;  %v6528_v53 = vld [vmem:[%s6901_s17 + $0x1b0] sm:$0xff] }
 0x7af   :  { %2826 = vmatpush.msrb.mxu0 %v2582_v56  ;;  %2846 = vmatpush.msrb.mxu1 %v2646_v43  ;;  %v6487_v56 = vld [vmem:[%s6901_s17 + $0x30] sm:$0xff]  ;;  %v6492_v43 = vld [vmem:[%s6901_s17 + $0x98] sm:$0xff] }
 0x7b0   :  { %2809 = vmatpush.msra.mxu3 %v2633_v17  ;;  %7031 = vst [vmem:[#allocation54_spill] sm:$0xff] %v6492_v43  ;;  %v6552_v17 = vld [vmem:[%s6901_s17 + $0x1a8] sm:$0xff] }
 0x7b1   :  { %2827 = vmatpush.msrb.mxu0 %v2578_v60  ;;  %2847 = vmatpush.msrb.mxu1 %v2642_v47  ;;  %v6511_v60 = vld [vmem:[%s6901_s17 + $0x28] sm:$0xff]  ;;  %v6516_v47 = vld [vmem:[%s6901_s17 + $0x90] sm:$0xff]  ;;  %7036 = vst [vmem:[#allocation61_spill] sm:$0xff] %v6552_v17 }
 0x7b2   :  { %2810 = vmatpush.msra.mxu3 %v2629_v34  ;;  %7032 = vst [vmem:[#allocation60_spill] sm:$0xff] %v6511_v60  ;;  %v6576_v34 = vld [vmem:[%s6901_s17 + $0x1a0] sm:$0xff] }
 0x7b3   :  { %2828 = vmatpush.msrb.mxu0 %v2574_v46  ;;  %2848 = vmatpush.msrb.mxu1 %v2638_v30  ;;  %7033 = vst [vmem:[#allocation44_spill] sm:$0xff] %v6516_v47  ;;  %v6535_v46 = vld [vmem:[%s6901_s17 + $0x20] sm:$0xff]  ;;  %v6540_v30 = vld [vmem:[%s6901_s17 + $0x88] sm:$0xff] }
 0x7b4   :  { %2811 = vmatpush.msra.mxu3 %v2625_v44  ;;  %7034 = vst [vmem:[#allocation48_spill] sm:$0xff] %v6535_v46  ;;  %v6601_v44 = vld [vmem:[%s6901_s17 + $0x8] sm:$0xff] }
 0x7b5   :  { %2829 = vmatpush.msrb.mxu0 %v2570_v21  ;;  %2849 = vmatpush.msrb.mxu1 %v2634_v32  ;;  %7035 = vst [vmem:[#allocation55_spill] sm:$0xff] %v6540_v30  ;;  %v6559_v21 = vld [vmem:[%s6901_s17 + $0x18] sm:$0xff]  ;;  %v6564_v32 = vld [vmem:[%s6901_s17 + $0x80] sm:$0xff] }
 0x7b6   :  { %7037 = vst [vmem:[#allocation45_spill] sm:$0xff] %v6559_v21 }
 0x7b7   :  { %2830 = vmatpush.msrb.mxu0 %v2566_v33  ;;  %2850 = vmatpush.msrb.mxu1 %v2630_v37  ;;  %7038 = vst [vmem:[#allocation50_spill] sm:$0xff] %v6564_v32  ;;  %v6583_v33 = vld [vmem:[%s6901_s17 + $0x10] sm:$0xff] }
 0x7b8   :  { %7039 = vst [vmem:[#allocation56_spill] sm:$0xff] %v6576_v34  ;;  %v6588_v37 = vld [vmem:[%s6901_s17 + $0x130] sm:$0xff] }
 0x7b9   :  { %2831 = vmatpush.msrb.mxu0 %v2562_v48  ;;  %2851 = vmatpush.msrb.mxu1 %v2626_v54  ;;  %7040 = vst [vmem:[#allocation62_spill] sm:$0xff] %v6583_v33  ;;  %v6606_v48 = vld [vmem:[%s6901_s17 + $0x128] sm:$0xff]  ;;  %v6611_v54 = vld [vmem:[%s6901_s17 + $0x190] sm:$0xff] }
 0x7ba   :  { %7042 = vst [vmem:[#allocation51_spill] sm:$0xff] %v6601_v44 }
 0x7bb   :  { %7043 = vst [vmem:[#allocation57_spill] sm:$0xff] %v6611_v54 }
 0x817   :  { %v2531_v6 = vpop.f32.mrf.mxu0  ;;  %v2551_v8 = vpop.f32.mrf.mxu1 }
 0x818   :  { %v2532_v11 = vadd.f32 %v2531_v6, %v2506_v59  ;;  %v2552_v13 = vadd.f32 %v2551_v8, %v2507_v4  ;;  %v6624_v59 = vld [vmem:[%s6901_s17 + $0x120] sm:$0xff]  ;;  %v6629_v4 = vld [vmem:[%s6901_s17 + $0x188] sm:$0xff]  ;;  %v6637_v8 = vld [vmem:[%s6901_s17 + $0x118] sm:$0xff] }
 0x819   :  { %7045 = vst [vmem:[#allocation49_spill] sm:$0xff] %v6624_v59  ;;  %v2554_v6 = vld [vmem:[#allocation23] ss:$4 sm:$0xf] }
 0x81a   :  { %2712 = vmatmul.f32.vlgmr.msrb.gmra.mxu2 %v2532_v11  ;;  %2732 = vmatmul.f32.vlgmr.msrb.gmra.mxu3 %v2552_v13  ;;  %7046 = vst [vmem:[#allocation52_spill] sm:$0xff] %v6629_v4 }
 0x81b   :  { %2752 = vmatmul.f32.vlgmr.msra.gmra.mxu0 %v2532_v11  ;;  %2772 = vmatmul.f32.vlgmr.msra.gmra.mxu1 %v2552_v13  ;;  %7047 = vst [vmem:[#allocation58_spill] sm:$0xff] %v6637_v8 }
 0x81c   :  { %2972 = vmatpush.msrb.mxu3 %v6283_v14  ;;  %2952 = vmatpush.msrb.mxu2 %v6288_v52 }
 0x81d   :  { %3012 = vmatpush.msra.mxu1 %v6293_v16  ;;  %2992 = vmatpush.msra.mxu0 %v6377_v26 }
 0x81e   :  { %2973 = vmatpush.msrb.mxu3 %v6298_v20  ;;  %2953 = vmatpush.msrb.mxu2 %v6303_v23 }
 0x81f   :  { %3013 = vmatpush.msra.mxu1 %v6310_v29  ;;  %2993 = vmatpush.msra.mxu0 %v6401_v51 }
 0x820   :  { %2974 = vmatpush.msrb.mxu3 %v6315_v7  ;;  %2954 = vmatpush.msrb.mxu2 %v6321_v9 }
 0x821   :  { %3014 = vmatpush.msra.mxu1 %v6359_v19  ;;  %2994 = vmatpush.msra.mxu0 %v6425_v2 }
 0x822   :  { %2792 = vmatmul.f32.vlgmr.msra.gmra.mxu2 %v2532_v11  ;;  %2812 = vmatmul.f32.vlgmr.msra.gmra.mxu3 %v2552_v13 }
 0x823   :  { %2832 = vmatmul.f32.vlgmr.msrb.gmra.mxu0 %v2532_v11  ;;  %2852 = vmatmul.f32.vlgmr.msrb.gmra.mxu1 %v2552_v13  ;;  %v6642_v11 = vld [vmem:[%s6901_s17 + $0x180] sm:$0xff]  ;;  %v6649_v13 = vld [vmem:[%s6901_s17 + $0x110] sm:$0xff] }
 0x824   :  { %2975 = vmatpush.msrb.mxu3 %v6331_v10  ;;  %2955 = vmatpush.msrb.mxu2 %v6349_v58  ;;  %7048 = vst [vmem:[#allocation64_spill] sm:$0xff] %v6642_v11 }
 0x825   :  { %3015 = vmatpush.msra.mxu1 %v6384_v28  ;;  %2995 = vmatpush.msra.mxu0 %v6449_v42  ;;  %7049 = vst [vmem:[#allocation42_spill] sm:$0xff] %v6649_v13 }
 0x826   :  { %2976 = vmatpush.msrb.mxu3 %v6336_v15  ;;  %2956 = vmatpush.msrb.mxu2 %v6367_v63 }
 0x827   :  { %3016 = vmatpush.msra.mxu1 %v6408_v61  ;;  %2996 = vmatpush.msra.mxu0 %v6473_v12 }
 0x828   :  { %2977 = vmatpush.msrb.mxu3 %v6342_v18  ;;  %2957 = vmatpush.msrb.mxu2 %v6391_v45 }
 0x829   :  { %3017 = vmatpush.msra.mxu1 %v6432_v5  ;;  %2997 = vmatpush.msra.mxu0 %v6497_v36 }
 0x82a   :  { %2978 = vmatpush.msrb.mxu3 %v6354_v22  ;;  %2958 = vmatpush.msrb.mxu2 %v6415_v62 }
 0x82b   :  { %3018 = vmatpush.msra.mxu1 %v6456_v35  ;;  %2998 = vmatpush.msra.mxu0 %v6521_v39 }
 0x82c   :  { %2979 = vmatpush.msrb.mxu3 %v6372_v24  ;;  %2959 = vmatpush.msrb.mxu2 %v6439_v31 }
 0x82d   :  { %3019 = vmatpush.msra.mxu1 %v6480_v41  ;;  %2999 = vmatpush.msra.mxu0 %v6545_v25 }
 0x82e   :  { %2980 = vmatpush.msrb.mxu3 %v6396_v50  ;;  %2960 = vmatpush.msrb.mxu2 %v6463_v38 }
 0x82f   :  { %3020 = vmatpush.msra.mxu1 %v6504_v49  ;;  %3000 = vmatpush.msra.mxu0 %v6569_v57 }
 0x830   :  { %2981 = vmatpush.msrb.mxu3 %v6420_v0  ;;  %2961 = vmatpush.msrb.mxu2 %v6487_v56 }
 0x831   :  { %3021 = vmatpush.msra.mxu1 %v6528_v53  ;;  %3001 = vmatpush.msra.mxu0 %v6588_v37 }
 0x832   :  { %2982 = vmatpush.msrb.mxu3 %v6444_v1  ;;  %2962 = vmatpush.msrb.mxu2 %v6511_v60 }
 0x833   :  { %3022 = vmatpush.msra.mxu1 %v6552_v17  ;;  %3002 = vmatpush.msra.mxu0 %v6606_v48 }
 0x834   :  { %2983 = vmatpush.msrb.mxu3 %v6468_v3  ;;  %2963 = vmatpush.msrb.mxu2 %v6535_v46 }
 0x835   :  { %3023 = vmatpush.msra.mxu1 %v6576_v34  ;;  %3003 = vmatpush.msra.mxu0 %v6624_v59 }
 0x836   :  { %2984 = vmatpush.msrb.mxu3 %v6492_v43  ;;  %2964 = vmatpush.msrb.mxu2 %v6559_v21  ;;  %v2691_v21 = vperm.slane %v2554_v6, 3 }
 0x837   :  { %3024 = vmatpush.msra.mxu1 %v6593_v40  ;;  %3004 = vmatpush.msra.mxu0 %v6637_v8 }
 0x838   :  { %2985 = vmatpush.msrb.mxu3 %v6516_v47  ;;  %2965 = vmatpush.msrb.mxu2 %v6583_v33  ;;  %v2688_v47 = vperm.slane %v2554_v6, 0 }
 0x839   :  { %3025 = vmatpush.msra.mxu1 %v6611_v54  ;;  %3005 = vmatpush.msra.mxu0 %v6649_v13 }
 0x83a   :  { %2986 = vmatpush.msrb.mxu3 %v6540_v30  ;;  %2966 = vmatpush.msrb.mxu2 %v6601_v44  ;;  %v6660_v30 = vld [vmem:[%s6901_s17 + $0x100] sm:$0xff] }
 0x83b   :  { %3026 = vmatpush.msra.mxu1 %v6629_v4  ;;  %7051 = vst [vmem:[#allocation59_spill] sm:$0xff] %v6660_v30 }
 0x83c   :  { %2987 = vmatpush.msrb.mxu3 %v6564_v32  ;;  %2967 = vmatpush.msrb.mxu2 %v6619_v55  ;;  %v2689_v32 = vperm.slane %v2554_v6, 1  ;;  %v6654_v55 = vld [vmem:[%s6901_s17 + $0x108] sm:$0xff]  ;;  %s5050_s17 = smov [#allocation28]  }
 0x83d   :  { %3027 = vmatpush.msra.mxu1 %v6642_v11  ;;  %7050 = vst [vmem:[#allocation53_spill] sm:$0xff] %v6654_v55  ;;  %3006 = vmatpush.msra.mxu0 %v6654_v55  ;;  %s4426_s4 = sshll.u32 %s5050_s17, 4  ;;  %s4427_s4 = int_to_ptr.vmem [resolvable:$true] %s4426_s4 }
 0x83e   :  { %4431 = dma.vmem_to_hbm [thread:$0]  %s4427_s4, 32, %s4429_s19, [#allocation4]  }
 0x83f   :  { %3007 = vmatpush.msra.mxu0 %v6660_v30 }
 0x898   :  { %v2753_v44 = vpop.f32.mrf.mxu0  ;;  %v2773_v11 = vpop.f32.mrf.mxu1 }
 0x899   :  { %v2754_v4 = vadd.f32 %v2753_v44, %v2689_v32 }
 0x89b   :  { %v6664_v33 = vadd.f32 %v2773_v11, %v2754_v4  ;;  %v2690_v4 = vperm.slane %v2554_v6, 2 }
 0x89d   :  { %7052 = vst [vmem:[#allocation65_spill] sm:$0xff] %v6664_v33  ;;  %v2863_v54 = vsel %vm1202_vm0, %v6664_v33, 0.0  ;;  %v2713_v43 = vpop.f32.mrf.mxu2  ;;  %v2733_v13 = vpop.f32.mrf.mxu3 }
 0x89e   :  { %v2864_v40 = vrot.slane %v2863_v54, 4  ;;  %v2714_v8 = vadd.f32 %v2713_v43, %v2688_v47 }
 0x8a0   :  { %v2865_v3 = vadd.f32 %v2864_v40, %v2863_v54  ;;  %v6668_v46 = vadd.f32 %v2733_v13, %v2714_v8  ;;  %v2833_v34 = vpop.f32.mrf.mxu0  ;;  %v2853_v44 = vpop.f32.mrf.mxu1 }
 0x8a1   :  { %v2834_v59 = vadd.f32 %v2833_v34, %v2691_v21 }
 0x8a2   :  { %7053 = vst [vmem:[#allocation66_spill] sm:$0xff] %v6668_v46  ;;  %v2866_v55 = vrot.slane %v2865_v3, 2  ;;  %v2856_v32 = vsel %vm1202_vm0, %v6668_v46, 0.0 }
 0x8a3   :  { %v2857_v11 = vrot.slane %v2856_v32, 4  ;;  %v6672_v30 = vadd.f32 %v2853_v44, %v2834_v59 }
 0x8a4   :  { %v2867_v33 = vadd.f32 %v2866_v55, %v2865_v3 }
 0x8a5   :  { %7054 = vst [vmem:[#allocation67_spill] sm:$0xff] %v6672_v30  ;;  %v2858_v1 = vadd.f32 %v2857_v11, %v2856_v32  ;;  %v2877_v60 = vsel %vm1202_vm0, %v6672_v30, 0.0  ;;  %v2793_v43 = vpop.f32.mrf.mxu2  ;;  %v2813_v21 = vpop.f32.mrf.mxu3 }
 0x8a6   :  { %v2868_v47 = vrot.slane %v2867_v33, 1  ;;  %v2878_v40 = vrot.slane %v2877_v60, 4  ;;  %v2794_v54 = vadd.f32 %v2793_v43, %v2690_v4 }
 0x8a7   :  { %v2859_v8 = vrot.slane %v2858_v1, 2 }
 0x8a8   :  { %v2869_v34 = vadd.f32 %v2868_v47, %v2867_v33  ;;  %v2879_v13 = vadd.f32 %v2878_v40, %v2877_v60  ;;  %v6676_v17 = vadd.f32 %v2813_v21, %v2794_v54  ;;  %v6684_v21 = vld [vmem:[#allocation22] sm:$0xff] }
 0x8a9   :  { %v2860_v46 = vadd.f32 %v2859_v8, %v2858_v1  ;;  %3054 = vmatpush.msra.mxu2 %v6684_v21 }
 0x8aa   :  { %v2880_v6 = vrot.slane %v2879_v13, 2  ;;  %v2870_v59 = vsel %vm1202_vm0, %v6676_v17, 0.0  ;;  %v2885_v3 = vmul.f32 %v2869_v34, %v5456_v27  ;;  %v6686_v34 = vld [vmem:[#allocation22 + $0x8] sm:$0xff] }
 0x8ab   :  { %v2861_v55 = vrot.slane %v2860_v46, 1  ;;  %v2871_v32 = vrot.slane %v2870_v59, 4  ;;  %3074 = vmatpush.msra.mxu3 %v6686_v34 }
 0x8ac   :  { %v2881_v44 = vadd.f32 %v2880_v6, %v2879_v13  ;;  %2988 = vmatmul.f32.vlgmr.msrb.gmra.mxu3 %v2885_v3 }
 0x8ad   :  { %v2862_v11 = vadd.f32 %v2861_v55, %v2860_v46  ;;  %v2872_v30 = vadd.f32 %v2871_v32, %v2870_v59  ;;  %v6688_v46 = vld [vmem:[#allocation22 + $0x10] sm:$0xff]  ;;  %3183 = vmatpush.msrb.mxu3 %v6283_v14  ;;  %v7079_v32 = vld [vmem:[#allocation66_spill] sm:$0xff] }
 0x8ae   :  { %v2882_v4 = vrot.slane %v2881_v44, 1  ;;  %3094 = vmatpush.msrb.mxu0 %v6688_v46  ;;  %v7055_v14 = vld [vmem:[#allocation61_spill] sm:$0xff] }
 0x8af   :  { %v2873_v43 = vrot.slane %v2872_v30, 2  ;;  %v2884_v33 = vmul.f32 %v2862_v11, %v5456_v27  ;;  %3184 = vmatpush.msrb.mxu3 %v6298_v20  ;;  %v7058_v20 = vld [vmem:[#allocation49_spill] sm:$0xff] }
 0x8b0   :  { %v2883_v60 = vadd.f32 %v2882_v4, %v2881_v44  ;;  %v7080_v11 = vld [vmem:[#allocation65_spill] sm:$0xff] }
 0x8b1   :  { %v2874_v47 = vadd.f32 %v2873_v43, %v2872_v30  ;;  %2968 = vmatmul.f32.vlgmr.msrb.gmra.mxu2 %v2884_v33  ;;  %v6692_v30 = vld [vmem:[#allocation22 + $0x18] sm:$0xff]  ;;  %3185 = vmatpush.msrb.mxu3 %v6315_v7 }
 0x8b2   :  { %v2887_v1 = vmul.f32 %v2883_v60, %v5456_v27  ;;  %3114 = vmatpush.msrb.mxu1 %v6692_v30  ;;  %3163 = vmatpush.msrb.mxu2 %v6288_v52  ;;  %v7056_v52 = vld [vmem:[#allocation60_spill] sm:$0xff]  ;;  %v7061_v7 = vld [vmem:[#allocation46_spill] sm:$0xff] }
 0x8b3   :  { %v2875_v40 = vrot.slane %v2874_v47, 1  ;;  %3186 = vmatpush.msrb.mxu3 %v6331_v10 }
 0x8b4   :  { %3028 = vmatmul.f32.vlgmr.msra.gmra.mxu1 %v2887_v1  ;;  %3164 = vmatpush.msrb.mxu2 %v6303_v23  ;;  %v7059_v23 = vld [vmem:[#allocation56_spill] sm:$0xff] }
 0x8b5   :  { %v2876_v54 = vadd.f32 %v2875_v40, %v2874_v47  ;;  %3223 = vmatpush.msra.mxu1 %v6293_v16  ;;  %3187 = vmatpush.msrb.mxu3 %v6336_v15  ;;  %v7057_v16 = vld [vmem:[#allocation43_spill] sm:$0xff]  ;;  %v7062_v15 = vld [vmem:[#allocation58_spill] sm:$0xff] }
 0x8b6   :  { %3165 = vmatpush.msrb.mxu2 %v6321_v9 }
 0x8b7   :  { %v2886_v8 = vmul.f32 %v2876_v54, %v5456_v27  ;;  %3224 = vmatpush.msra.mxu1 %v6310_v29  ;;  %3188 = vmatpush.msrb.mxu3 %v6342_v18  ;;  %v7060_v29 = vld [vmem:[#allocation48_spill] sm:$0xff]  ;;  %v7063_v18 = vld [vmem:[#allocation47_spill] sm:$0xff] }
 0x8b8   :  { %3166 = vmatpush.msrb.mxu2 %v6349_v58 }
 0x8b9   :  { %3008 = vmatmul.f32.vlgmr.msra.gmra.mxu0 %v2886_v8  ;;  %3225 = vmatpush.msra.mxu1 %v6359_v19  ;;  %v7065_v19 = vld [vmem:[#allocation54_spill] sm:$0xff] }
 0x8ba   :  { %3203 = vmatpush.msra.mxu0 %v6377_v26  ;;  %3167 = vmatpush.msrb.mxu2 %v6367_v63  ;;  %v7067_v26 = vld [vmem:[#allocation57_spill] sm:$0xff] }
 0x8bb   :  { %3226 = vmatpush.msra.mxu1 %v6384_v28  ;;  %3189 = vmatpush.msrb.mxu3 %v6354_v22  ;;  %v7064_v22 = vld [vmem:[#allocation45_spill] sm:$0xff] }
 0x8bc   :  { %3204 = vmatpush.msra.mxu0 %v6401_v51  ;;  %3168 = vmatpush.msrb.mxu2 %v6391_v45  ;;  %v7068_v45 = vld [vmem:[#allocation62_spill] sm:$0xff] }
 0x8bd   :  { %3227 = vmatpush.msra.mxu1 %v6408_v61  ;;  %3190 = vmatpush.msrb.mxu3 %v6372_v24  ;;  %v7066_v24 = vld [vmem:[#allocation42_spill] sm:$0xff]  ;;  %v7070_v61 = vld [vmem:[#allocation53_spill] sm:$0xff] }
 0x8be   :  { %3205 = vmatpush.msra.mxu0 %v6425_v2  ;;  %3169 = vmatpush.msrb.mxu2 %v6415_v62  ;;  %v7071_v62 = vld [vmem:[#allocation52_spill] sm:$0xff]  ;;  %v7072_v2 = vld [vmem:[#allocation51_spill] sm:$0xff] }
 0x8bf   :  { %3228 = vmatpush.msra.mxu1 %v6432_v5  ;;  %3191 = vmatpush.msrb.mxu3 %v6396_v50  ;;  %v7069_v50 = vld [vmem:[#allocation44_spill] sm:$0xff]  ;;  %v7073_v5 = vld [vmem:[#allocation55_spill] sm:$0xff] }
 0x8c0   :  { %3206 = vmatpush.msra.mxu0 %v6449_v42  ;;  %3170 = vmatpush.msrb.mxu2 %v6439_v31  ;;  %v7074_v31 = vld [vmem:[#allocation59_spill] sm:$0xff]  ;;  %v7075_v42 = vld [vmem:[#allocation64_spill] sm:$0xff] }
 0x8c1   :  { %3229 = vmatpush.msra.mxu1 %v6456_v35  ;;  %3192 = vmatpush.msrb.mxu3 %v6420_v0  ;;  %v7076_v35 = vld [vmem:[#allocation63_spill] sm:$0xff] }
 0x8c2   :  { %3207 = vmatpush.msra.mxu0 %v6473_v12  ;;  %3171 = vmatpush.msrb.mxu2 %v6463_v38  ;;  %v7077_v38 = vld [vmem:[#allocation50_spill] sm:$0xff] }
 0x8c3   :  { %3230 = vmatpush.msra.mxu1 %v6480_v41  ;;  %3193 = vmatpush.msrb.mxu3 %v7057_v16 }
 0x8c4   :  { %3208 = vmatpush.msra.mxu0 %v6497_v36  ;;  %3172 = vmatpush.msrb.mxu2 %v6487_v56 }
 0x8c5   :  { %3231 = vmatpush.msra.mxu1 %v6504_v49  ;;  %3194 = vmatpush.msrb.mxu3 %v7061_v7 }
 0x8c6   :  { %3209 = vmatpush.msra.mxu0 %v6521_v39  ;;  %3173 = vmatpush.msrb.mxu2 %v7056_v52  ;;  %v7078_v39 = vld [vmem:[#allocation67_spill] sm:$0xff] }
 0x8c7   :  { %3232 = vmatpush.msra.mxu1 %v6528_v53  ;;  %3195 = vmatpush.msrb.mxu3 %v7065_v19 }
 0x8c8   :  { %3210 = vmatpush.msra.mxu0 %v6545_v25  ;;  %3174 = vmatpush.msrb.mxu2 %v7060_v29 }
 0x8c9   :  { %3233 = vmatpush.msra.mxu1 %v7055_v14  ;;  %3196 = vmatpush.msrb.mxu3 %v7069_v50  ;;  %v3782_v50 = vld [vmem:[#allocation25 + $0xbd0] sm:$0xff] }
 0x8ca   :  { %3211 = vmatpush.msra.mxu0 %v6569_v57  ;;  %3175 = vmatpush.msrb.mxu2 %v7064_v22 }
 0x8cb   :  { %3234 = vmatpush.msra.mxu1 %v7059_v23  ;;  %3197 = vmatpush.msrb.mxu3 %v7073_v5  ;;  %v3590_v5 = vld [vmem:[#allocation25 + $0x5d0] sm:$0xff] }
 0x8cc   :  { %3212 = vmatpush.msra.mxu0 %v6588_v37  ;;  %3176 = vmatpush.msrb.mxu2 %v7068_v45  ;;  %v3686_v45 = vld [vmem:[#allocation25 + $0x8d0] sm:$0xff] }
 0x8cd   :  { %3235 = vmatpush.msra.mxu1 %v7063_v18  ;;  %3198 = vmatpush.msrb.mxu3 %v7077_v38  ;;  %v3482_v38 = vld [vmem:[#allocation25 + $0x270] sm:$0xff] }
 0x8ce   :  { %3213 = vmatpush.msra.mxu0 %v6606_v48  ;;  %3177 = vmatpush.msrb.mxu2 %v7072_v2  ;;  %v3494_v2 = vld [vmem:[#allocation25 + $0x2d0] sm:$0xff] }
 0x8cf   :  { %3236 = vmatpush.msra.mxu1 %v7067_v26 }
 0x8d0   :  { %3214 = vmatpush.msra.mxu0 %v7058_v20  ;;  %3178 = vmatpush.msrb.mxu2 %v7076_v35  ;;  %v3668_v35 = vld [vmem:[#allocation25 + $0x840] sm:$0xff] }
 0x8d1   :  { %3237 = vmatpush.msra.mxu1 %v7071_v62  ;;  %v3674_v62 = vld [vmem:[#allocation25 + $0x870] sm:$0xff] }
 0x8d2   :  { %3215 = vmatpush.msra.mxu0 %v7062_v15 }
 0x8d3   :  { %3238 = vmatpush.msra.mxu1 %v7075_v42  ;;  %v3584_v42 = vld [vmem:[#allocation25 + $0x5a0] sm:$0xff] }
 0x8d4   :  { %3216 = vmatpush.msra.mxu0 %v7066_v24 }
 0x8d6   :  { %3217 = vmatpush.msra.mxu0 %v7070_v61  ;;  %v3776_v61 = vld [vmem:[#allocation25 + $0xba0] sm:$0xff] }
 0x8d8   :  { %3218 = vmatpush.msra.mxu0 %v7074_v31  ;;  %v3488_v31 = vld [vmem:[#allocation25 + $0x2a0] sm:$0xff] }
 0x92f   :  { %v2989_v9 = vpop.f32.mrf.mxu3 }
 0x931   :  { %v3029_v51 = vpop.f32.mrf.mxu1 }
 0x934   :  { %v2969_v10 = vpop.f32.mrf.mxu2 }
 0x935   :  { %v2990_v58 = vadd.f32 %v2989_v9, %v2969_v10 }
 0x936   :  { %v3009_v63 = vpop.f32.mrf.mxu0 }
 0x937   :  { %v3010_v28 = vadd.f32 %v3009_v63, %v2990_v58 }
 0x939   :  { %v3030_v0 = vadd.f32 %v3029_v51, %v3010_v28  ;;  %v3680_v51 = vld [vmem:[#allocation25 + $0x8a0] sm:$0xff] }
 0x93b   :  { %4478 = vmatmul.msk.f32.vlgmr.msra.gmra.mxu2 %vm1390_vm2, %v3030_v0  ;;  %4479 = vmatmul.msk.f32.vlgmr.msra.gmra.mxu3 %vm1390_vm2, %v3030_v0 }
 0x93c   :  { %4480 = vmatmul.msk.f32.vlgmr.msrb.gmra.mxu0 %vm1390_vm2, %v3030_v0  ;;  %4481 = vmatmul.msk.f32.vlgmr.msrb.gmra.mxu1 %vm1390_vm2, %v3030_v0  ;;  %v3770_v0 = vld [vmem:[#allocation25 + $0xb70] sm:$0xff] }
 0x93d   :  { %3261 = vmatpush.msra.mxu2 %v6684_v21  ;;  %3281 = vmatpush.msra.mxu3 %v6686_v34 }
 0x93e   :  { %3301 = vmatpush.msrb.mxu0 %v6688_v46  ;;  %3321 = vmatpush.msrb.mxu1 %v6692_v30 }
 0x9b9   :  { %v3096_v12 = vpop.f32.mrf.mxu0  ;;  %v3116_v41 = vpop.f32.mrf.mxu1 }
 0x9ba   :  { %v3121_v56 = vperm.slane %v3096_v12, 0  ;;  %v3122_v36 = vperm.slane %v3116_v41, 0  ;;  %v3578_v12 = vld [vmem:[#allocation25 + $0x570] sm:$0xff] }
 0x9bb   :  { %v3662_v41 = vld [vmem:[#allocation25 + $0x810] sm:$0xff] }
 0x9bc   :  { %v6769_v49 = vsub.f32 %v6676_v17, %v3121_v56  ;;  %v6772_v53 = vsub.f32 %v7078_v39, %v3122_v36  ;;  %v3758_v56 = vld [vmem:[#allocation25 + $0xb10] sm:$0xff]  ;;  %v3476_v36 = vld [vmem:[#allocation25 + $0x240] sm:$0xff] }
 0x9bd   :  { %v3572_v39 = vld [vmem:[#allocation25 + $0x540] sm:$0xff] }
 0x9be   :  { %v3129_v25 = vmul.f32 %v6769_v49, %v6769_v49  ;;  %v3130_v57 = vmul.f32 %v6772_v53, %v6772_v53  ;;  %v3056_v37 = vpop.f32.mrf.mxu2  ;;  %v3076_v48 = vpop.f32.mrf.mxu3 }
 0x9bf   :  { %v3119_v13 = vperm.slane %v3056_v37, 0  ;;  %v3120_v6 = vperm.slane %v3076_v48, 0  ;;  %v3470_v37 = vld [vmem:[#allocation25 + $0x210] sm:$0xff] }
 0x9c0   :  { %v3145_v59 = vsel %vm1202_vm0, %v3129_v25, 0.0  ;;  %v3152_v3 = vsel %vm1202_vm0, %v3130_v57, 0.0  ;;  %v3656_v25 = vld [vmem:[#allocation25 + $0x7e0] sm:$0xff]  ;;  %v3566_v48 = vld [vmem:[#allocation25 + $0x510] sm:$0xff] }
 0x9c1   :  { %v3146_v55 = vrot.slane %v3145_v59, 4  ;;  %v3153_v17 = vrot.slane %v3152_v3, 4  ;;  %v6781_v44 = vsub.f32 %v7079_v32, %v3119_v13  ;;  %v6784_v4 = vsub.f32 %v7080_v11, %v3120_v6  ;;  %v3752_v57 = vld [vmem:[#allocation25 + $0xae0] sm:$0xff]  ;;  %v3650_v13 = vld [vmem:[#allocation25 + $0x7b0] sm:$0xff] }
 0x9c2   :  { %v3746_v6 = vld [vmem:[#allocation25 + $0xab0] sm:$0xff] }
 0x9c3   :  { %v3147_v43 = vadd.f32 %v3146_v55, %v3145_v59  ;;  %v3154_v33 = vadd.f32 %v3153_v17, %v3152_v3  ;;  %v3127_v60 = vmul.f32 %v6781_v44, %v6781_v44  ;;  %v3128_v47 = vmul.f32 %v6784_v4, %v6784_v4  ;;  %v3464_v59 = vld [vmem:[#allocation25 + $0x1e0] sm:$0xff]  ;;  %v3458_v32 = vld [vmem:[#allocation25 + $0x1b0] sm:$0xff] }
 0x9c4   :  { %v3560_v3 = vld [vmem:[#allocation25 + $0x4e0] sm:$0xff]  ;;  %v3554_v11 = vld [vmem:[#allocation25 + $0x4b0] sm:$0xff] }
 0x9c5   :  { %v3148_v1 = vrot.slane %v3147_v43, 2  ;;  %v3155_v40 = vrot.slane %v3154_v33, 2  ;;  %v3131_v54 = vsel %vm1202_vm0, %v3127_v60, 0.0  ;;  %v3138_v8 = vsel %vm1202_vm0, %v3128_v47, 0.0  ;;  %v3644_v55 = vld [vmem:[#allocation25 + $0x780] sm:$0xff] }
 0x9c6   :  { %v3132_v21 = vrot.slane %v3131_v54, 4  ;;  %v3139_v34 = vrot.slane %v3138_v8, 4  ;;  %v3740_v17 = vld [vmem:[#allocation25 + $0xa80] sm:$0xff] }
 0x9c7   :  { %v3149_v46 = vadd.f32 %v3148_v1, %v3147_v43  ;;  %v3156_v30 = vadd.f32 %v3155_v40, %v3154_v33  ;;  %v3638_v43 = vld [vmem:[#allocation25 + $0x750] sm:$0xff]  ;;  %v3452_v60 = vld [vmem:[#allocation25 + $0x180] sm:$0xff] }
 0x9c8   :  { %v3133_v14 = vadd.f32 %v3132_v21, %v3131_v54  ;;  %v3140_v52 = vadd.f32 %v3139_v34, %v3138_v8  ;;  %v3734_v33 = vld [vmem:[#allocation25 + $0xa50] sm:$0xff]  ;;  %v3548_v47 = vld [vmem:[#allocation25 + $0x480] sm:$0xff] }
 0x9c9   :  { %v3150_v16 = vrot.slane %v3149_v46, 1  ;;  %v3157_v20 = vrot.slane %v3156_v30, 1  ;;  %v3632_v1 = vld [vmem:[#allocation25 + $0x720] sm:$0xff]  ;;  %v3446_v54 = vld [vmem:[#allocation25 + $0x150] sm:$0xff] }
 0x9ca   :  { %v3134_v23 = vrot.slane %v3133_v14, 2  ;;  %v3141_v29 = vrot.slane %v3140_v52, 2  ;;  %v3728_v40 = vld [vmem:[#allocation25 + $0xa20] sm:$0xff]  ;;  %v3542_v8 = vld [vmem:[#allocation25 + $0x450] sm:$0xff] }
 0x9cb   :  { %v3151_v7 = vadd.f32 %v3150_v16, %v3149_v46  ;;  %v3158_v9 = vadd.f32 %v3157_v20, %v3156_v30  ;;  %v3626_v21 = vld [vmem:[#allocation25 + $0x6f0] sm:$0xff]  ;;  %v3440_v46 = vld [vmem:[#allocation25 + $0x120] sm:$0xff] }
 0x9cc   :  { %v3135_v10 = vadd.f32 %v3134_v23, %v3133_v14  ;;  %v3142_v15 = vadd.f32 %v3141_v29, %v3140_v52  ;;  %v3722_v34 = vld [vmem:[#allocation25 + $0x9f0] sm:$0xff]  ;;  %v3536_v30 = vld [vmem:[#allocation25 + $0x420] sm:$0xff] }
 0x9cd   :  { %v3161_v18 = vmul.f32 %v3151_v7, %v5456_v27  ;;  %v3162_v58 = vmul.f32 %v3158_v9, %v5456_v27  ;;  %v3620_v14 = vld [vmem:[#allocation25 + $0x6c0] sm:$0xff]  ;;  %v3434_v16 = vld [vmem:[#allocation25 + $0xf0] sm:$0xff] }
 0x9ce   :  { %v3136_v22 = vrot.slane %v3135_v10, 1  ;;  %v3143_v19 = vrot.slane %v3142_v15, 1  ;;  %v3716_v52 = vld [vmem:[#allocation25 + $0x9c0] sm:$0xff]  ;;  %v3530_v20 = vld [vmem:[#allocation25 + $0x3f0] sm:$0xff] }
 0x9cf   :  { %3219 = vmatmul.f32.vlgmr.msra.gmra.mxu0 %v3161_v18  ;;  %3239 = vmatmul.f32.vlgmr.msra.gmra.mxu1 %v3162_v58  ;;  %v3614_v23 = vld [vmem:[#allocation25 + $0x690] sm:$0xff]  ;;  %v3428_v7 = vld [vmem:[#allocation25 + $0xc0] sm:$0xff] }
 0x9d0   :  { %v3137_v63 = vadd.f32 %v3136_v22, %v3135_v10  ;;  %v3144_v24 = vadd.f32 %v3143_v19, %v3142_v15  ;;  %3842 = vmatpush.msra.mxu0 %v3686_v45  ;;  %3862 = vmatpush.msra.mxu1 %v3782_v50  ;;  %v3710_v29 = vld [vmem:[#allocation25 + $0x990] sm:$0xff]  ;;  %v3524_v9 = vld [vmem:[#allocation25 + $0x3c0] sm:$0xff] }
 0x9d1   :  { %v3608_v18 = vld [vmem:[#allocation25 + $0x660] sm:$0xff]  ;;  %v3422_v19 = vld [vmem:[#allocation25 + $0x90] sm:$0xff] }
 0x9d2   :  { %v3159_v26 = vmul.f32 %v3137_v63, %v5456_v27  ;;  %v3160_v28 = vmul.f32 %v3144_v24, %v5456_v27  ;;  %3843 = vmatpush.msra.mxu0 %v3680_v51  ;;  %3863 = vmatpush.msra.mxu1 %v3776_v61  ;;  %v3764_v27 = vld [vmem:[#allocation25 + $0xb40] sm:$0xff]  ;;  %v3518_v63 = vld [vmem:[#allocation25 + $0x390] sm:$0xff] }
 0x9d3   :  { %v3704_v58 = vld [vmem:[#allocation25 + $0x960] sm:$0xff] }
 0x9d4   :  { %3179 = vmatmul.f32.vlgmr.msrb.gmra.mxu2 %v3159_v26  ;;  %3199 = vmatmul.f32.vlgmr.msrb.gmra.mxu3 %v3160_v28  ;;  %v3602_v26 = vld [vmem:[#allocation25 + $0x630] sm:$0xff]  ;;  %v3596_v61 = vld [vmem:[#allocation25 + $0x600] sm:$0xff] }
 0x9d5   :  { %3802 = vmatpush.msrb.mxu2 %v3494_v2  ;;  %3822 = vmatpush.msrb.mxu3 %v3590_v5  ;;  %v3698_v28 = vld [vmem:[#allocation25 + $0x930] sm:$0xff]  ;;  %v3783_v2 = vld [vmem:[#allocation25 + $0xbd8] sm:$0xff]  ;;  %v3416_v5 = vld [vmem:[#allocation25 + $0x60] sm:$0xff] }
 0x9d6   :  { %3844 = vmatpush.msra.mxu0 %v3674_v62  ;;  %3864 = vmatpush.msra.mxu1 %v3770_v0  ;;  %v3692_v62 = vld [vmem:[#allocation25 + $0x900] sm:$0xff]  ;;  %v3687_v0 = vld [vmem:[#allocation25 + $0x8d8] sm:$0xff] }
 0x9d7   :  { %3803 = vmatpush.msrb.mxu2 %v3488_v31  ;;  %3823 = vmatpush.msrb.mxu3 %v3584_v42  ;;  %v3512_v31 = vld [vmem:[#allocation25 + $0x360] sm:$0xff]  ;;  %v3681_v42 = vld [vmem:[#allocation25 + $0x8a8] sm:$0xff] }
 0x9d8   :  { %3845 = vmatpush.msra.mxu0 %v3668_v35  ;;  %3865 = vmatpush.msra.mxu1 %v3764_v27  ;;  %v3777_v35 = vld [vmem:[#allocation25 + $0xba8] sm:$0xff]  ;;  %v3410_v27 = vld [vmem:[#allocation25 + $0x30] sm:$0xff] }
 0x9d9   :  { %3804 = vmatpush.msrb.mxu2 %v3482_v38  ;;  %3824 = vmatpush.msrb.mxu3 %v3578_v12  ;;  %v3506_v38 = vld [vmem:[#allocation25 + $0x330] sm:$0xff]  ;;  %v3675_v12 = vld [vmem:[#allocation25 + $0x878] sm:$0xff] }
 0x9da   :  { %3846 = vmatpush.msra.mxu0 %v3662_v41  ;;  %3866 = vmatpush.msra.mxu1 %v3758_v56  ;;  %v3771_v41 = vld [vmem:[#allocation25 + $0xb78] sm:$0xff]  ;;  %v3404_v56 = vld [vmem:[#allocation25] sm:$0xff] }
 0x9db   :  { %3805 = vmatpush.msrb.mxu2 %v3476_v36  ;;  %3825 = vmatpush.msrb.mxu3 %v3572_v39  ;;  %v3500_v36 = vld [vmem:[#allocation25 + $0x300] sm:$0xff]  ;;  %v3495_v39 = vld [vmem:[#allocation25 + $0x2d8] sm:$0xff] }
 0x9dc   :  { %3847 = vmatpush.msra.mxu0 %v3656_v25  ;;  %3867 = vmatpush.msra.mxu1 %v3752_v57  ;;  %v3591_v25 = vld [vmem:[#allocation25 + $0x5d8] sm:$0xff]  ;;  %v3669_v57 = vld [vmem:[#allocation25 + $0x848] sm:$0xff] }
 0x9dd   :  { %3806 = vmatpush.msrb.mxu2 %v3470_v37  ;;  %3826 = vmatpush.msrb.mxu3 %v3566_v48  ;;  %v3765_v37 = vld [vmem:[#allocation25 + $0xb48] sm:$0xff] }
 0x9de   :  { %3848 = vmatpush.msra.mxu0 %v3650_v13  ;;  %3868 = vmatpush.msra.mxu1 %v3746_v6  ;;  %v3489_v48 = vld [vmem:[#allocation25 + $0x2a8] sm:$0xff]  ;;  %v3663_v6 = vld [vmem:[#allocation25 + $0x818] sm:$0xff] }
 0x9df   :  { %3807 = vmatpush.msrb.mxu2 %v3464_v59  ;;  %3827 = vmatpush.msrb.mxu3 %v3560_v3  ;;  %v3585_v13 = vld [vmem:[#allocation25 + $0x5a8] sm:$0xff]  ;;  %v3759_v59 = vld [vmem:[#allocation25 + $0xb18] sm:$0xff] }
 0x9e0   :  { %3849 = vmatpush.msra.mxu0 %v3644_v55  ;;  %3869 = vmatpush.msra.mxu1 %v3740_v17  ;;  %v3483_v3 = vld [vmem:[#allocation25 + $0x278] sm:$0xff]  ;;  %v3657_v17 = vld [vmem:[#allocation25 + $0x7e8] sm:$0xff] }
 0x9e1   :  { %3808 = vmatpush.msrb.mxu2 %v3458_v32  ;;  %3828 = vmatpush.msrb.mxu3 %v3554_v11  ;;  %v3579_v55 = vld [vmem:[#allocation25 + $0x578] sm:$0xff]  ;;  %v3753_v32 = vld [vmem:[#allocation25 + $0xae8] sm:$0xff] }
 0x9e2   :  { %3850 = vmatpush.msra.mxu0 %v3638_v43  ;;  %3870 = vmatpush.msra.mxu1 %v3734_v33  ;;  %v3477_v11 = vld [vmem:[#allocation25 + $0x248] sm:$0xff]  ;;  %v3651_v33 = vld [vmem:[#allocation25 + $0x7b8] sm:$0xff] }
 0x9e3   :  { %3809 = vmatpush.msrb.mxu2 %v3452_v60  ;;  %3829 = vmatpush.msrb.mxu3 %v3548_v47  ;;  %v3573_v43 = vld [vmem:[#allocation25 + $0x548] sm:$0xff]  ;;  %v3747_v60 = vld [vmem:[#allocation25 + $0xab8] sm:$0xff] }
 0x9e4   :  { %3851 = vmatpush.msra.mxu0 %v3632_v1  ;;  %3871 = vmatpush.msra.mxu1 %v3728_v40  ;;  %v3471_v47 = vld [vmem:[#allocation25 + $0x218] sm:$0xff]  ;;  %v3645_v40 = vld [vmem:[#allocation25 + $0x788] sm:$0xff] }
 0x9e5   :  { %3810 = vmatpush.msrb.mxu2 %v3446_v54  ;;  %3830 = vmatpush.msrb.mxu3 %v3542_v8  ;;  %v3567_v1 = vld [vmem:[#allocation25 + $0x518] sm:$0xff]  ;;  %v3741_v54 = vld [vmem:[#allocation25 + $0xa88] sm:$0xff] }
 0x9e6   :  { %3852 = vmatpush.msra.mxu0 %v3626_v21  ;;  %3872 = vmatpush.msra.mxu1 %v3722_v34  ;;  %v3465_v8 = vld [vmem:[#allocation25 + $0x1e8] sm:$0xff]  ;;  %v3639_v34 = vld [vmem:[#allocation25 + $0x758] sm:$0xff] }
 0x9e7   :  { %3811 = vmatpush.msrb.mxu2 %v3440_v46  ;;  %3831 = vmatpush.msrb.mxu3 %v3536_v30  ;;  %v3561_v21 = vld [vmem:[#allocation25 + $0x4e8] sm:$0xff]  ;;  %v3735_v46 = vld [vmem:[#allocation25 + $0xa58] sm:$0xff] }
 0x9e8   :  { %3853 = vmatpush.msra.mxu0 %v3620_v14  ;;  %3873 = vmatpush.msra.mxu1 %v3716_v52  ;;  %v3459_v30 = vld [vmem:[#allocation25 + $0x1b8] sm:$0xff]  ;;  %v3633_v52 = vld [vmem:[#allocation25 + $0x728] sm:$0xff] }
 0x9e9   :  { %3812 = vmatpush.msrb.mxu2 %v3434_v16  ;;  %3832 = vmatpush.msrb.mxu3 %v3530_v20  ;;  %v3555_v14 = vld [vmem:[#allocation25 + $0x4b8] sm:$0xff]  ;;  %v3729_v16 = vld [vmem:[#allocation25 + $0xa28] sm:$0xff] }
 0x9ea   :  { %3854 = vmatpush.msra.mxu0 %v3614_v23  ;;  %3874 = vmatpush.msra.mxu1 %v3710_v29  ;;  %v3453_v20 = vld [vmem:[#allocation25 + $0x188] sm:$0xff]  ;;  %v3627_v29 = vld [vmem:[#allocation25 + $0x6f8] sm:$0xff] }
 0x9eb   :  { %3813 = vmatpush.msrb.mxu2 %v3428_v7  ;;  %3833 = vmatpush.msrb.mxu3 %v3524_v9  ;;  %v3549_v23 = vld [vmem:[#allocation25 + $0x488] sm:$0xff]  ;;  %v3723_v7 = vld [vmem:[#allocation25 + $0x9f8] sm:$0xff] }
 0x9ec   :  { %3855 = vmatpush.msra.mxu0 %v3608_v18  ;;  %3875 = vmatpush.msra.mxu1 %v3704_v58  ;;  %v3447_v9 = vld [vmem:[#allocation25 + $0x158] sm:$0xff]  ;;  %v3717_v18 = vld [vmem:[#allocation25 + $0x9c8] sm:$0xff] }
 0x9ed   :  { %3814 = vmatpush.msrb.mxu2 %v3422_v19  ;;  %3834 = vmatpush.msrb.mxu3 %v3518_v63  ;;  %v3441_v58 = vld [vmem:[#allocation25 + $0x128] sm:$0xff]  ;;  %v3615_v19 = vld [vmem:[#allocation25 + $0x698] sm:$0xff] }
 0x9ee   :  { %3856 = vmatpush.msra.mxu0 %v3602_v26  ;;  %3876 = vmatpush.msra.mxu1 %v3698_v28  ;;  %v3711_v63 = vld [vmem:[#allocation25 + $0x998] sm:$0xff]  ;;  %v3609_v28 = vld [vmem:[#allocation25 + $0x668] sm:$0xff] }
 0x9ef   :  { %3815 = vmatpush.msrb.mxu2 %v3416_v5  ;;  %3835 = vmatpush.msrb.mxu3 %v3512_v31  ;;  %v3531_v26 = vld [vmem:[#allocation25 + $0x3f8] sm:$0xff]  ;;  %v3597_v5 = vld [vmem:[#allocation25 + $0x608] sm:$0xff] }
 0x9f0   :  { %3857 = vmatpush.msra.mxu0 %v3596_v61  ;;  %3877 = vmatpush.msra.mxu1 %v3692_v62  ;;  %v3603_v61 = vld [vmem:[#allocation25 + $0x638] sm:$0xff]  ;;  %v3693_v31 = vld [vmem:[#allocation25 + $0x908] sm:$0xff] }
 0x9f1   :  { %3816 = vmatpush.msrb.mxu2 %v3410_v27  ;;  %3836 = vmatpush.msrb.mxu3 %v3506_v38  ;;  %v3699_v62 = vld [vmem:[#allocation25 + $0x938] sm:$0xff] }
 0x9f3   :  { %3817 = vmatpush.msrb.mxu2 %v3404_v56  ;;  %3837 = vmatpush.msrb.mxu3 %v3500_v36  ;;  %v3411_v56 = vld [vmem:[#allocation25 + $0x38] sm:$0xff] }
 0x9f4   :  { %v3507_v36 = vld [vmem:[#allocation25 + $0x338] sm:$0xff] }
 0xa4c   :  { %v3220_v24 = vpop.f32.mrf.mxu0  ;;  %v3240_v50 = vpop.f32.mrf.mxu1 }
 0xa57   :  { %v3180_v10 = vpop.f32.mrf.mxu2  ;;  %v3200_v15 = vpop.f32.mrf.mxu3 }
 0xa58   :  { %v3201_v22 = vadd.f32 %v3200_v15, %v3180_v10  ;;  %v3543_v10 = vld [vmem:[#allocation25 + $0x458] sm:$0xff]  ;;  %v3621_v15 = vld [vmem:[#allocation25 + $0x6c8] sm:$0xff] }
 0xa5a   :  { %v3221_v45 = vadd.f32 %v3220_v24, %v3201_v22  ;;  %v3537_v22 = vld [vmem:[#allocation25 + $0x428] sm:$0xff]  ;;  %v3435_v24 = vld [vmem:[#allocation25 + $0xf8] sm:$0xff] }
 0xa5c   :  { %v3241_v51 = vadd.f32 %v3240_v50, %v3221_v45  ;;  %v3705_v45 = vld [vmem:[#allocation25 + $0x968] sm:$0xff] }
 0xa5d   :  { %v3429_v50 = vld [vmem:[#allocation25 + $0xc8] sm:$0xff] }
 0xa5e   :  { %4482 = vmatmul.msk.f32.vlgmr.msra.gmra.mxu2 %vm1390_vm2, %v3241_v51  ;;  %4483 = vmatmul.msk.f32.vlgmr.msra.gmra.mxu3 %vm1390_vm2, %v3241_v51 }
 0xa5f   :  { %4484 = vmatmul.msk.f32.vlgmr.msrb.gmra.mxu0 %vm1390_vm2, %v3241_v51  ;;  %4485 = vmatmul.msk.f32.vlgmr.msrb.gmra.mxu1 %vm1390_vm2, %v3241_v51  ;;  %v3525_v51 = vld [vmem:[#allocation25 + $0x3c8] sm:$0xff] }
 0xa60   :  { %3922 = vmatpush.msrb.mxu0 %v3687_v0  ;;  %3942 = vmatpush.msrb.mxu1 %v3783_v2  ;;  %v3423_v0 = vld [vmem:[#allocation25 + $0x98] sm:$0xff] }
 0xa61   :  { %3882 = vmatpush.msra.mxu2 %v3495_v39  ;;  %3902 = vmatpush.msra.mxu3 %v3591_v25  ;;  %v3519_v2 = vld [vmem:[#allocation25 + $0x398] sm:$0xff] }
 0xa62   :  { %3923 = vmatpush.msrb.mxu0 %v3681_v42  ;;  %3943 = vmatpush.msrb.mxu1 %v3777_v35 }
 0xa63   :  { %3883 = vmatpush.msra.mxu2 %v3489_v48  ;;  %3903 = vmatpush.msra.mxu3 %v3585_v13 }
 0xa64   :  { %3924 = vmatpush.msrb.mxu0 %v3675_v12  ;;  %3944 = vmatpush.msrb.mxu1 %v3771_v41  ;;  %v3417_v12 = vld [vmem:[#allocation25 + $0x68] sm:$0xff] }
 0xa65   :  { %3884 = vmatpush.msra.mxu2 %v3483_v3  ;;  %3904 = vmatpush.msra.mxu3 %v3579_v55  ;;  %v3513_v41 = vld [vmem:[#allocation25 + $0x368] sm:$0xff] }
 0xa66   :  { %3925 = vmatpush.msrb.mxu0 %v3669_v57  ;;  %3945 = vmatpush.msrb.mxu1 %v3765_v37  ;;  %v3405_v57 = vld [vmem:[#allocation25 + $0x8] sm:$0xff] }
 0xa67   :  { %3885 = vmatpush.msra.mxu2 %v3477_v11  ;;  %3905 = vmatpush.msra.mxu3 %v3573_v43  ;;  %v3501_v37 = vld [vmem:[#allocation25 + $0x308] sm:$0xff]  ;;  %v2558_v43 = vld [vmem:[#allocation23 + $0x2] ss:$4 sm:$0xf] }
 0xa68   :  { %3926 = vmatpush.msrb.mxu0 %v3663_v6  ;;  %3946 = vmatpush.msrb.mxu1 %v3759_v59 }
 0xa69   :  { %3886 = vmatpush.msra.mxu2 %v3471_v47  ;;  %3906 = vmatpush.msra.mxu3 %v3567_v1 }
 0xa6a   :  { %3927 = vmatpush.msrb.mxu0 %v3657_v17  ;;  %3947 = vmatpush.msrb.mxu1 %v3753_v32 }
 0xa6b   :  { %3887 = vmatpush.msra.mxu2 %v3465_v8  ;;  %3907 = vmatpush.msra.mxu3 %v3561_v21  ;;  %v2556_v8 = vld [vmem:[#allocation23 + $0x1] ss:$4 sm:$0xf]  ;;  %v3369_v21 = vperm.slane %v2558_v43, 2 }
 0xa6c   :  { %3928 = vmatpush.msrb.mxu0 %v3651_v33  ;;  %3948 = vmatpush.msrb.mxu1 %v3747_v60 }
 0xa6d   :  { %3888 = vmatpush.msra.mxu2 %v3459_v30  ;;  %3908 = vmatpush.msra.mxu3 %v3555_v14  ;;  %v3370_v14 = vperm.slane %v2558_v43, 3 }
 0xa6e   :  { %3929 = vmatpush.msrb.mxu0 %v3645_v40  ;;  %3949 = vmatpush.msrb.mxu1 %v3741_v54 }
 0xa6f   :  { %3889 = vmatpush.msra.mxu2 %v3453_v20  ;;  %3909 = vmatpush.msra.mxu3 %v3549_v23 }
 0xa70   :  { %3930 = vmatpush.msrb.mxu0 %v3639_v34  ;;  %3950 = vmatpush.msrb.mxu1 %v3735_v46 }
 0xa71   :  { %3890 = vmatpush.msra.mxu2 %v3447_v9  ;;  %3910 = vmatpush.msra.mxu3 %v3543_v10 }
 0xa72   :  { %3931 = vmatpush.msrb.mxu0 %v3633_v52  ;;  %3951 = vmatpush.msrb.mxu1 %v3729_v16 }
 0xa73   :  { %3891 = vmatpush.msra.mxu2 %v3441_v58  ;;  %3911 = vmatpush.msra.mxu3 %v3537_v22  ;;  %v3367_v58 = vperm.slane %v2558_v43, 0 }
 0xa74   :  { %3932 = vmatpush.msrb.mxu0 %v3627_v29  ;;  %3952 = vmatpush.msrb.mxu1 %v3723_v7  ;;  %v3390_v29 = vperm.slane %v2556_v8, 2 }
 0xa75   :  { %3892 = vmatpush.msra.mxu2 %v3435_v24  ;;  %3912 = vmatpush.msra.mxu3 %v3531_v26  ;;  %v3368_v24 = vperm.slane %v2558_v43, 1  ;;  %v3760_v43 = vld [vmem:[#allocation25 + $0xb20] sm:$0xff] }
 0xa76   :  { %3933 = vmatpush.msrb.mxu0 %v3621_v15  ;;  %3953 = vmatpush.msrb.mxu1 %v3717_v18 }
 0xa77   :  { %3893 = vmatpush.msra.mxu2 %v3429_v50  ;;  %3913 = vmatpush.msra.mxu3 %v3525_v51 }
 0xa78   :  { %3934 = vmatpush.msrb.mxu0 %v3615_v19  ;;  %3954 = vmatpush.msrb.mxu1 %v3711_v63 }
 0xa79   :  { %3894 = vmatpush.msra.mxu2 %v3423_v0  ;;  %3914 = vmatpush.msra.mxu3 %v3519_v2 }
 0xa7a   :  { %3935 = vmatpush.msrb.mxu0 %v3609_v28  ;;  %3955 = vmatpush.msrb.mxu1 %v3705_v45  ;;  %v3391_v28 = vperm.slane %v2556_v8, 3 }
 0xa7b   :  { %3895 = vmatpush.msra.mxu2 %v3417_v12  ;;  %3915 = vmatpush.msra.mxu3 %v3513_v41  ;;  %v3389_v12 = vperm.slane %v2556_v8, 1  ;;  %v3688_v41 = vld [vmem:[#allocation25 + $0x8e0] sm:$0xff] }
 0xa7c   :  { %3936 = vmatpush.msrb.mxu0 %v3603_v61  ;;  %3956 = vmatpush.msrb.mxu1 %v3699_v62 }
 0xa7d   :  { %3896 = vmatpush.msra.mxu2 %v3411_v56  ;;  %3916 = vmatpush.msra.mxu3 %v3507_v36  ;;  %v3784_v36 = vld [vmem:[#allocation25 + $0xbe0] sm:$0xff] }
 0xa7e   :  { %3937 = vmatpush.msrb.mxu0 %v3597_v5  ;;  %3957 = vmatpush.msrb.mxu1 %v3693_v31 }
 0xa7f   :  { %3897 = vmatpush.msra.mxu2 %v3405_v57  ;;  %3917 = vmatpush.msra.mxu3 %v3501_v37  ;;  %v3778_v57 = vld [vmem:[#allocation25 + $0xbb0] sm:$0xff] }
 0xadc   :  { %v3303_v42 = vpop.f32.mrf.mxu0  ;;  %v3323_v35 = vpop.f32.mrf.mxu1 }
 0xadd   :  { %v3304_v27 = vadd.f32 1e-05, %v3303_v42  ;;  %v3324_v38 = vadd.f32 1e-05, %v3323_v35  ;;  %v3388_v35 = vperm.slane %v2556_v8, 0  ;;  %v3652_v8 = vld [vmem:[#allocation25 + $0x7c0] sm:$0xff] }
 0xadf   :  { %4535 = vrsqrt.f32 %v3304_v27  ;;  %vm3352_vm11 = vweird.f32 %v3304_v27  ;;  %vm3362_vm13 = vweird.f32 %v3324_v38 }
 0xae0   :  { %4537 = vrsqrt.f32 %v3324_v38 }
 0xae1   :  { %v3263_v39 = vpop.f32.mrf.mxu2  ;;  %v3283_v25 = vpop.f32.mrf.mxu3 }
 0xae2   :  { %v3264_v48 = vadd.f32 1e-05, %v3263_v39  ;;  %v3284_v13 = vadd.f32 1e-05, %v3283_v25 }
 0xae4   :  { %4539 = vrsqrt.f32 %v3264_v48  ;;  %vm3332_vm3 = vweird.f32 %v3264_v48  ;;  %vm3342_vm5 = vweird.f32 %v3284_v13 }
 0xae5   :  { %v4536_v6 = vpop.eup %4535  ;;  %4541 = vrsqrt.f32 %v3284_v13 }
 0xae6   :  { %v4538_v59 = vpop.eup %4537  ;;  %v3347_v3 = vmul.f32 %v4536_v6, %v3304_v27  ;;  %vm3353_vm2 = vweird.f32 %v4536_v6 }
 0xae7   :  { %v3357_v55 = vmul.f32 %v4538_v59, %v3324_v38  ;;  %vm3363_vm10 = vweird.f32 %v4538_v59  ;;  %vm3354_vm12 = vmor %vm3352_vm11, %vm3353_vm2 }
 0xae8   :  { %v3348_v17 = vmul.f32 %v4536_v6, %v3347_v3  ;;  %vm3364_vm14 = vmor %vm3362_vm13, %vm3363_vm10  ;;  %v3670_v3 = vld [vmem:[#allocation25 + $0x850] sm:$0xff] }
 0xae9   :  { %v3358_v32 = vmul.f32 %v4538_v59, %v3357_v55  ;;  %v3766_v55 = vld [vmem:[#allocation25 + $0xb50] sm:$0xff] }
 0xaea   :  { %v4540_v11 = vpop.eup %4539  ;;  %v3349_v33 = vmul.f32 0.5, %v3348_v17  ;;  %v3490_v17 = vld [vmem:[#allocation25 + $0x2b0] sm:$0xff] }
 0xaeb   :  { %v4542_v60 = vpop.eup %4541  ;;  %v3359_v47 = vmul.f32 0.5, %v3358_v32  ;;  %v3327_v1 = vmul.f32 %v4540_v11, %v3264_v48  ;;  %vm3333_vm15 = vweird.f32 %v4540_v11  ;;  %v3676_v48 = vld [vmem:[#allocation25 + $0x880] sm:$0xff]  ;;  %v3586_v32 = vld [vmem:[#allocation25 + $0x5b0] sm:$0xff] }
 0xaec   :  { %v3350_v40 = vsub.f32 1.5, %v3349_v33  ;;  %v3337_v54 = vmul.f32 %v4542_v60, %v3284_v13  ;;  %vm3343_vm1 = vweird.f32 %v4542_v60  ;;  %vm3334_vm4 = vmor %vm3332_vm3, %vm3333_vm15  ;;  %v3484_v33 = vld [vmem:[#allocation25 + $0x280] sm:$0xff] }
 0xaed   :  { %v3360_v34 = vsub.f32 1.5, %v3359_v47  ;;  %v3328_v46 = vmul.f32 %v4540_v11, %v3327_v1  ;;  %vm3344_vm6 = vmor %vm3342_vm5, %vm3343_vm1  ;;  %v3658_v47 = vld [vmem:[#allocation25 + $0x7f0] sm:$0xff] }
 0xaee   :  { %v3351_v30 = vmul.f32 %v4536_v6, %v3350_v40  ;;  %v3338_v52 = vmul.f32 %v4542_v60, %v3337_v54  ;;  %v3754_v1 = vld [vmem:[#allocation25 + $0xaf0] sm:$0xff] }
 0xaef   :  { %v3361_v16 = vmul.f32 %v4538_v59, %v3360_v34  ;;  %v3329_v20 = vmul.f32 0.5, %v3328_v46  ;;  %v3478_v40 = vld [vmem:[#allocation25 + $0x250] sm:$0xff]  ;;  %v3472_v34 = vld [vmem:[#allocation25 + $0x220] sm:$0xff] }
 0xaf0   :  { %v3355_v23 = vsel %vm3354_vm12, %v4536_v6, %v3351_v30  ;;  %v3339_v7 = vmul.f32 0.5, %v3338_v52  ;;  %v3772_v6 = vld [vmem:[#allocation25 + $0xb80] sm:$0xff]  ;;  %v3574_v54 = vld [vmem:[#allocation25 + $0x550] sm:$0xff] }
 0xaf1   :  { %v3377_v9 = vmul.f32 %v3369_v21, %v3355_v23  ;;  %v3365_v10 = vsel %vm3364_vm14, %v4538_v59, %v3361_v16  ;;  %v3330_v15 = vsub.f32 1.5, %v3329_v20  ;;  %v3748_v21 = vld [vmem:[#allocation25 + $0xac0] sm:$0xff]  ;;  %v3646_v30 = vld [vmem:[#allocation25 + $0x790] sm:$0xff] }
 0xaf2   :  { %v3378_v18 = vmul.f32 %v3370_v14, %v3365_v10  ;;  %v3340_v22 = vsub.f32 1.5, %v3339_v7  ;;  %v3568_v46 = vld [vmem:[#allocation25 + $0x520] sm:$0xff]  ;;  %v3742_v14 = vld [vmem:[#allocation25 + $0xa90] sm:$0xff] }
 0xaf3   :  { %v3381_v19 = vperm.slane %v3377_v9, 0  ;;  %v3331_v63 = vmul.f32 %v4540_v11, %v3330_v15  ;;  %v3466_v52 = vld [vmem:[#allocation25 + $0x1f0] sm:$0xff]  ;;  %v3640_v20 = vld [vmem:[#allocation25 + $0x760] sm:$0xff] }
 0xaf4   :  { %v3382_v26 = vperm.slane %v3378_v18, 0  ;;  %v3341_v45 = vmul.f32 %v4542_v60, %v3340_v22  ;;  %v3562_v16 = vld [vmem:[#allocation25 + $0x4f0] sm:$0xff]  ;;  %v3736_v23 = vld [vmem:[#allocation25 + $0xa60] sm:$0xff] }
 0xaf5   :  { %v3385_v50 = vmul.f32 %v3381_v19, %v6769_v49  ;;  %v3335_v51 = vsel %vm3334_vm4, %v4540_v11, %v3331_v63  ;;  %v3664_v11 = vld [vmem:[#allocation25 + $0x820] sm:$0xff]  ;;  %v3634_v9 = vld [vmem:[#allocation25 + $0x730] sm:$0xff] }
 0xaf6   :  { %v3386_v61 = vmul.f32 %v3382_v26, %v6772_v53  ;;  %v3375_v62 = vmul.f32 %v3367_v58, %v3335_v51  ;;  %v3345_v0 = vsel %vm3344_vm6, %v4542_v60, %v3341_v45  ;;  %v3682_v53 = vld [vmem:[#allocation25 + $0x8b0] sm:$0xff]  ;;  %v3580_v60 = vld [vmem:[#allocation25 + $0x580] sm:$0xff] }
 0xaf7   :  { %v3398_v2 = vadd.f32 %v3390_v29, %v3385_v50  ;;  %v3376_v5 = vmul.f32 %v3368_v24, %v3345_v0  ;;  %v3460_v29 = vld [vmem:[#allocation25 + $0x1c0] sm:$0xff]  ;;  %v3730_v10 = vld [vmem:[#allocation25 + $0xa30] sm:$0xff] }
 0xaf8   :  { %v3399_v31 = vadd.f32 %v3391_v28, %v3386_v61  ;;  %v3379_v42 = vperm.slane %v3375_v62, 0  ;;  %v3556_v7 = vld [vmem:[#allocation25 + $0x4c0] sm:$0xff]  ;;  %v3454_v15 = vld [vmem:[#allocation25 + $0x190] sm:$0xff] }
 0xaf9   :  { %v6802_v27 = vmax.f32 %v3398_v2, 0.0  ;;  %v3380_v38 = vperm.slane %v3376_v5, 0  ;;  %v3550_v18 = vld [vmem:[#allocation25 + $0x490] sm:$0xff]  ;;  %v3628_v58 = vld [vmem:[#allocation25 + $0x700] sm:$0xff] }
 0xafa   :  { %v6804_v56 = vmax.f32 %v3399_v31, 0.0  ;;  %v3383_v49 = vmul.f32 %v3379_v42, %v6781_v44  ;;  %v3496_v44 = vld [vmem:[#allocation25 + $0x2e0] sm:$0xff]  ;;  %v3622_v24 = vld [vmem:[#allocation25 + $0x6d0] sm:$0xff] }
 0xafb   :  { %v3384_v39 = vmul.f32 %v3380_v38, %v6784_v4  ;;  %3858 = vmatmul.f32.vlgmr.msra.gmra.mxu0 %v6802_v27  ;;  %v3592_v4 = vld [vmem:[#allocation25 + $0x5e0] sm:$0xff]  ;;  %v3718_v26 = vld [vmem:[#allocation25 + $0x9d0] sm:$0xff] }
 0xafc   :  { %v3396_v25 = vadd.f32 %v3388_v35, %v3383_v49  ;;  %3878 = vmatmul.f32.vlgmr.msra.gmra.mxu1 %v6804_v56  ;;  %4002 = vmatpush.msra.mxu0 %v3688_v41  ;;  %v3724_v22 = vld [vmem:[#allocation25 + $0xa00] sm:$0xff]  ;;  %v3442_v28 = vld [vmem:[#allocation25 + $0x130] sm:$0xff] }
 0xafd   :  { %v3397_v37 = vadd.f32 %v3389_v12, %v3384_v39  ;;  %4022 = vmatpush.msra.mxu1 %v3784_v36  ;;  %v3448_v19 = vld [vmem:[#allocation25 + $0x160] sm:$0xff]  ;;  %v3538_v45 = vld [vmem:[#allocation25 + $0x430] sm:$0xff]  ;;  %v3689_v36 = vld [vmem:[#allocation25 + $0x8e8] sm:$0xff] }
 0xafe   :  { %v6810_v13 = vmax.f32 %v3396_v25, 0.0  ;;  %4003 = vmatpush.msra.mxu0 %v3682_v53  ;;  %v3544_v63 = vld [vmem:[#allocation25 + $0x460] sm:$0xff]  ;;  %v3610_v0 = vld [vmem:[#allocation25 + $0x670] sm:$0xff]  ;;  %v3785_v39 = vld [vmem:[#allocation25 + $0xbe8] sm:$0xff] }
 0xaff   :  { %v6812_v59 = vmax.f32 %v3397_v37, 0.0  ;;  %4023 = vmatpush.msra.mxu1 %v3778_v57  ;;  %v3616_v50 = vld [vmem:[#allocation25 + $0x6a0] sm:$0xff]  ;;  %v3706_v2 = vld [vmem:[#allocation25 + $0x970] sm:$0xff]  ;;  %v3683_v57 = vld [vmem:[#allocation25 + $0x8b8] sm:$0xff] }
 0xb00   :  { %4004 = vmatpush.msra.mxu0 %v3676_v48  ;;  %3818 = vmatmul.f32.vlgmr.msrb.gmra.mxu2 %v6810_v13  ;;  %v3712_v51 = vld [vmem:[#allocation25 + $0x9a0] sm:$0xff]  ;;  %v3430_v5 = vld [vmem:[#allocation25 + $0xd0] sm:$0xff]  ;;  %v3779_v37 = vld [vmem:[#allocation25 + $0xbb8] sm:$0xff] }
 0xb01   :  { %4024 = vmatpush.msra.mxu1 %v3772_v6  ;;  %3838 = vmatmul.f32.vlgmr.msrb.gmra.mxu3 %v6812_v59  ;;  %v3436_v61 = vld [vmem:[#allocation25 + $0x100] sm:$0xff]  ;;  %v3526_v31 = vld [vmem:[#allocation25 + $0x3d0] sm:$0xff] }
 0xb02   :  { %3962 = vmatpush.msrb.mxu2 %v3496_v44  ;;  %3982 = vmatpush.msrb.mxu3 %v3592_v4  ;;  %v3532_v62 = vld [vmem:[#allocation25 + $0x400] sm:$0xff]  ;;  %v3598_v41 = vld [vmem:[#allocation25 + $0x610] sm:$0xff]  ;;  %v3677_v44 = vld [vmem:[#allocation25 + $0x888] sm:$0xff] }
 0xb03   :  { %4005 = vmatpush.msra.mxu0 %v3670_v3  ;;  %4025 = vmatpush.msra.mxu1 %v3766_v55  ;;  %v3604_v42 = vld [vmem:[#allocation25 + $0x640] sm:$0xff]  ;;  %v3694_v49 = vld [vmem:[#allocation25 + $0x910] sm:$0xff]  ;;  %v3773_v4 = vld [vmem:[#allocation25 + $0xb88] sm:$0xff] }
 0xb04   :  { %3938 = vmatmul.f32.vlgmr.msrb.gmra.mxu0 %v6802_v27  ;;  %3958 = vmatmul.f32.vlgmr.msrb.gmra.mxu1 %v6804_v56  ;;  %v3700_v35 = vld [vmem:[#allocation25 + $0x940] sm:$0xff]  ;;  %v3418_v53 = vld [vmem:[#allocation25 + $0x70] sm:$0xff] }
 0xb05   :  { %3963 = vmatpush.msrb.mxu2 %v3490_v17  ;;  %3983 = vmatpush.msrb.mxu3 %v3586_v32  ;;  %v3424_v38 = vld [vmem:[#allocation25 + $0xa0] sm:$0xff]  ;;  %v3514_v25 = vld [vmem:[#allocation25 + $0x370] sm:$0xff]  ;;  %v3497_v17 = vld [vmem:[#allocation25 + $0x2e8] sm:$0xff] }
 0xb06   :  { %4006 = vmatpush.msra.mxu0 %v3664_v11  ;;  %4026 = vmatpush.msra.mxu1 %v3760_v43  ;;  %v3520_v12 = vld [vmem:[#allocation25 + $0x3a0] sm:$0xff]  ;;  %v3406_v3 = vld [vmem:[#allocation25 + $0x10] sm:$0xff]  ;;  %v3593_v32 = vld [vmem:[#allocation25 + $0x5e8] sm:$0xff] }
 0xb07   :  { %3964 = vmatpush.msrb.mxu2 %v3484_v33  ;;  %3984 = vmatpush.msrb.mxu3 %v3580_v60  ;;  %v3412_v48 = vld [vmem:[#allocation25 + $0x40] sm:$0xff]  ;;  %v3502_v55 = vld [vmem:[#allocation25 + $0x310] sm:$0xff]  ;;  %v3671_v11 = vld [vmem:[#allocation25 + $0x858] sm:$0xff] }
 0xb08   :  { %4007 = vmatpush.msra.mxu0 %v3658_v47  ;;  %4027 = vmatpush.msra.mxu1 %v3754_v1  ;;  %v3508_v6 = vld [vmem:[#allocation25 + $0x340] sm:$0xff]  ;;  %v3767_v43 = vld [vmem:[#allocation25 + $0xb58] sm:$0xff]  ;;  %v3665_v47 = vld [vmem:[#allocation25 + $0x828] sm:$0xff] }
 0xb09   :  { %3965 = vmatpush.msrb.mxu2 %v3478_v40  ;;  %3985 = vmatpush.msrb.mxu3 %v3574_v54  ;;  %v3491_v33 = vld [vmem:[#allocation25 + $0x2b8] sm:$0xff]  ;;  %v3761_v1 = vld [vmem:[#allocation25 + $0xb28] sm:$0xff] }
 0xb0a   :  { %4008 = vmatpush.msra.mxu0 %v3652_v8  ;;  %4028 = vmatpush.msra.mxu1 %v3748_v21  ;;  %v3587_v60 = vld [vmem:[#allocation25 + $0x5b8] sm:$0xff]  ;;  %v3485_v40 = vld [vmem:[#allocation25 + $0x288] sm:$0xff] }
 0xb0b   :  { %3898 = vmatmul.f32.vlgmr.msra.gmra.mxu2 %v6810_v13  ;;  %3918 = vmatmul.f32.vlgmr.msra.gmra.mxu3 %v6812_v59  ;;  %v3581_v54 = vld [vmem:[#allocation25 + $0x588] sm:$0xff]  ;;  %v3659_v8 = vld [vmem:[#allocation25 + $0x7f8] sm:$0xff] }
 0xb0c   :  { %3966 = vmatpush.msrb.mxu2 %v3472_v34  ;;  %3986 = vmatpush.msrb.mxu3 %v3568_v46  ;;  %v3755_v21 = vld [vmem:[#allocation25 + $0xaf8] sm:$0xff] }
 0xb0d   :  { %4009 = vmatpush.msra.mxu0 %v3646_v30  ;;  %4029 = vmatpush.msra.mxu1 %v3742_v14  ;;  %v3479_v34 = vld [vmem:[#allocation25 + $0x258] sm:$0xff]  ;;  %v3653_v30 = vld [vmem:[#allocation25 + $0x7c8] sm:$0xff] }
 0xb0e   :  { %3967 = vmatpush.msrb.mxu2 %v3466_v52  ;;  %3987 = vmatpush.msrb.mxu3 %v3562_v16  ;;  %v3575_v46 = vld [vmem:[#allocation25 + $0x558] sm:$0xff]  ;;  %v3749_v14 = vld [vmem:[#allocation25 + $0xac8] sm:$0xff] }
 0xb0f   :  { %4010 = vmatpush.msra.mxu0 %v3640_v20  ;;  %4030 = vmatpush.msra.mxu1 %v3736_v23  ;;  %v3473_v52 = vld [vmem:[#allocation25 + $0x228] sm:$0xff]  ;;  %v3647_v20 = vld [vmem:[#allocation25 + $0x798] sm:$0xff] }
 0xb10   :  { %3968 = vmatpush.msrb.mxu2 %v3460_v29  ;;  %3988 = vmatpush.msrb.mxu3 %v3556_v7  ;;  %v3569_v16 = vld [vmem:[#allocation25 + $0x528] sm:$0xff]  ;;  %v3743_v23 = vld [vmem:[#allocation25 + $0xa98] sm:$0xff] }
 0xb11   :  { %4011 = vmatpush.msra.mxu0 %v3634_v9  ;;  %4031 = vmatpush.msra.mxu1 %v3730_v10  ;;  %v3467_v29 = vld [vmem:[#allocation25 + $0x1f8] sm:$0xff]  ;;  %v3641_v9 = vld [vmem:[#allocation25 + $0x768] sm:$0xff] }
 0xb12   :  { %3969 = vmatpush.msrb.mxu2 %v3454_v15  ;;  %3989 = vmatpush.msrb.mxu3 %v3550_v18  ;;  %v3563_v7 = vld [vmem:[#allocation25 + $0x4f8] sm:$0xff]  ;;  %v3737_v10 = vld [vmem:[#allocation25 + $0xa68] sm:$0xff] }
 0xb13   :  { %4012 = vmatpush.msra.mxu0 %v3628_v58  ;;  %4032 = vmatpush.msra.mxu1 %v3724_v22  ;;  %v3461_v15 = vld [vmem:[#allocation25 + $0x1c8] sm:$0xff]  ;;  %v3635_v58 = vld [vmem:[#allocation25 + $0x738] sm:$0xff] }
 0xb14   :  { %3970 = vmatpush.msrb.mxu2 %v3448_v19  ;;  %3990 = vmatpush.msrb.mxu3 %v3544_v63  ;;  %v3557_v18 = vld [vmem:[#allocation25 + $0x4c8] sm:$0xff]  ;;  %v3731_v22 = vld [vmem:[#allocation25 + $0xa38] sm:$0xff] }
 0xb15   :  { %4013 = vmatpush.msra.mxu0 %v3622_v24  ;;  %4033 = vmatpush.msra.mxu1 %v3718_v26  ;;  %v3455_v19 = vld [vmem:[#allocation25 + $0x198] sm:$0xff]  ;;  %v3629_v24 = vld [vmem:[#allocation25 + $0x708] sm:$0xff] }
 0xb16   :  { %3971 = vmatpush.msrb.mxu2 %v3442_v28  ;;  %3991 = vmatpush.msrb.mxu3 %v3538_v45  ;;  %v3551_v63 = vld [vmem:[#allocation25 + $0x498] sm:$0xff]  ;;  %v3725_v26 = vld [vmem:[#allocation25 + $0xa08] sm:$0xff] }
 0xb17   :  { %4014 = vmatpush.msra.mxu0 %v3616_v50  ;;  %4034 = vmatpush.msra.mxu1 %v3712_v51  ;;  %v3449_v28 = vld [vmem:[#allocation25 + $0x168] sm:$0xff]  ;;  %v3623_v50 = vld [vmem:[#allocation25 + $0x6d8] sm:$0xff] }
 0xb18   :  { %3972 = vmatpush.msrb.mxu2 %v3436_v61  ;;  %3992 = vmatpush.msrb.mxu3 %v3532_v62  ;;  %v3545_v45 = vld [vmem:[#allocation25 + $0x468] sm:$0xff]  ;;  %v3719_v51 = vld [vmem:[#allocation25 + $0x9d8] sm:$0xff] }
 0xb19   :  { %4015 = vmatpush.msra.mxu0 %v3610_v0  ;;  %4035 = vmatpush.msra.mxu1 %v3706_v2  ;;  %v3443_v61 = vld [vmem:[#allocation25 + $0x138] sm:$0xff]  ;;  %v3617_v0 = vld [vmem:[#allocation25 + $0x6a8] sm:$0xff] }
 0xb1a   :  { %3973 = vmatpush.msrb.mxu2 %v3430_v5  ;;  %3993 = vmatpush.msrb.mxu3 %v3526_v31  ;;  %v3539_v62 = vld [vmem:[#allocation25 + $0x438] sm:$0xff]  ;;  %v3713_v2 = vld [vmem:[#allocation25 + $0x9a8] sm:$0xff] }
 0xb1b   :  { %4016 = vmatpush.msra.mxu0 %v3604_v42  ;;  %4036 = vmatpush.msra.mxu1 %v3700_v35  ;;  %v3437_v5 = vld [vmem:[#allocation25 + $0x108] sm:$0xff]  ;;  %v3611_v42 = vld [vmem:[#allocation25 + $0x678] sm:$0xff] }
 0xb1c   :  { %3974 = vmatpush.msrb.mxu2 %v3424_v38  ;;  %3994 = vmatpush.msrb.mxu3 %v3520_v12  ;;  %v3533_v31 = vld [vmem:[#allocation25 + $0x408] sm:$0xff]  ;;  %v3707_v35 = vld [vmem:[#allocation25 + $0x978] sm:$0xff] }
 0xb1d   :  { %4017 = vmatpush.msra.mxu0 %v3598_v41  ;;  %4037 = vmatpush.msra.mxu1 %v3694_v49  ;;  %v3431_v38 = vld [vmem:[#allocation25 + $0xd8] sm:$0xff]  ;;  %v3605_v41 = vld [vmem:[#allocation25 + $0x648] sm:$0xff] }
 0xb1e   :  { %4018 = vmatmul.f32.vlgmr.msra.gmra.mxu0 %v6802_v27  ;;  %4038 = vmatmul.f32.vlgmr.msra.gmra.mxu1 %v6804_v56  ;;  %v3527_v12 = vld [vmem:[#allocation25 + $0x3d8] sm:$0xff]  ;;  %v3701_v49 = vld [vmem:[#allocation25 + $0x948] sm:$0xff] }
 0xb1f   :  { %4082 = vmatpush.msrb.mxu0 %v3689_v36  ;;  %4102 = vmatpush.msrb.mxu1 %v3785_v39  ;;  %v3425_v36 = vld [vmem:[#allocation25 + $0xa8] sm:$0xff] }
 0xb20   :  { %3975 = vmatpush.msrb.mxu2 %v3418_v53  ;;  %3995 = vmatpush.msrb.mxu3 %v3514_v25  ;;  %v3521_v39 = vld [vmem:[#allocation25 + $0x3a8] sm:$0xff]  ;;  %v3599_v53 = vld [vmem:[#allocation25 + $0x618] sm:$0xff] }
 0xb21   :  { %4083 = vmatpush.msrb.mxu0 %v3683_v57  ;;  %4103 = vmatpush.msrb.mxu1 %v3779_v37  ;;  %v3695_v25 = vld [vmem:[#allocation25 + $0x918] sm:$0xff]  ;;  %v3690_v57 = vld [vmem:[#allocation25 + $0x8f0] sm:$0xff] }
 0xb22   :  { %3976 = vmatpush.msrb.mxu2 %v3412_v48  ;;  %3996 = vmatpush.msrb.mxu3 %v3508_v6  ;;  %v3786_v37 = vld [vmem:[#allocation25 + $0xbf0] sm:$0xff]  ;;  %v3419_v48 = vld [vmem:[#allocation25 + $0x78] sm:$0xff] }
 0xb23   :  { %4084 = vmatpush.msrb.mxu0 %v3677_v44  ;;  %4104 = vmatpush.msrb.mxu1 %v3773_v4  ;;  %v3515_v6 = vld [vmem:[#allocation25 + $0x378] sm:$0xff]  ;;  %v3684_v44 = vld [vmem:[#allocation25 + $0x8c0] sm:$0xff] }
 0xb24   :  { %3977 = vmatpush.msrb.mxu2 %v3406_v3  ;;  %3997 = vmatpush.msrb.mxu3 %v3502_v55  ;;  %v3780_v4 = vld [vmem:[#allocation25 + $0xbc0] sm:$0xff]  ;;  %v3413_v3 = vld [vmem:[#allocation25 + $0x48] sm:$0xff] }
 0xb25   :  { %3978 = vmatmul.f32.vlgmr.msrb.gmra.mxu2 %v6810_v13  ;;  %3998 = vmatmul.f32.vlgmr.msrb.gmra.mxu3 %v6812_v59  ;;  %v3509_v55 = vld [vmem:[#allocation25 + $0x348] sm:$0xff] }
 0xb26   :  { %4042 = vmatpush.msra.mxu2 %v3497_v17  ;;  %4062 = vmatpush.msra.mxu3 %v3593_v32  ;;  %v3678_v17 = vld [vmem:[#allocation25 + $0x890] sm:$0xff] }
 0xb27   :  { %4085 = vmatpush.msrb.mxu0 %v3671_v11  ;;  %4105 = vmatpush.msrb.mxu1 %v3767_v43  ;;  %v3774_v32 = vld [vmem:[#allocation25 + $0xb90] sm:$0xff]  ;;  %v3407_v11 = vld [vmem:[#allocation25 + $0x18] sm:$0xff] }
 0xb28   :  { %4043 = vmatpush.msra.mxu2 %v3491_v33  ;;  %4063 = vmatpush.msra.mxu3 %v3587_v60  ;;  %v3503_v43 = vld [vmem:[#allocation25 + $0x318] sm:$0xff]  ;;  %v3498_v33 = vld [vmem:[#allocation25 + $0x2f0] sm:$0xff] }
 0xb29   :  { %4086 = vmatpush.msrb.mxu0 %v3665_v47  ;;  %4106 = vmatpush.msrb.mxu1 %v3761_v1  ;;  %v3594_v60 = vld [vmem:[#allocation25 + $0x5f0] sm:$0xff]  ;;  %v3672_v47 = vld [vmem:[#allocation25 + $0x860] sm:$0xff] }
 0xb2a   :  { %4044 = vmatpush.msra.mxu2 %v3485_v40  ;;  %4064 = vmatpush.msra.mxu3 %v3581_v54  ;;  %v3768_v1 = vld [vmem:[#allocation25 + $0xb60] sm:$0xff] }
 0xb2b   :  { %4087 = vmatpush.msrb.mxu0 %v3659_v8  ;;  %4107 = vmatpush.msrb.mxu1 %v3755_v21  ;;  %v3492_v40 = vld [vmem:[#allocation25 + $0x2c0] sm:$0xff]  ;;  %v3666_v8 = vld [vmem:[#allocation25 + $0x830] sm:$0xff] }
 0xb2c   :  { %4045 = vmatpush.msra.mxu2 %v3479_v34  ;;  %4065 = vmatpush.msra.mxu3 %v3575_v46  ;;  %v3588_v54 = vld [vmem:[#allocation25 + $0x5c0] sm:$0xff]  ;;  %v3762_v21 = vld [vmem:[#allocation25 + $0xb30] sm:$0xff] }
 0xb2d   :  { %4088 = vmatpush.msrb.mxu0 %v3653_v30  ;;  %4108 = vmatpush.msrb.mxu1 %v3749_v14  ;;  %v3486_v34 = vld [vmem:[#allocation25 + $0x290] sm:$0xff]  ;;  %v3660_v30 = vld [vmem:[#allocation25 + $0x800] sm:$0xff] }
 0xb2e   :  { %4046 = vmatpush.msra.mxu2 %v3473_v52  ;;  %4066 = vmatpush.msra.mxu3 %v3569_v16  ;;  %v3582_v46 = vld [vmem:[#allocation25 + $0x590] sm:$0xff]  ;;  %v3756_v14 = vld [vmem:[#allocation25 + $0xb00] sm:$0xff] }
 0xb2f   :  { %4089 = vmatpush.msrb.mxu0 %v3647_v20  ;;  %4109 = vmatpush.msrb.mxu1 %v3743_v23  ;;  %v3480_v52 = vld [vmem:[#allocation25 + $0x260] sm:$0xff]  ;;  %v3654_v20 = vld [vmem:[#allocation25 + $0x7d0] sm:$0xff] }
 0xb30   :  { %4047 = vmatpush.msra.mxu2 %v3467_v29  ;;  %4067 = vmatpush.msra.mxu3 %v3563_v7  ;;  %v3576_v16 = vld [vmem:[#allocation25 + $0x560] sm:$0xff]  ;;  %v3750_v23 = vld [vmem:[#allocation25 + $0xad0] sm:$0xff] }
 0xb31   :  { %4090 = vmatpush.msrb.mxu0 %v3641_v9  ;;  %4110 = vmatpush.msrb.mxu1 %v3737_v10  ;;  %v3474_v29 = vld [vmem:[#allocation25 + $0x230] sm:$0xff]  ;;  %v3648_v9 = vld [vmem:[#allocation25 + $0x7a0] sm:$0xff] }
 0xb32   :  { %4048 = vmatpush.msra.mxu2 %v3461_v15  ;;  %4068 = vmatpush.msra.mxu3 %v3557_v18  ;;  %v3570_v7 = vld [vmem:[#allocation25 + $0x530] sm:$0xff]  ;;  %v3744_v10 = vld [vmem:[#allocation25 + $0xaa0] sm:$0xff] }
 0xb33   :  { %4091 = vmatpush.msrb.mxu0 %v3635_v58  ;;  %4111 = vmatpush.msrb.mxu1 %v3731_v22  ;;  %v3468_v15 = vld [vmem:[#allocation25 + $0x200] sm:$0xff]  ;;  %v3642_v58 = vld [vmem:[#allocation25 + $0x770] sm:$0xff] }
 0xb34   :  { %4049 = vmatpush.msra.mxu2 %v3455_v19  ;;  %4069 = vmatpush.msra.mxu3 %v3551_v63  ;;  %v3564_v18 = vld [vmem:[#allocation25 + $0x500] sm:$0xff]  ;;  %v3738_v22 = vld [vmem:[#allocation25 + $0xa70] sm:$0xff] }
 0xb35   :  { %4092 = vmatpush.msrb.mxu0 %v3629_v24  ;;  %4112 = vmatpush.msrb.mxu1 %v3725_v26  ;;  %v3462_v19 = vld [vmem:[#allocation25 + $0x1d0] sm:$0xff]  ;;  %v3636_v24 = vld [vmem:[#allocation25 + $0x740] sm:$0xff] }
 0xb36   :  { %4050 = vmatpush.msra.mxu2 %v3449_v28  ;;  %4070 = vmatpush.msra.mxu3 %v3545_v45  ;;  %v3558_v63 = vld [vmem:[#allocation25 + $0x4d0] sm:$0xff]  ;;  %v3732_v26 = vld [vmem:[#allocation25 + $0xa40] sm:$0xff] }
 0xb37   :  { %4093 = vmatpush.msrb.mxu0 %v3623_v50  ;;  %4113 = vmatpush.msrb.mxu1 %v3719_v51  ;;  %v3456_v28 = vld [vmem:[#allocation25 + $0x1a0] sm:$0xff]  ;;  %v3630_v50 = vld [vmem:[#allocation25 + $0x710] sm:$0xff] }
 0xb38   :  { %4051 = vmatpush.msra.mxu2 %v3443_v61  ;;  %4071 = vmatpush.msra.mxu3 %v3539_v62  ;;  %v3552_v45 = vld [vmem:[#allocation25 + $0x4a0] sm:$0xff]  ;;  %v3726_v51 = vld [vmem:[#allocation25 + $0xa10] sm:$0xff] }
 0xb39   :  { %4094 = vmatpush.msrb.mxu0 %v3617_v0  ;;  %4114 = vmatpush.msrb.mxu1 %v3713_v2  ;;  %v3450_v61 = vld [vmem:[#allocation25 + $0x170] sm:$0xff]  ;;  %v3624_v0 = vld [vmem:[#allocation25 + $0x6e0] sm:$0xff] }
 0xb3a   :  { %4052 = vmatpush.msra.mxu2 %v3437_v5  ;;  %4072 = vmatpush.msra.mxu3 %v3533_v31  ;;  %v3546_v62 = vld [vmem:[#allocation25 + $0x470] sm:$0xff]  ;;  %v3720_v2 = vld [vmem:[#allocation25 + $0x9e0] sm:$0xff] }
 0xb3b   :  { %4095 = vmatpush.msrb.mxu0 %v3611_v42  ;;  %4115 = vmatpush.msrb.mxu1 %v3707_v35  ;;  %v3444_v5 = vld [vmem:[#allocation25 + $0x140] sm:$0xff]  ;;  %v3618_v42 = vld [vmem:[#allocation25 + $0x6b0] sm:$0xff] }
 0xb3c   :  { %4053 = vmatpush.msra.mxu2 %v3431_v38  ;;  %4073 = vmatpush.msra.mxu3 %v3527_v12  ;;  %v3540_v31 = vld [vmem:[#allocation25 + $0x440] sm:$0xff]  ;;  %v3714_v35 = vld [vmem:[#allocation25 + $0x9b0] sm:$0xff] }
 0xb3d   :  { %4096 = vmatpush.msrb.mxu0 %v3605_v41  ;;  %4116 = vmatpush.msrb.mxu1 %v3701_v49  ;;  %v3438_v38 = vld [vmem:[#allocation25 + $0x110] sm:$0xff]  ;;  %v3612_v41 = vld [vmem:[#allocation25 + $0x680] sm:$0xff] }
 0xb3e   :  { %4054 = vmatpush.msra.mxu2 %v3425_v36  ;;  %4074 = vmatpush.msra.mxu3 %v3521_v39  ;;  %v3534_v12 = vld [vmem:[#allocation25 + $0x410] sm:$0xff]  ;;  %v3708_v49 = vld [vmem:[#allocation25 + $0x980] sm:$0xff] }
 0xb3f   :  { %4097 = vmatpush.msrb.mxu0 %v3599_v53  ;;  %4117 = vmatpush.msrb.mxu1 %v3695_v25  ;;  %v3432_v36 = vld [vmem:[#allocation25 + $0xe0] sm:$0xff]  ;;  %v3606_v53 = vld [vmem:[#allocation25 + $0x650] sm:$0xff] }
 0xb40   :  { %4098 = vmatmul.f32.vlgmr.msrb.gmra.mxu0 %v6802_v27  ;;  %4118 = vmatmul.f32.vlgmr.msrb.gmra.mxu1 %v6804_v56  ;;  %v3528_v39 = vld [vmem:[#allocation25 + $0x3e0] sm:$0xff]  ;;  %v3702_v25 = vld [vmem:[#allocation25 + $0x950] sm:$0xff] }
 0xb41   :  { %4162 = vmatpush.msra.mxu0 %v3690_v57  ;;  %4182 = vmatpush.msra.mxu1 %v3786_v37  ;;  %v3426_v57 = vld [vmem:[#allocation25 + $0xb0] sm:$0xff] }
 0xb42   :  { %4055 = vmatpush.msra.mxu2 %v3419_v48  ;;  %4075 = vmatpush.msra.mxu3 %v3515_v6  ;;  %v3522_v37 = vld [vmem:[#allocation25 + $0x3b0] sm:$0xff]  ;;  %v3600_v48 = vld [vmem:[#allocation25 + $0x620] sm:$0xff] }
 0xb43   :  { %4163 = vmatpush.msra.mxu0 %v3684_v44  ;;  %4183 = vmatpush.msra.mxu1 %v3780_v4  ;;  %v3696_v6 = vld [vmem:[#allocation25 + $0x920] sm:$0xff]  ;;  %v3691_v44 = vld [vmem:[#allocation25 + $0x8f8] sm:$0xff] }
 0xb44   :  { %4056 = vmatpush.msra.mxu2 %v3413_v3  ;;  %4076 = vmatpush.msra.mxu3 %v3509_v55  ;;  %v3787_v4 = vld [vmem:[#allocation25 + $0xbf8] sm:$0xff]  ;;  %v3420_v3 = vld [vmem:[#allocation25 + $0x80] sm:$0xff] }
 0xb45   :  { %4164 = vmatpush.msra.mxu0 %v3678_v17  ;;  %4184 = vmatpush.msra.mxu1 %v3774_v32  ;;  %v3516_v55 = vld [vmem:[#allocation25 + $0x380] sm:$0xff]  ;;  %v3685_v17 = vld [vmem:[#allocation25 + $0x8c8] sm:$0xff] }
 0xb46   :  { %4057 = vmatpush.msra.mxu2 %v3407_v11  ;;  %4077 = vmatpush.msra.mxu3 %v3503_v43  ;;  %v3781_v32 = vld [vmem:[#allocation25 + $0xbc8] sm:$0xff]  ;;  %v3414_v11 = vld [vmem:[#allocation25 + $0x50] sm:$0xff] }
 0xb47   :  { %4058 = vmatmul.f32.vlgmr.msra.gmra.mxu2 %v6810_v13  ;;  %4078 = vmatmul.f32.vlgmr.msra.gmra.mxu3 %v6812_v59  ;;  %v3510_v43 = vld [vmem:[#allocation25 + $0x350] sm:$0xff] }
 0xb48   :  { %4122 = vmatpush.msrb.mxu2 %v3498_v33  ;;  %4142 = vmatpush.msrb.mxu3 %v3594_v60  ;;  %v3679_v33 = vld [vmem:[#allocation25 + $0x898] sm:$0xff] }
 0xb49   :  { %4165 = vmatpush.msra.mxu0 %v3672_v47  ;;  %4185 = vmatpush.msra.mxu1 %v3768_v1  ;;  %v3775_v60 = vld [vmem:[#allocation25 + $0xb98] sm:$0xff]  ;;  %v3408_v47 = vld [vmem:[#allocation25 + $0x20] sm:$0xff] }
 0xb4a   :  { %4123 = vmatpush.msrb.mxu2 %v3492_v40  ;;  %4143 = vmatpush.msrb.mxu3 %v3588_v54  ;;  %v3504_v1 = vld [vmem:[#allocation25 + $0x320] sm:$0xff]  ;;  %v3499_v40 = vld [vmem:[#allocation25 + $0x2f8] sm:$0xff] }
 0xb4b   :  { %4166 = vmatpush.msra.mxu0 %v3666_v8  ;;  %4186 = vmatpush.msra.mxu1 %v3762_v21  ;;  %v3595_v54 = vld [vmem:[#allocation25 + $0x5f8] sm:$0xff]  ;;  %v3673_v8 = vld [vmem:[#allocation25 + $0x868] sm:$0xff] }
 0xb4c   :  { %4124 = vmatpush.msrb.mxu2 %v3486_v34  ;;  %4144 = vmatpush.msrb.mxu3 %v3582_v46  ;;  %v3769_v21 = vld [vmem:[#allocation25 + $0xb68] sm:$0xff] }
 0xb4d   :  { %4167 = vmatpush.msra.mxu0 %v3660_v30  ;;  %4187 = vmatpush.msra.mxu1 %v3756_v14  ;;  %v3493_v34 = vld [vmem:[#allocation25 + $0x2c8] sm:$0xff]  ;;  %v3667_v30 = vld [vmem:[#allocation25 + $0x838] sm:$0xff] }
 0xb4e   :  { %4125 = vmatpush.msrb.mxu2 %v3480_v52  ;;  %4145 = vmatpush.msrb.mxu3 %v3576_v16  ;;  %v3589_v46 = vld [vmem:[#allocation25 + $0x5c8] sm:$0xff]  ;;  %v3763_v14 = vld [vmem:[#allocation25 + $0xb38] sm:$0xff] }
 0xb4f   :  { %4168 = vmatpush.msra.mxu0 %v3654_v20  ;;  %4188 = vmatpush.msra.mxu1 %v3750_v23  ;;  %v3487_v52 = vld [vmem:[#allocation25 + $0x298] sm:$0xff]  ;;  %v3661_v20 = vld [vmem:[#allocation25 + $0x808] sm:$0xff] }
 0xb50   :  { %4126 = vmatpush.msrb.mxu2 %v3474_v29  ;;  %4146 = vmatpush.msrb.mxu3 %v3570_v7  ;;  %v3583_v16 = vld [vmem:[#allocation25 + $0x598] sm:$0xff]  ;;  %v3757_v23 = vld [vmem:[#allocation25 + $0xb08] sm:$0xff] }
 0xb51   :  { %4169 = vmatpush.msra.mxu0 %v3648_v9  ;;  %4189 = vmatpush.msra.mxu1 %v3744_v10  ;;  %v3481_v29 = vld [vmem:[#allocation25 + $0x268] sm:$0xff]  ;;  %v3655_v9 = vld [vmem:[#allocation25 + $0x7d8] sm:$0xff] }
 0xb52   :  { %4127 = vmatpush.msrb.mxu2 %v3468_v15  ;;  %4147 = vmatpush.msrb.mxu3 %v3564_v18  ;;  %v3577_v7 = vld [vmem:[#allocation25 + $0x568] sm:$0xff]  ;;  %v3751_v10 = vld [vmem:[#allocation25 + $0xad8] sm:$0xff] }
 0xb53   :  { %4170 = vmatpush.msra.mxu0 %v3642_v58  ;;  %4190 = vmatpush.msra.mxu1 %v3738_v22  ;;  %v3475_v15 = vld [vmem:[#allocation25 + $0x238] sm:$0xff]  ;;  %v3649_v58 = vld [vmem:[#allocation25 + $0x7a8] sm:$0xff] }
 0xb54   :  { %4128 = vmatpush.msrb.mxu2 %v3462_v19  ;;  %4148 = vmatpush.msrb.mxu3 %v3558_v63  ;;  %v3571_v18 = vld [vmem:[#allocation25 + $0x538] sm:$0xff]  ;;  %v3745_v22 = vld [vmem:[#allocation25 + $0xaa8] sm:$0xff] }
 0xb55   :  { %4171 = vmatpush.msra.mxu0 %v3636_v24  ;;  %4191 = vmatpush.msra.mxu1 %v3732_v26  ;;  %v3469_v19 = vld [vmem:[#allocation25 + $0x208] sm:$0xff]  ;;  %v3643_v24 = vld [vmem:[#allocation25 + $0x778] sm:$0xff] }
 0xb56   :  { %4129 = vmatpush.msrb.mxu2 %v3456_v28  ;;  %4149 = vmatpush.msrb.mxu3 %v3552_v45  ;;  %v3565_v63 = vld [vmem:[#allocation25 + $0x508] sm:$0xff]  ;;  %v3739_v26 = vld [vmem:[#allocation25 + $0xa78] sm:$0xff] }
 0xb57   :  { %4172 = vmatpush.msra.mxu0 %v3630_v50  ;;  %4192 = vmatpush.msra.mxu1 %v3726_v51  ;;  %v3463_v28 = vld [vmem:[#allocation25 + $0x1d8] sm:$0xff]  ;;  %v3637_v50 = vld [vmem:[#allocation25 + $0x748] sm:$0xff] }
 0xb58   :  { %4130 = vmatpush.msrb.mxu2 %v3450_v61  ;;  %4150 = vmatpush.msrb.mxu3 %v3546_v62  ;;  %v3559_v45 = vld [vmem:[#allocation25 + $0x4d8] sm:$0xff]  ;;  %v3733_v51 = vld [vmem:[#allocation25 + $0xa48] sm:$0xff] }
 0xb59   :  { %4173 = vmatpush.msra.mxu0 %v3624_v0  ;;  %4193 = vmatpush.msra.mxu1 %v3720_v2  ;;  %v3457_v61 = vld [vmem:[#allocation25 + $0x1a8] sm:$0xff]  ;;  %v3631_v0 = vld [vmem:[#allocation25 + $0x718] sm:$0xff] }
 0xb5a   :  { %4131 = vmatpush.msrb.mxu2 %v3444_v5  ;;  %4151 = vmatpush.msrb.mxu3 %v3540_v31  ;;  %v3553_v62 = vld [vmem:[#allocation25 + $0x4a8] sm:$0xff]  ;;  %v3727_v2 = vld [vmem:[#allocation25 + $0xa18] sm:$0xff] }
 0xb5b   :  { %4174 = vmatpush.msra.mxu0 %v3618_v42  ;;  %4194 = vmatpush.msra.mxu1 %v3714_v35  ;;  %v3451_v5 = vld [vmem:[#allocation25 + $0x178] sm:$0xff]  ;;  %v3625_v42 = vld [vmem:[#allocation25 + $0x6e8] sm:$0xff] }
 0xb5c   :  { %4132 = vmatpush.msrb.mxu2 %v3438_v38  ;;  %4152 = vmatpush.msrb.mxu3 %v3534_v12  ;;  %v3547_v31 = vld [vmem:[#allocation25 + $0x478] sm:$0xff]  ;;  %v3721_v35 = vld [vmem:[#allocation25 + $0x9e8] sm:$0xff] }
 0xb5d   :  { %4175 = vmatpush.msra.mxu0 %v3612_v41  ;;  %4195 = vmatpush.msra.mxu1 %v3708_v49  ;;  %v3445_v38 = vld [vmem:[#allocation25 + $0x148] sm:$0xff]  ;;  %v3619_v41 = vld [vmem:[#allocation25 + $0x6b8] sm:$0xff] }
 0xb5e   :  { %4133 = vmatpush.msrb.mxu2 %v3432_v36  ;;  %4153 = vmatpush.msrb.mxu3 %v3528_v39  ;;  %v3541_v12 = vld [vmem:[#allocation25 + $0x448] sm:$0xff]  ;;  %v3715_v49 = vld [vmem:[#allocation25 + $0x9b8] sm:$0xff] }
 0xb5f   :  { %4176 = vmatpush.msra.mxu0 %v3606_v53  ;;  %4196 = vmatpush.msra.mxu1 %v3702_v25  ;;  %v3439_v36 = vld [vmem:[#allocation25 + $0x118] sm:$0xff]  ;;  %v3613_v53 = vld [vmem:[#allocation25 + $0x688] sm:$0xff] }
 0xb60   :  { %4134 = vmatpush.msrb.mxu2 %v3426_v57  ;;  %4154 = vmatpush.msrb.mxu3 %v3522_v37  ;;  %v3535_v39 = vld [vmem:[#allocation25 + $0x418] sm:$0xff]  ;;  %v3709_v25 = vld [vmem:[#allocation25 + $0x988] sm:$0xff] }
 0xb61   :  { %4177 = vmatpush.msra.mxu0 %v3600_v48  ;;  %4197 = vmatpush.msra.mxu1 %v3696_v6  ;;  %v3433_v57 = vld [vmem:[#allocation25 + $0xe8] sm:$0xff]  ;;  %v3607_v48 = vld [vmem:[#allocation25 + $0x658] sm:$0xff] }
 0xb62   :  { %4178 = vmatmul.f32.vlgmr.msra.gmra.mxu0 %v6802_v27  ;;  %4198 = vmatmul.f32.vlgmr.msra.gmra.mxu1 %v6804_v56  ;;  %v3529_v37 = vld [vmem:[#allocation25 + $0x3e8] sm:$0xff]  ;;  %v3703_v6 = vld [vmem:[#allocation25 + $0x958] sm:$0xff] }
 0xb63   :  { %4242 = vmatpush.msrb.mxu0 %v3691_v44  ;;  %4262 = vmatpush.msrb.mxu1 %v3787_v4  ;;  %v3427_v44 = vld [vmem:[#allocation25 + $0xb8] sm:$0xff] }
 0xb64   :  { %4135 = vmatpush.msrb.mxu2 %v3420_v3  ;;  %4155 = vmatpush.msrb.mxu3 %v3516_v55  ;;  %v3523_v4 = vld [vmem:[#allocation25 + $0x3b8] sm:$0xff]  ;;  %v3601_v3 = vld [vmem:[#allocation25 + $0x628] sm:$0xff] }
 0xb65   :  { %4243 = vmatpush.msrb.mxu0 %v3685_v17  ;;  %4263 = vmatpush.msrb.mxu1 %v3781_v32  ;;  %v3697_v55 = vld [vmem:[#allocation25 + $0x928] sm:$0xff] }
 0xb66   :  { %4136 = vmatpush.msrb.mxu2 %v3414_v11  ;;  %4156 = vmatpush.msrb.mxu3 %v3510_v43  ;;  %v3421_v17 = vld [vmem:[#allocation25 + $0x88] sm:$0xff]  ;;  %v3415_v11 = vld [vmem:[#allocation25 + $0x58] sm:$0xff] }
 0xb67   :  { %4244 = vmatpush.msrb.mxu0 %v3679_v33  ;;  %4264 = vmatpush.msrb.mxu1 %v3775_v60  ;;  %v3517_v32 = vld [vmem:[#allocation25 + $0x388] sm:$0xff]  ;;  %v3511_v43 = vld [vmem:[#allocation25 + $0x358] sm:$0xff] }
 0xb68   :  { %4137 = vmatpush.msrb.mxu2 %v3408_v47  ;;  %4157 = vmatpush.msrb.mxu3 %v3504_v1  ;;  %v3409_v33 = vld [vmem:[#allocation25 + $0x28] sm:$0xff] }
 0xb69   :  { %4138 = vmatmul.f32.vlgmr.msrb.gmra.mxu2 %v6810_v13  ;;  %4158 = vmatmul.f32.vlgmr.msrb.gmra.mxu3 %v6812_v59  ;;  %v3505_v60 = vld [vmem:[#allocation25 + $0x328] sm:$0xff] }
 0xb6a   :  { %4202 = vmatpush.msra.mxu2 %v3499_v40  ;;  %4222 = vmatpush.msra.mxu3 %v3595_v54 }
 0xb6b   :  { %4245 = vmatpush.msrb.mxu0 %v3673_v8  ;;  %4265 = vmatpush.msrb.mxu1 %v3769_v21 }
 0xb6c   :  { %4203 = vmatpush.msra.mxu2 %v3493_v34  ;;  %4223 = vmatpush.msra.mxu3 %v3589_v46 }
 0xb6d   :  { %4246 = vmatpush.msrb.mxu0 %v3667_v30  ;;  %4266 = vmatpush.msrb.mxu1 %v3763_v14 }
 0xb6e   :  { %4204 = vmatpush.msra.mxu2 %v3487_v52  ;;  %4224 = vmatpush.msra.mxu3 %v3583_v16 }
 0xb6f   :  { %4247 = vmatpush.msrb.mxu0 %v3661_v20  ;;  %4267 = vmatpush.msrb.mxu1 %v3757_v23 }
 0xb70   :  { %4205 = vmatpush.msra.mxu2 %v3481_v29  ;;  %4225 = vmatpush.msra.mxu3 %v3577_v7 }
 0xb71   :  { %4248 = vmatpush.msrb.mxu0 %v3655_v9  ;;  %4268 = vmatpush.msrb.mxu1 %v3751_v10 }
 0xb72   :  { %4206 = vmatpush.msra.mxu2 %v3475_v15  ;;  %4226 = vmatpush.msra.mxu3 %v3571_v18 }
 0xb73   :  { %4249 = vmatpush.msrb.mxu0 %v3649_v58  ;;  %4269 = vmatpush.msrb.mxu1 %v3745_v22 }
 0xb74   :  { %4207 = vmatpush.msra.mxu2 %v3469_v19  ;;  %4227 = vmatpush.msra.mxu3 %v3565_v63 }
 0xb75   :  { %4250 = vmatpush.msrb.mxu0 %v3643_v24  ;;  %4270 = vmatpush.msrb.mxu1 %v3739_v26 }
 0xb76   :  { %4208 = vmatpush.msra.mxu2 %v3463_v28  ;;  %4228 = vmatpush.msra.mxu3 %v3559_v45 }
 0xb77   :  { %4251 = vmatpush.msrb.mxu0 %v3637_v50  ;;  %4271 = vmatpush.msrb.mxu1 %v3733_v51 }
 0xb78   :  { %4209 = vmatpush.msra.mxu2 %v3457_v61  ;;  %4229 = vmatpush.msra.mxu3 %v3553_v62  ;;  %v3859_v40 = vpop.f32.mrf.mxu0 }
 0xb79   :  { %4252 = vmatpush.msrb.mxu0 %v3631_v0  ;;  %4272 = vmatpush.msrb.mxu1 %v3727_v2  ;;  %v3879_v54 = vpop.f32.mrf.mxu1 }
 0xb7a   :  { %4210 = vmatpush.msra.mxu2 %v3451_v5  ;;  %4230 = vmatpush.msra.mxu3 %v3547_v31 }
 0xb7b   :  { %4253 = vmatpush.msrb.mxu0 %v3625_v42  ;;  %4273 = vmatpush.msrb.mxu1 %v3721_v35 }
 0xb7c   :  { %4211 = vmatpush.msra.mxu2 %v3445_v38  ;;  %4231 = vmatpush.msra.mxu3 %v3541_v12 }
 0xb7d   :  { %4254 = vmatpush.msrb.mxu0 %v3619_v41  ;;  %4274 = vmatpush.msrb.mxu1 %v3715_v49 }
 0xb7e   :  { %4212 = vmatpush.msra.mxu2 %v3439_v36  ;;  %4232 = vmatpush.msra.mxu3 %v3535_v39 }
 0xb7f   :  { %4255 = vmatpush.msrb.mxu0 %v3613_v53  ;;  %4275 = vmatpush.msrb.mxu1 %v3709_v25 }
 0xb80   :  { %4213 = vmatpush.msra.mxu2 %v3433_v57  ;;  %4233 = vmatpush.msra.mxu3 %v3529_v37 }
 0xb81   :  { %4256 = vmatpush.msrb.mxu0 %v3607_v48  ;;  %4276 = vmatpush.msrb.mxu1 %v3703_v6  ;;  %v3939_v14 = vpop.f32.mrf.mxu0 }
 0xb82   :  { %4214 = vmatpush.msra.mxu2 %v3427_v44  ;;  %4234 = vmatpush.msra.mxu3 %v3523_v4 }
 0xb83   :  { %4257 = vmatpush.msrb.mxu0 %v3601_v3  ;;  %4277 = vmatpush.msrb.mxu1 %v3697_v55  ;;  %v3819_v47 = vpop.f32.mrf.mxu2 }
 0xb84   :  { %4258 = vmatmul.f32.vlgmr.msrb.gmra.mxu0 %v6802_v27  ;;  %4278 = vmatmul.f32.vlgmr.msrb.gmra.mxu1 %v6804_v56  ;;  %v3839_v1 = vpop.f32.mrf.mxu3  ;;  %v6836_v56 = vld [vmem:[#allocation26] sm:$0x3f] }
 0xb85   :  { %4215 = vmatpush.msra.mxu2 %v3421_v17  ;;  %4235 = vmatpush.msra.mxu3 %v3517_v32  ;;  %v3791_v8 = vperm.slane %v6836_v56, 1  ;;  %v3792_v34 = vperm.slane %v6836_v56, 2  ;;  %v3790_v52 = vperm.slane %v6836_v56, 0  ;;  %v3793_v50 = vperm.slane %v6836_v56, 3 }
 0xb87   :  { %4216 = vmatpush.msra.mxu2 %v3415_v11  ;;  %4236 = vmatpush.msra.mxu3 %v3511_v43  ;;  %v3820_v20 = vadd.f32 %v3819_v47, %v3790_v52 }
 0xb89   :  { %4217 = vmatpush.msra.mxu2 %v3409_v33  ;;  %4237 = vmatpush.msra.mxu3 %v3505_v60  ;;  %v3840_v9 = vadd.f32 %v3839_v1, %v3820_v20 }
 0xb8a   :  { %4218 = vmatmul.f32.vlgmr.msra.gmra.mxu2 %v6810_v13  ;;  %4238 = vmatmul.f32.vlgmr.msra.gmra.mxu3 %v6812_v59  ;;  %v3959_v59 = vpop.f32.mrf.mxu1 }
 0xb8b   :  { %v3860_v58 = vadd.f32 %v3859_v40, %v3840_v9 }
 0xb8d   :  { %v3880_v24 = vadd.f32 %v3879_v54, %v3860_v58 }
 0xb8e   :  { %v3899_v27 = vpop.f32.mrf.mxu2  ;;  %v3919_v21 = vpop.f32.mrf.mxu3 }
 0xb8f   :  { %v3900_v30 = vadd.f32 %v3899_v27, %v3791_v8  ;;  %v4486_v28 = vmul.f32 -1.442695, %v3880_v24 }
 0xb91   :  { %v3920_v16 = vadd.f32 %v3919_v21, %v3900_v30 }
 0xb93   :  { %v3940_v7 = vadd.f32 %v3939_v14, %v3920_v16 }
 0xb95   :  { %v3960_v18 = vadd.f32 %v3959_v59, %v3940_v7 }
 0xb97   :  { %v4487_v63 = vmul.f32 -1.442695, %v3960_v18 }
 0xb99   :  { %4543 = vpow2.f32 %v4487_v63 }
 0xb9b   :  { %v4019_v10 = vpop.f32.mrf.mxu0  ;;  %v4039_v22 = vpop.f32.mrf.mxu1 }
 0xb9f   :  { %v4544_v45 = vpop.eup %4543 }
 0xba0   :  { %v4301_v61 = vadd.f32 1.0, %v4544_v45 }
 0xba2   :  { %v4330_v60 = vand.u32 2147483647, %v4301_v61  ;;  %v4332_v47 = vand.u32 2147483648, %v4301_v61  ;;  %vm4326_vm8 = vweird.f32 %v4301_v61 }
 0xba4   :  { %vm4331_vm12 = vcmp.eq.f32.partialorder %v4330_v60, 8.507059e+37  ;;  %v4333_v30 = vor.u32 1.1754944e-38, %v4332_v47 }
 0xba8   :  { %v3979_v46 = vpop.f32.mrf.mxu2  ;;  %v3999_v23 = vpop.f32.mrf.mxu3 }
 0xba9   :  { %v3980_v13 = vadd.f32 %v3979_v46, %v3792_v34 }
 0xbab   :  { %v4000_v29 = vadd.f32 %v3999_v23, %v3980_v13 }
 0xbad   :  { %v4020_v15 = vadd.f32 %v4019_v10, %v4000_v29 }
 0xbaf   :  { %v4040_v19 = vadd.f32 %v4039_v22, %v4020_v15 }
 0xbb1   :  { %v4488_v26 = vmul.f32 -1.442695, %v4040_v19 }
 0xbb3   :  { %4545 = vpow2.f32 %v4488_v26 }
 0xbb4   :  { %4547 = vpow2.f32 %v4486_v28 }
 0xbb5   :  { %4549 = vrcp.f32 %v4301_v61 }
 0xbb9   :  { %v4546_v51 = vpop.eup %4545 }
 0xbba   :  { %v4548_v2 = vpop.eup %4547  ;;  %v4302_v5 = vadd.f32 1.0, %v4546_v51 }
 0xbbb   :  { %v6848_v38 = vadd.f32 1.0, %v4548_v2  ;;  %v4550_v39 = vpop.eup %4549 }
 0xbbc   :  { %4551 = vrcp.f32 %v4302_v5  ;;  %v4322_v25 = vmul.f32 %v4550_v39, %v4301_v61  ;;  %vm4327_vm7 = vweird.f32 %v4550_v39  ;;  %v4347_v54 = vand.u32 2147483648, %v4302_v5 }
 0xbbd   :  { %v4099_v35 = vpop.f32.mrf.mxu0  ;;  %v4119_v41 = vpop.f32.mrf.mxu1  ;;  %4553 = vrcp.f32 %v6848_v38  ;;  %vm6852_vm10 = vmor %vm4326_vm8, %vm4327_vm7  ;;  %vm4341_vm11 = vweird.f32 %v4302_v5  ;;  %v4345_v21 = vand.u32 2147483647, %v4302_v5  ;;  %vm4311_vm15 = vweird.f32 %v6848_v38 }
 0xbbe   :  { %v4323_v6 = vsub.f32 1.0, %v4322_v25  ;;  %v4317_v20 = vand.u32 2147483648, %v6848_v38  ;;  %v4348_v29 = vor.u32 1.1754944e-38, %v4347_v54  ;;  %v4315_v9 = vand.u32 2147483647, %v6848_v38 }
 0xbbf   :  { %vm4346_vm3 = vcmp.eq.f32.partialorder %v4345_v21, 8.507059e+37  ;;  %vm4407_vm7 = vcmask 1045508  }
 0xbc0   :  { %v4324_v55 = vmul.f32 %v4550_v39, %v4323_v6  ;;  %v4318_v63 = vor.u32 1.1754944e-38, %v4317_v20  ;;  %vm4316_vm8 = vcmp.eq.f32.partialorder %v4315_v9, 8.507059e+37 }
 0xbc2   :  { %v4552_v53 = vpop.eup %4551  ;;  %v4325_v11 = vadd.f32 %v4550_v39, %v4324_v55 }
 0xbc3   :  { %v4554_v57 = vpop.eup %4553  ;;  %v4337_v37 = vmul.f32 %v4552_v53, %v4302_v5  ;;  %vm4342_vm9 = vweird.f32 %v4552_v53 }
 0xbc4   :  { %v4307_v44 = vmul.f32 %v4554_v57, %v6848_v38  ;;  %vm4312_vm2 = vweird.f32 %v4554_v57  ;;  %v4329_v8 = vsel %vm6852_vm10, %v4550_v39, %v4325_v11  ;;  %vm6858_vm13 = vmor %vm4341_vm11, %vm4342_vm9  ;;  %vm4409_vm9 = vcmask 1043456  }
 0xbc5   :  { %v4338_v3 = vsub.f32 1.0, %v4337_v37  ;;  %v4334_v23 = vsel %vm4331_vm12, %v4333_v30, %v4329_v8  ;;  %vm6867_vm1 = vmor %vm4311_vm15, %vm4312_vm2 }
 0xbc6   :  { %v4308_v17 = vsub.f32 1.0, %v4307_v44  ;;  %v4402_v22 = vrot.slane %v4334_v23, 6 }
 0xbc7   :  { %v4339_v32 = vmul.f32 %v4552_v53, %v4338_v3 }
 0xbc8   :  { %v4309_v33 = vmul.f32 %v4554_v57, %v4308_v17 }
 0xbc9   :  { %v4340_v1 = vadd.f32 %v4552_v53, %v4339_v32 }
 0xbca   :  { %v4059_v62 = vpop.f32.mrf.mxu2  ;;  %v4079_v31 = vpop.f32.mrf.mxu3  ;;  %v4310_v46 = vadd.f32 %v4554_v57, %v4309_v33 }
 0xbcb   :  { %v4060_v0 = vadd.f32 %v4059_v62, %v3793_v50  ;;  %v4344_v13 = vsel %vm6858_vm13, %v4552_v53, %v4340_v1  ;;  %v3794_v62 = vperm.slane %v6836_v56, 4 }
 0xbcc   :  { %v4349_v15 = vsel %vm4346_vm3, %v4348_v29, %v4344_v13  ;;  %v4314_v58 = vsel %vm6867_vm1, %v4554_v57, %v4310_v46 }
 0xbcd   :  { %v4080_v42 = vadd.f32 %v4079_v31, %v4060_v0  ;;  %v4403_v26 = vrot.slane %v4349_v15, 4  ;;  %v4319_v45 = vsel %vm4316_vm8, %v4318_v63, %v4314_v58 }
 0xbce   :  { %v4406_v50 = vsel %vm1202_vm0, %v4319_v45, %v4402_v22 }
 0xbcf   :  { %v4100_v12 = vadd.f32 %v4099_v35, %v4080_v42 }
 0xbd1   :  { %v4120_v49 = vadd.f32 %v4119_v41, %v4100_v12 }
 0xbd3   :  { %v4489_v36 = vmul.f32 -1.442695, %v4120_v49  ;;  %v3795_v49 = vperm.slane %v6836_v56, 5 }
 0xbd5   :  { %4555 = vpow2.f32 %v4489_v36 }
 0xbdb   :  { %v4556_v48 = vpop.eup %4555 }
 0xbdc   :  { %v4303_v4 = vadd.f32 1.0, %v4556_v48 }
 0xbde   :  { %4557 = vrcp.f32 %v4303_v4  ;;  %v4362_v52 = vand.u32 2147483648, %v4303_v4  ;;  %v4360_v59 = vand.u32 2147483647, %v4303_v4  ;;  %vm4356_vm4 = vweird.f32 %v4303_v4 }
 0xbdf   :  { %v4179_v42 = vpop.f32.mrf.mxu0  ;;  %v4199_v38 = vpop.f32.mrf.mxu1 }
 0xbe0   :  { %v4363_v18 = vor.u32 1.1754944e-38, %v4362_v52  ;;  %vm4361_vm6 = vcmp.eq.f32.partialorder %v4360_v59, 8.507059e+37 }
 0xbe4   :  { %v4558_v43 = vpop.eup %4557 }
 0xbe5   :  { %v4352_v40 = vmul.f32 %v4558_v43, %v4303_v4  ;;  %vm4357_vm14 = vweird.f32 %v4558_v43 }
 0xbe6   :  { %vm4358_vm5 = vmor %vm4356_vm4, %vm4357_vm14 }
 0xbe7   :  { %v4353_v34 = vsub.f32 1.0, %v4352_v40 }
 0xbe9   :  { %v4354_v16 = vmul.f32 %v4558_v43, %v4353_v34 }
 0xbeb   :  { %v4355_v10 = vadd.f32 %v4558_v43, %v4354_v16 }
 0xbec   :  { %v4139_v0 = vpop.f32.mrf.mxu2  ;;  %v4159_v5 = vpop.f32.mrf.mxu3 }
 0xbed   :  { %v4359_v19 = vsel %vm4358_vm5, %v4558_v43, %v4355_v10  ;;  %v4140_v2 = vadd.f32 %v4139_v0, %v3794_v62 }
 0xbee   :  { %v4364_v24 = vsel %vm4361_vm6, %v4363_v18, %v4359_v19 }
 0xbef   :  { %v4404_v28 = vrot.slane %v4364_v24, 2  ;;  %v4160_v31 = vadd.f32 %v4159_v5, %v4140_v2 }
 0xbf1   :  { %v4408_v51 = vsel %vm4407_vm7, %v4403_v26, %v4404_v28  ;;  %v4180_v35 = vadd.f32 %v4179_v42, %v4160_v31 }
 0xbf2   :  { %v4410_v61 = vsel %vm4409_vm9, %v4406_v50, %v4408_v51 }
 0xbf3   :  { %4414 = vst [vmem:[%s7089_s11] sm:$0xff] %v4410_v61  ;;  %v4200_v12 = vadd.f32 %v4199_v38, %v4180_v35 }
 0xbf5   :  { %v4490_v41 = vmul.f32 -1.442695, %v4200_v12 }
 0xbf7   :  { %4559 = vpow2.f32 %v4490_v41 }
 0xbfd   :  { %v4560_v25 = vpop.eup %4559 }
 0xbfe   :  { %v4304_v6 = vadd.f32 1.0, %v4560_v25 }
 0xc00   :  { %4561 = vrcp.f32 %v4304_v6  ;;  %vm4371_vm11 = vweird.f32 %v4304_v6  ;;  %v4377_v8 = vand.u32 2147483648, %v4304_v6  ;;  %v4375_v21 = vand.u32 2147483647, %v4304_v6 }
 0xc01   :  { %v4259_v37 = vpop.f32.mrf.mxu0  ;;  %v4279_v44 = vpop.f32.mrf.mxu1 }
 0xc02   :  { %v4378_v52 = vor.u32 1.1754944e-38, %v4377_v8  ;;  %vm4376_vm1 = vcmp.eq.f32.partialorder %v4375_v21, 8.507059e+37 }
 0xc06   :  { %v4562_v55 = vpop.eup %4561 }
 0xc07   :  { %v4367_v11 = vmul.f32 %v4562_v55, %v4304_v6  ;;  %vm4372_vm2 = vweird.f32 %v4562_v55 }
 0xc08   :  { %vm4373_vm12 = vmor %vm4371_vm11, %vm4372_vm2 }
 0xc09   :  { %v4368_v43 = vsub.f32 1.0, %v4367_v11 }
 0xc0b   :  { %v4369_v33 = vmul.f32 %v4562_v55, %v4368_v43 }
 0xc0d   :  { %v4219_v36 = vpop.f32.mrf.mxu2  ;;  %v4239_v53 = vpop.f32.mrf.mxu3  ;;  %v4370_v40 = vadd.f32 %v4562_v55, %v4369_v33 }
 0xc0e   :  { %v4220_v39 = vadd.f32 %v4219_v36, %v3795_v49 }
 0xc0f   :  { %v4374_v30 = vsel %vm4373_vm12, %v4562_v55, %v4370_v40 }
 0xc10   :  { %v4240_v57 = vadd.f32 %v4239_v53, %v4220_v39  ;;  %v4379_v59 = vsel %vm4376_vm1, %v4378_v52, %v4374_v30 }
 0xc12   :  { %v4260_v48 = vadd.f32 %v4259_v37, %v4240_v57 }
 0xc14   :  { %v4280_v4 = vadd.f32 %v4279_v44, %v4260_v48 }
 0xc16   :  { %v4491_v3 = vmul.f32 -1.442695, %v4280_v4 }
 0xc18   :  { %4563 = vpow2.f32 %v4491_v3 }
 0xc1e   :  { %v4564_v17 = vpop.eup %4563 }
 0xc1f   :  { %v4305_v32 = vadd.f32 1.0, %v4564_v17 }
 0xc21   :  { %4565 = vrcp.f32 %v4305_v32  ;;  %v4392_v1 = vand.u32 2147483648, %v4305_v32  ;;  %v4390_v54 = vand.u32 2147483647, %v4305_v32  ;;  %vm4386_vm13 = vweird.f32 %v4305_v32 }
 0xc23   :  { %v4393_v46 = vor.u32 1.1754944e-38, %v4392_v1  ;;  %vm4391_vm15 = vcmp.eq.f32.partialorder %v4390_v54, 8.507059e+37 }
 0xc27   :  { %v4566_v56 = vpop.eup %4565 }
 0xc28   :  { %v4382_v60 = vmul.f32 %v4566_v56, %v4305_v32  ;;  %vm4387_vm10 = vweird.f32 %v4566_v56 }
 0xc29   :  { %vm4388_vm14 = vmor %vm4386_vm13, %vm4387_vm10 }
 0xc2a   :  { %v4383_v47 = vsub.f32 1.0, %v4382_v60 }
 0xc2c   :  { %v4384_v27 = vmul.f32 %v4566_v56, %v4383_v47 }
 0xc2e   :  { %v4385_v34 = vadd.f32 %v4566_v56, %v4384_v27 }
 0xc30   :  { %v4389_v14 = vsel %vm4388_vm14, %v4566_v56, %v4385_v34 }
 0xc31   :  { %v4394_v13 = vsel %vm4391_vm15, %v4393_v46, %v4389_v14 }
 0xc32   :  { %v4405_v16 = vrot.slane %v4394_v13, 6 }
 0xc34   :  { %v4411_v20 = vsel %vm1202_vm0, %v4379_v59, %v4405_v16 }
 0xc35   :  { %4415 = vst [vmem:[%s7089_s11 + $0x8] sm:$0xf] %v4411_v20 }
 0xc36   :  { %5023 = dma.done.wait [#allocation4], 32  }
 0xc37   :  { %5024 = vsyncadd [#allocation4], 4294967264 }
 0xc38   :  { %5025 = dma.done.wait [#allocation30], 32  }
 0xc39   :  { %5026 = vsyncadd [#allocation30], 4294967264 }
 0xc3a   :  { %4453 = vsyncpa [#allocation3], 1 }
 0xc3b   :  { %4454 = vsyncpa [#allocation6], 1 }
 0xc3c   :  { %4455 = vsyncpa [#allocation9], 1 }
 0xc3d   :  { %4456 = vsyncpa [#allocation12], 1 }
 0xc3e   :  { %4457 = vsyncpa [#allocation15], 1 }
 0xc3f   :  { %4458 = vsyncpa [#allocation18], 1 }
 0xc40   :  { %4459 = vsyncpa [#allocation21], 1 }
 0xc41   :  { %4460 = vsyncpa [#allocation24], 1 }
 0xc42   :  { %4461 = vsyncpa [#allocation27], 1 }
 0xc43   :  { %4462 = vsyncpa [#allocation4], 1 }
 0xc44   :  { %4463 = vsyncpa [#allocation30], 1 }

</bundles_post_ra>
